<compile_context>
chip_gen: v5e
topology: v5e:2x2
jax: 0.10.0
libtpu: 0.0.40
codegen_flags: <defaults>
</compile_context>

<pallas_src>
import functools

import jax
import jax.numpy as jnp
from jax import lax
from jax.experimental import pallas as pl
from jax.experimental.pallas import tpu as pltpu


def _round_up(x, m):
    return ((x + m - 1) // m) * m


# ----------------------------------------------------------------------------
# Pallas kernels
# ----------------------------------------------------------------------------
def _conv_leaky_kernel(w_ref, x_ref, o_ref, *, slope):
    """(C_out, K)bf16 @ (K, tm)bf16 -> f32 acc, fused LeakyReLU, bf16 store."""
    y = jnp.dot(w_ref[...], x_ref[...], preferred_element_type=jnp.float32)
    o_ref[...] = jnp.where(y > 0, y, slope * y).astype(o_ref.dtype)


def _conv_bn_leaky_kernel(w_ref, x_ref, g_ref, b_ref, o_ref, *, eps, slope, m_true):
    """Conv GEMM + BatchNorm (training-mode batch stats) + LeakyReLU, 1 block.

    y is (C_out, M_pad) with M = N*Ho*Wo on the lane axis; per-channel stats are
    a reduction over axis 1 (matches PyTorch BatchNorm2d over (N, H, W)).
    Padded columns of x are zero, so their y columns are exactly zero and do
    not perturb the sums; the divisor is the true M.  Variance is the centered
    two-pass form (no E[x^2]-mean^2 cancellation).
    """
    y = jnp.dot(w_ref[...], x_ref[...], preferred_element_type=jnp.float32)
    inv_m = 1.0 / m_true
    mean = jnp.sum(y, axis=1, keepdims=True) * inv_m        # pad cols add 0
    d = y - mean
    if y.shape[1] != m_true:                                 # mask pad columns
        col = lax.broadcasted_iota(jnp.int32, y.shape, 1)
        d = jnp.where(col < m_true, d, 0.0)
    var = jnp.sum(d * d, axis=1, keepdims=True) * inv_m      # biased var (PyTorch)
    yn = d * lax.rsqrt(var + eps) * g_ref[...] + b_ref[...]
    o_ref[...] = jnp.where(yn > 0, yn, slope * yn).astype(o_ref.dtype)


def _tail_kernel(a_ref, w5_ref, w1_ref, b1_ref, w2_ref, b2_ref, w3_ref, b3_ref,
                 o_ref, feat_ref, *, n_batch, n_feat):
    """Fused conv5 + ReLU + Linear(70,40)+ReLU + Linear(40,10)+ReLU
    + Linear(10,1) + sigmoid.  One launch, everything VMEM resident."""
    # conv5 as one transposed GEMM over all samples: (1,K5)@(K5,N*70) -> (1,N*70)
    c5 = jnp.maximum(
        jnp.dot(w5_ref[...], a_ref[...], preferred_element_type=jnp.float32), 0.0)
    # regroup the flat (1, N*70) row into (N, 70) features (tiny scratch)
    for b in range(n_batch):                                   # static unroll
        feat_ref[b:b + 1, :] = c5[:, b * n_feat:(b + 1) * n_feat]
    feat = feat_ref[...]                                       # (N, 70) f32
    h1 = jnp.maximum(jnp.dot(feat, w1_ref[...],
                             preferred_element_type=jnp.float32) + b1_ref[...], 0.0)
    h2 = jnp.maximum(jnp.dot(h1, w2_ref[...],
                             preferred_element_type=jnp.float32) + b2_ref[...], 0.0)
    z = jnp.dot(h2, w3_ref[...], preferred_element_type=jnp.float32) + b3_ref[...]
    # numerically stable sigmoid
    o_ref[...] = jnp.where(z >= 0.0,
                           1.0 / (1.0 + jnp.exp(-z)),
                           jnp.exp(z) / (1.0 + jnp.exp(z)))


# ----------------------------------------------------------------------------
# pallas_call wrappers
# ----------------------------------------------------------------------------
def conv_leaky(w_bf, pt_bf, slope=0.2):
    """w: (C_out, K) bf16, pt: (K, M) bf16 -> (C_out, M) bf16."""
    c_out, k = w_bf.shape
    m = pt_bf.shape[1]
    # Two lane-aligned blocks: perfect 2-way megacore split on v7x, only two
    # grid steps on single-TC v5e/v6e, no ragged/masked tail block.
    tm = m // 2 if m % 256 == 0 else m
    return pl.pallas_call(
        functools.partial(_conv_leaky_kernel, slope=slope),
        out_shape=jax.ShapeDtypeStruct((c_out, m), jnp.bfloat16),
        grid=(m // tm,),
        in_specs=[
            pl.BlockSpec((c_out, k), lambda i: (0, 0)),
            pl.BlockSpec((k, tm), lambda i: (0, i)),
        ],
        out_specs=pl.BlockSpec((c_out, tm), lambda i: (0, i)),
        compiler_params=pltpu.CompilerParams(dimension_semantics=("parallel",)),
    )(w_bf, pt_bf)


def conv_bn_leaky(w_bf, pt_bf, gamma, beta, m_true, eps=1e-5, slope=0.2):
    """Single-block fused conv + BN + LeakyReLU (whole operands in VMEM)."""
    c_out = w_bf.shape[0]
    m_pad = pt_bf.shape[1]
    return pl.pallas_call(
        functools.partial(_conv_bn_leaky_kernel, eps=eps, slope=slope, m_true=m_true),
        out_shape=jax.ShapeDtypeStruct((c_out, m_pad), jnp.bfloat16),
        in_specs=[pl.BlockSpec(memory_space=pltpu.MemorySpace.VMEM)] * 4,
        out_specs=pl.BlockSpec(memory_space=pltpu.MemorySpace.VMEM),
    )(w_bf, pt_bf,
      gamma.reshape(c_out, 1).astype(jnp.float32),
      beta.reshape(c_out, 1).astype(jnp.float32))


def tail(pt5_bf, w5row_bf, w1t, b1, w2t, b2, w3t, b3, n_batch, n_feat):
    """Fused conv5 + fc1 + fc2 + fc3 + sigmoid.  pt5: (K5, N*70) bf16."""
    return pl.pallas_call(
        functools.partial(_tail_kernel, n_batch=n_batch, n_feat=n_feat),
        out_shape=jax.ShapeDtypeStruct((n_batch, 1), jnp.float32),
        in_specs=[pl.BlockSpec(memory_space=pltpu.MemorySpace.VMEM)] * 8,
        out_specs=pl.BlockSpec(memory_space=pltpu.MemorySpace.VMEM),
        scratch_shapes=[pltpu.VMEM((n_batch, n_feat), jnp.float32)],
    )(pt5_bf, w5row_bf,
      w1t.astype(jnp.float32), b1.astype(jnp.float32),
      w2t.astype(jnp.float32), b2.astype(jnp.float32),
      w3t.astype(jnp.float32), b3.astype(jnp.float32))


# ----------------------------------------------------------------------------
# JAX glue: channel-major transposed im2col (no NCHW round trips)
# ----------------------------------------------------------------------------
def im2col_cm(a, kh, kw, stride, pad):
    """a: channel-major (C, N, H, W) -> transposed patches (C*kh*kw, N*Ho*Wo).

    Row index = c*kh*kw + i*kw + j (matches PyTorch weight.reshape(C_out, -1));
    column index = n*Ho*Wo + ho*Wo + wo.  Built in the input dtype (bf16).
    """
    c, n, h, w = a.shape
    ho = (h + 2 * pad - kh) // stride + 1
    wo = (w + 2 * pad - kw) // stride + 1
    ap = jnp.pad(a, ((0, 0), (0, 0), (pad, pad), (pad, pad))) if pad else a
    cols = [ap[:, :, i:i + stride * ho:stride, j:j + stride * wo:stride]
            for i in range(kh) for j in range(kw)]
    pt = jnp.stack(cols, axis=1).reshape(c * kh * kw, n * ho * wo)
    return pt, ho, wo


# ----------------------------------------------------------------------------
# Discriminator forward
# ----------------------------------------------------------------------------
def discriminator_forward(x, p):
    n = x.shape[0]
    # One-time NCHW f32 -> channel-major bf16 cast of the input; everything
    # downstream stays channel-major bf16.
    a = jnp.transpose(x, (1, 0, 2, 3)).astype(jnp.bfloat16)   # (C, N, H, W)

    # conv1 + LeakyReLU (no BN)
    pt, ho, wo = im2col_cm(a, 4, 4, 2, 1)                      # (48, 16640) bf16
    w1m = p["w1"].reshape(p["w1"].shape[0], -1).astype(jnp.bfloat16)
    y = conv_leaky(w1m, pt)                                    # (ndf, 16640) bf16
    a = y.reshape(w1m.shape[0], n, ho, wo)

    # conv2..conv4: fused GEMM + BatchNorm(batch stats) + LeakyReLU
    for wk, gk, bk in (("w2", "g2", "be2"), ("w3", "g3", "be3"), ("w4", "g4", "be4")):
        pt, ho, wo = im2col_cm(a, 4, 4, 2, 1)
        m_true = n * ho * wo
        m_pad = _round_up(m_true, 128)                         # lane-dense output
        if m_pad > m_true:
            pt = jnp.pad(pt, ((0, 0), (0, m_pad - m_true)))
        wm = p[wk].reshape(p[wk].shape[0], -1).astype(jnp.bfloat16)
        y = conv_bn_leaky(wm, pt, p[gk], p[bk], m_true=m_true)  # (C_out, m_pad) bf16
        a = y[:, :m_true].reshape(p[wk].shape[0], n, ho, wo)

    # Fused tail: conv5 + ReLU + Linear(70,40)+ReLU + Linear(40,10)+ReLU
    #             + Linear(10,1) + sigmoid, all in one kernel.
    pt5, ho5, wo5 = im2col_cm(a, 4, 4, 1, 0)                    # (K5, N*70) bf16
    n_feat = ho5 * wo5
    assert n_feat == 70, (ho5, wo5)                             # Linear(70, 40) contract
    w5row = p["w5"].reshape(1, -1).astype(jnp.bfloat16)         # (1, K5)
    return tail(pt5, w5row,
                p["fc1_w"].T, p["fc1_b"].reshape(1, -1),
                p["fc2_w"].T, p["fc2_b"].reshape(1, -1),
                p["fc3_w"].T, p["fc3_b"].reshape(1, -1),
                n, n_feat)


def init_params(key, nc, ndf):
    ks = jax.random.split(key, 11)
    s = 0.02  # DCGAN-style init scale; deterministic synthetic weights
    params = {
        "w1": s * jax.random.normal(ks[0], (ndf, nc, 4, 4), jnp.float32),
        "w2": s * jax.random.normal(ks[1], (ndf * 2, ndf, 4, 4), jnp.float32),
        "w3": s * jax.random.normal(ks[2], (ndf * 4, ndf * 2, 4, 4), jnp.float32),
        "w4": s * jax.random.normal(ks[3], (ndf * 8, ndf * 4, 4, 4), jnp.float32),
        "w5": s * jax.random.normal(ks[4], (1, ndf * 8, 4, 4), jnp.float32),
        # BatchNorm affine params (PyTorch init: gamma=1, beta=0)
        "g2": jnp.ones((ndf * 2,), jnp.float32), "be2": jnp.zeros((ndf * 2,), jnp.float32),
        "g3": jnp.ones((ndf * 4,), jnp.float32), "be3": jnp.zeros((ndf * 4,), jnp.float32),
        "g4": jnp.ones((ndf * 8,), jnp.float32), "be4": jnp.zeros((ndf * 8,), jnp.float32),
        # The PyTorch forward builds fresh nn.Linear layers each call (random
        # weights); here they are deterministic synthetic parameters.
        "fc1_w": s * jax.random.normal(ks[5], (40, 70), jnp.float32),
        "fc1_b": s * jax.random.normal(ks[6], (40,), jnp.float32),
        "fc2_w": s * jax.random.normal(ks[7], (10, 40), jnp.float32),
        "fc2_b": s * jax.random.normal(ks[8], (10,), jnp.float32),
        "fc3_w": s * jax.random.normal(ks[9], (1, 10), jnp.float32),
        "fc3_b": s * jax.random.normal(ks[10], (1,), jnp.float32),
    }
    return params


if __name__ == "__main__":
    # Spatial size (160, 208) is dictated by the hard-coded Linear(70, 40):
    # conv stack -> (N, 1, 7, 10) -> flatten -> 70 features.
    nc, ndf, batch = 3, 8, 2
    key = jax.random.PRNGKey(0)
    k_x, k_p = jax.random.split(key)
    x = jax.random.normal(k_x, (batch, nc, 160, 208), jnp.float32)
    params = init_params(k_p, nc, ndf)

    fwd = jax.jit(discriminator_forward)
    out = jax.block_until_ready(fwd(x, params))

    assert out.shape == (batch, 1), out.shape
    assert bool(jnp.all(jnp.isfinite(out)))
    assert bool(jnp.all((out >= 0.0) & (out <= 1.0)))  # sigmoid output
    # TODO(synk): BatchNorm running-stat updates (training-mode side effect)
    # are not materialized; forward output is unaffected.
    print("KERNEL_OK")
</pallas_src>

<mosaic_0001>
module attributes {stable_mosaic.version = 11 : i64} {
  func.func @_conv_leaky_kernel(%arg0: i32, %arg1: memref<8x48xbf16, #tpu.memory_space<vmem>>, %arg2: memref<48x8320xbf16, #tpu.memory_space<vmem>>, %arg3: memref<8x8320xbf16, #tpu.memory_space<vmem>>) attributes {dimension_semantics = [#tpu.dimension_semantics<parallel>], iteration_bounds = array<i64: 2>, scalar_prefetch = 0 : i64, scratch_operands = 0 : i64, tpu.core_type = #tpu.core_type<tc>, window_params = [{pipeline_mode = #tpu.pipeline_mode<synchronous>, transform_indices = @transform_0, window_bounds = array<i64: 8, 48>}, {transform_indices = @transform_1, window_bounds = array<i64: 48, 8320>}, {transform_indices = @transform_2, window_bounds = array<i64: 8, 8320>}]} {
    %c0 = arith.constant 0 : index
    %c0_0 = arith.constant 0 : index
    %0 = vector.load %arg1[%c0, %c0_0] : memref<8x48xbf16, #tpu.memory_space<vmem>>, vector<8x48xbf16>
    %c0_1 = arith.constant 0 : index
    %c0_2 = arith.constant 0 : index
    %1 = vector.load %arg2[%c0_1, %c0_2] : memref<48x8320xbf16, #tpu.memory_space<vmem>>, vector<48x8320xbf16>
    %cst = arith.constant dense<0.000000e+00> : vector<8x8320xf32>
    %2 = tpu.matmul %0, %1, %cst {dimension_numbers = #tpu.dot_dimension_numbers<[1], [0], [0], [1], [0, 0, 1, 1], [], []>} : vector<8x48xbf16>, vector<48x8320xbf16>, vector<8x8320xf32> -> vector<8x8320xf32>
    %cst_3 = arith.constant 0.000000e+00 : f32
    %3 = vector.broadcast %cst_3 : f32 to vector<8x8320xf32>
    %4 = arith.cmpf ogt, %2, %3 : vector<8x8320xf32>
    %cst_4 = arith.constant 2.000000e-01 : f32
    %5 = vector.broadcast %cst_4 : f32 to vector<8x8320xf32>
    %6 = arith.mulf %5, %2 : vector<8x8320xf32>
    %7 = arith.select %4, %2, %6 : vector<8x8320xi1>, vector<8x8320xf32>
    %8 = arith.truncf %7 : vector<8x8320xf32> to vector<8x8320xbf16>
    %c0_5 = arith.constant 0 : index
    %c0_6 = arith.constant 0 : index
    %9 = vector.load %arg3[%c0_5, %c0_6] : memref<8x8320xbf16, #tpu.memory_space<vmem>>, vector<8x8320xbf16>
    tpu.vector_store %arg3[%c0_5, %c0_6], %8 {strides = array<i32>} : memref<8x8320xbf16, #tpu.memory_space<vmem>>, vector<8x8320xbf16>,
    return
  }
  func.func @transform_0(%arg0: i32) -> (i32, i32) {
    %c0_i32 = arith.constant 0 : i32
    %c0_i32_0 = arith.constant 0 : i32
    %c0_i32_1 = arith.constant 0 : i32
    return %c0_i32, %c0_i32_0 : i32, i32
  }
  func.func @transform_1(%arg0: i32) -> (i32, i32) {
    %c0_i32 = arith.constant 0 : i32
    %c0_i32_0 = arith.constant 0 : i32
    return %c0_i32, %arg0 : i32, i32
  }
  func.func @transform_2(%arg0: i32) -> (i32, i32) {
    %c0_i32 = arith.constant 0 : i32
    %c0_i32_0 = arith.constant 0 : i32
    return %c0_i32, %arg0 : i32, i32
  }
}

module attributes {stable_mosaic.version = 11 : i64} {
  func.func @_conv_bn_leaky_kernel(%arg0: memref<16x128xbf16, #tpu.memory_space<vmem>>, %arg1: memref<128x4224xbf16, #tpu.memory_space<vmem>>, %arg2: memref<16x1xf32, #tpu.memory_space<vmem>>, %arg3: memref<16x1xf32, #tpu.memory_space<vmem>>, %arg4: memref<16x4224xbf16, #tpu.memory_space<vmem>>) attributes {dimension_semantics = [], scalar_prefetch = 0 : i64, scratch_operands = 0 : i64, tpu.core_type = #tpu.core_type<tc>} {
    %c0 = arith.constant 0 : index
    %c0_0 = arith.constant 0 : index
    %0 = vector.load %arg0[%c0, %c0_0] : memref<16x128xbf16, #tpu.memory_space<vmem>>, vector<16x128xbf16>
    %c0_1 = arith.constant 0 : index
    %c0_2 = arith.constant 0 : index
    %1 = vector.load %arg1[%c0_1, %c0_2] : memref<128x4224xbf16, #tpu.memory_space<vmem>>, vector<128x4224xbf16>
    %cst = arith.constant dense<0.000000e+00> : vector<16x4224xf32>
    %2 = tpu.matmul %0, %1, %cst {dimension_numbers = #tpu.dot_dimension_numbers<[1], [0], [0], [1], [0, 0, 1, 1], [], []>} : vector<16x128xbf16>, vector<128x4224xbf16>, vector<16x4224xf32> -> vector<16x4224xf32>
    %cst_3 = arith.constant dense<0.000000e+00> : vector<16xf32>
    %3 = vector.multi_reduction <add>, %2, %cst_3 [1] : vector<16x4224xf32> to vector<16xf32>
    %4 = vector.shape_cast %3 : vector<16xf32> to vector<16x1xf32>
    %cst_4 = arith.constant 2.40384616E-4 : f32
    %5 = vector.broadcast %cst_4 : f32 to vector<16x1xf32>
    %6 = arith.mulf %4, %5 : vector<16x1xf32>
    %7 = vector.broadcast %6 : vector<16x1xf32> to vector<16x4224xf32>
    %8 = arith.subf %2, %7 : vector<16x4224xf32>
    %9 = tpu.iota {dimensions = array<i32: 1>} : vector<16x4224xi32>
    %c4160_i32 = arith.constant 4160 : i32
    %10 = vector.broadcast %c4160_i32 : i32 to vector<16x4224xi32>
    %11 = arith.cmpi slt, %9, %10 : vector<16x4224xi32>
    %cst_5 = arith.constant 0.000000e+00 : f32
    %12 = vector.broadcast %cst_5 : f32 to vector<16x4224xf32>
    %13 = arith.select %11, %8, %12 : vector<16x4224xi1>, vector<16x4224xf32>
    %14 = arith.mulf %13, %13 : vector<16x4224xf32>
    %cst_6 = arith.constant dense<0.000000e+00> : vector<16xf32>
    %15 = vector.multi_reduction <add>, %14, %cst_6 [1] : vector<16x4224xf32> to vector<16xf32>
    %16 = vector.shape_cast %15 : vector<16xf32> to vector<16x1xf32>
    %cst_7 = arith.constant 2.40384616E-4 : f32
    %17 = vector.broadcast %cst_7 : f32 to vector<16x1xf32>
    %18 = arith.mulf %16, %17 : vector<16x1xf32>
    %cst_8 = arith.constant 9.99999974E-6 : f32
    %19 = vector.broadcast %cst_8 : f32 to vector<16x1xf32>
    %20 = arith.addf %18, %19 : vector<16x1xf32>
    %21 = math.rsqrt %20 : vector<16x1xf32>
    %22 = vector.broadcast %21 : vector<16x1xf32> to vector<16x4224xf32>
    %23 = arith.mulf %13, %22 : vector<16x4224xf32>
    %c0_9 = arith.constant 0 : index
    %c0_10 = arith.constant 0 : index
    %24 = vector.load %arg2[%c0_9, %c0_10] : memref<16x1xf32, #tpu.memory_space<vmem>>, vector<16x1xf32>
    %25 = vector.broadcast %24 : vector<16x1xf32> to vector<16x4224xf32>
    %26 = arith.mulf %23, %25 : vector<16x4224xf32>
    %c0_11 = arith.constant 0 : index
    %c0_12 = arith.constant 0 : index
    %27 = vector.load %arg3[%c0_11, %c0_12] : memref<16x1xf32, #tpu.memory_space<vmem>>, vector<16x1xf32>
    %28 = vector.broadcast %27 : vector<16x1xf32> to vector<16x4224xf32>
    %29 = arith.addf %26, %28 : vector<16x4224xf32>
    %cst_13 = arith.constant 0.000000e+00 : f32
    %30 = vector.broadcast %cst_13 : f32 to vector<16x4224xf32>
    %31 = arith.cmpf ogt, %29, %30 : vector<16x4224xf32>
    %cst_14 = arith.constant 2.000000e-01 : f32
    %32 = vector.broadcast %cst_14 : f32 to vector<16x4224xf32>
    %33 = arith.mulf %32, %29 : vector<16x4224xf32>
    %34 = arith.select %31, %29, %33 : vector<16x4224xi1>, vector<16x4224xf32>
    %35 = arith.truncf %34 : vector<16x4224xf32> to vector<16x4224xbf16>
    %c0_15 = arith.constant 0 : index
    %c0_16 = arith.constant 0 : index
    %36 = vector.load %arg4[%c0_15, %c0_16] : memref<16x4224xbf16, #tpu.memory_space<vmem>>, vector<16x4224xbf16>
    tpu.vector_store %arg4[%c0_15, %c0_16], %35 {strides = array<i32>} : memref<16x4224xbf16, #tpu.memory_space<vmem>>, vector<16x4224xbf16>,
    return
  }
}

module attributes {stable_mosaic.version = 11 : i64} {
  func.func @_conv_bn_leaky_kernel(%arg0: memref<32x256xbf16, #tpu.memory_space<vmem>>, %arg1: memref<256x1152xbf16, #tpu.memory_space<vmem>>, %arg2: memref<32x1xf32, #tpu.memory_space<vmem>>, %arg3: memref<32x1xf32, #tpu.memory_space<vmem>>, %arg4: memref<32x1152xbf16, #tpu.memory_space<vmem>>) attributes {dimension_semantics = [], scalar_prefetch = 0 : i64, scratch_operands = 0 : i64, tpu.core_type = #tpu.core_type<tc>} {
    %c0 = arith.constant 0 : index
    %c0_0 = arith.constant 0 : index
    %0 = vector.load %arg0[%c0, %c0_0] : memref<32x256xbf16, #tpu.memory_space<vmem>>, vector<32x256xbf16>
    %c0_1 = arith.constant 0 : index
    %c0_2 = arith.constant 0 : index
    %1 = vector.load %arg1[%c0_1, %c0_2] : memref<256x1152xbf16, #tpu.memory_space<vmem>>, vector<256x1152xbf16>
    %cst = arith.constant dense<0.000000e+00> : vector<32x1152xf32>
    %2 = tpu.matmul %0, %1, %cst {dimension_numbers = #tpu.dot_dimension_numbers<[1], [0], [0], [1], [0, 0, 1, 1], [], []>} : vector<32x256xbf16>, vector<256x1152xbf16>, vector<32x1152xf32> -> vector<32x1152xf32>
    %cst_3 = arith.constant dense<0.000000e+00> : vector<32xf32>
    %3 = vector.multi_reduction <add>, %2, %cst_3 [1] : vector<32x1152xf32> to vector<32xf32>
    %4 = vector.shape_cast %3 : vector<32xf32> to vector<32x1xf32>
    %cst_4 = arith.constant 9.61538462E-4 : f32
    %5 = vector.broadcast %cst_4 : f32 to vector<32x1xf32>
    %6 = arith.mulf %4, %5 : vector<32x1xf32>
    %7 = vector.broadcast %6 : vector<32x1xf32> to vector<32x1152xf32>
    %8 = arith.subf %2, %7 : vector<32x1152xf32>
    %9 = tpu.iota {dimensions = array<i32: 1>} : vector<32x1152xi32>
    %c1040_i32 = arith.constant 1040 : i32
    %10 = vector.broadcast %c1040_i32 : i32 to vector<32x1152xi32>
    %11 = arith.cmpi slt, %9, %10 : vector<32x1152xi32>
    %cst_5 = arith.constant 0.000000e+00 : f32
    %12 = vector.broadcast %cst_5 : f32 to vector<32x1152xf32>
    %13 = arith.select %11, %8, %12 : vector<32x1152xi1>, vector<32x1152xf32>
    %14 = arith.mulf %13, %13 : vector<32x1152xf32>
    %cst_6 = arith.constant dense<0.000000e+00> : vector<32xf32>
    %15 = vector.multi_reduction <add>, %14, %cst_6 [1] : vector<32x1152xf32> to vector<32xf32>
    %16 = vector.shape_cast %15 : vector<32xf32> to vector<32x1xf32>
    %cst_7 = arith.constant 9.61538462E-4 : f32
    %17 = vector.broadcast %cst_7 : f32 to vector<32x1xf32>
    %18 = arith.mulf %16, %17 : vector<32x1xf32>
    %cst_8 = arith.constant 9.99999974E-6 : f32
    %19 = vector.broadcast %cst_8 : f32 to vector<32x1xf32>
    %20 = arith.addf %18, %19 : vector<32x1xf32>
    %21 = math.rsqrt %20 : vector<32x1xf32>
    %22 = vector.broadcast %21 : vector<32x1xf32> to vector<32x1152xf32>
    %23 = arith.mulf %13, %22 : vector<32x1152xf32>
    %c0_9 = arith.constant 0 : index
    %c0_10 = arith.constant 0 : index
    %24 = vector.load %arg2[%c0_9, %c0_10] : memref<32x1xf32, #tpu.memory_space<vmem>>, vector<32x1xf32>
    %25 = vector.broadcast %24 : vector<32x1xf32> to vector<32x1152xf32>
    %26 = arith.mulf %23, %25 : vector<32x1152xf32>
    %c0_11 = arith.constant 0 : index
    %c0_12 = arith.constant 0 : index
    %27 = vector.load %arg3[%c0_11, %c0_12] : memref<32x1xf32, #tpu.memory_space<vmem>>, vector<32x1xf32>
    %28 = vector.broadcast %27 : vector<32x1xf32> to vector<32x1152xf32>
    %29 = arith.addf %26, %28 : vector<32x1152xf32>
    %cst_13 = arith.constant 0.000000e+00 : f32
    %30 = vector.broadcast %cst_13 : f32 to vector<32x1152xf32>
    %31 = arith.cmpf ogt, %29, %30 : vector<32x1152xf32>
    %cst_14 = arith.constant 2.000000e-01 : f32
    %32 = vector.broadcast %cst_14 : f32 to vector<32x1152xf32>
    %33 = arith.mulf %32, %29 : vector<32x1152xf32>
    %34 = arith.select %31, %29, %33 : vector<32x1152xi1>, vector<32x1152xf32>
    %35 = arith.truncf %34 : vector<32x1152xf32> to vector<32x1152xbf16>
    %c0_15 = arith.constant 0 : index
    %c0_16 = arith.constant 0 : index
    %36 = vector.load %arg4[%c0_15, %c0_16] : memref<32x1152xbf16, #tpu.memory_space<vmem>>, vector<32x1152xbf16>
    tpu.vector_store %arg4[%c0_15, %c0_16], %35 {strides = array<i32>} : memref<32x1152xbf16, #tpu.memory_space<vmem>>, vector<32x1152xbf16>,
    return
  }
}

module attributes {stable_mosaic.version = 11 : i64} {
  func.func @_conv_bn_leaky_kernel(%arg0: memref<64x512xbf16, #tpu.memory_space<vmem>>, %arg1: memref<512x384xbf16, #tpu.memory_space<vmem>>, %arg2: memref<64x1xf32, #tpu.memory_space<vmem>>, %arg3: memref<64x1xf32, #tpu.memory_space<vmem>>, %arg4: memref<64x384xbf16, #tpu.memory_space<vmem>>) attributes {dimension_semantics = [], scalar_prefetch = 0 : i64, scratch_operands = 0 : i64, tpu.core_type = #tpu.core_type<tc>} {
    %c0 = arith.constant 0 : index
    %c0_0 = arith.constant 0 : index
    %0 = vector.load %arg0[%c0, %c0_0] : memref<64x512xbf16, #tpu.memory_space<vmem>>, vector<64x512xbf16>
    %c0_1 = arith.constant 0 : index
    %c0_2 = arith.constant 0 : index
    %1 = vector.load %arg1[%c0_1, %c0_2] : memref<512x384xbf16, #tpu.memory_space<vmem>>, vector<512x384xbf16>
    %cst = arith.constant dense<0.000000e+00> : vector<64x384xf32>
    %2 = tpu.matmul %0, %1, %cst {dimension_numbers = #tpu.dot_dimension_numbers<[1], [0], [0], [1], [0, 0, 1, 1], [], []>} : vector<64x512xbf16>, vector<512x384xbf16>, vector<64x384xf32> -> vector<64x384xf32>
    %cst_3 = arith.constant dense<0.000000e+00> : vector<64xf32>
    %3 = vector.multi_reduction <add>, %2, %cst_3 [1] : vector<64x384xf32> to vector<64xf32>
    %4 = vector.shape_cast %3 : vector<64xf32> to vector<64x1xf32>
    %cst_4 = arith.constant 0.00384615385 : f32
    %5 = vector.broadcast %cst_4 : f32 to vector<64x1xf32>
    %6 = arith.mulf %4, %5 : vector<64x1xf32>
    %7 = vector.broadcast %6 : vector<64x1xf32> to vector<64x384xf32>
    %8 = arith.subf %2, %7 : vector<64x384xf32>
    %9 = tpu.iota {dimensions = array<i32: 1>} : vector<64x384xi32>
    %c260_i32 = arith.constant 260 : i32
    %10 = vector.broadcast %c260_i32 : i32 to vector<64x384xi32>
    %11 = arith.cmpi slt, %9, %10 : vector<64x384xi32>
    %cst_5 = arith.constant 0.000000e+00 : f32
    %12 = vector.broadcast %cst_5 : f32 to vector<64x384xf32>
    %13 = arith.select %11, %8, %12 : vector<64x384xi1>, vector<64x384xf32>
    %14 = arith.mulf %13, %13 : vector<64x384xf32>
    %cst_6 = arith.constant dense<0.000000e+00> : vector<64xf32>
    %15 = vector.multi_reduction <add>, %14, %cst_6 [1] : vector<64x384xf32> to vector<64xf32>
    %16 = vector.shape_cast %15 : vector<64xf32> to vector<64x1xf32>
    %cst_7 = arith.constant 0.00384615385 : f32
    %17 = vector.broadcast %cst_7 : f32 to vector<64x1xf32>
    %18 = arith.mulf %16, %17 : vector<64x1xf32>
    %cst_8 = arith.constant 9.99999974E-6 : f32
    %19 = vector.broadcast %cst_8 : f32 to vector<64x1xf32>
    %20 = arith.addf %18, %19 : vector<64x1xf32>
    %21 = math.rsqrt %20 : vector<64x1xf32>
    %22 = vector.broadcast %21 : vector<64x1xf32> to vector<64x384xf32>
    %23 = arith.mulf %13, %22 : vector<64x384xf32>
    %c0_9 = arith.constant 0 : index
    %c0_10 = arith.constant 0 : index
    %24 = vector.load %arg2[%c0_9, %c0_10] : memref<64x1xf32, #tpu.memory_space<vmem>>, vector<64x1xf32>
    %25 = vector.broadcast %24 : vector<64x1xf32> to vector<64x384xf32>
    %26 = arith.mulf %23, %25 : vector<64x384xf32>
    %c0_11 = arith.constant 0 : index
    %c0_12 = arith.constant 0 : index
    %27 = vector.load %arg3[%c0_11, %c0_12] : memref<64x1xf32, #tpu.memory_space<vmem>>, vector<64x1xf32>
    %28 = vector.broadcast %27 : vector<64x1xf32> to vector<64x384xf32>
    %29 = arith.addf %26, %28 : vector<64x384xf32>
    %cst_13 = arith.constant 0.000000e+00 : f32
    %30 = vector.broadcast %cst_13 : f32 to vector<64x384xf32>
    %31 = arith.cmpf ogt, %29, %30 : vector<64x384xf32>
    %cst_14 = arith.constant 2.000000e-01 : f32
    %32 = vector.broadcast %cst_14 : f32 to vector<64x384xf32>
    %33 = arith.mulf %32, %29 : vector<64x384xf32>
    %34 = arith.select %31, %29, %33 : vector<64x384xi1>, vector<64x384xf32>
    %35 = arith.truncf %34 : vector<64x384xf32> to vector<64x384xbf16>
    %c0_15 = arith.constant 0 : index
    %c0_16 = arith.constant 0 : index
    %36 = vector.load %arg4[%c0_15, %c0_16] : memref<64x384xbf16, #tpu.memory_space<vmem>>, vector<64x384xbf16>
    tpu.vector_store %arg4[%c0_15, %c0_16], %35 {strides = array<i32>} : memref<64x384xbf16, #tpu.memory_space<vmem>>, vector<64x384xbf16>,
    return
  }
}

module attributes {stable_mosaic.version = 11 : i64} {
  func.func @_tail_kernel(%arg0: memref<1024x140xbf16, #tpu.memory_space<vmem>>, %arg1: memref<1x1024xbf16, #tpu.memory_space<vmem>>, %arg2: memref<70x40xf32, #tpu.memory_space<vmem>>, %arg3: memref<1x40xf32, #tpu.memory_space<vmem>>, %arg4: memref<40x10xf32, #tpu.memory_space<vmem>>, %arg5: memref<1x10xf32, #tpu.memory_space<vmem>>, %arg6: memref<10x1xf32, #tpu.memory_space<vmem>>, %arg7: memref<1x1xf32, #tpu.memory_space<vmem>>, %arg8: memref<2x1xf32, #tpu.memory_space<vmem>>, %arg9: memref<2x70xf32, #tpu.memory_space<vmem>>) attributes {dimension_semantics = [], scalar_prefetch = 0 : i64, scratch_operands = 1 : i64, tpu.core_type = #tpu.core_type<tc>} {
    %c0 = arith.constant 0 : index
    %c0_0 = arith.constant 0 : index
    %0 = vector.load %arg1[%c0, %c0_0] : memref<1x1024xbf16, #tpu.memory_space<vmem>>, vector<1x1024xbf16>
    %c0_1 = arith.constant 0 : index
    %c0_2 = arith.constant 0 : index
    %1 = vector.load %arg0[%c0_1, %c0_2] : memref<1024x140xbf16, #tpu.memory_space<vmem>>, vector<1024x140xbf16>
    %cst = arith.constant dense<0.000000e+00> : vector<1x140xf32>
    %2 = tpu.matmul %0, %1, %cst {dimension_numbers = #tpu.dot_dimension_numbers<[1], [0], [0], [1], [0, 0, 1, 1], [], []>} : vector<1x1024xbf16>, vector<1024x140xbf16>, vector<1x140xf32> -> vector<1x140xf32>
    %cst_3 = arith.constant 0.000000e+00 : f32
    %3 = vector.broadcast %cst_3 : f32 to vector<1x140xf32>
    %4 = arith.maximumf %2, %3 : vector<1x140xf32>
    %5 = vector.extract_strided_slice %4 {offsets = [0, 0], sizes = [1, 70], strides = [1, 1]} : vector<1x140xf32> to vector<1x70xf32>
    %c0_4 = arith.constant 0 : index
    %c0_5 = arith.constant 0 : index
    %6 = vector.load %arg9[%c0_4, %c0_5] : memref<2x70xf32, #tpu.memory_space<vmem>>, vector<1x70xf32>
    tpu.vector_store %arg9[%c0_4, %c0_5], %5 {strides = array<i32>} : memref<2x70xf32, #tpu.memory_space<vmem>>, vector<1x70xf32>,
    %7 = vector.extract_strided_slice %4 {offsets = [0, 70], sizes = [1, 70], strides = [1, 1]} : vector<1x140xf32> to vector<1x70xf32>
    %c1 = arith.constant 1 : index
    %c0_6 = arith.constant 0 : index
    %8 = vector.load %arg9[%c1, %c0_6] : memref<2x70xf32, #tpu.memory_space<vmem>>, vector<1x70xf32>
    tpu.vector_store %arg9[%c1, %c0_6], %7 {strides = array<i32>} : memref<2x70xf32, #tpu.memory_space<vmem>>, vector<1x70xf32>,
    %c0_7 = arith.constant 0 : index
    %c0_8 = arith.constant 0 : index
    %9 = vector.load %arg9[%c0_7, %c0_8] : memref<2x70xf32, #tpu.memory_space<vmem>>, vector<2x70xf32>
    %c0_9 = arith.constant 0 : index
    %c0_10 = arith.constant 0 : index
    %10 = vector.load %arg2[%c0_9, %c0_10] : memref<70x40xf32, #tpu.memory_space<vmem>>, vector<70x40xf32>
    %cst_11 = arith.constant dense<0.000000e+00> : vector<2x40xf32>
    %11 = tpu.matmul %9, %10, %cst_11 {dimension_numbers = #tpu.dot_dimension_numbers<[1], [0], [0], [1], [0, 0, 1, 1], [], []>} : vector<2x70xf32>, vector<70x40xf32>, vector<2x40xf32> -> vector<2x40xf32>
    %c0_12 = arith.constant 0 : index
    %c0_13 = arith.constant 0 : index
    %12 = vector.load %arg3[%c0_12, %c0_13] : memref<1x40xf32, #tpu.memory_space<vmem>>, vector<1x40xf32>
    %13 = vector.broadcast %12 : vector<1x40xf32> to vector<2x40xf32>
    %14 = arith.addf %11, %13 : vector<2x40xf32>
    %cst_14 = arith.constant 0.000000e+00 : f32
    %15 = vector.broadcast %cst_14 : f32 to vector<2x40xf32>
    %16 = arith.maximumf %14, %15 : vector<2x40xf32>
    %c0_15 = arith.constant 0 : index
    %c0_16 = arith.constant 0 : index
    %17 = vector.load %arg4[%c0_15, %c0_16] : memref<40x10xf32, #tpu.memory_space<vmem>>, vector<40x10xf32>
    %cst_17 = arith.constant dense<0.000000e+00> : vector<2x10xf32>
    %18 = tpu.matmul %16, %17, %cst_17 {dimension_numbers = #tpu.dot_dimension_numbers<[1], [0], [0], [1], [0, 0, 1, 1], [], []>} : vector<2x40xf32>, vector<40x10xf32>, vector<2x10xf32> -> vector<2x10xf32>
    %c0_18 = arith.constant 0 : index
    %c0_19 = arith.constant 0 : index
    %19 = vector.load %arg5[%c0_18, %c0_19] : memref<1x10xf32, #tpu.memory_space<vmem>>, vector<1x10xf32>
    %20 = vector.broadcast %19 : vector<1x10xf32> to vector<2x10xf32>
    %21 = arith.addf %18, %20 : vector<2x10xf32>
    %cst_20 = arith.constant 0.000000e+00 : f32
    %22 = vector.broadcast %cst_20 : f32 to vector<2x10xf32>
    %23 = arith.maximumf %21, %22 : vector<2x10xf32>
    %c0_21 = arith.constant 0 : index
    %c0_22 = arith.constant 0 : index
    %24 = vector.load %arg6[%c0_21, %c0_22] : memref<10x1xf32, #tpu.memory_space<vmem>>, vector<10x1xf32>
    %cst_23 = arith.constant dense<0.000000e+00> : vector<2x1xf32>
    %25 = tpu.matmul %23, %24, %cst_23 {dimension_numbers = #tpu.dot_dimension_numbers<[1], [0], [0], [1], [0, 0, 1, 1], [], []>} : vector<2x10xf32>, vector<10x1xf32>, vector<2x1xf32> -> vector<2x1xf32>
    %c0_24 = arith.constant 0 : index
    %c0_25 = arith.constant 0 : index
    %26 = vector.load %arg7[%c0_24, %c0_25] : memref<1x1xf32, #tpu.memory_space<vmem>>, vector<1x1xf32>
    %27 = vector.broadcast %26 : vector<1x1xf32> to vector<2x1xf32>
    %28 = arith.addf %25, %27 : vector<2x1xf32>
    %cst_26 = arith.constant 0.000000e+00 : f32
    %29 = vector.broadcast %cst_26 : f32 to vector<2x1xf32>
    %30 = arith.cmpf oge, %28, %29 : vector<2x1xf32>
    %cst_27 = arith.constant 0.000000e+00 : f32
    %31 = vector.broadcast %cst_27 : f32 to vector<2x1xf32>
    %32 = arith.subf %31, %28 : vector<2x1xf32>
    %33 = math.exp %32 : vector<2x1xf32>
    %cst_28 = arith.constant 1.000000e+00 : f32
    %34 = vector.broadcast %cst_28 : f32 to vector<2x1xf32>
    %35 = arith.addf %34, %33 : vector<2x1xf32>
    %cst_29 = arith.constant 1.000000e+00 : f32
    %36 = vector.broadcast %cst_29 : f32 to vector<2x1xf32>
    %37 = arith.divf %36, %35 : vector<2x1xf32>
    %38 = math.exp %28 : vector<2x1xf32>
    %39 = math.exp %28 : vector<2x1xf32>
    %cst_30 = arith.constant 1.000000e+00 : f32
    %40 = vector.broadcast %cst_30 : f32 to vector<2x1xf32>
    %41 = arith.addf %40, %39 : vector<2x1xf32>
    %42 = arith.divf %38, %41 : vector<2x1xf32>
    %43 = arith.select %30, %37, %42 : vector<2x1xi1>, vector<2x1xf32>
    %c0_31 = arith.constant 0 : index
    %c0_32 = arith.constant 0 : index
    %44 = vector.load %arg8[%c0_31, %c0_32] : memref<2x1xf32, #tpu.memory_space<vmem>>, vector<2x1xf32>
    tpu.vector_store %arg8[%c0_31, %c0_32], %43 {strides = array<i32>} : memref<2x1xf32, #tpu.memory_space<vmem>>, vector<2x1xf32>,
    return
  }
}

</mosaic_0001>

<bundles_post_ra>
// kernel: discriminator_forward.5
= control target key start
LH: loop header
LB: loop body
LE: loop exit
PB: predicated region body
PF: predicated region fallthrough
CT: control target
= control target key end

     0   :  { %s4052_s9 = smov 0   ;;  %s4054_s10 = smov 0   ;;  %s5074_s0 = inlined_call_operand.vmem [shape: bf16[8,48], index: 0, kind: input, shape index: {}]   ;;  %s5075_s1 = inlined_call_operand.vmem [shape: bf16[48,16640], index: 1, kind: input, shape index: {}]   ;;  %s5076_s2 = inlined_call_operand.vmem [shape: bf16[8,16640], index: 2, kind: output, shape index: {}]  }
   0x1   :  { %s4056_s11 = smov 0  }
   0x2 LB: > { %s2924_s12 = sadd.s32 4294967295, %s4035_s11   ;;  %s4069_s13 = sadd.s32 1, %s4035_s11   ;;  %s4035_s11 = sphi %s4056_s11, %s5079_s11   ;;  %s4031_s10 = sphi %s4054_s10, %s5078_s10   ;;  %s4027_s9 = sphi %s4052_s9, %s5077_s9  }
   0x3   : > { %s37_s14 = ssub.s32 %s4035_s11, %s4069_s13  ;;  %s40_s15 = sadd.s32 1, %s4031_s10 }
   0x4   : > { %p38_p0 = scmp.eq.s32.totalorder %s37_s14, 0  ;;  %p47_p1 = scmp.ne.s32.totalorder %s4031_s10, %s4027_s9 }
   0x5   : > { %p48_p2 = scmp.eq.s32.totalorder %s4035_s11, 0  ;;  %p2927_p4 = scmp.ge.s32.totalorder %s4035_s11, 2 }
   0x6   : > { %s4078_s16 = scalar_select %p38_p0, %s4031_s10, %s40_s15  }
   0x7   : > { %p49_p3 = por %p48_p2, %p47_p1  ;;  %102 = sbr.rel (%p2927_p4) target bundleno = 215 (0xd7), region = 20 }
   0xc   : > { %105 = sbr.rel (!%p49_p3) target bundleno = 215 (0xd7), region = 24  ;;  %s107_s17 = sand.u32 (%p49_p3), 1, %s4031_s10  }
   0xd   : > { %s3790_s18 = smul.u32 (%p49_p3), 260, %s4035_s11 }
   0xe   : > { %s3986_s19 = smul.u32 (%p49_p3), 1560, %s107_s17 }
   0xf   : > { %s4086_s22 = scalar_lea.vmem (%p49_p3), %s5075_s1, %s3790_s18 }
  0x10   : > { %v127_v0 = vld [vmem:[%s4086_s22] sm:$0xff] (%p49_p3)  ;;  %v129_v1 = vld [vmem:[%s4086_s22 + $0x8] sm:$0xff] (%p49_p3)  ;;  %v131_v2 = vld [vmem:[%s4086_s22 + $0x10] sm:$0xff] (%p49_p3)  ;;  %s4091_s23 = scalar_lea.vmem (%p49_p3), [#allocation2], %s3986_s19 }
  0x11   : > { %128 = vst [vmem:[%s4091_s23] sm:$0xff] %v127_v0  ;;  %v133_v3 = vld [vmem:[%s4086_s22 + $0x18] sm:$0xff]  ;;  %v135_v4 = vld [vmem:[%s4086_s22 + $0x20] sm:$0xff]  ;;  %v137_v5 = vld [vmem:[%s4086_s22 + $0x28] sm:$0xff] }
  0x12   : > { %130 = vst [vmem:[%s4091_s23 + $0x8] sm:$0xff] %v129_v1  ;;  %v139_v6 = vld [vmem:[%s4086_s22 + $0x30] sm:$0xff]  ;;  %v141_v7 = vld [vmem:[%s4086_s22 + $0x38] sm:$0xff]  ;;  %v143_v8 = vld [vmem:[%s4086_s22 + $0x40] sm:$0xff] }
  0x13   : > { %132 = vst [vmem:[%s4091_s23 + $0x10] sm:$0xff] %v131_v2  ;;  %v145_v9 = vld [vmem:[%s4086_s22 + $0x48] sm:$0xff]  ;;  %v147_v10 = vld [vmem:[%s4086_s22 + $0x50] sm:$0xff]  ;;  %v149_v11 = vld [vmem:[%s4086_s22 + $0x58] sm:$0xff] }
  0x14   : > { %134 = vst [vmem:[%s4091_s23 + $0x18] sm:$0xff] %v133_v3  ;;  %v151_v12 = vld [vmem:[%s4086_s22 + $0x60] sm:$0xff]  ;;  %v153_v13 = vld [vmem:[%s4086_s22 + $0x68] sm:$0xff]  ;;  %v155_v14 = vld [vmem:[%s4086_s22 + $0x70] sm:$0xff] }
  0x15   : > { %136 = vst [vmem:[%s4091_s23 + $0x20] sm:$0xff] %v135_v4  ;;  %v157_v15 = vld [vmem:[%s4086_s22 + $0x78] sm:$0xff]  ;;  %v159_v16 = vld [vmem:[%s4086_s22 + $0x80] sm:$0xff]  ;;  %v161_v17 = vld [vmem:[%s4086_s22 + $0x88] sm:$0xff] }
  0x16   : > { %138 = vst [vmem:[%s4091_s23 + $0x28] sm:$0xff] %v137_v5  ;;  %v163_v18 = vld [vmem:[%s4086_s22 + $0x90] sm:$0xff]  ;;  %v165_v19 = vld [vmem:[%s4086_s22 + $0x98] sm:$0xff]  ;;  %v167_v20 = vld [vmem:[%s4086_s22 + $0xa0] sm:$0xff] }
  0x17   : > { %140 = vst [vmem:[%s4091_s23 + $0x30] sm:$0xff] %v139_v6  ;;  %v169_v21 = vld [vmem:[%s4086_s22 + $0xa8] sm:$0xff]  ;;  %v171_v22 = vld [vmem:[%s4086_s22 + $0xb0] sm:$0xff]  ;;  %v173_v23 = vld [vmem:[%s4086_s22 + $0xb8] sm:$0xff] }
  0x18   : > { %142 = vst [vmem:[%s4091_s23 + $0x38] sm:$0xff] %v141_v7  ;;  %v175_v24 = vld [vmem:[%s4086_s22 + $0xc0] sm:$0xff]  ;;  %v177_v25 = vld [vmem:[%s4086_s22 + $0xc8] sm:$0xff]  ;;  %v179_v26 = vld [vmem:[%s4086_s22 + $0xd0] sm:$0xff] }
  0x19   : > { %144 = vst [vmem:[%s4091_s23 + $0x40] sm:$0xff] %v143_v8  ;;  %v181_v27 = vld [vmem:[%s4086_s22 + $0xd8] sm:$0xff]  ;;  %v183_v28 = vld [vmem:[%s4086_s22 + $0xe0] sm:$0xff]  ;;  %v185_v29 = vld [vmem:[%s4086_s22 + $0xe8] sm:$0xff] }
  0x1a   : > { %146 = vst [vmem:[%s4091_s23 + $0x48] sm:$0xff] %v145_v9  ;;  %v187_v30 = vld [vmem:[%s4086_s22 + $0xf0] sm:$0xff]  ;;  %v189_v31 = vld [vmem:[%s4086_s22 + $0xf8] sm:$0xff]  ;;  %v191_v32 = vld [vmem:[%s4086_s22 + $0x208] sm:$0xff] }
  0x1b   : > { %148 = vst [vmem:[%s4091_s23 + $0x50] sm:$0xff] %v147_v10  ;;  %v193_v33 = vld [vmem:[%s4086_s22 + $0x210] sm:$0xff]  ;;  %v195_v34 = vld [vmem:[%s4086_s22 + $0x218] sm:$0xff]  ;;  %v197_v35 = vld [vmem:[%s4086_s22 + $0x220] sm:$0xff] }
  0x1c   : > { %150 = vst [vmem:[%s4091_s23 + $0x58] sm:$0xff] %v149_v11  ;;  %v199_v36 = vld [vmem:[%s4086_s22 + $0x228] sm:$0xff]  ;;  %v201_v37 = vld [vmem:[%s4086_s22 + $0x230] sm:$0xff]  ;;  %v203_v38 = vld [vmem:[%s4086_s22 + $0x238] sm:$0xff] }
  0x1d   : > { %152 = vst [vmem:[%s4091_s23 + $0x60] sm:$0xff] %v151_v12  ;;  %v205_v39 = vld [vmem:[%s4086_s22 + $0x240] sm:$0xff]  ;;  %v207_v40 = vld [vmem:[%s4086_s22 + $0x248] sm:$0xff]  ;;  %v209_v41 = vld [vmem:[%s4086_s22 + $0x250] sm:$0xff] }
  0x1e   : > { %154 = vst [vmem:[%s4091_s23 + $0x68] sm:$0xff] %v153_v13  ;;  %v211_v42 = vld [vmem:[%s4086_s22 + $0x258] sm:$0xff]  ;;  %v213_v43 = vld [vmem:[%s4086_s22 + $0x260] sm:$0xff]  ;;  %v215_v44 = vld [vmem:[%s4086_s22 + $0x268] sm:$0xff] }
  0x1f   : > { %156 = vst [vmem:[%s4091_s23 + $0x70] sm:$0xff] %v155_v14  ;;  %v217_v45 = vld [vmem:[%s4086_s22 + $0x270] sm:$0xff]  ;;  %v219_v46 = vld [vmem:[%s4086_s22 + $0x278] sm:$0xff]  ;;  %v221_v47 = vld [vmem:[%s4086_s22 + $0x280] sm:$0xff] }
  0x20   : > { %158 = vst [vmem:[%s4091_s23 + $0x78] sm:$0xff] %v157_v15  ;;  %v223_v48 = vld [vmem:[%s4086_s22 + $0x288] sm:$0xff]  ;;  %v225_v49 = vld [vmem:[%s4086_s22 + $0x290] sm:$0xff]  ;;  %v227_v50 = vld [vmem:[%s4086_s22 + $0x298] sm:$0xff] }
  0x21   : > { %160 = vst [vmem:[%s4091_s23 + $0x80] sm:$0xff] %v159_v16  ;;  %v229_v51 = vld [vmem:[%s4086_s22 + $0x2a0] sm:$0xff]  ;;  %v231_v52 = vld [vmem:[%s4086_s22 + $0x2a8] sm:$0xff]  ;;  %v233_v53 = vld [vmem:[%s4086_s22 + $0x2b0] sm:$0xff] }
  0x22   : > { %162 = vst [vmem:[%s4091_s23 + $0x88] sm:$0xff] %v161_v17  ;;  %v235_v54 = vld [vmem:[%s4086_s22 + $0x2b8] sm:$0xff]  ;;  %v237_v55 = vld [vmem:[%s4086_s22 + $0x2c0] sm:$0xff]  ;;  %v239_v56 = vld [vmem:[%s4086_s22 + $0x2c8] sm:$0xff] }
  0x23   : > { %164 = vst [vmem:[%s4091_s23 + $0x90] sm:$0xff] %v163_v18  ;;  %v241_v57 = vld [vmem:[%s4086_s22 + $0x2d0] sm:$0xff]  ;;  %v243_v58 = vld [vmem:[%s4086_s22 + $0x2d8] sm:$0xff]  ;;  %v245_v59 = vld [vmem:[%s4086_s22 + $0x2e0] sm:$0xff] }
  0x24   : > { %166 = vst [vmem:[%s4091_s23 + $0x98] sm:$0xff] %v165_v19  ;;  %v247_v60 = vld [vmem:[%s4086_s22 + $0x2e8] sm:$0xff]  ;;  %v249_v61 = vld [vmem:[%s4086_s22 + $0x2f0] sm:$0xff]  ;;  %v251_v62 = vld [vmem:[%s4086_s22 + $0x2f8] sm:$0xff] }
  0x25   : > { %168 = vst [vmem:[%s4091_s23 + $0xa0] sm:$0xff] %v167_v20  ;;  %v253_v63 = vld [vmem:[%s4086_s22 + $0x300] sm:$0xff]  ;;  %v255_v0 = vld [vmem:[%s4086_s22 + $0x410] sm:$0xff]  ;;  %v257_v1 = vld [vmem:[%s4086_s22 + $0x418] sm:$0xff] }
  0x26   : > { %170 = vst [vmem:[%s4091_s23 + $0xa8] sm:$0xff] %v169_v21  ;;  %v259_v2 = vld [vmem:[%s4086_s22 + $0x420] sm:$0xff]  ;;  %v261_v3 = vld [vmem:[%s4086_s22 + $0x428] sm:$0xff]  ;;  %v263_v4 = vld [vmem:[%s4086_s22 + $0x430] sm:$0xff] }
  0x27   : > { %172 = vst [vmem:[%s4091_s23 + $0xb0] sm:$0xff] %v171_v22  ;;  %v265_v5 = vld [vmem:[%s4086_s22 + $0x438] sm:$0xff]  ;;  %v267_v6 = vld [vmem:[%s4086_s22 + $0x440] sm:$0xff]  ;;  %v269_v7 = vld [vmem:[%s4086_s22 + $0x448] sm:$0xff] }
  0x28   : > { %174 = vst [vmem:[%s4091_s23 + $0xb8] sm:$0xff] %v173_v23  ;;  %v271_v8 = vld [vmem:[%s4086_s22 + $0x450] sm:$0xff]  ;;  %v273_v9 = vld [vmem:[%s4086_s22 + $0x458] sm:$0xff]  ;;  %v275_v10 = vld [vmem:[%s4086_s22 + $0x460] sm:$0xff] }
  0x29   : > { %176 = vst [vmem:[%s4091_s23 + $0xc0] sm:$0xff] %v175_v24  ;;  %v277_v11 = vld [vmem:[%s4086_s22 + $0x468] sm:$0xff]  ;;  %v279_v12 = vld [vmem:[%s4086_s22 + $0x470] sm:$0xff]  ;;  %v281_v13 = vld [vmem:[%s4086_s22 + $0x478] sm:$0xff] }
  0x2a   : > { %178 = vst [vmem:[%s4091_s23 + $0xc8] sm:$0xff] %v177_v25  ;;  %v283_v14 = vld [vmem:[%s4086_s22 + $0x480] sm:$0xff]  ;;  %v285_v15 = vld [vmem:[%s4086_s22 + $0x488] sm:$0xff]  ;;  %v287_v16 = vld [vmem:[%s4086_s22 + $0x490] sm:$0xff] }
  0x2b   : > { %180 = vst [vmem:[%s4091_s23 + $0xd0] sm:$0xff] %v179_v26  ;;  %v289_v17 = vld [vmem:[%s4086_s22 + $0x498] sm:$0xff]  ;;  %v291_v18 = vld [vmem:[%s4086_s22 + $0x4a0] sm:$0xff]  ;;  %v293_v19 = vld [vmem:[%s4086_s22 + $0x4a8] sm:$0xff] }
  0x2c   : > { %182 = vst [vmem:[%s4091_s23 + $0xd8] sm:$0xff] %v181_v27  ;;  %v295_v20 = vld [vmem:[%s4086_s22 + $0x4b0] sm:$0xff]  ;;  %v297_v21 = vld [vmem:[%s4086_s22 + $0x4b8] sm:$0xff]  ;;  %v299_v22 = vld [vmem:[%s4086_s22 + $0x4c0] sm:$0xff] }
  0x2d   : > { %184 = vst [vmem:[%s4091_s23 + $0xe0] sm:$0xff] %v183_v28  ;;  %v301_v23 = vld [vmem:[%s4086_s22 + $0x4c8] sm:$0xff]  ;;  %v303_v24 = vld [vmem:[%s4086_s22 + $0x4d0] sm:$0xff]  ;;  %v305_v25 = vld [vmem:[%s4086_s22 + $0x4d8] sm:$0xff] }
  0x2e   : > { %186 = vst [vmem:[%s4091_s23 + $0xe8] sm:$0xff] %v185_v29  ;;  %v307_v26 = vld [vmem:[%s4086_s22 + $0x4e0] sm:$0xff]  ;;  %v309_v27 = vld [vmem:[%s4086_s22 + $0x4e8] sm:$0xff]  ;;  %v311_v28 = vld [vmem:[%s4086_s22 + $0x4f0] sm:$0xff] }
  0x2f   : > { %188 = vst [vmem:[%s4091_s23 + $0xf0] sm:$0xff] %v187_v30  ;;  %v313_v29 = vld [vmem:[%s4086_s22 + $0x4f8] sm:$0xff]  ;;  %v315_v30 = vld [vmem:[%s4086_s22 + $0x500] sm:$0xff] }
  0x30   : > { %190 = vst [vmem:[%s4091_s23 + $0xf8] sm:$0xff] %v189_v31  ;;  %v317_v31 = vld [vmem:[%s4086_s22 + $0x508] sm:$0xff] }
  0x31   : > { %192 = vst [vmem:[%s4091_s23 + $0x104] sm:$0xff] %v191_v32  ;;  %v319_v32 = vld [vmem:[%s4086_s22 + $0x618] sm:$0xff] }
  0x32   : > { %194 = vst [vmem:[%s4091_s23 + $0x10c] sm:$0xff] %v193_v33  ;;  %v321_v33 = vld [vmem:[%s4086_s22 + $0x620] sm:$0xff] }
  0x33   : > { %196 = vst [vmem:[%s4091_s23 + $0x114] sm:$0xff] %v195_v34  ;;  %v323_v34 = vld [vmem:[%s4086_s22 + $0x628] sm:$0xff] }
  0x34   : > { %198 = vst [vmem:[%s4091_s23 + $0x11c] sm:$0xff] %v197_v35  ;;  %v325_v35 = vld [vmem:[%s4086_s22 + $0x630] sm:$0xff] }
  0x35   : > { %200 = vst [vmem:[%s4091_s23 + $0x124] sm:$0xff] %v199_v36  ;;  %v327_v36 = vld [vmem:[%s4086_s22 + $0x638] sm:$0xff] }
  0x36   : > { %202 = vst [vmem:[%s4091_s23 + $0x12c] sm:$0xff] %v201_v37  ;;  %v329_v37 = vld [vmem:[%s4086_s22 + $0x640] sm:$0xff] }
  0x37   : > { %204 = vst [vmem:[%s4091_s23 + $0x134] sm:$0xff] %v203_v38  ;;  %v331_v38 = vld [vmem:[%s4086_s22 + $0x648] sm:$0xff] }
  0x38   : > { %206 = vst [vmem:[%s4091_s23 + $0x13c] sm:$0xff] %v205_v39  ;;  %v333_v39 = vld [vmem:[%s4086_s22 + $0x650] sm:$0xff] }
  0x39   : > { %208 = vst [vmem:[%s4091_s23 + $0x144] sm:$0xff] %v207_v40  ;;  %v335_v40 = vld [vmem:[%s4086_s22 + $0x658] sm:$0xff] }
  0x3a   : > { %210 = vst [vmem:[%s4091_s23 + $0x14c] sm:$0xff] %v209_v41  ;;  %v337_v41 = vld [vmem:[%s4086_s22 + $0x660] sm:$0xff] }
  0x3b   : > { %212 = vst [vmem:[%s4091_s23 + $0x154] sm:$0xff] %v211_v42  ;;  %v339_v42 = vld [vmem:[%s4086_s22 + $0x668] sm:$0xff] }
  0x3c   : > { %214 = vst [vmem:[%s4091_s23 + $0x15c] sm:$0xff] %v213_v43  ;;  %v341_v43 = vld [vmem:[%s4086_s22 + $0x670] sm:$0xff] }
  0x3d   : > { %216 = vst [vmem:[%s4091_s23 + $0x164] sm:$0xff] %v215_v44  ;;  %v343_v44 = vld [vmem:[%s4086_s22 + $0x678] sm:$0xff] }
  0x3e   : > { %218 = vst [vmem:[%s4091_s23 + $0x16c] sm:$0xff] %v217_v45  ;;  %v345_v45 = vld [vmem:[%s4086_s22 + $0x680] sm:$0xff] }
  0x3f   : > { %220 = vst [vmem:[%s4091_s23 + $0x174] sm:$0xff] %v219_v46  ;;  %v347_v46 = vld [vmem:[%s4086_s22 + $0x688] sm:$0xff] }
  0x40   : > { %222 = vst [vmem:[%s4091_s23 + $0x17c] sm:$0xff] %v221_v47  ;;  %v349_v47 = vld [vmem:[%s4086_s22 + $0x690] sm:$0xff] }
  0x41   : > { %224 = vst [vmem:[%s4091_s23 + $0x184] sm:$0xff] %v223_v48  ;;  %v351_v48 = vld [vmem:[%s4086_s22 + $0x698] sm:$0xff] }
  0x42   : > { %226 = vst [vmem:[%s4091_s23 + $0x18c] sm:$0xff] %v225_v49  ;;  %v353_v49 = vld [vmem:[%s4086_s22 + $0x6a0] sm:$0xff] }
  0x43   : > { %228 = vst [vmem:[%s4091_s23 + $0x194] sm:$0xff] %v227_v50  ;;  %v355_v50 = vld [vmem:[%s4086_s22 + $0x6a8] sm:$0xff] }
  0x44   : > { %230 = vst [vmem:[%s4091_s23 + $0x19c] sm:$0xff] %v229_v51  ;;  %v357_v51 = vld [vmem:[%s4086_s22 + $0x6b0] sm:$0xff] }
  0x45   : > { %232 = vst [vmem:[%s4091_s23 + $0x1a4] sm:$0xff] %v231_v52  ;;  %v359_v52 = vld [vmem:[%s4086_s22 + $0x6b8] sm:$0xff] }
  0x46   : > { %234 = vst [vmem:[%s4091_s23 + $0x1ac] sm:$0xff] %v233_v53  ;;  %v361_v53 = vld [vmem:[%s4086_s22 + $0x6c0] sm:$0xff] }
  0x47   : > { %236 = vst [vmem:[%s4091_s23 + $0x1b4] sm:$0xff] %v235_v54  ;;  %v363_v54 = vld [vmem:[%s4086_s22 + $0x6c8] sm:$0xff] }
  0x48   : > { %238 = vst [vmem:[%s4091_s23 + $0x1bc] sm:$0xff] %v237_v55  ;;  %v365_v55 = vld [vmem:[%s4086_s22 + $0x6d0] sm:$0xff] }
  0x49   : > { %240 = vst [vmem:[%s4091_s23 + $0x1c4] sm:$0xff] %v239_v56  ;;  %v367_v56 = vld [vmem:[%s4086_s22 + $0x6d8] sm:$0xff] }
  0x4a   : > { %242 = vst [vmem:[%s4091_s23 + $0x1cc] sm:$0xff] %v241_v57  ;;  %v369_v57 = vld [vmem:[%s4086_s22 + $0x6e0] sm:$0xff] }
  0x4b   : > { %244 = vst [vmem:[%s4091_s23 + $0x1d4] sm:$0xff] %v243_v58  ;;  %v371_v58 = vld [vmem:[%s4086_s22 + $0x6e8] sm:$0xff] }
  0x4c   : > { %246 = vst [vmem:[%s4091_s23 + $0x1dc] sm:$0xff] %v245_v59  ;;  %v373_v59 = vld [vmem:[%s4086_s22 + $0x6f0] sm:$0xff] }
  0x4d   : > { %248 = vst [vmem:[%s4091_s23 + $0x1e4] sm:$0xff] %v247_v60  ;;  %v375_v60 = vld [vmem:[%s4086_s22 + $0x6f8] sm:$0xff] }
  0x4e   : > { %250 = vst [vmem:[%s4091_s23 + $0x1ec] sm:$0xff] %v249_v61  ;;  %v377_v61 = vld [vmem:[%s4086_s22 + $0x700] sm:$0xff] }
  0x4f   : > { %252 = vst [vmem:[%s4091_s23 + $0x1f4] sm:$0xff] %v251_v62  ;;  %v379_v62 = vld [vmem:[%s4086_s22 + $0x708] sm:$0xff] }
  0x50   : > { %254 = vst [vmem:[%s4091_s23 + $0x1fc] sm:$0xff] %v253_v63  ;;  %v381_v63 = vld [vmem:[%s4086_s22 + $0x710] sm:$0xff] }
  0x51   : > { %256 = vst [vmem:[%s4091_s23 + $0x208] sm:$0xff] %v255_v0  ;;  %v383_v0 = vld [vmem:[%s4086_s22 + $0x820] sm:$0xff] }
  0x52   : > { %258 = vst [vmem:[%s4091_s23 + $0x210] sm:$0xff] %v257_v1  ;;  %v385_v1 = vld [vmem:[%s4086_s22 + $0x828] sm:$0xff] }
  0x53   : > { %260 = vst [vmem:[%s4091_s23 + $0x218] sm:$0xff] %v259_v2  ;;  %v387_v2 = vld [vmem:[%s4086_s22 + $0x830] sm:$0xff] }
  0x54   : > { %262 = vst [vmem:[%s4091_s23 + $0x220] sm:$0xff] %v261_v3  ;;  %v389_v3 = vld [vmem:[%s4086_s22 + $0x838] sm:$0xff] }
  0x55   : > { %264 = vst [vmem:[%s4091_s23 + $0x228] sm:$0xff] %v263_v4  ;;  %v391_v4 = vld [vmem:[%s4086_s22 + $0x840] sm:$0xff] }
  0x56   : > { %266 = vst [vmem:[%s4091_s23 + $0x230] sm:$0xff] %v265_v5  ;;  %v393_v5 = vld [vmem:[%s4086_s22 + $0x848] sm:$0xff] }
  0x57   : > { %268 = vst [vmem:[%s4091_s23 + $0x238] sm:$0xff] %v267_v6  ;;  %v395_v6 = vld [vmem:[%s4086_s22 + $0x850] sm:$0xff] }
  0x58   : > { %270 = vst [vmem:[%s4091_s23 + $0x240] sm:$0xff] %v269_v7  ;;  %v397_v7 = vld [vmem:[%s4086_s22 + $0x858] sm:$0xff] }
  0x59   : > { %272 = vst [vmem:[%s4091_s23 + $0x248] sm:$0xff] %v271_v8  ;;  %v399_v8 = vld [vmem:[%s4086_s22 + $0x860] sm:$0xff] }
  0x5a   : > { %274 = vst [vmem:[%s4091_s23 + $0x250] sm:$0xff] %v273_v9  ;;  %v401_v9 = vld [vmem:[%s4086_s22 + $0x868] sm:$0xff] }
  0x5b   : > { %276 = vst [vmem:[%s4091_s23 + $0x258] sm:$0xff] %v275_v10  ;;  %v403_v10 = vld [vmem:[%s4086_s22 + $0x870] sm:$0xff] }
  0x5c   : > { %278 = vst [vmem:[%s4091_s23 + $0x260] sm:$0xff] %v277_v11  ;;  %v405_v11 = vld [vmem:[%s4086_s22 + $0x878] sm:$0xff] }
  0x5d   : > { %280 = vst [vmem:[%s4091_s23 + $0x268] sm:$0xff] %v279_v12  ;;  %v407_v12 = vld [vmem:[%s4086_s22 + $0x880] sm:$0xff] }
  0x5e   : > { %282 = vst [vmem:[%s4091_s23 + $0x270] sm:$0xff] %v281_v13  ;;  %v409_v13 = vld [vmem:[%s4086_s22 + $0x888] sm:$0xff] }
  0x5f   : > { %284 = vst [vmem:[%s4091_s23 + $0x278] sm:$0xff] %v283_v14  ;;  %v411_v14 = vld [vmem:[%s4086_s22 + $0x890] sm:$0xff] }
  0x60   : > { %286 = vst [vmem:[%s4091_s23 + $0x280] sm:$0xff] %v285_v15  ;;  %v413_v15 = vld [vmem:[%s4086_s22 + $0x898] sm:$0xff] }
  0x61   : > { %288 = vst [vmem:[%s4091_s23 + $0x288] sm:$0xff] %v287_v16  ;;  %v415_v16 = vld [vmem:[%s4086_s22 + $0x8a0] sm:$0xff] }
  0x62   : > { %290 = vst [vmem:[%s4091_s23 + $0x290] sm:$0xff] %v289_v17  ;;  %v417_v17 = vld [vmem:[%s4086_s22 + $0x8a8] sm:$0xff] }
  0x63   : > { %292 = vst [vmem:[%s4091_s23 + $0x298] sm:$0xff] %v291_v18  ;;  %v419_v18 = vld [vmem:[%s4086_s22 + $0x8b0] sm:$0xff] }
  0x64   : > { %294 = vst [vmem:[%s4091_s23 + $0x2a0] sm:$0xff] %v293_v19  ;;  %v421_v19 = vld [vmem:[%s4086_s22 + $0x8b8] sm:$0xff] }
  0x65   : > { %296 = vst [vmem:[%s4091_s23 + $0x2a8] sm:$0xff] %v295_v20  ;;  %v423_v20 = vld [vmem:[%s4086_s22 + $0x8c0] sm:$0xff] }
  0x66   : > { %298 = vst [vmem:[%s4091_s23 + $0x2b0] sm:$0xff] %v297_v21  ;;  %v425_v21 = vld [vmem:[%s4086_s22 + $0x8c8] sm:$0xff] }
  0x67   : > { %300 = vst [vmem:[%s4091_s23 + $0x2b8] sm:$0xff] %v299_v22  ;;  %v427_v22 = vld [vmem:[%s4086_s22 + $0x8d0] sm:$0xff] }
  0x68   : > { %302 = vst [vmem:[%s4091_s23 + $0x2c0] sm:$0xff] %v301_v23  ;;  %v429_v23 = vld [vmem:[%s4086_s22 + $0x8d8] sm:$0xff] }
  0x69   : > { %304 = vst [vmem:[%s4091_s23 + $0x2c8] sm:$0xff] %v303_v24  ;;  %v431_v24 = vld [vmem:[%s4086_s22 + $0x8e0] sm:$0xff] }
  0x6a   : > { %306 = vst [vmem:[%s4091_s23 + $0x2d0] sm:$0xff] %v305_v25  ;;  %v433_v25 = vld [vmem:[%s4086_s22 + $0x8e8] sm:$0xff] }
  0x6b   : > { %308 = vst [vmem:[%s4091_s23 + $0x2d8] sm:$0xff] %v307_v26  ;;  %v435_v26 = vld [vmem:[%s4086_s22 + $0x8f0] sm:$0xff] }
  0x6c   : > { %310 = vst [vmem:[%s4091_s23 + $0x2e0] sm:$0xff] %v309_v27  ;;  %v437_v27 = vld [vmem:[%s4086_s22 + $0x8f8] sm:$0xff] }
  0x6d   : > { %312 = vst [vmem:[%s4091_s23 + $0x2e8] sm:$0xff] %v311_v28  ;;  %v439_v28 = vld [vmem:[%s4086_s22 + $0x900] sm:$0xff] }
  0x6e   : > { %314 = vst [vmem:[%s4091_s23 + $0x2f0] sm:$0xff] %v313_v29  ;;  %v441_v29 = vld [vmem:[%s4086_s22 + $0x908] sm:$0xff] }
  0x6f   : > { %316 = vst [vmem:[%s4091_s23 + $0x2f8] sm:$0xff] %v315_v30  ;;  %v443_v30 = vld [vmem:[%s4086_s22 + $0x910] sm:$0xff] }
  0x70   : > { %318 = vst [vmem:[%s4091_s23 + $0x300] sm:$0xff] %v317_v31  ;;  %v445_v31 = vld [vmem:[%s4086_s22 + $0x918] sm:$0xff] }
  0x71   : > { %320 = vst [vmem:[%s4091_s23 + $0x30c] sm:$0xff] %v319_v32  ;;  %v447_v32 = vld [vmem:[%s4086_s22 + $0xa28] sm:$0xff] }
  0x72   : > { %322 = vst [vmem:[%s4091_s23 + $0x314] sm:$0xff] %v321_v33  ;;  %v449_v33 = vld [vmem:[%s4086_s22 + $0xa30] sm:$0xff] }
  0x73   : > { %324 = vst [vmem:[%s4091_s23 + $0x31c] sm:$0xff] %v323_v34  ;;  %v451_v34 = vld [vmem:[%s4086_s22 + $0xa38] sm:$0xff] }
  0x74   : > { %326 = vst [vmem:[%s4091_s23 + $0x324] sm:$0xff] %v325_v35  ;;  %v453_v35 = vld [vmem:[%s4086_s22 + $0xa40] sm:$0xff] }
  0x75   : > { %328 = vst [vmem:[%s4091_s23 + $0x32c] sm:$0xff] %v327_v36  ;;  %v455_v36 = vld [vmem:[%s4086_s22 + $0xa48] sm:$0xff] }
  0x76   : > { %330 = vst [vmem:[%s4091_s23 + $0x334] sm:$0xff] %v329_v37  ;;  %v457_v37 = vld [vmem:[%s4086_s22 + $0xa50] sm:$0xff] }
  0x77   : > { %332 = vst [vmem:[%s4091_s23 + $0x33c] sm:$0xff] %v331_v38  ;;  %v459_v38 = vld [vmem:[%s4086_s22 + $0xa58] sm:$0xff] }
  0x78   : > { %334 = vst [vmem:[%s4091_s23 + $0x344] sm:$0xff] %v333_v39  ;;  %v461_v39 = vld [vmem:[%s4086_s22 + $0xa60] sm:$0xff] }
  0x79   : > { %336 = vst [vmem:[%s4091_s23 + $0x34c] sm:$0xff] %v335_v40  ;;  %v463_v40 = vld [vmem:[%s4086_s22 + $0xa68] sm:$0xff] }
  0x7a   : > { %338 = vst [vmem:[%s4091_s23 + $0x354] sm:$0xff] %v337_v41  ;;  %v465_v41 = vld [vmem:[%s4086_s22 + $0xa70] sm:$0xff] }
  0x7b   : > { %340 = vst [vmem:[%s4091_s23 + $0x35c] sm:$0xff] %v339_v42  ;;  %v467_v42 = vld [vmem:[%s4086_s22 + $0xa78] sm:$0xff] }
  0x7c   : > { %342 = vst [vmem:[%s4091_s23 + $0x364] sm:$0xff] %v341_v43  ;;  %v469_v43 = vld [vmem:[%s4086_s22 + $0xa80] sm:$0xff] }
  0x7d   : > { %344 = vst [vmem:[%s4091_s23 + $0x36c] sm:$0xff] %v343_v44  ;;  %v471_v44 = vld [vmem:[%s4086_s22 + $0xa88] sm:$0xff] }
  0x7e   : > { %346 = vst [vmem:[%s4091_s23 + $0x374] sm:$0xff] %v345_v45  ;;  %v473_v45 = vld [vmem:[%s4086_s22 + $0xa90] sm:$0xff] }
  0x7f   : > { %348 = vst [vmem:[%s4091_s23 + $0x37c] sm:$0xff] %v347_v46  ;;  %v475_v46 = vld [vmem:[%s4086_s22 + $0xa98] sm:$0xff] }
  0x80   : > { %350 = vst [vmem:[%s4091_s23 + $0x384] sm:$0xff] %v349_v47  ;;  %v477_v47 = vld [vmem:[%s4086_s22 + $0xaa0] sm:$0xff] }
  0x81   : > { %352 = vst [vmem:[%s4091_s23 + $0x38c] sm:$0xff] %v351_v48  ;;  %v479_v48 = vld [vmem:[%s4086_s22 + $0xaa8] sm:$0xff] }
  0x82   : > { %354 = vst [vmem:[%s4091_s23 + $0x394] sm:$0xff] %v353_v49  ;;  %v481_v49 = vld [vmem:[%s4086_s22 + $0xab0] sm:$0xff] }
  0x83   : > { %356 = vst [vmem:[%s4091_s23 + $0x39c] sm:$0xff] %v355_v50  ;;  %v483_v50 = vld [vmem:[%s4086_s22 + $0xab8] sm:$0xff] }
  0x84   : > { %358 = vst [vmem:[%s4091_s23 + $0x3a4] sm:$0xff] %v357_v51  ;;  %v485_v51 = vld [vmem:[%s4086_s22 + $0xac0] sm:$0xff] }
  0x85   : > { %360 = vst [vmem:[%s4091_s23 + $0x3ac] sm:$0xff] %v359_v52  ;;  %v487_v52 = vld [vmem:[%s4086_s22 + $0xac8] sm:$0xff] }
  0x86   : > { %362 = vst [vmem:[%s4091_s23 + $0x3b4] sm:$0xff] %v361_v53  ;;  %v489_v53 = vld [vmem:[%s4086_s22 + $0xad0] sm:$0xff] }
  0x87   : > { %364 = vst [vmem:[%s4091_s23 + $0x3bc] sm:$0xff] %v363_v54  ;;  %v491_v54 = vld [vmem:[%s4086_s22 + $0xad8] sm:$0xff] }
  0x88   : > { %366 = vst [vmem:[%s4091_s23 + $0x3c4] sm:$0xff] %v365_v55  ;;  %v493_v55 = vld [vmem:[%s4086_s22 + $0xae0] sm:$0xff] }
  0x89   : > { %368 = vst [vmem:[%s4091_s23 + $0x3cc] sm:$0xff] %v367_v56  ;;  %v495_v56 = vld [vmem:[%s4086_s22 + $0xae8] sm:$0xff] }
  0x8a   : > { %370 = vst [vmem:[%s4091_s23 + $0x3d4] sm:$0xff] %v369_v57  ;;  %v497_v57 = vld [vmem:[%s4086_s22 + $0xaf0] sm:$0xff] }
  0x8b   : > { %372 = vst [vmem:[%s4091_s23 + $0x3dc] sm:$0xff] %v371_v58  ;;  %v499_v58 = vld [vmem:[%s4086_s22 + $0xaf8] sm:$0xff] }
  0x8c   : > { %374 = vst [vmem:[%s4091_s23 + $0x3e4] sm:$0xff] %v373_v59  ;;  %v501_v59 = vld [vmem:[%s4086_s22 + $0xb00] sm:$0xff] }
  0x8d   : > { %376 = vst [vmem:[%s4091_s23 + $0x3ec] sm:$0xff] %v375_v60  ;;  %v503_v60 = vld [vmem:[%s4086_s22 + $0xb08] sm:$0xff] }
  0x8e   : > { %378 = vst [vmem:[%s4091_s23 + $0x3f4] sm:$0xff] %v377_v61  ;;  %v505_v61 = vld [vmem:[%s4086_s22 + $0xb10] sm:$0xff] }
  0x8f   : > { %380 = vst [vmem:[%s4091_s23 + $0x3fc] sm:$0xff] %v379_v62  ;;  %v507_v62 = vld [vmem:[%s4086_s22 + $0xb18] sm:$0xff] }
  0x90   : > { %382 = vst [vmem:[%s4091_s23 + $0x404] sm:$0xff] %v381_v63  ;;  %v509_v63 = vld [vmem:[%s4086_s22 + $0xb20] sm:$0xff] }
  0x91   : > { %384 = vst [vmem:[%s4091_s23 + $0x410] sm:$0xff] %v383_v0  ;;  %v2929_v0 = vld [vmem:[%s4086_s22 + $0x100] sm:$0xf] }
  0x92   : > { %386 = vst [vmem:[%s4091_s23 + $0x418] sm:$0xff] %v385_v1  ;;  %v2931_v1 = vld [vmem:[%s4086_s22 + $0x308] sm:$0xf] }
  0x93   : > { %388 = vst [vmem:[%s4091_s23 + $0x420] sm:$0xff] %v387_v2  ;;  %v2933_v2 = vld [vmem:[%s4086_s22 + $0x510] sm:$0xf] }
  0x94   : > { %390 = vst [vmem:[%s4091_s23 + $0x428] sm:$0xff] %v389_v3  ;;  %v2935_v3 = vld [vmem:[%s4086_s22 + $0x718] sm:$0xf] }
  0x95   : > { %392 = vst [vmem:[%s4091_s23 + $0x430] sm:$0xff] %v391_v4  ;;  %v2937_v4 = vld [vmem:[%s4086_s22 + $0x920] sm:$0xf] }
  0x96   : > { %394 = vst [vmem:[%s4091_s23 + $0x438] sm:$0xff] %v393_v5  ;;  %v2939_v5 = vld [vmem:[%s4086_s22 + $0xb28] sm:$0xf] }
  0x97   : > { %396 = vst [vmem:[%s4091_s23 + $0x440] sm:$0xff] %v395_v6 }
  0x98   : > { %398 = vst [vmem:[%s4091_s23 + $0x448] sm:$0xff] %v397_v7 }
  0x99   : > { %400 = vst [vmem:[%s4091_s23 + $0x450] sm:$0xff] %v399_v8 }
  0x9a   : > { %402 = vst [vmem:[%s4091_s23 + $0x458] sm:$0xff] %v401_v9 }
  0x9b   : > { %404 = vst [vmem:[%s4091_s23 + $0x460] sm:$0xff] %v403_v10 }
  0x9c   : > { %406 = vst [vmem:[%s4091_s23 + $0x468] sm:$0xff] %v405_v11 }
  0x9d   : > { %408 = vst [vmem:[%s4091_s23 + $0x470] sm:$0xff] %v407_v12 }
  0x9e   : > { %410 = vst [vmem:[%s4091_s23 + $0x478] sm:$0xff] %v409_v13 }
  0x9f   : > { %412 = vst [vmem:[%s4091_s23 + $0x480] sm:$0xff] %v411_v14 }
  0xa0   : > { %414 = vst [vmem:[%s4091_s23 + $0x488] sm:$0xff] %v413_v15 }
  0xa1   : > { %416 = vst [vmem:[%s4091_s23 + $0x490] sm:$0xff] %v415_v16 }
  0xa2   : > { %418 = vst [vmem:[%s4091_s23 + $0x498] sm:$0xff] %v417_v17 }
  0xa3   : > { %420 = vst [vmem:[%s4091_s23 + $0x4a0] sm:$0xff] %v419_v18 }
  0xa4   : > { %422 = vst [vmem:[%s4091_s23 + $0x4a8] sm:$0xff] %v421_v19 }
  0xa5   : > { %424 = vst [vmem:[%s4091_s23 + $0x4b0] sm:$0xff] %v423_v20 }
  0xa6   : > { %426 = vst [vmem:[%s4091_s23 + $0x4b8] sm:$0xff] %v425_v21 }
  0xa7   : > { %428 = vst [vmem:[%s4091_s23 + $0x4c0] sm:$0xff] %v427_v22 }
  0xa8   : > { %430 = vst [vmem:[%s4091_s23 + $0x4c8] sm:$0xff] %v429_v23 }
  0xa9   : > { %432 = vst [vmem:[%s4091_s23 + $0x4d0] sm:$0xff] %v431_v24 }
  0xaa   : > { %434 = vst [vmem:[%s4091_s23 + $0x4d8] sm:$0xff] %v433_v25 }
  0xab   : > { %436 = vst [vmem:[%s4091_s23 + $0x4e0] sm:$0xff] %v435_v26 }
  0xac   : > { %438 = vst [vmem:[%s4091_s23 + $0x4e8] sm:$0xff] %v437_v27 }
  0xad   : > { %440 = vst [vmem:[%s4091_s23 + $0x4f0] sm:$0xff] %v439_v28 }
  0xae   : > { %442 = vst [vmem:[%s4091_s23 + $0x4f8] sm:$0xff] %v441_v29 }
  0xaf   : > { %444 = vst [vmem:[%s4091_s23 + $0x500] sm:$0xff] %v443_v30 }
  0xb0   : > { %446 = vst [vmem:[%s4091_s23 + $0x508] sm:$0xff] %v445_v31 }
  0xb1   : > { %448 = vst [vmem:[%s4091_s23 + $0x514] sm:$0xff] %v447_v32 }
  0xb2   : > { %450 = vst [vmem:[%s4091_s23 + $0x51c] sm:$0xff] %v449_v33 }
  0xb3   : > { %452 = vst [vmem:[%s4091_s23 + $0x524] sm:$0xff] %v451_v34 }
  0xb4   : > { %454 = vst [vmem:[%s4091_s23 + $0x52c] sm:$0xff] %v453_v35 }
  0xb5   : > { %456 = vst [vmem:[%s4091_s23 + $0x534] sm:$0xff] %v455_v36 }
  0xb6   : > { %458 = vst [vmem:[%s4091_s23 + $0x53c] sm:$0xff] %v457_v37 }
  0xb7   : > { %460 = vst [vmem:[%s4091_s23 + $0x544] sm:$0xff] %v459_v38 }
  0xb8   : > { %462 = vst [vmem:[%s4091_s23 + $0x54c] sm:$0xff] %v461_v39 }
  0xb9   : > { %464 = vst [vmem:[%s4091_s23 + $0x554] sm:$0xff] %v463_v40 }
  0xba   : > { %466 = vst [vmem:[%s4091_s23 + $0x55c] sm:$0xff] %v465_v41 }
  0xbb   : > { %468 = vst [vmem:[%s4091_s23 + $0x564] sm:$0xff] %v467_v42 }
  0xbc   : > { %470 = vst [vmem:[%s4091_s23 + $0x56c] sm:$0xff] %v469_v43 }
  0xbd   : > { %472 = vst [vmem:[%s4091_s23 + $0x574] sm:$0xff] %v471_v44 }
  0xbe   : > { %474 = vst [vmem:[%s4091_s23 + $0x57c] sm:$0xff] %v473_v45 }
  0xbf   : > { %476 = vst [vmem:[%s4091_s23 + $0x584] sm:$0xff] %v475_v46 }
  0xc0   : > { %478 = vst [vmem:[%s4091_s23 + $0x58c] sm:$0xff] %v477_v47 }
  0xc1   : > { %480 = vst [vmem:[%s4091_s23 + $0x594] sm:$0xff] %v479_v48 }
  0xc2   : > { %482 = vst [vmem:[%s4091_s23 + $0x59c] sm:$0xff] %v481_v49 }
  0xc3   : > { %484 = vst [vmem:[%s4091_s23 + $0x5a4] sm:$0xff] %v483_v50 }
  0xc4   : > { %486 = vst [vmem:[%s4091_s23 + $0x5ac] sm:$0xff] %v485_v51 }
  0xc5   : > { %488 = vst [vmem:[%s4091_s23 + $0x5b4] sm:$0xff] %v487_v52 }
  0xc6   : > { %490 = vst [vmem:[%s4091_s23 + $0x5bc] sm:$0xff] %v489_v53 }
  0xc7   : > { %492 = vst [vmem:[%s4091_s23 + $0x5c4] sm:$0xff] %v491_v54 }
  0xc8   : > { %494 = vst [vmem:[%s4091_s23 + $0x5cc] sm:$0xff] %v493_v55 }
  0xc9   : > { %496 = vst [vmem:[%s4091_s23 + $0x5d4] sm:$0xff] %v495_v56 }
  0xca   : > { %498 = vst [vmem:[%s4091_s23 + $0x5dc] sm:$0xff] %v497_v57 }
  0xcb   : > { %500 = vst [vmem:[%s4091_s23 + $0x5e4] sm:$0xff] %v499_v58 }
  0xcc   : > { %502 = vst [vmem:[%s4091_s23 + $0x5ec] sm:$0xff] %v501_v59 }
  0xcd   : > { %504 = vst [vmem:[%s4091_s23 + $0x5f4] sm:$0xff] %v503_v60 }
  0xce   : > { %506 = vst [vmem:[%s4091_s23 + $0x5fc] sm:$0xff] %v505_v61 }
  0xcf   : > { %508 = vst [vmem:[%s4091_s23 + $0x604] sm:$0xff] %v507_v62 }
  0xd0   : > { %510 = vst [vmem:[%s4091_s23 + $0x60c] sm:$0xff] %v509_v63 }
  0xd1   : > { %2930 = vst [vmem:[%s4091_s23 + $0x100] sm:$0xf] %v2929_v0 }
  0xd2   : > { %2932 = vst [vmem:[%s4091_s23 + $0x204] sm:$0xf] %v2931_v1 }
  0xd3   : > { %2934 = vst [vmem:[%s4091_s23 + $0x308] sm:$0xf] %v2933_v2 }
  0xd4   : > { %2936 = vst [vmem:[%s4091_s23 + $0x40c] sm:$0xf] %v2935_v3 }
  0xd5   : > { %2938 = vst [vmem:[%s4091_s23 + $0x510] sm:$0xf] %v2937_v4 }
  0xd6   : > { %2940 = vst [vmem:[%s4091_s23 + $0x614] sm:$0xf] %v2939_v5 }
  0xd7 PF: > { %p2941_p5 = scmp.ge.s32.totalorder %s4035_s11, 1  ;;  %p535_p6 = scmp.lt.s32.totalorder %s4035_s11, 3 }
  0xd9   : > { %p536_p7 = pnand %p2941_p5, %p535_p6 }
  0xda   : > { %s542_s24 = sand.u32 (!%p536_p7), 1, %s4027_s9   ;;  %s564_s29 = smul.u32 (!%p536_p7), 65, %s2924_s12 }
  0xdb   : > { %539 = sbr.rel (%p536_p7) target bundleno = 628 (0x274), region = 50 }
  0xdc   : > { %s3987_s25 = smul.u32 (!%p536_p7), 1560, %s542_s24  ;;  %p565_p8 = scmp.lt.s32.totalorder (!%p536_p7), %s564_s29, 129 }
  0xde   : > { %s4489_s26 = scalar_lea.vmem (!%p536_p7), [#allocation2], %s3987_s25 }
  0xe0   : > { %v3465_v6 = vld [vmem:[%s4489_s26 + $0x410] sm:$0xf]  ;;  %v3953_v7 = vld [vmem:[%s4489_s26 + $0x510] sm:$0xf0]  ;;  %v3467_v10 = vld [vmem:[%s4489_s26 + $0x514] sm:$0xf0] }
  0xe1   : > { %v3921_v8 = vld [vmem:[%s4489_s26 + $0x414] sm:$0xf]  ;;  %v3466_v9 = vor.u32 %v3953_v7, %v3465_v6  ;;  %v3473_v11 = vld [vmem:[%s4489_s26 + $0x418] sm:$0xf]  ;;  %v3954_v12 = vld [vmem:[%s4489_s26 + $0x518] sm:$0xf0] }
  0xe2   : > { %v3470_v13 = vor.u32 %v3921_v8, %v3467_v10  ;;  %v3474_v14 = vor.u32 %v3954_v12, %v3473_v11  ;;  %v3922_v15 = vld [vmem:[%s4489_s26 + $0x41c] sm:$0xf]  ;;  %v3475_v16 = vld [vmem:[%s4489_s26 + $0x51c] sm:$0xf0]  ;;  %v3205_v17 = vld [vmem:[%s4489_s26 + $0x208] sm:$0xf] }
  0xe3   : > { %1757 = vmatpush.bf16.msra.mxu0 %v3466_v9  ;;  %v3478_v18 = vor.u32 %v3922_v15, %v3475_v16  ;;  %v3888_v19 = vld [vmem:[%s4489_s26 + $0x308] sm:$0xf0]  ;;  %v3207_v21 = vld [vmem:[%s4489_s26 + $0x30c] sm:$0xf0]  ;;  %vm1748_vm0 = vcmask 392192   ;;  %s5081_s29 = smov (!%p565_p8, %s564_s29), 129 }
  0xe4   : > { %v3856_v20 = vld [vmem:[%s4489_s26 + $0x20c] sm:$0xf]  ;;  %1770 = vmatpush.bf16.msra.mxu1 %v3470_v13  ;;  %1783 = vmatpush.bf16.msra.mxu2 %v3474_v14  ;;  %v3206_v22 = vor.u32 %v3888_v19, %v3205_v17  ;;  %v3213_v24 = vld [vmem:[%s4489_s26 + $0x210] sm:$0xf]  ;;  %v3889_v25 = vld [vmem:[%s4489_s26 + $0x310] sm:$0xf0] }
  0xe5   : > { %v3210_v23 = vor.u32 %v3856_v20, %v3207_v21  ;;  %v3857_v26 = vld [vmem:[%s4489_s26 + $0x214] sm:$0xf]  ;;  %1796 = vmatpush.bf16.msra.mxu3 %v3478_v18  ;;  %v3214_v27 = vor.u32 %v3889_v25, %v3213_v24  ;;  %v3215_v28 = vld [vmem:[%s4489_s26 + $0x314] sm:$0xf0]  ;;  %v2945_v29 = vld [vmem:[%s4489_s26] sm:$0xf] }
  0xe6   : > { %v3823_v30 = vld [vmem:[%s4489_s26 + $0x100] sm:$0xf0]  ;;  %v3218_v31 = vor.u32 %v3857_v26, %v3215_v28  ;;  %v2947_v33 = vld [vmem:[%s4489_s26 + $0x104] sm:$0xf0]  ;;  %v3824_v36 = vld [vmem:[%s4489_s26 + $0x108] sm:$0xf0] }
  0xe7   : > { %v3791_v32 = vld [vmem:[%s4489_s26 + $0x4] sm:$0xf]  ;;  %v2953_v34 = vld [vmem:[%s4489_s26 + $0x8] sm:$0xf]  ;;  %1758 = vmatpush.bf16.msra.mxu0 %v3206_v22  ;;  %v2946_v35 = vor.u32 %v3823_v30, %v2945_v29  ;;  %v3792_v37 = vld [vmem:[%s4489_s26 + $0xc] sm:$0xf] }
  0xe8   : > { %v2955_v38 = vld [vmem:[%s4489_s26 + $0x10c] sm:$0xf0]  ;;  %1771 = vmatpush.bf16.msra.mxu1 %v3210_v23  ;;  %1784 = vmatpush.bf16.msra.mxu2 %v3214_v27  ;;  %v2950_v39 = vor.u32 %v3791_v32, %v2947_v33  ;;  %v2954_v40 = vor.u32 %v3824_v36, %v2953_v34  ;;  %v3481_v41 = vld [vmem:[%s4489_s26 + $0x420] sm:$0xf]  ;;  %v3955_v42 = vld [vmem:[%s4489_s26 + $0x520] sm:$0xf0] }
  0xe9   : > { %v3923_v43 = vld [vmem:[%s4489_s26 + $0x424] sm:$0xf]  ;;  %1797 = vmatpush.bf16.msra.mxu3 %v3218_v31  ;;  %v2958_v44 = vor.u32 %v3792_v37, %v2955_v38  ;;  %v4521_v45 = vld [vmem:[%s5074_s0] sm:$0xf]  ;;  %v3482_v46 = vor.u32 %v3955_v42, %v3481_v41  ;;  %v3221_v48 = vld [vmem:[%s4489_s26 + $0x218] sm:$0xf] }
  0xea   : > { %v3483_v47 = vld [vmem:[%s4489_s26 + $0x524] sm:$0xf0]  ;;  %v3890_v49 = vld [vmem:[%s4489_s26 + $0x318] sm:$0xf0]  ;;  %v3956_v52 = vld [vmem:[%s4489_s26 + $0x528] sm:$0xf0] }
  0xeb   : > { %v3486_v50 = vor.u32 %v3923_v43, %v3483_v47  ;;  %v3489_v51 = vld [vmem:[%s4489_s26 + $0x428] sm:$0xf]  ;;  %v3924_v53 = vld [vmem:[%s4489_s26 + $0x42c] sm:$0xf]  ;;  %1759 = vmatpush.bf16.msra.mxu0 %v2946_v35  ;;  %v3491_v54 = vld [vmem:[%s4489_s26 + $0x52c] sm:$0xf0]  ;;  %v3222_v59 = vor.u32 %v3890_v49, %v3221_v48 }
  0xec   : > { %v3858_v55 = vld [vmem:[%s4489_s26 + $0x21c] sm:$0xf]  ;;  %v3223_v56 = vld [vmem:[%s4489_s26 + $0x31c] sm:$0xf0]  ;;  %1772 = vmatpush.bf16.msra.mxu1 %v2950_v39  ;;  %1785 = vmatpush.bf16.msra.mxu2 %v2954_v40  ;;  %v3490_v57 = vor.u32 %v3956_v52, %v3489_v51  ;;  %v2961_v58 = vld [vmem:[%s4489_s26 + $0x10] sm:$0xf]  ;;  %v3494_v60 = vor.u32 %v3924_v53, %v3491_v54 }
  0xed   : > { %1798 = vmatpush.bf16.msra.mxu3 %v2958_v44  ;;  %v3825_v61 = vld [vmem:[%s4489_s26 + $0x110] sm:$0xf0]  ;;  %v3229_v62 = vld [vmem:[%s4489_s26 + $0x220] sm:$0xf]  ;;  %v3891_v63 = vld [vmem:[%s4489_s26 + $0x320] sm:$0xf0]  ;;  %v3226_v0 = vor.u32 %v3858_v55, %v3223_v56 }
  0xee   : > { %3723 = vmatmul.msk.bf16.vlgmr.msra.gmra.mxu0 %vm1748_vm0, %v4521_v45  ;;  %v3859_v1 = vld [vmem:[%s4489_s26 + $0x224] sm:$0xf]  ;;  %v3231_v2 = vld [vmem:[%s4489_s26 + $0x324] sm:$0xf0]  ;;  %v3793_v3 = vld [vmem:[%s4489_s26 + $0x14] sm:$0xf]  ;;  %v3230_v7 = vor.u32 %v3891_v63, %v3229_v62  ;;  %v2962_v11 = vor.u32 %v3825_v61, %v2961_v58 }
  0xef   : > { %1809 = vmatpush.bf16.msrb.mxu0 %v3482_v46  ;;  %3724 = vmatmul.msk.bf16.vlgmr.msra.gmra.mxu1 %vm1748_vm0, %v4521_v45  ;;  %v2963_v4 = vld [vmem:[%s4489_s26 + $0x114] sm:$0xf0]  ;;  %v3826_v6 = vld [vmem:[%s4489_s26 + $0x118] sm:$0xf0]  ;;  %v3497_v8 = vld [vmem:[%s4489_s26 + $0x430] sm:$0xf]  ;;  %v3234_v12 = vor.u32 %v3859_v1, %v3231_v2 }
  0xf0   : > { %1822 = vmatpush.bf16.msrb.mxu1 %v3486_v50  ;;  %3725 = vmatmul.msk.bf16.vlgmr.msra.gmra.mxu2 %vm1748_vm0, %v4521_v45  ;;  %v2969_v5 = vld [vmem:[%s4489_s26 + $0x18] sm:$0xf]  ;;  %v3957_v9 = vld [vmem:[%s4489_s26 + $0x530] sm:$0xf0]  ;;  %v3794_v13 = vld [vmem:[%s4489_s26 + $0x1c] sm:$0xf]  ;;  %v2966_v16 = vor.u32 %v3793_v3, %v2963_v4 }
  0xf1   : > { %3726 = vmatmul.msk.bf16.vlgmr.msra.gmra.mxu3 %vm1748_vm0, %v4521_v45  ;;  %1835 = vmatpush.bf16.msrb.mxu2 %v3490_v57  ;;  %v3925_v10 = vld [vmem:[%s4489_s26 + $0x434] sm:$0xf]  ;;  %v2971_v14 = vld [vmem:[%s4489_s26 + $0x11c] sm:$0xf0]  ;;  %v3499_v15 = vld [vmem:[%s4489_s26 + $0x534] sm:$0xf0]  ;;  %v3498_v17 = vor.u32 %v3957_v9, %v3497_v8  ;;  %v2970_v25 = vor.u32 %v3826_v6, %v2969_v5 }
  0xf2   : > { %1848 = vmatpush.bf16.msrb.mxu3 %v3494_v60  ;;  %v3237_v18 = vld [vmem:[%s4489_s26 + $0x228] sm:$0xf]  ;;  %v3505_v19 = vld [vmem:[%s4489_s26 + $0x438] sm:$0xf]  ;;  %v3958_v20 = vld [vmem:[%s4489_s26 + $0x538] sm:$0xf0]  ;;  %v3502_v21 = vor.u32 %v3925_v10, %v3499_v15  ;;  %v2974_v28 = vor.u32 %v3794_v13, %v2971_v14 }
  0xf3   : > { %1810 = vmatpush.bf16.msrb.mxu0 %v3222_v59  ;;  %v3892_v22 = vld [vmem:[%s4489_s26 + $0x328] sm:$0xf0]  ;;  %v3926_v23 = vld [vmem:[%s4489_s26 + $0x43c] sm:$0xf]  ;;  %v3507_v24 = vld [vmem:[%s4489_s26 + $0x53c] sm:$0xf0]  ;;  %v3506_v29 = vor.u32 %v3958_v20, %v3505_v19 }
  0xf4   : > { %1823 = vmatpush.bf16.msrb.mxu1 %v3226_v0  ;;  %v3860_v26 = vld [vmem:[%s4489_s26 + $0x22c] sm:$0xf]  ;;  %v3239_v27 = vld [vmem:[%s4489_s26 + $0x32c] sm:$0xf0]  ;;  %v3238_v30 = vor.u32 %v3892_v22, %v3237_v18  ;;  %v3510_v31 = vor.u32 %v3926_v23, %v3507_v24  ;;  %v3893_v33 = vld [vmem:[%s4489_s26 + $0x330] sm:$0xf0] }
  0xf5   : > { %1836 = vmatpush.bf16.msrb.mxu2 %v3230_v7  ;;  %v3245_v32 = vld [vmem:[%s4489_s26 + $0x230] sm:$0xf]  ;;  %v3242_v34 = vor.u32 %v3860_v26, %v3239_v27  ;;  %v3861_v35 = vld [vmem:[%s4489_s26 + $0x234] sm:$0xf]  ;;  %v3247_v36 = vld [vmem:[%s4489_s26 + $0x334] sm:$0xf0] }
  0xf6   : > { %1849 = vmatpush.bf16.msrb.mxu3 %v3234_v12  ;;  %v2977_v37 = vld [vmem:[%s4489_s26 + $0x20] sm:$0xf]  ;;  %v3827_v38 = vld [vmem:[%s4489_s26 + $0x120] sm:$0xf0]  ;;  %v3246_v39 = vor.u32 %v3893_v33, %v3245_v32  ;;  %v2979_v41 = vld [vmem:[%s4489_s26 + $0x124] sm:$0xf0]  ;;  %v3250_v43 = vor.u32 %v3861_v35, %v3247_v36 }
  0xf7   : > { %1811 = vmatpush.bf16.msrb.mxu0 %v2962_v11  ;;  %v3795_v40 = vld [vmem:[%s4489_s26 + $0x24] sm:$0xf]  ;;  %v2985_v42 = vld [vmem:[%s4489_s26 + $0x28] sm:$0xf]  ;;  %v3828_v44 = vld [vmem:[%s4489_s26 + $0x128] sm:$0xf0]  ;;  %v2978_v51 = vor.u32 %v3827_v38, %v2977_v37 }
  0xf8   : > { %1824 = vmatpush.bf16.msrb.mxu1 %v2966_v16  ;;  %v3796_v46 = vld [vmem:[%s4489_s26 + $0x2c] sm:$0xf]  ;;  %v2987_v47 = vld [vmem:[%s4489_s26 + $0x12c] sm:$0xf0]  ;;  %v3513_v48 = vld [vmem:[%s4489_s26 + $0x440] sm:$0xf]  ;;  %v2982_v55 = vor.u32 %v3795_v40, %v2979_v41  ;;  %v2986_v56 = vor.u32 %v3828_v44, %v2985_v42 }
  0xf9   : > { %1837 = vmatpush.bf16.msrb.mxu2 %v2970_v25  ;;  %v3959_v49 = vld [vmem:[%s4489_s26 + $0x540] sm:$0xf0]  ;;  %v3515_v52 = vld [vmem:[%s4489_s26 + $0x544] sm:$0xf0]  ;;  %v3960_v54 = vld [vmem:[%s4489_s26 + $0x548] sm:$0xf0]  ;;  %v2990_v59 = vor.u32 %v3796_v46, %v2987_v47 }
  0xfa   : > { %1850 = vmatpush.bf16.msrb.mxu3 %v2974_v28  ;;  %v3927_v50 = vld [vmem:[%s4489_s26 + $0x444] sm:$0xf]  ;;  %v3521_v53 = vld [vmem:[%s4489_s26 + $0x448] sm:$0xf]  ;;  %v3928_v57 = vld [vmem:[%s4489_s26 + $0x44c] sm:$0xf]  ;;  %v3514_v60 = vor.u32 %v3959_v49, %v3513_v48 }
  0xfb   : > { %1861 = vmatpush.bf16.msra.mxu0 %v3498_v17  ;;  %v3523_v58 = vld [vmem:[%s4489_s26 + $0x54c] sm:$0xf0]  ;;  %v3518_v61 = vor.u32 %v3927_v50, %v3515_v52  ;;  %v3253_v62 = vld [vmem:[%s4489_s26 + $0x238] sm:$0xf]  ;;  %v3894_v63 = vld [vmem:[%s4489_s26 + $0x338] sm:$0xf0]  ;;  %v3522_v0 = vor.u32 %v3960_v54, %v3521_v53 }
  0xfc   : > { %1874 = vmatpush.bf16.msra.mxu1 %v3502_v21  ;;  %v3862_v1 = vld [vmem:[%s4489_s26 + $0x23c] sm:$0xf]  ;;  %v3526_v2 = vor.u32 %v3928_v57, %v3523_v58  ;;  %v3255_v3 = vld [vmem:[%s4489_s26 + $0x33c] sm:$0xf0]  ;;  %v3895_v5 = vld [vmem:[%s4489_s26 + $0x340] sm:$0xf0]  ;;  %v3254_v8 = vor.u32 %v3894_v63, %v3253_v62 }
  0xfd   : > { %1887 = vmatpush.bf16.msra.mxu2 %v3506_v29  ;;  %v3261_v4 = vld [vmem:[%s4489_s26 + $0x240] sm:$0xf]  ;;  %v3863_v6 = vld [vmem:[%s4489_s26 + $0x244] sm:$0xf]  ;;  %v3263_v7 = vld [vmem:[%s4489_s26 + $0x344] sm:$0xf0]  ;;  %v3258_v9 = vor.u32 %v3862_v1, %v3255_v3 }
  0xfe   : > { %1900 = vmatpush.bf16.msra.mxu3 %v3510_v31  ;;  %3727 = vmatmul.msk.bf16.vlgmr.msrb.gmra.mxu0 %vm1748_vm0, %v4521_v45  ;;  %v2993_v10 = vld [vmem:[%s4489_s26 + $0x30] sm:$0xf]  ;;  %v3829_v11 = vld [vmem:[%s4489_s26 + $0x130] sm:$0xf0]  ;;  %v3262_v12 = vor.u32 %v3895_v5, %v3261_v4  ;;  %v3266_v14 = vor.u32 %v3863_v6, %v3263_v7  ;;  %v2995_v15 = vld [vmem:[%s4489_s26 + $0x134] sm:$0xf0] }
  0xff   : > { %1862 = vmatpush.bf16.msra.mxu0 %v3238_v30  ;;  %3728 = vmatmul.msk.bf16.vlgmr.msrb.gmra.mxu1 %vm1748_vm0, %v4521_v45  ;;  %v3797_v13 = vld [vmem:[%s4489_s26 + $0x34] sm:$0xf]  ;;  %v3001_v16 = vld [vmem:[%s4489_s26 + $0x38] sm:$0xf]  ;;  %v3830_v17 = vld [vmem:[%s4489_s26 + $0x138] sm:$0xf0]  ;;  %v2994_v20 = vor.u32 %v3829_v11, %v2993_v10 }
 0x100   : > { %1875 = vmatpush.bf16.msra.mxu1 %v3242_v34  ;;  %3729 = vmatmul.msk.bf16.vlgmr.msrb.gmra.mxu2 %vm1748_vm0, %v4521_v45  ;;  %v3798_v18 = vld [vmem:[%s4489_s26 + $0x3c] sm:$0xf]  ;;  %v3003_v19 = vld [vmem:[%s4489_s26 + $0x13c] sm:$0xf0]  ;;  %v2998_v21 = vor.u32 %v3797_v13, %v2995_v15  ;;  %v3002_v22 = vor.u32 %v3830_v17, %v3001_v16  ;;  %v3529_v24 = vld [vmem:[%s4489_s26 + $0x450] sm:$0xf] }
 0x101   : > { %1888 = vmatpush.bf16.msra.mxu2 %v3246_v39  ;;  %3730 = vmatmul.msk.bf16.vlgmr.msrb.gmra.mxu3 %vm1748_vm0, %v4521_v45  ;;  %v3006_v23 = vor.u32 %v3798_v18, %v3003_v19  ;;  %v3961_v25 = vld [vmem:[%s4489_s26 + $0x550] sm:$0xf0]  ;;  %v3531_v27 = vld [vmem:[%s4489_s26 + $0x554] sm:$0xf0]  ;;  %v3962_v29 = vld [vmem:[%s4489_s26 + $0x558] sm:$0xf0] }
 0x102   : > { %1901 = vmatpush.bf16.msra.mxu3 %v3250_v43  ;;  %v3929_v26 = vld [vmem:[%s4489_s26 + $0x454] sm:$0xf]  ;;  %v3537_v28 = vld [vmem:[%s4489_s26 + $0x458] sm:$0xf]  ;;  %v3930_v30 = vld [vmem:[%s4489_s26 + $0x45c] sm:$0xf]  ;;  %v3530_v32 = vor.u32 %v3961_v25, %v3529_v24 }
 0x103   : > { %1863 = vmatpush.bf16.msra.mxu0 %v2978_v51  ;;  %v3539_v31 = vld [vmem:[%s4489_s26 + $0x55c] sm:$0xf0]  ;;  %v3534_v33 = vor.u32 %v3929_v26, %v3531_v27  ;;  %v3269_v34 = vld [vmem:[%s4489_s26 + $0x248] sm:$0xf]  ;;  %v3896_v35 = vld [vmem:[%s4489_s26 + $0x348] sm:$0xf0]  ;;  %v3538_v36 = vor.u32 %v3962_v29, %v3537_v28 }
 0x104   : > { %1876 = vmatpush.bf16.msra.mxu1 %v2982_v55  ;;  %v3864_v37 = vld [vmem:[%s4489_s26 + $0x24c] sm:$0xf]  ;;  %v3542_v38 = vor.u32 %v3930_v30, %v3539_v31  ;;  %v3271_v39 = vld [vmem:[%s4489_s26 + $0x34c] sm:$0xf0]  ;;  %v3897_v41 = vld [vmem:[%s4489_s26 + $0x350] sm:$0xf0]  ;;  %v3270_v44 = vor.u32 %v3896_v35, %v3269_v34 }
 0x105   : > { %1889 = vmatpush.bf16.msra.mxu2 %v2986_v56  ;;  %v3277_v40 = vld [vmem:[%s4489_s26 + $0x250] sm:$0xf]  ;;  %v3865_v42 = vld [vmem:[%s4489_s26 + $0x254] sm:$0xf]  ;;  %v3279_v43 = vld [vmem:[%s4489_s26 + $0x354] sm:$0xf0]  ;;  %v3274_v46 = vor.u32 %v3864_v37, %v3271_v39 }
 0x106   : > { %1902 = vmatpush.bf16.msra.mxu3 %v2990_v59  ;;  %v3009_v47 = vld [vmem:[%s4489_s26 + $0x40] sm:$0xf]  ;;  %v3831_v48 = vld [vmem:[%s4489_s26 + $0x140] sm:$0xf0]  ;;  %v3278_v49 = vor.u32 %v3897_v41, %v3277_v40  ;;  %v3282_v51 = vor.u32 %v3865_v42, %v3279_v43  ;;  %v3011_v52 = vld [vmem:[%s4489_s26 + $0x144] sm:$0xf0] }
 0x107   : > { %1913 = vmatpush.bf16.msrb.mxu0 %v3514_v60  ;;  %v3799_v50 = vld [vmem:[%s4489_s26 + $0x44] sm:$0xf]  ;;  %v3017_v53 = vld [vmem:[%s4489_s26 + $0x48] sm:$0xf]  ;;  %v3832_v54 = vld [vmem:[%s4489_s26 + $0x148] sm:$0xf0]  ;;  %v3010_v57 = vor.u32 %v3831_v48, %v3009_v47 }
 0x108   : > { %1926 = vmatpush.bf16.msrb.mxu1 %v3518_v61  ;;  %v3800_v55 = vld [vmem:[%s4489_s26 + $0x4c] sm:$0xf]  ;;  %v3019_v56 = vld [vmem:[%s4489_s26 + $0x14c] sm:$0xf0]  ;;  %v3014_v58 = vor.u32 %v3799_v50, %v3011_v52  ;;  %v3018_v59 = vor.u32 %v3832_v54, %v3017_v53  ;;  %v3545_v61 = vld [vmem:[%s4489_s26 + $0x460] sm:$0xf] }
 0x109   : > { %1939 = vmatpush.bf16.msrb.mxu2 %v3522_v0  ;;  %v3022_v60 = vor.u32 %v3800_v55, %v3019_v56  ;;  %v3963_v62 = vld [vmem:[%s4489_s26 + $0x560] sm:$0xf0]  ;;  %v3547_v0 = vld [vmem:[%s4489_s26 + $0x564] sm:$0xf0]  ;;  %v3932_v3 = vld [vmem:[%s4489_s26 + $0x46c] sm:$0xf] }
 0x10a   : > { %1952 = vmatpush.bf16.msrb.mxu3 %v3526_v2  ;;  %v3931_v63 = vld [vmem:[%s4489_s26 + $0x464] sm:$0xf]  ;;  %v3553_v1 = vld [vmem:[%s4489_s26 + $0x468] sm:$0xf]  ;;  %v3964_v2 = vld [vmem:[%s4489_s26 + $0x568] sm:$0xf0]  ;;  %v3546_v5 = vor.u32 %v3963_v62, %v3545_v61 }
 0x10b   : > { %1914 = vmatpush.bf16.msrb.mxu0 %v3254_v8  ;;  %v3555_v4 = vld [vmem:[%s4489_s26 + $0x56c] sm:$0xf0]  ;;  %v3550_v6 = vor.u32 %v3931_v63, %v3547_v0  ;;  %v3285_v7 = vld [vmem:[%s4489_s26 + $0x258] sm:$0xf]  ;;  %v3898_v8 = vld [vmem:[%s4489_s26 + $0x358] sm:$0xf0] }
 0x10c   : > { %1927 = vmatpush.bf16.msrb.mxu1 %v3258_v9  ;;  %v3554_v9 = vor.u32 %v3964_v2, %v3553_v1  ;;  %v3866_v10 = vld [vmem:[%s4489_s26 + $0x25c] sm:$0xf]  ;;  %v3558_v11 = vor.u32 %v3932_v3, %v3555_v4  ;;  %v3293_v13 = vld [vmem:[%s4489_s26 + $0x260] sm:$0xf]  ;;  %v3867_v15 = vld [vmem:[%s4489_s26 + $0x264] sm:$0xf]  ;;  %v3286_v17 = vor.u32 %v3898_v8, %v3285_v7 }
 0x10d   : > { %1940 = vmatpush.bf16.msrb.mxu2 %v3262_v12  ;;  %v3287_v12 = vld [vmem:[%s4489_s26 + $0x35c] sm:$0xf0]  ;;  %v3295_v16 = vld [vmem:[%s4489_s26 + $0x364] sm:$0xf0]  ;;  %v3025_v19 = vld [vmem:[%s4489_s26 + $0x50] sm:$0xf] }
 0x10e   : > { %1953 = vmatpush.bf16.msrb.mxu3 %v3266_v14  ;;  %3731 = vmatmul.msk.bf16.vlgmr.msra.gmra.mxu0 %vm1748_vm0, %v4521_v45  ;;  %v3899_v14 = vld [vmem:[%s4489_s26 + $0x360] sm:$0xf0]  ;;  %v3290_v18 = vor.u32 %v3866_v10, %v3287_v12  ;;  %v3027_v24 = vld [vmem:[%s4489_s26 + $0x154] sm:$0xf0]  ;;  %v3834_v26 = vld [vmem:[%s4489_s26 + $0x158] sm:$0xf0] }
 0x10f   : > { %1915 = vmatpush.bf16.msrb.mxu0 %v2994_v20  ;;  %3732 = vmatmul.msk.bf16.vlgmr.msra.gmra.mxu1 %vm1748_vm0, %v4521_v45  ;;  %v3833_v20 = vld [vmem:[%s4489_s26 + $0x150] sm:$0xf0]  ;;  %v3033_v25 = vld [vmem:[%s4489_s26 + $0x58] sm:$0xf]  ;;  %v3802_v27 = vld [vmem:[%s4489_s26 + $0x5c] sm:$0xf] }
 0x110   : > { %1928 = vmatpush.bf16.msrb.mxu1 %v2998_v21  ;;  %3733 = vmatmul.msk.bf16.vlgmr.msra.gmra.mxu2 %vm1748_vm0, %v4521_v45  ;;  %v3294_v21 = vor.u32 %v3899_v14, %v3293_v13  ;;  %v3035_v28 = vld [vmem:[%s4489_s26 + $0x15c] sm:$0xf0]  ;;  %v3026_v29 = vor.u32 %v3833_v20, %v3025_v19  ;;  %v3034_v31 = vor.u32 %v3834_v26, %v3033_v25  ;;  %v3965_v34 = vld [vmem:[%s4489_s26 + $0x570] sm:$0xf0]  ;;  %v3569_v37 = vld [vmem:[%s4489_s26 + $0x478] sm:$0xf] }
 0x111   : > { %1941 = vmatpush.bf16.msrb.mxu2 %v3002_v22  ;;  %3734 = vmatmul.msk.bf16.vlgmr.msra.gmra.mxu3 %vm1748_vm0, %v4521_v45  ;;  %v3801_v22 = vld [vmem:[%s4489_s26 + $0x54] sm:$0xf]  ;;  %v3934_v39 = vld [vmem:[%s4489_s26 + $0x47c] sm:$0xf]  ;;  %v3571_v40 = vld [vmem:[%s4489_s26 + $0x57c] sm:$0xf0] }
 0x112   : > { %1954 = vmatpush.bf16.msrb.mxu3 %v3006_v23  ;;  %v3298_v23 = vor.u32 %v3867_v15, %v3295_v16  ;;  %v3030_v30 = vor.u32 %v3801_v22, %v3027_v24  ;;  %v3933_v35 = vld [vmem:[%s4489_s26 + $0x474] sm:$0xf]  ;;  %v3301_v43 = vld [vmem:[%s4489_s26 + $0x268] sm:$0xf]  ;;  %v3868_v47 = vld [vmem:[%s4489_s26 + $0x26c] sm:$0xf]  ;;  %v3574_v48 = vor.u32 %v3934_v39, %v3571_v40 }
 0x113   : > { %1965 = vmatpush.bf16.msra.mxu0 %v3530_v32  ;;  %v3038_v32 = vor.u32 %v3802_v27, %v3035_v28  ;;  %v3309_v50 = vld [vmem:[%s4489_s26 + $0x270] sm:$0xf]  ;;  %v3869_v52 = vld [vmem:[%s4489_s26 + $0x274] sm:$0xf]  ;;  %v3311_v53 = vld [vmem:[%s4489_s26 + $0x374] sm:$0xf0] }
 0x114   : > { %1978 = vmatpush.bf16.msra.mxu1 %v3534_v33  ;;  %v3561_v33 = vld [vmem:[%s4489_s26 + $0x470] sm:$0xf]  ;;  %v3041_v56 = vld [vmem:[%s4489_s26 + $0x60] sm:$0xf]  ;;  %v3043_v61 = vld [vmem:[%s4489_s26 + $0x164] sm:$0xf0] }
 0x115   : > { %1991 = vmatpush.bf16.msra.mxu2 %v3538_v36  ;;  %v3563_v36 = vld [vmem:[%s4489_s26 + $0x574] sm:$0xf0]  ;;  %v3562_v41 = vor.u32 %v3965_v34, %v3561_v33  ;;  %v3049_v62 = vld [vmem:[%s4489_s26 + $0x68] sm:$0xf]  ;;  %v3836_v63 = vld [vmem:[%s4489_s26 + $0x168] sm:$0xf0] }
 0x116   : > { %2004 = vmatpush.bf16.msra.mxu3 %v3542_v38  ;;  %v3966_v38 = vld [vmem:[%s4489_s26 + $0x578] sm:$0xf0]  ;;  %v3566_v42 = vor.u32 %v3933_v35, %v3563_v36  ;;  %v3804_v0 = vld [vmem:[%s4489_s26 + $0x6c] sm:$0xf]  ;;  %v3051_v1 = vld [vmem:[%s4489_s26 + $0x16c] sm:$0xf0]  ;;  %v3050_v4 = vor.u32 %v3836_v63, %v3049_v62 }
 0x117   : > { %1966 = vmatpush.bf16.msra.mxu0 %v3270_v44  ;;  %v3900_v44 = vld [vmem:[%s4489_s26 + $0x368] sm:$0xf0]  ;;  %v3967_v7 = vld [vmem:[%s4489_s26 + $0x580] sm:$0xf0]  ;;  %v3585_v10 = vld [vmem:[%s4489_s26 + $0x488] sm:$0xf] }
 0x118   : > { %1979 = vmatpush.bf16.msra.mxu1 %v3274_v46  ;;  %v3570_v46 = vor.u32 %v3966_v38, %v3569_v37  ;;  %v3302_v54 = vor.u32 %v3900_v44, %v3301_v43  ;;  %v3935_v8 = vld [vmem:[%s4489_s26 + $0x484] sm:$0xf]  ;;  %v3936_v12 = vld [vmem:[%s4489_s26 + $0x48c] sm:$0xf]  ;;  %v3587_v13 = vld [vmem:[%s4489_s26 + $0x58c] sm:$0xf0] }
 0x119   : > { %1992 = vmatpush.bf16.msra.mxu2 %v3278_v49  ;;  %v3303_v49 = vld [vmem:[%s4489_s26 + $0x36c] sm:$0xf0]  ;;  %v3317_v16 = vld [vmem:[%s4489_s26 + $0x278] sm:$0xf]  ;;  %v3870_v19 = vld [vmem:[%s4489_s26 + $0x27c] sm:$0xf]  ;;  %v3590_v20 = vor.u32 %v3936_v12, %v3587_v13 }
 0x11a   : > { %2005 = vmatpush.bf16.msra.mxu3 %v3282_v51  ;;  %v3901_v51 = vld [vmem:[%s4489_s26 + $0x370] sm:$0xf0]  ;;  %v3306_v55 = vor.u32 %v3868_v47, %v3303_v49  ;;  %v3325_v22 = vld [vmem:[%s4489_s26 + $0x280] sm:$0xf]  ;;  %v3871_v24 = vld [vmem:[%s4489_s26 + $0x284] sm:$0xf] }
 0x11b   : > { %1967 = vmatpush.bf16.msra.mxu0 %v3010_v57  ;;  %v3835_v57 = vld [vmem:[%s4489_s26 + $0x160] sm:$0xf0]  ;;  %v3327_v25 = vld [vmem:[%s4489_s26 + $0x384] sm:$0xf0]  ;;  %v3057_v28 = vld [vmem:[%s4489_s26 + $0x70] sm:$0xf] }
 0x11c   : > { %1980 = vmatpush.bf16.msra.mxu1 %v3014_v58  ;;  %v3310_v58 = vor.u32 %v3901_v51, %v3309_v50  ;;  %v3042_v2 = vor.u32 %v3835_v57, %v3041_v56  ;;  %v3059_v33 = vld [vmem:[%s4489_s26 + $0x174] sm:$0xf0]  ;;  %v3838_v35 = vld [vmem:[%s4489_s26 + $0x178] sm:$0xf0]  ;;  %v3067_v37 = vld [vmem:[%s4489_s26 + $0x17c] sm:$0xf0] }
 0x11d   : > { %1993 = vmatpush.bf16.msra.mxu2 %v3018_v59  ;;  %v3803_v59 = vld [vmem:[%s4489_s26 + $0x64] sm:$0xf]  ;;  %v3065_v34 = vld [vmem:[%s4489_s26 + $0x78] sm:$0xf]  ;;  %v3806_v36 = vld [vmem:[%s4489_s26 + $0x7c] sm:$0xf] }
 0x11e   : > { %2006 = vmatpush.bf16.msra.mxu3 %v3022_v60  ;;  %3735 = vmatmul.msk.bf16.vlgmr.msrb.gmra.mxu0 %vm1748_vm0, %v4521_v45  ;;  %v3314_v60 = vor.u32 %v3869_v52, %v3311_v53  ;;  %v3046_v3 = vor.u32 %v3803_v59, %v3043_v61  ;;  %v3066_v40 = vor.u32 %v3838_v35, %v3065_v34  ;;  %v3969_v43 = vld [vmem:[%s4489_s26 + $0x590] sm:$0xf0]  ;;  %v3601_v47 = vld [vmem:[%s4489_s26 + $0x498] sm:$0xf]  ;;  %v3938_v49 = vld [vmem:[%s4489_s26 + $0x49c] sm:$0xf] }
 0x11f   : > { %3736 = vmatmul.msk.bf16.vlgmr.msrb.gmra.mxu1 %vm1748_vm0, %v4521_v45  ;;  %2017 = vmatpush.bf16.msrb.mxu0 %v3546_v5  ;;  %v3054_v5 = vor.u32 %v3804_v0, %v3051_v1  ;;  %v3937_v44 = vld [vmem:[%s4489_s26 + $0x494] sm:$0xf]  ;;  %v3603_v50 = vld [vmem:[%s4489_s26 + $0x59c] sm:$0xf0]  ;;  %v3333_v53 = vld [vmem:[%s4489_s26 + $0x288] sm:$0xf] }
 0x120   : > { %3737 = vmatmul.msk.bf16.vlgmr.msrb.gmra.mxu2 %vm1748_vm0, %v4521_v45  ;;  %2030 = vmatpush.bf16.msrb.mxu1 %v3550_v6  ;;  %v3577_v6 = vld [vmem:[%s4489_s26 + $0x480] sm:$0xf]  ;;  %v3872_v56 = vld [vmem:[%s4489_s26 + $0x28c] sm:$0xf]  ;;  %v3606_v57 = vor.u32 %v3938_v49, %v3603_v50  ;;  %v3341_v59 = vld [vmem:[%s4489_s26 + $0x290] sm:$0xf] }
 0x121   : > { %3738 = vmatmul.msk.bf16.vlgmr.msrb.gmra.mxu3 %vm1748_vm0, %v4521_v45  ;;  %2043 = vmatpush.bf16.msrb.mxu2 %v3554_v9  ;;  %v3579_v9 = vld [vmem:[%s4489_s26 + $0x584] sm:$0xf0]  ;;  %v3578_v14 = vor.u32 %v3967_v7, %v3577_v6  ;;  %v3873_v61 = vld [vmem:[%s4489_s26 + $0x294] sm:$0xf]  ;;  %v3343_v62 = vld [vmem:[%s4489_s26 + $0x394] sm:$0xf0] }
 0x122   : > { %2056 = vmatpush.bf16.msrb.mxu3 %v3558_v11  ;;  %v3968_v11 = vld [vmem:[%s4489_s26 + $0x588] sm:$0xf0]  ;;  %v3582_v15 = vor.u32 %v3935_v8, %v3579_v9  ;;  %v3073_v1 = vld [vmem:[%s4489_s26 + $0x80] sm:$0xf]  ;;  %v3075_v6 = vld [vmem:[%s4489_s26 + $0x184] sm:$0xf0] }
 0x123   : > { %2018 = vmatpush.bf16.msrb.mxu0 %v3286_v17  ;;  %v3902_v17 = vld [vmem:[%s4489_s26 + $0x378] sm:$0xf0]  ;;  %v3081_v7 = vld [vmem:[%s4489_s26 + $0x88] sm:$0xf]  ;;  %v3840_v8 = vld [vmem:[%s4489_s26 + $0x188] sm:$0xf0] }
 0x124   : > { %2031 = vmatpush.bf16.msrb.mxu1 %v3290_v18  ;;  %v3586_v18 = vor.u32 %v3968_v11, %v3585_v10  ;;  %v3318_v26 = vor.u32 %v3902_v17, %v3317_v16  ;;  %v3808_v9 = vld [vmem:[%s4489_s26 + $0x8c] sm:$0xf]  ;;  %v3083_v10 = vld [vmem:[%s4489_s26 + $0x18c] sm:$0xf0]  ;;  %v3082_v13 = vor.u32 %v3840_v8, %v3081_v7  ;;  %v3971_v16 = vld [vmem:[%s4489_s26 + $0x5a0] sm:$0xf0] }
 0x125   : > { %2044 = vmatpush.bf16.msrb.mxu2 %v3294_v21  ;;  %v3319_v21 = vld [vmem:[%s4489_s26 + $0x37c] sm:$0xf0]  ;;  %v3939_v17 = vld [vmem:[%s4489_s26 + $0x4a4] sm:$0xf]  ;;  %v3359_v34 = vld [vmem:[%s4489_s26 + $0x3a4] sm:$0xf0] }
 0x126   : > { %2057 = vmatpush.bf16.msrb.mxu3 %v3298_v23  ;;  %v3903_v23 = vld [vmem:[%s4489_s26 + $0x380] sm:$0xf0]  ;;  %v3322_v27 = vor.u32 %v3870_v19, %v3319_v21  ;;  %v3617_v19 = vld [vmem:[%s4489_s26 + $0x4a8] sm:$0xf]  ;;  %v3940_v21 = vld [vmem:[%s4489_s26 + $0x4ac] sm:$0xf] }
 0x127   : > { %2019 = vmatpush.bf16.msrb.mxu0 %v3026_v29  ;;  %v3837_v29 = vld [vmem:[%s4489_s26 + $0x170] sm:$0xf0]  ;;  %s2942_s30 = sshll.u32 %s5081_s29, 2  ;;  %v3367_v8 = vld [vmem:[%s4489_s26 + $0x3ac] sm:$0xf0] }
 0x128   : > { %2032 = vmatpush.bf16.msrb.mxu1 %v3030_v30  ;;  %v3326_v30 = vor.u32 %v3903_v23, %v3325_v22  ;;  %v3058_v38 = vor.u32 %v3837_v29, %v3057_v28  ;;  %v3619_v22 = vld [vmem:[%s4489_s26 + $0x5ac] sm:$0xf0]  ;;  %v3874_v28 = vld [vmem:[%s4489_s26 + $0x29c] sm:$0xf]  ;;  %s4824_s5 = scalar_lea.vmem %s5076_s2, %s2942_s30 }
 0x129   : > { %2045 = vmatpush.bf16.msrb.mxu2 %v3034_v31  ;;  %v3805_v31 = vld [vmem:[%s4489_s26 + $0x74] sm:$0xf]  ;;  %v3622_v29 = vor.u32 %v3940_v21, %v3619_v22  ;;  %v3107_v21 = vld [vmem:[%s4489_s26 + $0x1a4] sm:$0xf0] }
 0x12a   : > { %2058 = vmatpush.bf16.msrb.mxu3 %v3038_v32  ;;  %v3330_v32 = vor.u32 %v3871_v24, %v3327_v25  ;;  %v3062_v39 = vor.u32 %v3805_v31, %v3059_v33  ;;  %v3349_v25 = vld [vmem:[%s4489_s26 + $0x298] sm:$0xf]  ;;  %v3357_v31 = vld [vmem:[%s4489_s26 + $0x2a0] sm:$0xf]  ;;  %v3875_v33 = vld [vmem:[%s4489_s26 + $0x2a4] sm:$0xf] }
 0x12e   : > { %3739 = vmatmul.msk.bf16.vlgmr.msra.gmra.mxu0 %vm1748_vm0, %v4521_v45 }
 0x12f   : > { %3740 = vmatmul.msk.bf16.vlgmr.msra.gmra.mxu1 %vm1748_vm0, %v4521_v45  ;;  %2069 = vmatpush.bf16.msra.mxu0 %v3562_v41  ;;  %v3070_v41 = vor.u32 %v3806_v36, %v3067_v37  ;;  %v3089_v37 = vld [vmem:[%s4489_s26 + $0x90] sm:$0xf] }
 0x130   : > { %3741 = vmatmul.msk.bf16.vlgmr.msra.gmra.mxu2 %vm1748_vm0, %v4521_v45  ;;  %2082 = vmatpush.bf16.msra.mxu1 %v3566_v42  ;;  %v3593_v42 = vld [vmem:[%s4489_s26 + $0x490] sm:$0xf] }
 0x131   : > { %3742 = vmatmul.msk.bf16.vlgmr.msra.gmra.mxu3 %vm1748_vm0, %v4521_v45  ;;  %2095 = vmatpush.bf16.msra.mxu2 %v3570_v46  ;;  %v3595_v46 = vld [vmem:[%s4489_s26 + $0x594] sm:$0xf0]  ;;  %v3594_v51 = vor.u32 %v3969_v43, %v3593_v42 }
 0x132   : > { %2108 = vmatpush.bf16.msra.mxu3 %v3574_v48  ;;  %v3970_v48 = vld [vmem:[%s4489_s26 + $0x598] sm:$0xf0]  ;;  %v3598_v52 = vor.u32 %v3937_v44, %v3595_v46  ;;  %v3091_v42 = vld [vmem:[%s4489_s26 + $0x194] sm:$0xf0] }
 0x133   : > { %2070 = vmatpush.bf16.msra.mxu0 %v3302_v54  ;;  %v3904_v54 = vld [vmem:[%s4489_s26 + $0x388] sm:$0xf0]  ;;  %v3097_v43 = vld [vmem:[%s4489_s26 + $0x98] sm:$0xf]  ;;  %v3842_v44 = vld [vmem:[%s4489_s26 + $0x198] sm:$0xf0] }
 0x134   : > { %2083 = vmatpush.bf16.msra.mxu1 %v3306_v55  ;;  %v3602_v55 = vor.u32 %v3970_v48, %v3601_v47  ;;  %v3334_v63 = vor.u32 %v3904_v54, %v3333_v53  ;;  %v3810_v46 = vld [vmem:[%s4489_s26 + $0x9c] sm:$0xf]  ;;  %v3099_v47 = vld [vmem:[%s4489_s26 + $0x19c] sm:$0xf0]  ;;  %v3098_v50 = vor.u32 %v3842_v44, %v3097_v43  ;;  %v3973_v53 = vld [vmem:[%s4489_s26 + $0x5b0] sm:$0xf0] }
 0x135   : > { %2096 = vmatpush.bf16.msra.mxu2 %v3310_v58  ;;  %v3335_v58 = vld [vmem:[%s4489_s26 + $0x38c] sm:$0xf0]  ;;  %v3941_v54 = vld [vmem:[%s4489_s26 + $0x4b4] sm:$0xf]  ;;  %v3643_v43 = vld [vmem:[%s4489_s26 + $0x5c4] sm:$0xf0] }
 0x136   : > { %2109 = vmatpush.bf16.msra.mxu3 %v3314_v60  ;;  %v3905_v60 = vld [vmem:[%s4489_s26 + $0x390] sm:$0xf0]  ;;  %v3338_v0 = vor.u32 %v3872_v56, %v3335_v58  ;;  %v3633_v56 = vld [vmem:[%s4489_s26 + $0x4b8] sm:$0xf]  ;;  %v3649_v44 = vld [vmem:[%s4489_s26 + $0x4c8] sm:$0xf] }
 0x137   : > { %2071 = vmatpush.bf16.msra.mxu0 %v3042_v2  ;;  %v3839_v2 = vld [vmem:[%s4489_s26 + $0x180] sm:$0xf0] }
 0x138   : > { %2084 = vmatpush.bf16.msra.mxu1 %v3046_v3  ;;  %v3342_v3 = vor.u32 %v3905_v60, %v3341_v59  ;;  %v3074_v11 = vor.u32 %v3839_v2, %v3073_v1  ;;  %v3365_v59 = vld [vmem:[%s4489_s26 + $0x2a8] sm:$0xf]  ;;  %v3942_v60 = vld [vmem:[%s4489_s26 + $0x4bc] sm:$0xf]  ;;  %v3908_v1 = vld [vmem:[%s4489_s26 + $0x3a8] sm:$0xf0] }
 0x139   : > { %2097 = vmatpush.bf16.msra.mxu2 %v3050_v4  ;;  %v3807_v4 = vld [vmem:[%s4489_s26 + $0x84] sm:$0xf] }
 0x13a   : > { %2110 = vmatpush.bf16.msra.mxu3 %v3054_v5  ;;  %v3346_v5 = vor.u32 %v3873_v61, %v3343_v62  ;;  %v3078_v12 = vor.u32 %v3807_v4, %v3075_v6  ;;  %v3635_v61 = vld [vmem:[%s4489_s26 + $0x5bc] sm:$0xf0] }
 0x13b   : > { %v3638_v7 = vor.u32 %v3942_v60, %v3635_v61  ;;  %v4858_v61 = vld [vmem:[%s5074_s0] sm:$0xf] }
 0x13e   : > { %3743 = vmatmul.msk.bf16.vlgmr.msrb.gmra.mxu0 %vm1748_vm0, %v4521_v45 }
 0x13f   : > { %3744 = vmatmul.msk.bf16.vlgmr.msrb.gmra.mxu1 %vm1748_vm0, %v4521_v45  ;;  %2121 = vmatpush.bf16.msrb.mxu0 %v3578_v14  ;;  %v3086_v14 = vor.u32 %v3808_v9, %v3083_v10  ;;  %v3373_v9 = vld [vmem:[%s4489_s26 + $0x2b0] sm:$0xf]  ;;  %v3909_v10 = vld [vmem:[%s4489_s26 + $0x3b0] sm:$0xf0] }
 0x140   : > { %3745 = vmatmul.msk.bf16.vlgmr.msrb.gmra.mxu2 %vm1748_vm0, %v4521_v45  ;;  %2134 = vmatpush.bf16.msrb.mxu1 %v3582_v15  ;;  %v3609_v15 = vld [vmem:[%s4489_s26 + $0x4a0] sm:$0xf] }
 0x141   : > { %3746 = vmatmul.msk.bf16.vlgmr.msrb.gmra.mxu3 %vm1748_vm0, %v4521_v45  ;;  %2147 = vmatpush.bf16.msrb.mxu2 %v3586_v18  ;;  %v3611_v18 = vld [vmem:[%s4489_s26 + $0x5a4] sm:$0xf0]  ;;  %v3610_v23 = vor.u32 %v3971_v16, %v3609_v15  ;;  %v3366_v15 = vor.u32 %v3908_v1, %v3365_v59  ;;  %v3105_v16 = vld [vmem:[%s4489_s26 + $0xa0] sm:$0xf]  ;;  %v3878_v59 = vld [vmem:[%s4489_s26 + $0x2bc] sm:$0xf] }
 0x142   : > { %2160 = vmatpush.bf16.msrb.mxu3 %v3590_v20  ;;  %v3972_v20 = vld [vmem:[%s4489_s26 + $0x5a8] sm:$0xf0]  ;;  %v3614_v24 = vor.u32 %v3939_v17, %v3611_v18  ;;  %v3843_v18 = vld [vmem:[%s4489_s26 + $0x1a0] sm:$0xf0] }
 0x143   : > { %2122 = vmatpush.bf16.msrb.mxu0 %v3318_v26  ;;  %v3906_v26 = vld [vmem:[%s4489_s26 + $0x398] sm:$0xf0]  ;;  %v3911_v1 = vld [vmem:[%s4489_s26 + $0x3c0] sm:$0xf0] }
 0x144   : > { %2135 = vmatpush.bf16.msrb.mxu1 %v3322_v27  ;;  %v3618_v27 = vor.u32 %v3972_v20, %v3617_v19  ;;  %v3350_v35 = vor.u32 %v3906_v26, %v3349_v25  ;;  %v3374_v19 = vor.u32 %v3909_v10, %v3373_v9  ;;  %v3811_v20 = vld [vmem:[%s4489_s26 + $0xa4] sm:$0xf]  ;;  %v3844_v25 = vld [vmem:[%s4489_s26 + $0x1a8] sm:$0xf0] }
 0x145   : > { %2148 = vmatpush.bf16.msrb.mxu2 %v3326_v30  ;;  %v3351_v30 = vld [vmem:[%s4489_s26 + $0x39c] sm:$0xf0] }
 0x146   : > { %2161 = vmatpush.bf16.msrb.mxu3 %v3330_v32  ;;  %v3907_v32 = vld [vmem:[%s4489_s26 + $0x3a0] sm:$0xf0]  ;;  %v3354_v36 = vor.u32 %v3874_v28, %v3351_v30 }
 0x147   : > { %2123 = vmatpush.bf16.msrb.mxu0 %v3058_v38  ;;  %v3841_v38 = vld [vmem:[%s4489_s26 + $0x190] sm:$0xf0] }
 0x148   : > { %2136 = vmatpush.bf16.msrb.mxu1 %v3062_v39  ;;  %v3358_v39 = vor.u32 %v3907_v32, %v3357_v31  ;;  %v3090_v48 = vor.u32 %v3841_v38, %v3089_v37  ;;  %v3106_v32 = vor.u32 %v3843_v18, %v3105_v16  ;;  %v3846_v16 = vld [vmem:[%s4489_s26 + $0x1b8] sm:$0xf0] }
 0x149   : > { %2149 = vmatpush.bf16.msrb.mxu2 %v3066_v40  ;;  %v3809_v40 = vld [vmem:[%s4489_s26 + $0x94] sm:$0xf] }
 0x14a   : > { %2162 = vmatpush.bf16.msrb.mxu3 %v3070_v41  ;;  %v3362_v41 = vor.u32 %v3875_v33, %v3359_v34  ;;  %v3094_v49 = vor.u32 %v3809_v40, %v3091_v42  ;;  %v3110_v34 = vor.u32 %v3811_v20, %v3107_v21  ;;  %v3975_v40 = vld [vmem:[%s4489_s26 + $0x5c0] sm:$0xf0]  ;;  %v3131_v21 = vld [vmem:[%s4489_s26 + $0x1bc] sm:$0xf0] }
 0x14e   : > { %3747 = vmatmul.msk.bf16.vlgmr.msra.gmra.mxu0 %vm1748_vm0, %v4521_v45 }
 0x14f   : > { %3748 = vmatmul.msk.bf16.vlgmr.msra.gmra.mxu1 %vm1748_vm0, %v4521_v45  ;;  %2173 = vmatpush.bf16.msra.mxu0 %v3594_v51  ;;  %v3102_v51 = vor.u32 %v3810_v46, %v3099_v47  ;;  %v3976_v46 = vld [vmem:[%s4489_s26 + $0x5c8] sm:$0xf0] }
 0x150   : > { %3749 = vmatmul.msk.bf16.vlgmr.msra.gmra.mxu2 %vm1748_vm0, %v4521_v45  ;;  %2186 = vmatpush.bf16.msra.mxu1 %v3598_v52  ;;  %v3625_v52 = vld [vmem:[%s4489_s26 + $0x4b0] sm:$0xf] }
 0x151   : > { %3750 = vmatmul.msk.bf16.vlgmr.msra.gmra.mxu3 %vm1748_vm0, %v4521_v45  ;;  %2199 = vmatpush.bf16.msra.mxu2 %v3602_v55  ;;  %v3627_v55 = vld [vmem:[%s4489_s26 + $0x5b4] sm:$0xf0] }
 0x152   : > { %2212 = vmatpush.bf16.msra.mxu3 %v3606_v57  ;;  %v3974_v57 = vld [vmem:[%s4489_s26 + $0x5b8] sm:$0xf0] }
 0x153   : > { %2174 = vmatpush.bf16.msra.mxu0 %v3334_v63  ;;  %v3634_v4 = vor.u32 %v3974_v57, %v3633_v56 }
 0x154   : > { %2187 = vmatpush.bf16.msra.mxu1 %v3338_v0  ;;  %v3626_v0 = vor.u32 %v3973_v53, %v3625_v52 }
 0x155   : > { %2200 = vmatpush.bf16.msra.mxu2 %v3342_v3  ;;  %v3630_v3 = vor.u32 %v3941_v54, %v3627_v55  ;;  %v3910_v55 = vld [vmem:[%s4489_s26 + $0x3b8] sm:$0xf0] }
 0x156   : > { %2213 = vmatpush.bf16.msra.mxu3 %v3346_v5  ;;  %v3876_v5 = vld [vmem:[%s4489_s26 + $0x2ac] sm:$0xf] }
 0x157   : > { %2175 = vmatpush.bf16.msra.mxu0 %v3074_v11  ;;  %v3370_v17 = vor.u32 %v3876_v5, %v3367_v8  ;;  %v3845_v8 = vld [vmem:[%s4489_s26 + $0x1b0] sm:$0xf0] }
 0x158   : > { %2188 = vmatpush.bf16.msra.mxu1 %v3078_v12  ;;  %v3877_v12 = vld [vmem:[%s4489_s26 + $0x2b4] sm:$0xf] }
 0x159   : > { %2201 = vmatpush.bf16.msra.mxu2 %v3082_v13  ;;  %v3375_v13 = vld [vmem:[%s4489_s26 + $0x3b4] sm:$0xf0] }
 0x15a   : > { %2214 = vmatpush.bf16.msra.mxu3 %v3086_v14 }
 0x15e   : > { %3751 = vmatmul.msk.bf16.vlgmr.msrb.gmra.mxu0 %vm1748_vm0, %v4521_v45 }
 0x15f   : > { %3752 = vmatmul.msk.bf16.vlgmr.msrb.gmra.mxu1 %vm1748_vm0, %v4521_v45  ;;  %2225 = vmatpush.bf16.msrb.mxu0 %v3610_v23  ;;  %v3378_v23 = vor.u32 %v3877_v12, %v3375_v13  ;;  %v3123_v12 = vld [vmem:[%s4489_s26 + $0x1b4] sm:$0xf0] }
 0x160   : > { %3753 = vmatmul.msk.bf16.vlgmr.msrb.gmra.mxu2 %vm1748_vm0, %v4521_v45  ;;  %2238 = vmatpush.bf16.msrb.mxu1 %v3614_v24  ;;  %v3113_v24 = vld [vmem:[%s4489_s26 + $0xa8] sm:$0xf]  ;;  %v3129_v13 = vld [vmem:[%s4489_s26 + $0xb8] sm:$0xf] }
 0x161   : > { %3754 = vmatmul.msk.bf16.vlgmr.msrb.gmra.mxu3 %vm1748_vm0, %v4521_v45  ;;  %2251 = vmatpush.bf16.msrb.mxu2 %v3618_v27 }
 0x162   : > { %2264 = vmatpush.bf16.msrb.mxu3 %v3622_v29  ;;  %v3115_v29 = vld [vmem:[%s4489_s26 + $0x1ac] sm:$0xf0] }
 0x163   : > { %2226 = vmatpush.bf16.msrb.mxu0 %v3350_v35  ;;  %v3114_v35 = vor.u32 %v3844_v25, %v3113_v24 }
 0x164   : > { %2239 = vmatpush.bf16.msrb.mxu1 %v3354_v36 }
 0x165   : > { %2252 = vmatpush.bf16.msrb.mxu2 %v3358_v39  ;;  %v3641_v39 = vld [vmem:[%s4489_s26 + $0x4c0] sm:$0xf] }
 0x166   : > { %2265 = vmatpush.bf16.msrb.mxu3 %v3362_v41  ;;  %v3943_v41 = vld [vmem:[%s4489_s26 + $0x4c4] sm:$0xf]  ;;  %v3642_v54 = vor.u32 %v3975_v40, %v3641_v39  ;;  %v3397_v39 = vld [vmem:[%s4489_s26 + $0x2c8] sm:$0xf]  ;;  %v3946_v40 = vld [vmem:[%s4489_s26 + $0x4dc] sm:$0xf] }
 0x167   : > { %2227 = vmatpush.bf16.msrb.mxu0 %v3090_v48  ;;  %v3646_v57 = vor.u32 %v3943_v41, %v3643_v43  ;;  %v3667_v41 = vld [vmem:[%s4489_s26 + $0x5dc] sm:$0xf0] }
 0x168   : > { %2240 = vmatpush.bf16.msrb.mxu1 %v3094_v49  ;;  %v3381_v49 = vld [vmem:[%s4489_s26 + $0x2b8] sm:$0xf] }
 0x169   : > { %2253 = vmatpush.bf16.msrb.mxu2 %v3098_v50  ;;  %v3944_v50 = vld [vmem:[%s4489_s26 + $0x4cc] sm:$0xf] }
 0x16a   : > { %2266 = vmatpush.bf16.msrb.mxu3 %v3102_v51  ;;  %v3651_v51 = vld [vmem:[%s4489_s26 + $0x5cc] sm:$0xf0] }
 0x16b   : > { %v1761_v58 = vpop.f32.mrf.mxu0 }
 0x16c   : > { %vm2597_vm1 = vcmp.gt.f32.partialorder %v1761_v58, 0.0  ;;  %v2662_v62 = vmul.f32 0.2, %v1761_v58  ;;  %v1774_v63 = vpop.f32.mrf.mxu1 }
 0x16d   : > { %vm2598_vm2 = vcmp.gt.f32.partialorder %v1774_v63, 0.0  ;;  %v2663_v2 = vmul.f32 0.2, %v1774_v63 }
 0x16e   : > { %v2727_v6 = vsel %vm2597_vm1, %v1761_v58, %v2662_v62  ;;  %3755 = vmatmul.msk.bf16.vlgmr.msra.gmra.mxu0 %vm1748_vm0, %v4521_v45  ;;  %v3650_v58 = vor.u32 %v3976_v46, %v3649_v44  ;;  %v3654_v62 = vor.u32 %v3944_v50, %v3651_v51  ;;  %v3912_v46 = vld [vmem:[%s4489_s26 + $0x3c8] sm:$0xf0] }
 0x16f   : > { %v2728_v11 = vsel %vm2598_vm2, %v1774_v63, %v2663_v2  ;;  %3756 = vmatmul.msk.bf16.vlgmr.msra.gmra.mxu1 %vm1748_vm0, %v4521_v45  ;;  %2277 = vmatpush.bf16.msra.mxu0 %v3626_v0  ;;  %v3383_v63 = vld [vmem:[%s4489_s26 + $0x3bc] sm:$0xf0]  ;;  %v3880_v50 = vld [vmem:[%s4489_s26 + $0x2cc] sm:$0xf] }
 0x170   : > { %3757 = vmatmul.msk.bf16.vlgmr.msra.gmra.mxu2 %vm1748_vm0, %v4521_v45  ;;  %v2792_v14 = vpack.c.bf16 %v2728_v11, %v2727_v6  ;;  %2290 = vmatpush.bf16.msra.mxu1 %v3630_v3  ;;  %v3389_v0 = vld [vmem:[%s4489_s26 + $0x2c0] sm:$0xf]  ;;  %v3879_v3 = vld [vmem:[%s4489_s26 + $0x2c4] sm:$0xf]  ;;  %v3382_v6 = vor.u32 %v3910_v55, %v3381_v49  ;;  %v3386_v9 = vor.u32 %v3878_v59, %v3383_v63  ;;  %v3813_v11 = vld [vmem:[%s4489_s26 + $0xb4] sm:$0xf] }
 0x171   : > { %3758 = vmatmul.msk.bf16.vlgmr.msra.gmra.mxu3 %vm1748_vm0, %v4521_v45  ;;  %2303 = vmatpush.bf16.msra.mxu2 %v3634_v4  ;;  %v3812_v45 = vld [vmem:[%s4489_s26 + $0xac] sm:$0xf]  ;;  %v3391_v4 = vld [vmem:[%s4489_s26 + $0x3c4] sm:$0xf0]  ;;  %v3390_v10 = vor.u32 %v3911_v1, %v3389_v0  ;;  %v3913_v55 = vld [vmem:[%s4489_s26 + $0x3d0] sm:$0xf0] }
 0x172   : > { %2825 = vst [vmem:[%s4824_s5] sm:$0xff] %v2792_v14  ;;  %2316 = vmatpush.bf16.msra.mxu3 %v3638_v7  ;;  %v3118_v37 = vor.u32 %v3812_v45, %v3115_v29  ;;  %v3121_v7 = vld [vmem:[%s4489_s26 + $0xb0] sm:$0xf]  ;;  %v3126_v45 = vor.u32 %v3813_v11, %v3123_v12  ;;  %v3847_v63 = vld [vmem:[%s4489_s26 + $0x1c0] sm:$0xf0] }
 0x173   : > { %v1787_v22 = vpop.f32.mrf.mxu2  ;;  %v1763_v26 = vpop.f32.mrf.mxu0  ;;  %2278 = vmatpush.bf16.msra.mxu0 %v3366_v15  ;;  %v3394_v15 = vor.u32 %v3879_v3, %v3391_v4  ;;  %v3122_v24 = vor.u32 %v3845_v8, %v3121_v7  ;;  %v3139_v3 = vld [vmem:[%s4489_s26 + $0x1c4] sm:$0xf0]  ;;  %v3848_v7 = vld [vmem:[%s4489_s26 + $0x1c8] sm:$0xf0]  ;;  %v3147_v12 = vld [vmem:[%s4489_s26 + $0x1cc] sm:$0xf0] }
 0x174   : > { %vm2599_vm3 = vcmp.gt.f32.partialorder %v1787_v22, 0.0  ;;  %v2664_v27 = vmul.f32 0.2, %v1787_v22  ;;  %v1800_v28 = vpop.f32.mrf.mxu3  ;;  %v1776_v30 = vpop.f32.mrf.mxu1  ;;  %2291 = vmatpush.bf16.msra.mxu1 %v3370_v17  ;;  %v3814_v17 = vld [vmem:[%s4489_s26 + $0xbc] sm:$0xf]  ;;  %v3130_v26 = vor.u32 %v3846_v16, %v3129_v13 }
 0x175   : > { %vm2600_vm4 = vcmp.gt.f32.partialorder %v1800_v28, 0.0  ;;  %v2665_v31 = vmul.f32 0.2, %v1800_v28  ;;  %2304 = vmatpush.bf16.msra.mxu2 %v3374_v19  ;;  %v3657_v30 = vld [vmem:[%s4489_s26 + $0x4d0] sm:$0xf] }
 0x176   : > { %v2729_v33 = vsel %vm2599_vm3, %v1787_v22, %v2664_v27  ;;  %2317 = vmatpush.bf16.msra.mxu3 %v3378_v23  ;;  %v3145_v4 = vld [vmem:[%s4489_s26 + $0xc8] sm:$0xf]  ;;  %v3816_v8 = vld [vmem:[%s4489_s26 + $0xcc] sm:$0xf] }
 0x177   : > { %v2730_v36 = vsel %vm2600_vm4, %v1800_v28, %v2665_v31  ;;  %2279 = vmatpush.bf16.msra.mxu0 %v3106_v32  ;;  %v3134_v28 = vor.u32 %v3814_v17, %v3131_v21  ;;  %v3977_v31 = vld [vmem:[%s4489_s26 + $0x5d0] sm:$0xf0] }
 0x178   : > { %v2793_v38 = vpack.c.bf16 %v2730_v36, %v2729_v33  ;;  %2292 = vmatpush.bf16.msra.mxu1 %v3110_v34  ;;  %v3945_v32 = vld [vmem:[%s4489_s26 + $0x4d4] sm:$0xf]  ;;  %v3659_v34 = vld [vmem:[%s4489_s26 + $0x5d4] sm:$0xf0]  ;;  %v3978_v36 = vld [vmem:[%s4489_s26 + $0x5d8] sm:$0xf0]  ;;  %v3658_v44 = vor.u32 %v3977_v31, %v3657_v30 }
 0x179   : > { %2305 = vmatpush.bf16.msra.mxu2 %v3114_v35  ;;  %v3665_v35 = vld [vmem:[%s4489_s26 + $0x4d8] sm:$0xf]  ;;  %v3948_v31 = vld [vmem:[%s4489_s26 + $0x4ec] sm:$0xf] }
 0x17a   : > { %2826 = vst [vmem:[%s4824_s5 + $0x8] sm:$0xff] %v2793_v38  ;;  %2318 = vmatpush.bf16.msra.mxu3 %v3118_v37  ;;  %v3666_v49 = vor.u32 %v3978_v36, %v3665_v35  ;;  %v3413_v30 = vld [vmem:[%s4489_s26 + $0x2d8] sm:$0xf]  ;;  %v3914_v36 = vld [vmem:[%s4489_s26 + $0x3d8] sm:$0xf0] }
 0x17b   : > { %v1789_v42 = vpop.f32.mrf.mxu2  ;;  %v1813_v48 = vpop.f32.mrf.mxu0 }
 0x17c   : > { %v1802_v47 = vpop.f32.mrf.mxu3  ;;  %vm2601_vm5 = vcmp.gt.f32.partialorder %v1813_v48, 0.0  ;;  %v2666_v52 = vmul.f32 0.2, %v1813_v48  ;;  %v1826_v53 = vpop.f32.mrf.mxu1 }
 0x17d   : > { %vm2602_vm6 = vcmp.gt.f32.partialorder %v1826_v53, 0.0  ;;  %v2667_v56 = vmul.f32 0.2, %v1826_v53 }
 0x17e   : > { %v2731_v60 = vsel %vm2601_vm5, %v1813_v48, %v2666_v52  ;;  %3759 = vmatmul.msk.bf16.vlgmr.msrb.gmra.mxu0 %vm1748_vm0, %v4858_v61  ;;  %v3662_v48 = vor.u32 %v3945_v32, %v3659_v34  ;;  %v3670_v52 = vor.u32 %v3946_v40, %v3667_v41  ;;  %v3683_v32 = vld [vmem:[%s4489_s26 + $0x5ec] sm:$0xf0]  ;;  %v3882_v40 = vld [vmem:[%s4489_s26 + $0x2dc] sm:$0xf] }
 0x17f   : > { %v2732_v2 = vsel %vm2602_vm6, %v1826_v53, %v2667_v56  ;;  %3760 = vmatmul.msk.bf16.vlgmr.msrb.gmra.mxu1 %vm1748_vm0, %v4858_v61  ;;  %2329 = vmatpush.bf16.msrb.mxu0 %v3642_v54  ;;  %v3399_v53 = vld [vmem:[%s4489_s26 + $0x3cc] sm:$0xf0] }
 0x180   : > { %3761 = vmatmul.msk.bf16.vlgmr.msrb.gmra.mxu2 %vm1748_vm0, %v4858_v61  ;;  %v2794_v5 = vpack.c.bf16 %v2732_v2, %v2731_v60  ;;  %2342 = vmatpush.bf16.msrb.mxu1 %v3646_v57  ;;  %v3405_v54 = vld [vmem:[%s4489_s26 + $0x2d0] sm:$0xf]  ;;  %v3881_v57 = vld [vmem:[%s4489_s26 + $0x2d4] sm:$0xf]  ;;  %v3398_v60 = vor.u32 %v3912_v46, %v3397_v39  ;;  %v3402_v0 = vor.u32 %v3880_v50, %v3399_v53  ;;  %v3815_v2 = vld [vmem:[%s4489_s26 + $0xc4] sm:$0xf] }
 0x181   : > { %3762 = vmatmul.msk.bf16.vlgmr.msrb.gmra.mxu3 %vm1748_vm0, %v4858_v61  ;;  %2355 = vmatpush.bf16.msrb.mxu2 %v3650_v58  ;;  %v3407_v58 = vld [vmem:[%s4489_s26 + $0x3d4] sm:$0xf0]  ;;  %v3406_v1 = vor.u32 %v3913_v55, %v3405_v54  ;;  %v3142_v17 = vor.u32 %v3815_v2, %v3139_v3  ;;  %v3915_v46 = vld [vmem:[%s4489_s26 + $0x3e0] sm:$0xf0]  ;;  %v3849_v53 = vld [vmem:[%s4489_s26 + $0x1d0] sm:$0xf0] }
 0x182   : > { %2827 = vst [vmem:[%s4824_s5 + $0x10] sm:$0xff] %v2794_v5  ;;  %2368 = vmatpush.bf16.msrb.mxu3 %v3654_v62  ;;  %v3137_v62 = vld [vmem:[%s4489_s26 + $0xc0] sm:$0xf] }
 0x183   : > { %v1839_v14 = vpop.f32.mrf.mxu2  ;;  %v1815_v18 = vpop.f32.mrf.mxu0  ;;  %2330 = vmatpush.bf16.msrb.mxu0 %v3382_v6  ;;  %v3410_v6 = vor.u32 %v3881_v57, %v3407_v58  ;;  %v3155_v57 = vld [vmem:[%s4489_s26 + $0x1d4] sm:$0xf0]  ;;  %v3163_v3 = vld [vmem:[%s4489_s26 + $0x1dc] sm:$0xf0] }
 0x184   : > { %vm2603_vm7 = vcmp.gt.f32.partialorder %v1839_v14, 0.0  ;;  %v2668_v19 = vmul.f32 0.2, %v1839_v14  ;;  %v1852_v20 = vpop.f32.mrf.mxu3  ;;  %v1828_v22 = vpop.f32.mrf.mxu1  ;;  %2343 = vmatpush.bf16.msrb.mxu1 %v3386_v9  ;;  %v3146_v18 = vor.u32 %v3848_v7, %v3145_v4  ;;  %v3161_v58 = vld [vmem:[%s4489_s26 + $0xd8] sm:$0xf] }
 0x185   : > { %vm2604_vm8 = vcmp.gt.f32.partialorder %v1852_v20, 0.0  ;;  %v2669_v23 = vmul.f32 0.2, %v1852_v20  ;;  %2356 = vmatpush.bf16.msrb.mxu2 %v3390_v10  ;;  %v3673_v22 = vld [vmem:[%s4489_s26 + $0x4e0] sm:$0xf] }
 0x186   : > { %v2733_v25 = vsel %vm2603_vm7, %v1839_v14, %v2668_v19  ;;  %2369 = vmatpush.bf16.msrb.mxu3 %v3394_v15  ;;  %v3138_v15 = vor.u32 %v3847_v63, %v3137_v62  ;;  %v3850_v62 = vld [vmem:[%s4489_s26 + $0x1d8] sm:$0xf0] }
 0x187   : > { %v2734_v27 = vsel %vm2604_vm8, %v1852_v20, %v2669_v23  ;;  %2331 = vmatpush.bf16.msrb.mxu0 %v3122_v24  ;;  %v3150_v20 = vor.u32 %v3816_v8, %v3147_v12  ;;  %v3979_v23 = vld [vmem:[%s4489_s26 + $0x5e0] sm:$0xf0]  ;;  %v3818_v63 = vld [vmem:[%s4489_s26 + $0xdc] sm:$0xf] }
 0x188   : > { %v2795_v29 = vpack.c.bf16 %v2734_v27, %v2733_v25  ;;  %2344 = vmatpush.bf16.msrb.mxu1 %v3126_v45  ;;  %v3947_v24 = vld [vmem:[%s4489_s26 + $0x4e4] sm:$0xf]  ;;  %v3675_v45 = vld [vmem:[%s4489_s26 + $0x5e4] sm:$0xf0]  ;;  %v3980_v27 = vld [vmem:[%s4489_s26 + $0x5e8] sm:$0xf0]  ;;  %v3674_v35 = vor.u32 %v3979_v23, %v3673_v22 }
 0x189   : > { %2357 = vmatpush.bf16.msrb.mxu2 %v3130_v26  ;;  %v3681_v26 = vld [vmem:[%s4489_s26 + $0x4e8] sm:$0xf]  ;;  %v3950_v23 = vld [vmem:[%s4489_s26 + $0x4fc] sm:$0xf] }
 0x18a   : > { %2828 = vst [vmem:[%s4824_s5 + $0x18] sm:$0xff] %v2795_v29  ;;  %2370 = vmatpush.bf16.msrb.mxu3 %v3134_v28  ;;  %v3682_v39 = vor.u32 %v3980_v27, %v3681_v26  ;;  %v3429_v22 = vld [vmem:[%s4489_s26 + $0x2e8] sm:$0xf]  ;;  %v3916_v27 = vld [vmem:[%s4489_s26 + $0x3e8] sm:$0xf0] }
 0x18b   : > { %v1841_v33 = vpop.f32.mrf.mxu2  ;;  %v1865_v38 = vpop.f32.mrf.mxu0 }
 0x18c   : > { %v1854_v37 = vpop.f32.mrf.mxu3  ;;  %vm2605_vm9 = vcmp.gt.f32.partialorder %v1865_v38, 0.0  ;;  %v2670_v42 = vmul.f32 0.2, %v1865_v38  ;;  %v1878_v43 = vpop.f32.mrf.mxu1 }
 0x18d   : > { %vm2606_vm10 = vcmp.gt.f32.partialorder %v1878_v43, 0.0  ;;  %v2671_v47 = vmul.f32 0.2, %v1878_v43 }
 0x18e   : > { %v2735_v51 = vsel %vm2605_vm9, %v1865_v38, %v2670_v42  ;;  %3763 = vmatmul.msk.bf16.vlgmr.msra.gmra.mxu0 %vm1748_vm0, %v4858_v61  ;;  %v3678_v38 = vor.u32 %v3947_v24, %v3675_v45  ;;  %v3686_v42 = vor.u32 %v3948_v31, %v3683_v32  ;;  %v3699_v24 = vld [vmem:[%s4489_s26 + $0x5fc] sm:$0xf0]  ;;  %v3884_v31 = vld [vmem:[%s4489_s26 + $0x2ec] sm:$0xf] }
 0x18f   : > { %v2736_v56 = vsel %vm2606_vm10, %v1878_v43, %v2671_v47  ;;  %3764 = vmatmul.msk.bf16.vlgmr.msra.gmra.mxu1 %vm1748_vm0, %v4858_v61  ;;  %2381 = vmatpush.bf16.msra.mxu0 %v3658_v44  ;;  %v3415_v43 = vld [vmem:[%s4489_s26 + $0x3dc] sm:$0xf0] }
 0x190   : > { %3765 = vmatmul.msk.bf16.vlgmr.msra.gmra.mxu2 %vm1748_vm0, %v4858_v61  ;;  %v2796_v59 = vpack.c.bf16 %v2736_v56, %v2735_v51  ;;  %2394 = vmatpush.bf16.msra.mxu1 %v3662_v48  ;;  %v3421_v44 = vld [vmem:[%s4489_s26 + $0x2e0] sm:$0xf]  ;;  %v3883_v48 = vld [vmem:[%s4489_s26 + $0x2e4] sm:$0xf]  ;;  %v3414_v51 = vor.u32 %v3914_v36, %v3413_v30  ;;  %v3418_v54 = vor.u32 %v3882_v40, %v3415_v43  ;;  %v3817_v56 = vld [vmem:[%s4489_s26 + $0xd4] sm:$0xf] }
 0x191   : > { %3766 = vmatmul.msk.bf16.vlgmr.msra.gmra.mxu3 %vm1748_vm0, %v4858_v61  ;;  %2407 = vmatpush.bf16.msra.mxu2 %v3666_v49  ;;  %v3423_v49 = vld [vmem:[%s4489_s26 + $0x3e4] sm:$0xf0]  ;;  %v3422_v55 = vor.u32 %v3915_v46, %v3421_v44  ;;  %v3158_v8 = vor.u32 %v3817_v56, %v3155_v57  ;;  %v3917_v36 = vld [vmem:[%s4489_s26 + $0x3f0] sm:$0xf0]  ;;  %v3851_v43 = vld [vmem:[%s4489_s26 + $0x1e0] sm:$0xf0] }
 0x192   : > { %2829 = vst [vmem:[%s4824_s5 + $0x20] sm:$0xff] %v2796_v59  ;;  %2420 = vmatpush.bf16.msra.mxu3 %v3670_v52  ;;  %v3153_v52 = vld [vmem:[%s4489_s26 + $0xd0] sm:$0xf] }
 0x193   : > { %v1891_v5 = vpop.f32.mrf.mxu2  ;;  %v1867_v9 = vpop.f32.mrf.mxu0  ;;  %2382 = vmatpush.bf16.msra.mxu0 %v3398_v60  ;;  %v3426_v60 = vor.u32 %v3883_v48, %v3423_v49  ;;  %v3171_v48 = vld [vmem:[%s4489_s26 + $0x1e4] sm:$0xf0]  ;;  %v3179_v57 = vld [vmem:[%s4489_s26 + $0x1ec] sm:$0xf0] }
 0x194   : > { %vm2607_vm11 = vcmp.gt.f32.partialorder %v1891_v5, 0.0  ;;  %v2672_v10 = vmul.f32 0.2, %v1891_v5  ;;  %v1904_v11 = vpop.f32.mrf.mxu3  ;;  %v1880_v13 = vpop.f32.mrf.mxu1  ;;  %2395 = vmatpush.bf16.msra.mxu1 %v3402_v0  ;;  %v3162_v9 = vor.u32 %v3850_v62, %v3161_v58  ;;  %v3177_v49 = vld [vmem:[%s4489_s26 + $0xe8] sm:$0xf] }
 0x195   : > { %vm2608_vm12 = vcmp.gt.f32.partialorder %v1904_v11, 0.0  ;;  %v2673_v14 = vmul.f32 0.2, %v1904_v11  ;;  %2408 = vmatpush.bf16.msra.mxu2 %v3406_v1  ;;  %v3689_v13 = vld [vmem:[%s4489_s26 + $0x4f0] sm:$0xf] }
 0x196   : > { %v2737_v16 = vsel %vm2607_vm11, %v1891_v5, %v2672_v10  ;;  %2421 = vmatpush.bf16.msra.mxu3 %v3410_v6  ;;  %v3154_v6 = vor.u32 %v3849_v53, %v3153_v52  ;;  %v3852_v52 = vld [vmem:[%s4489_s26 + $0x1e8] sm:$0xf0] }
 0x197   : > { %v2738_v19 = vsel %vm2608_vm12, %v1904_v11, %v2673_v14  ;;  %2383 = vmatpush.bf16.msra.mxu0 %v3138_v15  ;;  %v3166_v11 = vor.u32 %v3818_v63, %v3163_v3  ;;  %v3981_v14 = vld [vmem:[%s4489_s26 + $0x5f0] sm:$0xf0]  ;;  %v3820_v53 = vld [vmem:[%s4489_s26 + $0xec] sm:$0xf] }
 0x198   : > { %v2797_v21 = vpack.c.bf16 %v2738_v19, %v2737_v16  ;;  %2396 = vmatpush.bf16.msra.mxu1 %v3142_v17  ;;  %v3949_v15 = vld [vmem:[%s4489_s26 + $0x4f4] sm:$0xf]  ;;  %v3691_v17 = vld [vmem:[%s4489_s26 + $0x5f4] sm:$0xf0]  ;;  %v3982_v19 = vld [vmem:[%s4489_s26 + $0x5f8] sm:$0xf0]  ;;  %v3690_v26 = vor.u32 %v3981_v14, %v3689_v13 }
 0x199   : > { %2409 = vmatpush.bf16.msra.mxu2 %v3146_v18  ;;  %v3697_v18 = vld [vmem:[%s4489_s26 + $0x4f8] sm:$0xf]  ;;  %v3952_v14 = vld [vmem:[%s4489_s26 + $0x50c] sm:$0xf] }
 0x19a   : > { %2830 = vst [vmem:[%s4824_s5 + $0x28] sm:$0xff] %v2797_v21  ;;  %2422 = vmatpush.bf16.msra.mxu3 %v3150_v20  ;;  %v3698_v30 = vor.u32 %v3982_v19, %v3697_v18  ;;  %v3445_v13 = vld [vmem:[%s4489_s26 + $0x2f8] sm:$0xf]  ;;  %v3918_v19 = vld [vmem:[%s4489_s26 + $0x3f8] sm:$0xf0] }
 0x19b   : > { %v1893_v25 = vpop.f32.mrf.mxu2  ;;  %v1917_v29 = vpop.f32.mrf.mxu0 }
 0x19c   : > { %v1906_v28 = vpop.f32.mrf.mxu3  ;;  %vm2609_vm13 = vcmp.gt.f32.partialorder %v1917_v29, 0.0  ;;  %v2674_v33 = vmul.f32 0.2, %v1917_v29  ;;  %v1930_v34 = vpop.f32.mrf.mxu1 }
 0x19d   : > { %vm2610_vm14 = vcmp.gt.f32.partialorder %v1930_v34, 0.0  ;;  %v2675_v37 = vmul.f32 0.2, %v1930_v34 }
 0x19e   : > { %v2739_v41 = vsel %vm2609_vm13, %v1917_v29, %v2674_v33  ;;  %3767 = vmatmul.msk.bf16.vlgmr.msrb.gmra.mxu0 %vm1748_vm0, %v4858_v61  ;;  %v3694_v29 = vor.u32 %v3949_v15, %v3691_v17  ;;  %v3702_v33 = vor.u32 %v3950_v23, %v3699_v24  ;;  %v3715_v15 = vld [vmem:[%s4489_s26 + $0x60c] sm:$0xf0]  ;;  %v3886_v23 = vld [vmem:[%s4489_s26 + $0x2fc] sm:$0xf] }
 0x19f   : > { %v2740_v47 = vsel %vm2610_vm14, %v1930_v34, %v2675_v37  ;;  %3768 = vmatmul.msk.bf16.vlgmr.msrb.gmra.mxu1 %vm1748_vm0, %v4858_v61  ;;  %2433 = vmatpush.bf16.msrb.mxu0 %v3674_v35  ;;  %v3431_v34 = vld [vmem:[%s4489_s26 + $0x3ec] sm:$0xf0] }
 0x1a0   : > { %3769 = vmatmul.msk.bf16.vlgmr.msrb.gmra.mxu2 %vm1748_vm0, %v4858_v61  ;;  %v2798_v50 = vpack.c.bf16 %v2740_v47, %v2739_v41  ;;  %2446 = vmatpush.bf16.msrb.mxu1 %v3678_v38  ;;  %v3437_v35 = vld [vmem:[%s4489_s26 + $0x2f0] sm:$0xf]  ;;  %v3885_v38 = vld [vmem:[%s4489_s26 + $0x2f4] sm:$0xf]  ;;  %v3430_v41 = vor.u32 %v3916_v27, %v3429_v22  ;;  %v3434_v44 = vor.u32 %v3884_v31, %v3431_v34  ;;  %v3819_v47 = vld [vmem:[%s4489_s26 + $0xe4] sm:$0xf] }
 0x1a1   : > { %3770 = vmatmul.msk.bf16.vlgmr.msrb.gmra.mxu3 %vm1748_vm0, %v4858_v61  ;;  %2459 = vmatpush.bf16.msrb.mxu2 %v3682_v39  ;;  %v3439_v39 = vld [vmem:[%s4489_s26 + $0x3f4] sm:$0xf0]  ;;  %v3438_v46 = vor.u32 %v3917_v36, %v3437_v35  ;;  %v3174_v63 = vor.u32 %v3819_v47, %v3171_v48  ;;  %v3919_v27 = vld [vmem:[%s4489_s26 + $0x400] sm:$0xf0]  ;;  %v3853_v34 = vld [vmem:[%s4489_s26 + $0x1f0] sm:$0xf0] }
 0x1a2   : > { %2831 = vst [vmem:[%s4824_s5 + $0x30] sm:$0xff] %v2798_v50  ;;  %2472 = vmatpush.bf16.msrb.mxu3 %v3686_v42  ;;  %v3169_v42 = vld [vmem:[%s4489_s26 + $0xe0] sm:$0xf] }
 0x1a3   : > { %v1943_v59 = vpop.f32.mrf.mxu2  ;;  %v1919_v0 = vpop.f32.mrf.mxu0  ;;  %2434 = vmatpush.bf16.msrb.mxu0 %v3414_v51  ;;  %v3442_v51 = vor.u32 %v3885_v38, %v3439_v39  ;;  %v3187_v38 = vld [vmem:[%s4489_s26 + $0x1f4] sm:$0xf0]  ;;  %v3195_v48 = vld [vmem:[%s4489_s26 + $0x1fc] sm:$0xf0] }
 0x1a4   : > { %vm2611_vm15 = vcmp.gt.f32.partialorder %v1943_v59, 0.0  ;;  %v2676_v1 = vmul.f32 0.2, %v1943_v59  ;;  %v1956_v2 = vpop.f32.mrf.mxu3  ;;  %v1932_v4 = vpop.f32.mrf.mxu1  ;;  %2447 = vmatpush.bf16.msrb.mxu1 %v3418_v54  ;;  %v3178_v0 = vor.u32 %v3852_v52, %v3177_v49  ;;  %v3193_v39 = vld [vmem:[%s4489_s26 + $0xf8] sm:$0xf] }
 0x1a5   : > { %vm2612_vm1 = vcmp.gt.f32.partialorder %v1956_v2, 0.0  ;;  %v2677_v5 = vmul.f32 0.2, %v1956_v2  ;;  %2460 = vmatpush.bf16.msrb.mxu2 %v3422_v55  ;;  %v3705_v4 = vld [vmem:[%s4489_s26 + $0x500] sm:$0xf] }
 0x1a6   : > { %v2741_v7 = vsel %vm2611_vm15, %v1943_v59, %v2676_v1  ;;  %2473 = vmatpush.bf16.msrb.mxu3 %v3426_v60  ;;  %v3170_v60 = vor.u32 %v3851_v43, %v3169_v42  ;;  %v3854_v42 = vld [vmem:[%s4489_s26 + $0x1f8] sm:$0xf0] }
 0x1a7   : > { %v2742_v10 = vsel %vm2612_vm1, %v1956_v2, %v2677_v5  ;;  %2435 = vmatpush.bf16.msrb.mxu0 %v3154_v6  ;;  %v3182_v2 = vor.u32 %v3820_v53, %v3179_v57  ;;  %v3983_v5 = vld [vmem:[%s4489_s26 + $0x600] sm:$0xf0]  ;;  %v3822_v43 = vld [vmem:[%s4489_s26 + $0xfc] sm:$0xf] }
 0x1a8   : > { %v2799_v12 = vpack.c.bf16 %v2742_v10, %v2741_v7  ;;  %2448 = vmatpush.bf16.msrb.mxu1 %v3158_v8  ;;  %v3951_v6 = vld [vmem:[%s4489_s26 + $0x504] sm:$0xf]  ;;  %v3707_v8 = vld [vmem:[%s4489_s26 + $0x604] sm:$0xf0]  ;;  %v3984_v10 = vld [vmem:[%s4489_s26 + $0x608] sm:$0xf0]  ;;  %v3706_v18 = vor.u32 %v3983_v5, %v3705_v4 }
 0x1a9   : > { %2461 = vmatpush.bf16.msrb.mxu2 %v3162_v9  ;;  %v3713_v9 = vld [vmem:[%s4489_s26 + $0x508] sm:$0xf]  ;;  %v3920_v5 = vld [vmem:[%s4489_s26 + $0x408] sm:$0xf0] }
 0x1aa   : > { %2832 = vst [vmem:[%s4824_s5 + $0x38] sm:$0xff] %v2799_v12  ;;  %2474 = vmatpush.bf16.msrb.mxu3 %v3166_v11  ;;  %v3714_v22 = vor.u32 %v3984_v10, %v3713_v9  ;;  %v3201_v10 = vld [vmem:[%s4489_s26 + $0x100] sm:$0xf] }
 0x1ab   : > { %v1945_v16 = vpop.f32.mrf.mxu2  ;;  %v1969_v21 = vpop.f32.mrf.mxu0 }
 0x1ac   : > { %v1958_v20 = vpop.f32.mrf.mxu3  ;;  %vm2613_vm2 = vcmp.gt.f32.partialorder %v1969_v21, 0.0  ;;  %v2678_v25 = vmul.f32 0.2, %v1969_v21  ;;  %v1982_v45 = vpop.f32.mrf.mxu1 }
 0x1ad   : > { %vm2614_vm3 = vcmp.gt.f32.partialorder %v1982_v45, 0.0  ;;  %v2679_v28 = vmul.f32 0.2, %v1982_v45 }
 0x1ae   : > { %v2743_v32 = vsel %vm2613_vm2, %v1969_v21, %v2678_v25  ;;  %3771 = vmatmul.msk.bf16.vlgmr.msra.gmra.mxu0 %vm1748_vm0, %v4858_v61  ;;  %v3710_v21 = vor.u32 %v3951_v6, %v3707_v8  ;;  %v3718_v25 = vor.u32 %v3952_v14, %v3715_v15 }
 0x1af   : > { %v2744_v37 = vsel %vm2614_vm3, %v1982_v45, %v2679_v28  ;;  %3772 = vmatmul.msk.bf16.vlgmr.msra.gmra.mxu1 %vm1748_vm0, %v4858_v61  ;;  %2485 = vmatpush.bf16.msra.mxu0 %v3690_v26  ;;  %v3447_v45 = vld [vmem:[%s4489_s26 + $0x3fc] sm:$0xf0] }
 0x1b0   : > { %3773 = vmatmul.msk.bf16.vlgmr.msra.gmra.mxu2 %vm1748_vm0, %v4858_v61  ;;  %v2800_v40 = vpack.c.bf16 %v2744_v37, %v2743_v32  ;;  %2498 = vmatpush.bf16.msra.mxu1 %v3694_v29  ;;  %v3453_v26 = vld [vmem:[%s4489_s26 + $0x300] sm:$0xf]  ;;  %v3887_v29 = vld [vmem:[%s4489_s26 + $0x304] sm:$0xf]  ;;  %v3446_v32 = vor.u32 %v3918_v19, %v3445_v13  ;;  %v3450_v35 = vor.u32 %v3886_v23, %v3447_v45  ;;  %v3821_v37 = vld [vmem:[%s4489_s26 + $0xf4] sm:$0xf] }
 0x1b1   : > { %3774 = vmatmul.msk.bf16.vlgmr.msra.gmra.mxu3 %vm1748_vm0, %v4858_v61  ;;  %2511 = vmatpush.bf16.msra.mxu2 %v3698_v30  ;;  %v3455_v30 = vld [vmem:[%s4489_s26 + $0x404] sm:$0xf0]  ;;  %v3454_v36 = vor.u32 %v3919_v27, %v3453_v26  ;;  %v3190_v53 = vor.u32 %v3821_v37, %v3187_v38 }
 0x1b2   : > { %2833 = vst [vmem:[%s4824_s5 + $0x40] sm:$0xff] %v2800_v40  ;;  %2524 = vmatpush.bf16.msra.mxu3 %v3702_v33  ;;  %v3185_v33 = vld [vmem:[%s4489_s26 + $0xf0] sm:$0xf] }
 0x1b3   : > { %v1995_v50 = vpop.f32.mrf.mxu2  ;;  %v1971_v54 = vpop.f32.mrf.mxu0  ;;  %2486 = vmatpush.bf16.msra.mxu0 %v3430_v41  ;;  %v3458_v41 = vor.u32 %v3887_v29, %v3455_v30 }
 0x1b4   : > { %vm2615_vm4 = vcmp.gt.f32.partialorder %v1995_v50, 0.0  ;;  %v2680_v55 = vmul.f32 0.2, %v1995_v50  ;;  %v2008_v56 = vpop.f32.mrf.mxu3  ;;  %v1984_v58 = vpop.f32.mrf.mxu1  ;;  %2499 = vmatpush.bf16.msra.mxu1 %v3434_v44  ;;  %v3194_v54 = vor.u32 %v3854_v42, %v3193_v39 }
 0x1b5   : > { %vm2616_vm5 = vcmp.gt.f32.partialorder %v2008_v56, 0.0  ;;  %v2681_v59 = vmul.f32 0.2, %v2008_v56  ;;  %2512 = vmatpush.bf16.msra.mxu2 %v3438_v46  ;;  %v3721_v58 = vld [vmem:[%s4489_s26 + $0x510] sm:$0xf] }
 0x1b6   : > { %v2745_v62 = vsel %vm2615_vm4, %v1995_v50, %v2680_v55  ;;  %2525 = vmatpush.bf16.msra.mxu3 %v3442_v51  ;;  %v3186_v51 = vor.u32 %v3853_v34, %v3185_v33 }
 0x1b7   : > { %v2746_v1 = vsel %vm2616_vm5, %v2008_v56, %v2681_v59  ;;  %2487 = vmatpush.bf16.msra.mxu0 %v3170_v60  ;;  %v3198_v56 = vor.u32 %v3822_v43, %v3195_v48  ;;  %v3985_v59 = vld [vmem:[%s4489_s26 + $0x610] sm:$0xf0] }
 0x1b8   : > { %v2801_v3 = vpack.c.bf16 %v2746_v1, %v2745_v62  ;;  %2500 = vmatpush.bf16.msra.mxu1 %v3174_v63 }
 0x1b9   : > { %2513 = vmatpush.bf16.msra.mxu2 %v3178_v0 }
 0x1ba   : > { %2834 = vst [vmem:[%s4824_s5 + $0x48] sm:$0xff] %v2801_v3  ;;  %2526 = vmatpush.bf16.msra.mxu3 %v3182_v2  ;;  %v3722_v2 = vor.u32 %v3985_v59, %v3721_v58  ;;  %v3461_v3 = vld [vmem:[%s4489_s26 + $0x308] sm:$0xf] }
 0x1bb   : > { %v1997_v7 = vpop.f32.mrf.mxu2  ;;  %v2021_v12 = vpop.f32.mrf.mxu0  ;;  %v3462_v9 = vor.u32 %v3920_v5, %v3461_v3 }
 0x1bc   : > { %v2010_v11 = vpop.f32.mrf.mxu3  ;;  %vm2617_vm6 = vcmp.gt.f32.partialorder %v2021_v12, 0.0  ;;  %v2682_v16 = vmul.f32 0.2, %v2021_v12  ;;  %v2034_v17 = vpop.f32.mrf.mxu1 }
 0x1bd   : > { %vm2618_vm7 = vcmp.gt.f32.partialorder %v2034_v17, 0.0  ;;  %v2683_v20 = vmul.f32 0.2, %v2034_v17  ;;  %v3855_v11 = vld [vmem:[%s4489_s26 + $0x200] sm:$0xf0] }
 0x1be   : > { %v2747_v24 = vsel %vm2617_vm6, %v2021_v12, %v2682_v16  ;;  %3775 = vmatmul.msk.bf16.vlgmr.msrb.gmra.mxu0 %vm1748_vm0, %v4858_v61 }
 0x1bf   : > { %v2748_v28 = vsel %vm2618_vm7, %v2034_v17, %v2683_v20  ;;  %3776 = vmatmul.msk.bf16.vlgmr.msrb.gmra.mxu1 %vm1748_vm0, %v4858_v61  ;;  %2537 = vmatpush.bf16.msrb.mxu0 %v3706_v18  ;;  %v3202_v18 = vor.u32 %v3855_v11, %v3201_v10 }
 0x1c0   : > { %3777 = vmatmul.msk.bf16.vlgmr.msrb.gmra.mxu2 %vm1748_vm0, %v4858_v61  ;;  %v2802_v31 = vpack.c.bf16 %v2748_v28, %v2747_v24  ;;  %2550 = vmatpush.bf16.msrb.mxu1 %v3710_v21 }
 0x1c1   : > { %3778 = vmatmul.msk.bf16.vlgmr.msrb.gmra.mxu3 %vm1748_vm0, %v4858_v61  ;;  %2563 = vmatpush.bf16.msrb.mxu2 %v3714_v22 }
 0x1c2   : > { %2835 = vst [vmem:[%s4824_s5 + $0x50] sm:$0xff] %v2802_v31  ;;  %2576 = vmatpush.bf16.msrb.mxu3 %v3718_v25 }
 0x1c3   : > { %v2047_v40 = vpop.f32.mrf.mxu2  ;;  %v2023_v44 = vpop.f32.mrf.mxu0  ;;  %2538 = vmatpush.bf16.msrb.mxu0 %v3446_v32 }
 0x1c4   : > { %vm2619_vm8 = vcmp.gt.f32.partialorder %v2047_v40, 0.0  ;;  %v2684_v46 = vmul.f32 0.2, %v2047_v40  ;;  %v2060_v47 = vpop.f32.mrf.mxu3  ;;  %v2036_v49 = vpop.f32.mrf.mxu1  ;;  %2551 = vmatpush.bf16.msrb.mxu1 %v3450_v35 }
 0x1c5   : > { %vm2620_vm9 = vcmp.gt.f32.partialorder %v2060_v47, 0.0  ;;  %v2685_v50 = vmul.f32 0.2, %v2060_v47  ;;  %2564 = vmatpush.bf16.msrb.mxu2 %v3454_v36 }
 0x1c6   : > { %v2749_v52 = vsel %vm2619_vm8, %v2047_v40, %v2684_v46  ;;  %2577 = vmatpush.bf16.msrb.mxu3 %v3458_v41 }
 0x1c7   : > { %v2750_v55 = vsel %vm2620_vm9, %v2060_v47, %v2685_v50  ;;  %2539 = vmatpush.bf16.msrb.mxu0 %v3186_v51 }
 0x1c8   : > { %v2803_v57 = vpack.c.bf16 %v2750_v55, %v2749_v52  ;;  %2552 = vmatpush.bf16.msrb.mxu1 %v3190_v53 }
 0x1c9   : > { %2565 = vmatpush.bf16.msrb.mxu2 %v3194_v54 }
 0x1ca   : > { %2836 = vst [vmem:[%s4824_s5 + $0x58] sm:$0xff] %v2803_v57  ;;  %2578 = vmatpush.bf16.msrb.mxu3 %v3198_v56 }
 0x1cb   : > { %v2049_v60 = vpop.f32.mrf.mxu2  ;;  %v2073_v63 = vpop.f32.mrf.mxu0 }
 0x1cc   : > { %v2062_v62 = vpop.f32.mrf.mxu3  ;;  %vm2621_vm10 = vcmp.gt.f32.partialorder %v2073_v63, 0.0  ;;  %v2686_v0 = vmul.f32 0.2, %v2073_v63  ;;  %v2086_v1 = vpop.f32.mrf.mxu1 }
 0x1cd   : > { %vm2622_vm11 = vcmp.gt.f32.partialorder %v2086_v1, 0.0  ;;  %v2687_v4 = vmul.f32 0.2, %v2086_v1 }
 0x1ce   : > { %v2751_v6 = vsel %vm2621_vm10, %v2073_v63, %v2686_v0  ;;  %3779 = vmatmul.msk.bf16.vlgmr.msra.gmra.mxu0 %vm1748_vm0, %v4858_v61 }
 0x1cf   : > { %v2752_v7 = vsel %vm2622_vm11, %v2086_v1, %v2687_v4  ;;  %3780 = vmatmul.msk.bf16.vlgmr.msra.gmra.mxu1 %vm1748_vm0, %v4858_v61  ;;  %2589 = vmatpush.bf16.msra.mxu0 %v3722_v2 }
 0x1d0   : > { %3781 = vmatmul.msk.bf16.vlgmr.msra.gmra.mxu2 %vm1748_vm0, %v4858_v61  ;;  %v2804_v8 = vpack.c.bf16 %v2752_v7, %v2751_v6 }
 0x1d1   : > { %3782 = vmatmul.msk.bf16.vlgmr.msra.gmra.mxu3 %vm1748_vm0, %v4858_v61 }
 0x1d2   : > { %2837 = vst [vmem:[%s4824_s5 + $0x60] sm:$0xff] %v2804_v8 }
 0x1d3   : > { %v2099_v12 = vpop.f32.mrf.mxu2  ;;  %v2075_v13 = vpop.f32.mrf.mxu0  ;;  %2590 = vmatpush.bf16.msra.mxu0 %v3462_v9 }
 0x1d4   : > { %vm2623_vm12 = vcmp.gt.f32.partialorder %v2099_v12, 0.0  ;;  %v2688_v14 = vmul.f32 0.2, %v2099_v12  ;;  %v2112_v15 = vpop.f32.mrf.mxu3  ;;  %v2088_v16 = vpop.f32.mrf.mxu1 }
 0x1d5   : > { %vm2624_vm13 = vcmp.gt.f32.partialorder %v2112_v15, 0.0  ;;  %v2689_v17 = vmul.f32 0.2, %v2112_v15 }
 0x1d6   : > { %v2753_v19 = vsel %vm2623_vm12, %v2099_v12, %v2688_v14 }
 0x1d7   : > { %v2754_v20 = vsel %vm2624_vm13, %v2112_v15, %v2689_v17  ;;  %2591 = vmatpush.bf16.msra.mxu0 %v3202_v18 }
 0x1d8   : > { %v2805_v21 = vpack.c.bf16 %v2754_v20, %v2753_v19 }
 0x1da   : > { %2838 = vst [vmem:[%s4824_s5 + $0x68] sm:$0xff] %v2805_v21 }
 0x1db   : > { %v2101_v22 = vpop.f32.mrf.mxu2  ;;  %v2125_v24 = vpop.f32.mrf.mxu0 }
 0x1dc   : > { %v2114_v23 = vpop.f32.mrf.mxu3  ;;  %vm2625_vm14 = vcmp.gt.f32.partialorder %v2125_v24, 0.0  ;;  %v2690_v25 = vmul.f32 0.2, %v2125_v24  ;;  %v2138_v45 = vpop.f32.mrf.mxu1 }
 0x1dd   : > { %vm2626_vm15 = vcmp.gt.f32.partialorder %v2138_v45, 0.0  ;;  %v2691_v26 = vmul.f32 0.2, %v2138_v45 }
 0x1de   : > { %v2755_v27 = vsel %vm2625_vm14, %v2125_v24, %v2690_v25  ;;  %3783 = vmatmul.msk.bf16.vlgmr.msrb.gmra.mxu0 %vm1748_vm0, %v4858_v61 }
 0x1df   : > { %v2756_v28 = vsel %vm2626_vm15, %v2138_v45, %v2691_v26  ;;  %3784 = vmatmul.msk.bf16.vlgmr.msrb.gmra.mxu1 %vm1748_vm0, %v4858_v61 }
 0x1e0   : > { %3785 = vmatmul.msk.bf16.vlgmr.msrb.gmra.mxu2 %vm1748_vm0, %v4858_v61  ;;  %v2806_v29 = vpack.c.bf16 %v2756_v28, %v2755_v27 }
 0x1e1   : > { %3786 = vmatmul.msk.bf16.vlgmr.msrb.gmra.mxu3 %vm1748_vm0, %v4858_v61 }
 0x1e2   : > { %2839 = vst [vmem:[%s4824_s5 + $0x70] sm:$0xff] %v2806_v29 }
 0x1e3   : > { %v2151_v30 = vpop.f32.mrf.mxu2  ;;  %v2127_v31 = vpop.f32.mrf.mxu0 }
 0x1e4   : > { %vm2627_vm1 = vcmp.gt.f32.partialorder %v2151_v30, 0.0  ;;  %v2692_v32 = vmul.f32 0.2, %v2151_v30  ;;  %v2164_v33 = vpop.f32.mrf.mxu3  ;;  %v2140_v34 = vpop.f32.mrf.mxu1 }
 0x1e5   : > { %vm2628_vm2 = vcmp.gt.f32.partialorder %v2164_v33, 0.0  ;;  %v2693_v35 = vmul.f32 0.2, %v2164_v33 }
 0x1e6   : > { %v2757_v36 = vsel %vm2627_vm1, %v2151_v30, %v2692_v32 }
 0x1e7   : > { %v2758_v37 = vsel %vm2628_vm2, %v2164_v33, %v2693_v35 }
 0x1e8   : > { %v2807_v38 = vpack.c.bf16 %v2758_v37, %v2757_v36 }
 0x1ea   : > { %2840 = vst [vmem:[%s4824_s5 + $0x78] sm:$0xff] %v2807_v38 }
 0x1eb   : > { %v2153_v39 = vpop.f32.mrf.mxu2  ;;  %v2177_v41 = vpop.f32.mrf.mxu0 }
 0x1ec   : > { %v2166_v40 = vpop.f32.mrf.mxu3  ;;  %vm2629_vm3 = vcmp.gt.f32.partialorder %v2177_v41, 0.0  ;;  %v2694_v42 = vmul.f32 0.2, %v2177_v41  ;;  %v2190_v43 = vpop.f32.mrf.mxu1 }
 0x1ed   : > { %vm2630_vm4 = vcmp.gt.f32.partialorder %v2190_v43, 0.0  ;;  %v2695_v44 = vmul.f32 0.2, %v2190_v43 }
 0x1ee   : > { %v2759_v46 = vsel %vm2629_vm3, %v2177_v41, %v2694_v42  ;;  %3787 = vmatmul.msk.bf16.vlgmr.msra.gmra.mxu0 %vm1748_vm0, %v4858_v61 }
 0x1ef   : > { %v2760_v47 = vsel %vm2630_vm4, %v2190_v43, %v2695_v44 }
 0x1f0   : > { %v2808_v48 = vpack.c.bf16 %v2760_v47, %v2759_v46 }
 0x1f2   : > { %2841 = vst [vmem:[%s4824_s5 + $0x80] sm:$0xff] %v2808_v48 }
 0x1f3   : > { %v2203_v49 = vpop.f32.mrf.mxu2  ;;  %v2179_v50 = vpop.f32.mrf.mxu0 }
 0x1f4   : > { %vm2631_vm5 = vcmp.gt.f32.partialorder %v2203_v49, 0.0  ;;  %v2696_v51 = vmul.f32 0.2, %v2203_v49  ;;  %v2216_v52 = vpop.f32.mrf.mxu3  ;;  %v2192_v53 = vpop.f32.mrf.mxu1 }
 0x1f5   : > { %vm2632_vm6 = vcmp.gt.f32.partialorder %v2216_v52, 0.0  ;;  %v2697_v54 = vmul.f32 0.2, %v2216_v52 }
 0x1f6   : > { %v2761_v55 = vsel %vm2631_vm5, %v2203_v49, %v2696_v51 }
 0x1f7   : > { %v2762_v56 = vsel %vm2632_vm6, %v2216_v52, %v2697_v54 }
 0x1f8   : > { %v2809_v57 = vpack.c.bf16 %v2762_v56, %v2761_v55 }
 0x1fa   : > { %2842 = vst [vmem:[%s4824_s5 + $0x88] sm:$0xff] %v2809_v57 }
 0x1fb   : > { %v2205_v58 = vpop.f32.mrf.mxu2  ;;  %v2229_v60 = vpop.f32.mrf.mxu0 }
 0x1fc   : > { %v2218_v59 = vpop.f32.mrf.mxu3  ;;  %vm2633_vm0 = vcmp.gt.f32.partialorder %v2229_v60, 0.0  ;;  %v2698_v61 = vmul.f32 0.2, %v2229_v60  ;;  %v2242_v62 = vpop.f32.mrf.mxu1 }
 0x1fd   : > { %vm2634_vm7 = vcmp.gt.f32.partialorder %v2242_v62, 0.0  ;;  %v2699_v63 = vmul.f32 0.2, %v2242_v62 }
 0x1fe   : > { %v2763_v0 = vsel %vm2633_vm0, %v2229_v60, %v2698_v61 }
 0x1ff   : > { %v2764_v1 = vsel %vm2634_vm7, %v2242_v62, %v2699_v63 }
 0x200   : > { %v2810_v2 = vpack.c.bf16 %v2764_v1, %v2763_v0 }
 0x202   : > { %2843 = vst [vmem:[%s4824_s5 + $0x90] sm:$0xff] %v2810_v2 }
 0x203   : > { %v2255_v3 = vpop.f32.mrf.mxu2  ;;  %v2231_v4 = vpop.f32.mrf.mxu0 }
 0x204   : > { %vm2635_vm8 = vcmp.gt.f32.partialorder %v2255_v3, 0.0  ;;  %v2700_v5 = vmul.f32 0.2, %v2255_v3  ;;  %v2268_v6 = vpop.f32.mrf.mxu3  ;;  %v2244_v7 = vpop.f32.mrf.mxu1 }
 0x205   : > { %vm2636_vm9 = vcmp.gt.f32.partialorder %v2268_v6, 0.0  ;;  %v2701_v8 = vmul.f32 0.2, %v2268_v6 }
 0x206   : > { %v2765_v9 = vsel %vm2635_vm8, %v2255_v3, %v2700_v5 }
 0x207   : > { %v2766_v10 = vsel %vm2636_vm9, %v2268_v6, %v2701_v8 }
 0x208   : > { %v2811_v11 = vpack.c.bf16 %v2766_v10, %v2765_v9 }
 0x20a   : > { %2844 = vst [vmem:[%s4824_s5 + $0x98] sm:$0xff] %v2811_v11 }
 0x20b   : > { %v2257_v12 = vpop.f32.mrf.mxu2  ;;  %v2281_v14 = vpop.f32.mrf.mxu0 }
 0x20c   : > { %v2270_v13 = vpop.f32.mrf.mxu3  ;;  %vm2637_vm10 = vcmp.gt.f32.partialorder %v2281_v14, 0.0  ;;  %v2702_v15 = vmul.f32 0.2, %v2281_v14  ;;  %v2294_v16 = vpop.f32.mrf.mxu1 }
 0x20d   : > { %vm2638_vm11 = vcmp.gt.f32.partialorder %v2294_v16, 0.0  ;;  %v2703_v17 = vmul.f32 0.2, %v2294_v16 }
 0x20e   : > { %v2767_v18 = vsel %vm2637_vm10, %v2281_v14, %v2702_v15 }
 0x20f   : > { %v2768_v19 = vsel %vm2638_vm11, %v2294_v16, %v2703_v17 }
 0x210   : > { %v2812_v20 = vpack.c.bf16 %v2768_v19, %v2767_v18 }
 0x212   : > { %2845 = vst [vmem:[%s4824_s5 + $0xa0] sm:$0xff] %v2812_v20 }
 0x213   : > { %v2307_v21 = vpop.f32.mrf.mxu2  ;;  %v2283_v22 = vpop.f32.mrf.mxu0 }
 0x214   : > { %vm2639_vm12 = vcmp.gt.f32.partialorder %v2307_v21, 0.0  ;;  %v2704_v23 = vmul.f32 0.2, %v2307_v21  ;;  %v2320_v24 = vpop.f32.mrf.mxu3  ;;  %v2296_v25 = vpop.f32.mrf.mxu1 }
 0x215   : > { %vm2640_vm13 = vcmp.gt.f32.partialorder %v2320_v24, 0.0  ;;  %v2705_v45 = vmul.f32 0.2, %v2320_v24 }
 0x216   : > { %v2769_v26 = vsel %vm2639_vm12, %v2307_v21, %v2704_v23 }
 0x217   : > { %v2770_v27 = vsel %vm2640_vm13, %v2320_v24, %v2705_v45 }
 0x218   : > { %v2813_v28 = vpack.c.bf16 %v2770_v27, %v2769_v26 }
 0x21a   : > { %2846 = vst [vmem:[%s4824_s5 + $0xa8] sm:$0xff] %v2813_v28 }
 0x21b   : > { %v2309_v29 = vpop.f32.mrf.mxu2  ;;  %v2333_v31 = vpop.f32.mrf.mxu0 }
 0x21c   : > { %v2322_v30 = vpop.f32.mrf.mxu3  ;;  %vm2641_vm14 = vcmp.gt.f32.partialorder %v2333_v31, 0.0  ;;  %v2706_v32 = vmul.f32 0.2, %v2333_v31  ;;  %v2346_v33 = vpop.f32.mrf.mxu1 }
 0x21d   : > { %vm2642_vm15 = vcmp.gt.f32.partialorder %v2346_v33, 0.0  ;;  %v2707_v34 = vmul.f32 0.2, %v2346_v33 }
 0x21e   : > { %v2771_v35 = vsel %vm2641_vm14, %v2333_v31, %v2706_v32 }
 0x21f   : > { %v2772_v36 = vsel %vm2642_vm15, %v2346_v33, %v2707_v34 }
 0x220   : > { %v2814_v37 = vpack.c.bf16 %v2772_v36, %v2771_v35 }
 0x222   : > { %2847 = vst [vmem:[%s4824_s5 + $0xb0] sm:$0xff] %v2814_v37 }
 0x223   : > { %v2359_v38 = vpop.f32.mrf.mxu2  ;;  %v2335_v39 = vpop.f32.mrf.mxu0 }
 0x224   : > { %vm2643_vm1 = vcmp.gt.f32.partialorder %v2359_v38, 0.0  ;;  %v2708_v40 = vmul.f32 0.2, %v2359_v38  ;;  %v2372_v41 = vpop.f32.mrf.mxu3  ;;  %v2348_v42 = vpop.f32.mrf.mxu1 }
 0x225   : > { %vm2644_vm2 = vcmp.gt.f32.partialorder %v2372_v41, 0.0  ;;  %v2709_v43 = vmul.f32 0.2, %v2372_v41 }
 0x226   : > { %v2773_v44 = vsel %vm2643_vm1, %v2359_v38, %v2708_v40 }
 0x227   : > { %v2774_v46 = vsel %vm2644_vm2, %v2372_v41, %v2709_v43 }
 0x228   : > { %v2815_v47 = vpack.c.bf16 %v2774_v46, %v2773_v44 }
 0x22a   : > { %2848 = vst [vmem:[%s4824_s5 + $0xb8] sm:$0xff] %v2815_v47 }
 0x22b   : > { %v2361_v48 = vpop.f32.mrf.mxu2  ;;  %v2385_v50 = vpop.f32.mrf.mxu0 }
 0x22c   : > { %v2374_v49 = vpop.f32.mrf.mxu3  ;;  %vm2645_vm3 = vcmp.gt.f32.partialorder %v2385_v50, 0.0  ;;  %v2710_v51 = vmul.f32 0.2, %v2385_v50  ;;  %v2398_v52 = vpop.f32.mrf.mxu1 }
 0x22d   : > { %vm2646_vm4 = vcmp.gt.f32.partialorder %v2398_v52, 0.0  ;;  %v2711_v53 = vmul.f32 0.2, %v2398_v52 }
 0x22e   : > { %v2775_v54 = vsel %vm2645_vm3, %v2385_v50, %v2710_v51 }
 0x22f   : > { %v2776_v55 = vsel %vm2646_vm4, %v2398_v52, %v2711_v53 }
 0x230   : > { %v2816_v56 = vpack.c.bf16 %v2776_v55, %v2775_v54 }
 0x232   : > { %2849 = vst [vmem:[%s4824_s5 + $0xc0] sm:$0xff] %v2816_v56 }
 0x233   : > { %v2411_v57 = vpop.f32.mrf.mxu2  ;;  %v2387_v58 = vpop.f32.mrf.mxu0 }
 0x234   : > { %vm2647_vm5 = vcmp.gt.f32.partialorder %v2411_v57, 0.0  ;;  %v2712_v59 = vmul.f32 0.2, %v2411_v57  ;;  %v2424_v60 = vpop.f32.mrf.mxu3  ;;  %v2400_v61 = vpop.f32.mrf.mxu1 }
 0x235   : > { %vm2648_vm6 = vcmp.gt.f32.partialorder %v2424_v60, 0.0  ;;  %v2713_v62 = vmul.f32 0.2, %v2424_v60 }
 0x236   : > { %v2777_v63 = vsel %vm2647_vm5, %v2411_v57, %v2712_v59 }
 0x237   : > { %v2778_v0 = vsel %vm2648_vm6, %v2424_v60, %v2713_v62 }
 0x238   : > { %v2817_v1 = vpack.c.bf16 %v2778_v0, %v2777_v63 }
 0x23a   : > { %2850 = vst [vmem:[%s4824_s5 + $0xc8] sm:$0xff] %v2817_v1 }
 0x23b   : > { %v2413_v2 = vpop.f32.mrf.mxu2  ;;  %v2437_v4 = vpop.f32.mrf.mxu0 }
 0x23c   : > { %v2426_v3 = vpop.f32.mrf.mxu3  ;;  %vm2649_vm0 = vcmp.gt.f32.partialorder %v2437_v4, 0.0  ;;  %v2714_v5 = vmul.f32 0.2, %v2437_v4  ;;  %v2450_v6 = vpop.f32.mrf.mxu1 }
 0x23d   : > { %vm2650_vm7 = vcmp.gt.f32.partialorder %v2450_v6, 0.0  ;;  %v2715_v7 = vmul.f32 0.2, %v2450_v6 }
 0x23e   : > { %v2779_v8 = vsel %vm2649_vm0, %v2437_v4, %v2714_v5 }
 0x23f   : > { %v2780_v9 = vsel %vm2650_vm7, %v2450_v6, %v2715_v7 }
 0x240   : > { %v2818_v10 = vpack.c.bf16 %v2780_v9, %v2779_v8 }
 0x242   : > { %2851 = vst [vmem:[%s4824_s5 + $0xd0] sm:$0xff] %v2818_v10 }
 0x243   : > { %v2463_v11 = vpop.f32.mrf.mxu2  ;;  %v2439_v12 = vpop.f32.mrf.mxu0 }
 0x244   : > { %vm2651_vm8 = vcmp.gt.f32.partialorder %v2463_v11, 0.0  ;;  %v2716_v13 = vmul.f32 0.2, %v2463_v11  ;;  %v2476_v14 = vpop.f32.mrf.mxu3  ;;  %v2452_v15 = vpop.f32.mrf.mxu1 }
 0x245   : > { %vm2652_vm9 = vcmp.gt.f32.partialorder %v2476_v14, 0.0  ;;  %v2717_v16 = vmul.f32 0.2, %v2476_v14 }
 0x246   : > { %v2781_v17 = vsel %vm2651_vm8, %v2463_v11, %v2716_v13 }
 0x247   : > { %v2782_v18 = vsel %vm2652_vm9, %v2476_v14, %v2717_v16 }
 0x248   : > { %v2819_v19 = vpack.c.bf16 %v2782_v18, %v2781_v17 }
 0x24a   : > { %2852 = vst [vmem:[%s4824_s5 + $0xd8] sm:$0xff] %v2819_v19 }
 0x24b   : > { %v2465_v20 = vpop.f32.mrf.mxu2  ;;  %v2489_v22 = vpop.f32.mrf.mxu0 }
 0x24c   : > { %v2478_v21 = vpop.f32.mrf.mxu3  ;;  %vm2653_vm10 = vcmp.gt.f32.partialorder %v2489_v22, 0.0  ;;  %v2718_v23 = vmul.f32 0.2, %v2489_v22  ;;  %v2502_v24 = vpop.f32.mrf.mxu1 }
 0x24d   : > { %vm2654_vm11 = vcmp.gt.f32.partialorder %v2502_v24, 0.0  ;;  %v2719_v25 = vmul.f32 0.2, %v2502_v24 }
 0x24e   : > { %v2783_v45 = vsel %vm2653_vm10, %v2489_v22, %v2718_v23 }
 0x24f   : > { %v2784_v26 = vsel %vm2654_vm11, %v2502_v24, %v2719_v25 }
 0x250   : > { %v2820_v27 = vpack.c.bf16 %v2784_v26, %v2783_v45 }
 0x252   : > { %2853 = vst [vmem:[%s4824_s5 + $0xe0] sm:$0xff] %v2820_v27 }
 0x253   : > { %v2515_v28 = vpop.f32.mrf.mxu2  ;;  %v2491_v29 = vpop.f32.mrf.mxu0 }
 0x254   : > { %vm2655_vm12 = vcmp.gt.f32.partialorder %v2515_v28, 0.0  ;;  %v2720_v30 = vmul.f32 0.2, %v2515_v28  ;;  %v2528_v31 = vpop.f32.mrf.mxu3  ;;  %v2504_v32 = vpop.f32.mrf.mxu1 }
 0x255   : > { %vm2656_vm13 = vcmp.gt.f32.partialorder %v2528_v31, 0.0  ;;  %v2721_v33 = vmul.f32 0.2, %v2528_v31 }
 0x256   : > { %v2785_v34 = vsel %vm2655_vm12, %v2515_v28, %v2720_v30 }
 0x257   : > { %v2786_v35 = vsel %vm2656_vm13, %v2528_v31, %v2721_v33 }
 0x258   : > { %v2821_v36 = vpack.c.bf16 %v2786_v35, %v2785_v34 }
 0x25a   : > { %2854 = vst [vmem:[%s4824_s5 + $0xe8] sm:$0xff] %v2821_v36 }
 0x25b   : > { %v2517_v37 = vpop.f32.mrf.mxu2  ;;  %v2541_v39 = vpop.f32.mrf.mxu0 }
 0x25c   : > { %v2530_v38 = vpop.f32.mrf.mxu3  ;;  %vm2657_vm14 = vcmp.gt.f32.partialorder %v2541_v39, 0.0  ;;  %v2722_v40 = vmul.f32 0.2, %v2541_v39  ;;  %v2554_v41 = vpop.f32.mrf.mxu1 }
 0x25d   : > { %vm2658_vm15 = vcmp.gt.f32.partialorder %v2554_v41, 0.0  ;;  %v2723_v42 = vmul.f32 0.2, %v2554_v41 }
 0x25e   : > { %v2787_v43 = vsel %vm2657_vm14, %v2541_v39, %v2722_v40 }
 0x25f   : > { %v2788_v44 = vsel %vm2658_vm15, %v2554_v41, %v2723_v42 }
 0x260   : > { %v2822_v46 = vpack.c.bf16 %v2788_v44, %v2787_v43 }
 0x262   : > { %2855 = vst [vmem:[%s4824_s5 + $0xf0] sm:$0xff] %v2822_v46 }
 0x263   : > { %v2567_v47 = vpop.f32.mrf.mxu2  ;;  %v2543_v48 = vpop.f32.mrf.mxu0 }
 0x264   : > { %vm2659_vm1 = vcmp.gt.f32.partialorder %v2567_v47, 0.0  ;;  %v2724_v49 = vmul.f32 0.2, %v2567_v47  ;;  %v2580_v50 = vpop.f32.mrf.mxu3  ;;  %v2556_v52 = vpop.f32.mrf.mxu1 }
 0x265   : > { %vm2660_vm2 = vcmp.gt.f32.partialorder %v2580_v50, 0.0  ;;  %v2725_v51 = vmul.f32 0.2, %v2580_v50 }
 0x266   : > { %v2789_v53 = vsel %vm2659_vm1, %v2567_v47, %v2724_v49 }
 0x267   : > { %v2790_v54 = vsel %vm2660_vm2, %v2580_v50, %v2725_v51 }
 0x268   : > { %v2823_v55 = vpack.c.bf16 %v2790_v54, %v2789_v53 }
 0x26a   : > { %2856 = vst [vmem:[%s4824_s5 + $0xf8] sm:$0xff] %v2823_v55 }
 0x26b   : > { %v2569_v56 = vpop.f32.mrf.mxu2  ;;  %v2593_v58 = vpop.f32.mrf.mxu0 }
 0x26c   : > { %v2582_v57 = vpop.f32.mrf.mxu3  ;;  %vm2661_vm3 = vcmp.gt.f32.partialorder %v2593_v58, 0.0  ;;  %v2726_v59 = vmul.f32 0.2, %v2593_v58 }
 0x26e   : > { %v2791_v60 = vsel %vm2661_vm3, %v2593_v58, %v2726_v59 }
 0x26f   : > { %v2824_v61 = vpack.c.bf16 %v2791_v60, %v2791_v60 }
 0x271   : > { %2857 = vst [vmem:[%s4824_s5 + $0x100] sm:$0xf] %v2824_v61 }
 0x273   : > { %v2595_v62 = vpop.f32.mrf.mxu0 }
 0x274 PF: > { %p9_p9 = scmp.ge.s32.totalorder %s4069_s13, 4   ;;  %s5077_s9 = smov %s4031_s10 }
 0x275   : > { %s5078_s10 = smov %s4078_s16  ;;  %s5079_s11 = smov %s4069_s13 }
 0x276   :  { %11 = sbr.rel (!%p9_p9) target bundleno = 2 (0x2), region = 95 }

// kernel: discriminator_forward.6
= control target key start
LH: loop header
LB: loop body
LE: loop exit
PB: predicated region body
PF: predicated region fallthrough
CT: control target
= control target key end

     0   :  { %s7491_s1 = inlined_call_operand.vmem [shape: bf16[128,4224], index: 1, kind: input, shape index: {}]   ;;  %s7492_s0 = inlined_call_operand.vmem [shape: bf16[16,128], index: 0, kind: input, shape index: {}]   ;;  %s7493_s3 = inlined_call_operand.vmem [shape: f32[16,1], index: 3, kind: input, shape index: {}]   ;;  %s7494_s2 = inlined_call_operand.vmem [shape: f32[16,1], index: 2, kind: input, shape index: {}]   ;;  %s7495_s4 = inlined_call_operand.vmem [shape: bf16[16,4224], index: 4, kind: output, shape index: {}]  }
   0x1   :  { %v3936_v0 = vld [vmem:[%s7491_s1 + $0x738] sm:$0xf]  ;;  %v4314_v1 = vld [vmem:[%s7491_s1 + $0x7b8] sm:$0xf0]  ;;  %v3944_v2 = vld [vmem:[%s7491_s1 + $0x740] sm:$0xf] }
   0x2   :  { %v3937_v3 = vor.u32 %v4314_v1, %v3936_v0  ;;  %v4315_v4 = vld [vmem:[%s7491_s1 + $0x7c0] sm:$0xf0]  ;;  %v4298_v5 = vld [vmem:[%s7491_s1 + $0x73c] sm:$0xf]  ;;  %v3938_v6 = vld [vmem:[%s7491_s1 + $0x7bc] sm:$0xf0] }
   0x3   :  { %v3945_v7 = vor.u32 %v4315_v4, %v3944_v2  ;;  %v3941_v8 = vor.u32 %v4298_v5, %v3938_v6  ;;  %v4299_v9 = vld [vmem:[%s7491_s1 + $0x744] sm:$0xf]  ;;  %v3946_v10 = vld [vmem:[%s7491_s1 + $0x7c4] sm:$0xf0]  ;;  %v3804_v11 = vld [vmem:[%s7491_s1 + $0x630] sm:$0xf] }
   0x4   :  { %1625 = vmatpush.bf16.msra.mxu0 %v3937_v3  ;;  %v3949_v12 = vor.u32 %v4299_v9, %v3946_v10  ;;  %v4281_v13 = vld [vmem:[%s7491_s1 + $0x6b0] sm:$0xf0]  ;;  %v3812_v14 = vld [vmem:[%s7491_s1 + $0x638] sm:$0xf]  ;;  %v4282_v15 = vld [vmem:[%s7491_s1 + $0x6b8] sm:$0xf0] }
   0x5   :  { %1653 = vmatpush.bf16.msra.mxu2 %v3945_v7  ;;  %1639 = vmatpush.bf16.msra.mxu1 %v3941_v8  ;;  %v3805_v16 = vor.u32 %v4281_v13, %v3804_v11  ;;  %v3813_v17 = vor.u32 %v4282_v15, %v3812_v14  ;;  %v4265_v18 = vld [vmem:[%s7491_s1 + $0x634] sm:$0xf]  ;;  %v3806_v19 = vld [vmem:[%s7491_s1 + $0x6b4] sm:$0xf0]  ;;  %v4266_v20 = vld [vmem:[%s7491_s1 + $0x63c] sm:$0xf] }
   0x6   :  { %1667 = vmatpush.bf16.msra.mxu3 %v3949_v12  ;;  %v3809_v21 = vor.u32 %v4265_v18, %v3806_v19  ;;  %v3814_v22 = vld [vmem:[%s7491_s1 + $0x6bc] sm:$0xf0]  ;;  %v3672_v23 = vld [vmem:[%s7491_s1 + $0x528] sm:$0xf]  ;;  %v4248_v24 = vld [vmem:[%s7491_s1 + $0x5a8] sm:$0xf0] }
   0x7   :  { %v3817_v25 = vor.u32 %v4266_v20, %v3814_v22  ;;  %v3680_v26 = vld [vmem:[%s7491_s1 + $0x530] sm:$0xf]  ;;  %v4249_v27 = vld [vmem:[%s7491_s1 + $0x5b0] sm:$0xf0]  ;;  %v4232_v28 = vld [vmem:[%s7491_s1 + $0x52c] sm:$0xf]  ;;  %v3673_v29 = vor.u32 %v4248_v24, %v3672_v23 }
   0x8   :  { %1626 = vmatpush.bf16.msra.mxu0 %v3805_v16  ;;  %v3674_v30 = vld [vmem:[%s7491_s1 + $0x5ac] sm:$0xf0]  ;;  %v4233_v31 = vld [vmem:[%s7491_s1 + $0x534] sm:$0xf]  ;;  %v3682_v32 = vld [vmem:[%s7491_s1 + $0x5b4] sm:$0xf0]  ;;  %v3681_v33 = vor.u32 %v4249_v27, %v3680_v26 }
   0x9   :  { %1654 = vmatpush.bf16.msra.mxu2 %v3813_v17  ;;  %1640 = vmatpush.bf16.msra.mxu1 %v3809_v21  ;;  %v3677_v34 = vor.u32 %v4232_v28, %v3674_v30  ;;  %v3540_v35 = vld [vmem:[%s7491_s1 + $0x420] sm:$0xf]  ;;  %v4215_v36 = vld [vmem:[%s7491_s1 + $0x4a0] sm:$0xf0]  ;;  %v3548_v37 = vld [vmem:[%s7491_s1 + $0x428] sm:$0xf]  ;;  %v3685_v38 = vor.u32 %v4233_v31, %v3682_v32 }
   0xa   :  { %1668 = vmatpush.bf16.msra.mxu3 %v3817_v25  ;;  %v4216_v39 = vld [vmem:[%s7491_s1 + $0x4a8] sm:$0xf0]  ;;  %v4199_v40 = vld [vmem:[%s7491_s1 + $0x424] sm:$0xf]  ;;  %v3542_v41 = vld [vmem:[%s7491_s1 + $0x4a4] sm:$0xf0]  ;;  %v3541_v44 = vor.u32 %v4215_v36, %v3540_v35 }
   0xb   :  { %v4200_v42 = vld [vmem:[%s7491_s1 + $0x42c] sm:$0xf]  ;;  %v3550_v43 = vld [vmem:[%s7491_s1 + $0x4ac] sm:$0xf0]  ;;  %v3549_v45 = vor.u32 %v4216_v39, %v3548_v37  ;;  %v3545_v46 = vor.u32 %v4199_v40, %v3542_v41  ;;  %v3408_v47 = vld [vmem:[%s7491_s1 + $0x318] sm:$0xf] }
   0xc   :  { %1627 = vmatpush.bf16.msra.mxu0 %v3673_v29  ;;  %v4182_v48 = vld [vmem:[%s7491_s1 + $0x398] sm:$0xf0]  ;;  %v3416_v49 = vld [vmem:[%s7491_s1 + $0x320] sm:$0xf]  ;;  %v3553_v50 = vor.u32 %v4200_v42, %v3550_v43  ;;  %v4183_v51 = vld [vmem:[%s7491_s1 + $0x3a0] sm:$0xf0] }
   0xd   :  { %1655 = vmatpush.bf16.msra.mxu2 %v3681_v33  ;;  %1641 = vmatpush.bf16.msra.mxu1 %v3677_v34  ;;  %v4166_v52 = vld [vmem:[%s7491_s1 + $0x31c] sm:$0xf]  ;;  %v3410_v53 = vld [vmem:[%s7491_s1 + $0x39c] sm:$0xf0]  ;;  %v4167_v54 = vld [vmem:[%s7491_s1 + $0x324] sm:$0xf]  ;;  %v3409_v56 = vor.u32 %v4182_v48, %v3408_v47  ;;  %v3417_v57 = vor.u32 %v4183_v51, %v3416_v49 }
   0xe   :  { %1669 = vmatpush.bf16.msra.mxu3 %v3685_v38  ;;  %v3418_v55 = vld [vmem:[%s7491_s1 + $0x3a4] sm:$0xf0]  ;;  %v3413_v58 = vor.u32 %v4166_v52, %v3410_v53  ;;  %v3276_v59 = vld [vmem:[%s7491_s1 + $0x210] sm:$0xf]  ;;  %v4149_v60 = vld [vmem:[%s7491_s1 + $0x290] sm:$0xf0] }
   0xf   :  { %v3284_v61 = vld [vmem:[%s7491_s1 + $0x218] sm:$0xf]  ;;  %v3421_v62 = vor.u32 %v4167_v54, %v3418_v55  ;;  %v4150_v63 = vld [vmem:[%s7491_s1 + $0x298] sm:$0xf0]  ;;  %v4133_v0 = vld [vmem:[%s7491_s1 + $0x214] sm:$0xf]  ;;  %v3277_v4 = vor.u32 %v4149_v60, %v3276_v59 }
  0x10   :  { %1628 = vmatpush.bf16.msra.mxu0 %v3541_v44  ;;  %v3278_v1 = vld [vmem:[%s7491_s1 + $0x294] sm:$0xf0]  ;;  %v4134_v2 = vld [vmem:[%s7491_s1 + $0x21c] sm:$0xf]  ;;  %v3286_v3 = vld [vmem:[%s7491_s1 + $0x29c] sm:$0xf0]  ;;  %v3285_v5 = vor.u32 %v4150_v63, %v3284_v61 }
  0x11   :  { %1656 = vmatpush.bf16.msra.mxu2 %v3549_v45  ;;  %1642 = vmatpush.bf16.msra.mxu1 %v3545_v46  ;;  %v3281_v6 = vor.u32 %v4133_v0, %v3278_v1  ;;  %v3144_v7 = vld [vmem:[%s7491_s1 + $0x108] sm:$0xf]  ;;  %v4116_v8 = vld [vmem:[%s7491_s1 + $0x188] sm:$0xf0]  ;;  %v3152_v9 = vld [vmem:[%s7491_s1 + $0x110] sm:$0xf]  ;;  %v3289_v10 = vor.u32 %v4134_v2, %v3286_v3 }
  0x12   :  { %1670 = vmatpush.bf16.msra.mxu3 %v3553_v50  ;;  %v4117_v11 = vld [vmem:[%s7491_s1 + $0x190] sm:$0xf0]  ;;  %v4100_v12 = vld [vmem:[%s7491_s1 + $0x10c] sm:$0xf]  ;;  %v3146_v13 = vld [vmem:[%s7491_s1 + $0x18c] sm:$0xf0]  ;;  %v3145_v16 = vor.u32 %v4116_v8, %v3144_v7 }
  0x13   :  { %v4101_v14 = vld [vmem:[%s7491_s1 + $0x114] sm:$0xf]  ;;  %v3154_v15 = vld [vmem:[%s7491_s1 + $0x194] sm:$0xf0]  ;;  %v3012_v17 = vld [vmem:[%s7491_s1] sm:$0xf]  ;;  %v3153_v19 = vor.u32 %v4117_v11, %v3152_v9  ;;  %v3149_v20 = vor.u32 %v4100_v12, %v3146_v13 }
  0x14   :  { %1629 = vmatpush.bf16.msra.mxu0 %v3409_v56  ;;  %v4083_v18 = vld [vmem:[%s7491_s1 + $0x80] sm:$0xf0]  ;;  %v3020_v21 = vld [vmem:[%s7491_s1 + $0x8] sm:$0xf]  ;;  %v4084_v22 = vld [vmem:[%s7491_s1 + $0x88] sm:$0xf0]  ;;  %v3157_v24 = vor.u32 %v4101_v14, %v3154_v15 }
  0x15   :  { %1657 = vmatpush.bf16.msra.mxu2 %v3417_v57  ;;  %1643 = vmatpush.bf16.msra.mxu1 %v3413_v58  ;;  %v3952_v23 = vld [vmem:[%s7491_s1 + $0x748] sm:$0xf]  ;;  %v4316_v25 = vld [vmem:[%s7491_s1 + $0x7c8] sm:$0xf0]  ;;  %v3960_v26 = vld [vmem:[%s7491_s1 + $0x750] sm:$0xf]  ;;  %v3013_v31 = vor.u32 %v4083_v18, %v3012_v17  ;;  %v3021_v35 = vor.u32 %v4084_v22, %v3020_v21 }
  0x16   :  { %1671 = vmatpush.bf16.msra.mxu3 %v3421_v62  ;;  %v4317_v27 = vld [vmem:[%s7491_s1 + $0x7d0] sm:$0xf0]  ;;  %v4067_v28 = vld [vmem:[%s7491_s1 + $0x4] sm:$0xf]  ;;  %v3014_v29 = vld [vmem:[%s7491_s1 + $0x84] sm:$0xf0]  ;;  %v3953_v36 = vor.u32 %v4316_v25, %v3952_v23 }
  0x17   :  { %v4068_v30 = vld [vmem:[%s7491_s1 + $0xc] sm:$0xf]  ;;  %v3022_v32 = vld [vmem:[%s7491_s1 + $0x8c] sm:$0xf0]  ;;  %v4301_v37 = vld [vmem:[%s7491_s1 + $0x754] sm:$0xf]  ;;  %v3961_v39 = vor.u32 %v4317_v27, %v3960_v26  ;;  %v3017_v40 = vor.u32 %v4067_v28, %v3014_v29 }
  0x18   :  { %1630 = vmatpush.bf16.msra.mxu0 %v3277_v4  ;;  %v4300_v33 = vld [vmem:[%s7491_s1 + $0x74c] sm:$0xf]  ;;  %v3954_v34 = vld [vmem:[%s7491_s1 + $0x7cc] sm:$0xf0]  ;;  %v3962_v38 = vld [vmem:[%s7491_s1 + $0x7d4] sm:$0xf0]  ;;  %v3025_v43 = vor.u32 %v4068_v30, %v3022_v32 }
  0x19   :  { %1658 = vmatpush.bf16.msra.mxu2 %v3285_v5  ;;  %1644 = vmatpush.bf16.msra.mxu1 %v3281_v6  ;;  %v3820_v41 = vld [vmem:[%s7491_s1 + $0x640] sm:$0xf]  ;;  %v4283_v42 = vld [vmem:[%s7491_s1 + $0x6c0] sm:$0xf0]  ;;  %v3957_v44 = vor.u32 %v4300_v33, %v3954_v34  ;;  %v3828_v45 = vld [vmem:[%s7491_s1 + $0x648] sm:$0xf]  ;;  %v3965_v47 = vor.u32 %v4301_v37, %v3962_v38 }
  0x1a   :  { %1672 = vmatpush.bf16.msra.mxu3 %v3289_v10  ;;  %v4284_v46 = vld [vmem:[%s7491_s1 + $0x6c8] sm:$0xf0]  ;;  %v4267_v48 = vld [vmem:[%s7491_s1 + $0x644] sm:$0xf]  ;;  %v3822_v49 = vld [vmem:[%s7491_s1 + $0x6c4] sm:$0xf0]  ;;  %v3821_v50 = vor.u32 %v4283_v42, %v3820_v41 }
  0x1b   :  { %v4268_v51 = vld [vmem:[%s7491_s1 + $0x64c] sm:$0xf]  ;;  %v3830_v52 = vld [vmem:[%s7491_s1 + $0x6cc] sm:$0xf0]  ;;  %v4609_v53 = vld [vmem:[%s7492_s0] sm:$0xff]  ;;  %v3829_v54 = vor.u32 %v4284_v46, %v3828_v45  ;;  %v3825_v57 = vor.u32 %v4267_v48, %v3822_v49 }
  0x1c   :  { %1631 = vmatpush.bf16.msra.mxu0 %v3145_v16  ;;  %v3688_v55 = vld [vmem:[%s7491_s1 + $0x538] sm:$0xf]  ;;  %v4250_v56 = vld [vmem:[%s7491_s1 + $0x5b8] sm:$0xf0]  ;;  %v3696_v58 = vld [vmem:[%s7491_s1 + $0x540] sm:$0xf]  ;;  %v3833_v60 = vor.u32 %v4268_v51, %v3830_v52 }
  0x1d   :  { %1659 = vmatpush.bf16.msra.mxu2 %v3153_v19  ;;  %1645 = vmatpush.bf16.msra.mxu1 %v3149_v20  ;;  %v4251_v59 = vld [vmem:[%s7491_s1 + $0x5c0] sm:$0xf0]  ;;  %v4234_v61 = vld [vmem:[%s7491_s1 + $0x53c] sm:$0xf]  ;;  %v3690_v62 = vld [vmem:[%s7491_s1 + $0x5bc] sm:$0xf0]  ;;  %v3689_v63 = vor.u32 %v4250_v56, %v3688_v55 }
  0x1e   :  { %1673 = vmatpush.bf16.msra.mxu3 %v3157_v24  ;;  %v4235_v0 = vld [vmem:[%s7491_s1 + $0x544] sm:$0xf]  ;;  %v3698_v1 = vld [vmem:[%s7491_s1 + $0x5c4] sm:$0xf0]  ;;  %v3697_v2 = vor.u32 %v4251_v59, %v3696_v58  ;;  %v3556_v3 = vld [vmem:[%s7491_s1 + $0x430] sm:$0xf]  ;;  %v3693_v5 = vor.u32 %v4234_v61, %v3690_v62 }
  0x1f   :  { %v4217_v4 = vld [vmem:[%s7491_s1 + $0x4b0] sm:$0xf0]  ;;  %v3564_v6 = vld [vmem:[%s7491_s1 + $0x438] sm:$0xf]  ;;  %v4218_v7 = vld [vmem:[%s7491_s1 + $0x4b8] sm:$0xf0]  ;;  %v3701_v8 = vor.u32 %v4235_v0, %v3698_v1 }
  0x20   :  { %1632 = vmatpush.bf16.msra.mxu0 %v3013_v31  ;;  %v4201_v9 = vld [vmem:[%s7491_s1 + $0x434] sm:$0xf]  ;;  %v3558_v10 = vld [vmem:[%s7491_s1 + $0x4b4] sm:$0xf0]  ;;  %v3557_v11 = vor.u32 %v4217_v4, %v3556_v3  ;;  %v4202_v12 = vld [vmem:[%s7491_s1 + $0x43c] sm:$0xf]  ;;  %v3565_v14 = vor.u32 %v4218_v7, %v3564_v6 }
  0x21   :  { %1660 = vmatpush.bf16.msra.mxu2 %v3021_v35  ;;  %1646 = vmatpush.bf16.msra.mxu1 %v3017_v40  ;;  %v3566_v13 = vld [vmem:[%s7491_s1 + $0x4bc] sm:$0xf0]  ;;  %v3424_v15 = vld [vmem:[%s7491_s1 + $0x328] sm:$0xf]  ;;  %v4184_v16 = vld [vmem:[%s7491_s1 + $0x3a8] sm:$0xf0]  ;;  %v3561_v17 = vor.u32 %v4201_v9, %v3558_v10 }
  0x22   :  { %1674 = vmatpush.bf16.msra.mxu3 %v3025_v43  ;;  %v3432_v18 = vld [vmem:[%s7491_s1 + $0x330] sm:$0xf]  ;;  %v4185_v19 = vld [vmem:[%s7491_s1 + $0x3b0] sm:$0xf0]  ;;  %v3569_v20 = vor.u32 %v4202_v12, %v3566_v13  ;;  %v4168_v21 = vld [vmem:[%s7491_s1 + $0x32c] sm:$0xf]  ;;  %v3425_v23 = vor.u32 %v4184_v16, %v3424_v15 }
  0x23   :  { %1633 = vmatmul.bf16.vlgmr.msra.gmra.mxu0 %v4609_v53  ;;  %v3426_v22 = vld [vmem:[%s7491_s1 + $0x3ac] sm:$0xf0]  ;;  %v4169_v24 = vld [vmem:[%s7491_s1 + $0x334] sm:$0xf]  ;;  %v3434_v25 = vld [vmem:[%s7491_s1 + $0x3b4] sm:$0xf0]  ;;  %v3433_v26 = vor.u32 %v4185_v19, %v3432_v18 }
  0x24   :  { %1681 = vmatpush.bf16.msrb.mxu0 %v3953_v36  ;;  %1661 = vmatmul.bf16.vlgmr.msra.gmra.mxu2 %v4609_v53  ;;  %v3292_v27 = vld [vmem:[%s7491_s1 + $0x220] sm:$0xf]  ;;  %v4151_v28 = vld [vmem:[%s7491_s1 + $0x2a0] sm:$0xf0]  ;;  %v3429_v29 = vor.u32 %v4168_v21, %v3426_v22  ;;  %v3300_v30 = vld [vmem:[%s7491_s1 + $0x228] sm:$0xf]  ;;  %v3437_v32 = vor.u32 %v4169_v24, %v3434_v25 }
  0x25   :  { %1709 = vmatpush.bf16.msrb.mxu2 %v3961_v39  ;;  %1695 = vmatpush.bf16.msrb.mxu1 %v3957_v44  ;;  %v4152_v31 = vld [vmem:[%s7491_s1 + $0x2a8] sm:$0xf0]  ;;  %v4135_v33 = vld [vmem:[%s7491_s1 + $0x224] sm:$0xf]  ;;  %v3294_v34 = vld [vmem:[%s7491_s1 + $0x2a4] sm:$0xf0]  ;;  %v3293_v35 = vor.u32 %v4151_v28, %v3292_v27 }
  0x26   :  { %1723 = vmatpush.bf16.msrb.mxu3 %v3965_v47  ;;  %1647 = vmatmul.bf16.vlgmr.msra.gmra.mxu1 %v4609_v53  ;;  %v4136_v36 = vld [vmem:[%s7491_s1 + $0x22c] sm:$0xf]  ;;  %v3302_v37 = vld [vmem:[%s7491_s1 + $0x2ac] sm:$0xf0]  ;;  %v3301_v38 = vor.u32 %v4152_v31, %v3300_v30  ;;  %v3160_v39 = vld [vmem:[%s7491_s1 + $0x118] sm:$0xf]  ;;  %v3297_v41 = vor.u32 %v4135_v33, %v3294_v34 }
  0x27   :  { %1675 = vmatmul.bf16.vlgmr.msra.gmra.mxu3 %v4609_v53  ;;  %v4118_v40 = vld [vmem:[%s7491_s1 + $0x198] sm:$0xf0]  ;;  %v3168_v42 = vld [vmem:[%s7491_s1 + $0x120] sm:$0xf]  ;;  %v4119_v43 = vld [vmem:[%s7491_s1 + $0x1a0] sm:$0xf0]  ;;  %v3305_v44 = vor.u32 %v4136_v36, %v3302_v37 }
  0x28   :  { %1682 = vmatpush.bf16.msrb.mxu0 %v3821_v50  ;;  %v4102_v45 = vld [vmem:[%s7491_s1 + $0x11c] sm:$0xf]  ;;  %v3162_v46 = vld [vmem:[%s7491_s1 + $0x19c] sm:$0xf0]  ;;  %v3161_v47 = vor.u32 %v4118_v40, %v3160_v39  ;;  %v4103_v48 = vld [vmem:[%s7491_s1 + $0x124] sm:$0xf]  ;;  %v3169_v51 = vor.u32 %v4119_v43, %v3168_v42 }
  0x29   :  { %1710 = vmatpush.bf16.msrb.mxu2 %v3829_v54  ;;  %1696 = vmatpush.bf16.msrb.mxu1 %v3825_v57  ;;  %v3170_v49 = vld [vmem:[%s7491_s1 + $0x1a4] sm:$0xf0]  ;;  %v3028_v50 = vld [vmem:[%s7491_s1 + $0x10] sm:$0xf]  ;;  %v4085_v52 = vld [vmem:[%s7491_s1 + $0x90] sm:$0xf0]  ;;  %v3165_v56 = vor.u32 %v4102_v45, %v3162_v46 }
  0x2a   :  { %1724 = vmatpush.bf16.msrb.mxu3 %v3833_v60  ;;  %v3036_v54 = vld [vmem:[%s7491_s1 + $0x18] sm:$0xf]  ;;  %v4086_v55 = vld [vmem:[%s7491_s1 + $0x98] sm:$0xf0]  ;;  %v3976_v59 = vld [vmem:[%s7491_s1 + $0x760] sm:$0xf]  ;;  %v3173_v60 = vor.u32 %v4103_v48, %v3170_v49  ;;  %v3029_v0 = vor.u32 %v4085_v52, %v3028_v50 }
  0x2b   :  { %v3968_v57 = vld [vmem:[%s7491_s1 + $0x758] sm:$0xf]  ;;  %v4318_v58 = vld [vmem:[%s7491_s1 + $0x7d8] sm:$0xf0]  ;;  %v4319_v61 = vld [vmem:[%s7491_s1 + $0x7e0] sm:$0xf0]  ;;  %v3037_v3 = vor.u32 %v4086_v55, %v3036_v54 }
  0x2c   :  { %1683 = vmatpush.bf16.msrb.mxu0 %v3689_v63  ;;  %v4069_v62 = vld [vmem:[%s7491_s1 + $0x14] sm:$0xf]  ;;  %v3030_v63 = vld [vmem:[%s7491_s1 + $0x94] sm:$0xf0]  ;;  %v4070_v1 = vld [vmem:[%s7491_s1 + $0x1c] sm:$0xf]  ;;  %v3969_v4 = vor.u32 %v4318_v58, %v3968_v57  ;;  %v3977_v7 = vor.u32 %v4319_v61, %v3976_v59 }
  0x2d   :  { %1711 = vmatpush.bf16.msrb.mxu2 %v3697_v2  ;;  %1697 = vmatpush.bf16.msrb.mxu1 %v3693_v5  ;;  %v3038_v2 = vld [vmem:[%s7491_s1 + $0x9c] sm:$0xf0]  ;;  %v4302_v5 = vld [vmem:[%s7491_s1 + $0x75c] sm:$0xf]  ;;  %v4303_v9 = vld [vmem:[%s7491_s1 + $0x764] sm:$0xf] }
  0x2e   :  { %1725 = vmatpush.bf16.msrb.mxu3 %v3701_v8  ;;  %v3970_v6 = vld [vmem:[%s7491_s1 + $0x7dc] sm:$0xf0]  ;;  %v3033_v8 = vor.u32 %v4069_v62, %v3030_v63  ;;  %v3978_v10 = vld [vmem:[%s7491_s1 + $0x7e4] sm:$0xf0]  ;;  %v3836_v12 = vld [vmem:[%s7491_s1 + $0x650] sm:$0xf] }
  0x2f   :  { %v4285_v13 = vld [vmem:[%s7491_s1 + $0x6d0] sm:$0xf0]  ;;  %v3844_v15 = vld [vmem:[%s7491_s1 + $0x658] sm:$0xf]  ;;  %v4286_v16 = vld [vmem:[%s7491_s1 + $0x6d8] sm:$0xf0] }
  0x30   :  { %1684 = vmatpush.bf16.msrb.mxu0 %v3557_v11  ;;  %v3041_v11 = vor.u32 %v4070_v1, %v3038_v2  ;;  %v4269_v18 = vld [vmem:[%s7491_s1 + $0x654] sm:$0xf]  ;;  %v3838_v19 = vld [vmem:[%s7491_s1 + $0x6d4] sm:$0xf0]  ;;  %v4270_v21 = vld [vmem:[%s7491_s1 + $0x65c] sm:$0xf] }
  0x31   :  { %1712 = vmatpush.bf16.msrb.mxu2 %v3565_v14  ;;  %1698 = vmatpush.bf16.msrb.mxu1 %v3561_v17  ;;  %v3973_v14 = vor.u32 %v4302_v5, %v3970_v6  ;;  %v3981_v17 = vor.u32 %v4303_v9, %v3978_v10  ;;  %v3846_v22 = vld [vmem:[%s7491_s1 + $0x6dc] sm:$0xf0]  ;;  %v3704_v24 = vld [vmem:[%s7491_s1 + $0x548] sm:$0xf]  ;;  %v4252_v25 = vld [vmem:[%s7491_s1 + $0x5c8] sm:$0xf0] }
  0x32   :  { %1726 = vmatpush.bf16.msrb.mxu3 %v3569_v20  ;;  %v3837_v20 = vor.u32 %v4285_v13, %v3836_v12  ;;  %v3712_v27 = vld [vmem:[%s7491_s1 + $0x550] sm:$0xf]  ;;  %v4253_v28 = vld [vmem:[%s7491_s1 + $0x5d0] sm:$0xf0]  ;;  %v4236_v30 = vld [vmem:[%s7491_s1 + $0x54c] sm:$0xf] }
  0x33   :  { %v3706_v31 = vld [vmem:[%s7491_s1 + $0x5cc] sm:$0xf0]  ;;  %v4237_v33 = vld [vmem:[%s7491_s1 + $0x554] sm:$0xf]  ;;  %v3714_v34 = vld [vmem:[%s7491_s1 + $0x5d4] sm:$0xf0] }
  0x34   :  { %1685 = vmatpush.bf16.msrb.mxu0 %v3425_v23  ;;  %v3845_v23 = vor.u32 %v4286_v16, %v3844_v15  ;;  %v3572_v36 = vld [vmem:[%s7491_s1 + $0x440] sm:$0xf]  ;;  %v4219_v37 = vld [vmem:[%s7491_s1 + $0x4c0] sm:$0xf0]  ;;  %v3580_v39 = vld [vmem:[%s7491_s1 + $0x448] sm:$0xf] }
  0x35   :  { %1713 = vmatpush.bf16.msrb.mxu2 %v3433_v26  ;;  %1699 = vmatpush.bf16.msrb.mxu1 %v3429_v29  ;;  %v3841_v26 = vor.u32 %v4269_v18, %v3838_v19  ;;  %v3849_v29 = vor.u32 %v4270_v21, %v3846_v22  ;;  %v4220_v40 = vld [vmem:[%s7491_s1 + $0x4c8] sm:$0xf0]  ;;  %v4203_v42 = vld [vmem:[%s7491_s1 + $0x444] sm:$0xf]  ;;  %v3574_v43 = vld [vmem:[%s7491_s1 + $0x4c4] sm:$0xf0] }
  0x36   :  { %1727 = vmatpush.bf16.msrb.mxu3 %v3437_v32  ;;  %v3705_v32 = vor.u32 %v4252_v25, %v3704_v24  ;;  %v4204_v45 = vld [vmem:[%s7491_s1 + $0x44c] sm:$0xf]  ;;  %v3582_v46 = vld [vmem:[%s7491_s1 + $0x4cc] sm:$0xf0]  ;;  %v3440_v48 = vld [vmem:[%s7491_s1 + $0x338] sm:$0xf]  ;;  %v3577_v50 = vor.u32 %v4203_v42, %v3574_v43 }
  0x37   :  { %v4186_v49 = vld [vmem:[%s7491_s1 + $0x3b8] sm:$0xf0]  ;;  %v4187_v52 = vld [vmem:[%s7491_s1 + $0x3c0] sm:$0xf0]  ;;  %v3585_v54 = vor.u32 %v4204_v45, %v3582_v46  ;;  %v3450_v59 = vld [vmem:[%s7491_s1 + $0x3c4] sm:$0xf0] }
  0x38   :  { %1686 = vmatpush.bf16.msrb.mxu0 %v3293_v35  ;;  %v3713_v35 = vor.u32 %v4253_v28, %v3712_v27  ;;  %v4170_v55 = vld [vmem:[%s7491_s1 + $0x33c] sm:$0xf]  ;;  %v3441_v57 = vor.u32 %v4186_v49, %v3440_v48  ;;  %v4171_v58 = vld [vmem:[%s7491_s1 + $0x344] sm:$0xf]  ;;  %v3308_v61 = vld [vmem:[%s7491_s1 + $0x230] sm:$0xf] }
  0x39   :  { %1714 = vmatpush.bf16.msrb.mxu2 %v3301_v38  ;;  %1700 = vmatpush.bf16.msrb.mxu1 %v3297_v41  ;;  %v3709_v38 = vor.u32 %v4236_v30, %v3706_v31  ;;  %v3717_v41 = vor.u32 %v4237_v33, %v3714_v34  ;;  %v4153_v62 = vld [vmem:[%s7491_s1 + $0x2b0] sm:$0xf0]  ;;  %v4154_v1 = vld [vmem:[%s7491_s1 + $0x2b8] sm:$0xf0]  ;;  %v3453_v2 = vor.u32 %v4171_v58, %v3450_v59  ;;  %v3176_v9 = vld [vmem:[%s7491_s1 + $0x128] sm:$0xf] }
  0x3a   :  { %1728 = vmatpush.bf16.msrb.mxu3 %v3305_v44  ;;  %v3573_v44 = vor.u32 %v4219_v37, %v3572_v36  ;;  %v3309_v5 = vor.u32 %v4153_v62, %v3308_v61  ;;  %v4138_v6 = vld [vmem:[%s7491_s1 + $0x23c] sm:$0xf]  ;;  %v4120_v10 = vld [vmem:[%s7491_s1 + $0x1a8] sm:$0xf0]  ;;  %v3184_v12 = vld [vmem:[%s7491_s1 + $0x130] sm:$0xf] }
  0x3b   :  { %v4121_v13 = vld [vmem:[%s7491_s1 + $0x1b0] sm:$0xf0]  ;;  %v4104_v15 = vld [vmem:[%s7491_s1 + $0x12c] sm:$0xf]  ;;  %v3178_v16 = vld [vmem:[%s7491_s1 + $0x1ac] sm:$0xf0] }
  0x3c   :  { %1687 = vmatpush.bf16.msrb.mxu0 %v3161_v47  ;;  %v3581_v47 = vor.u32 %v4220_v40, %v3580_v39  ;;  %v4105_v18 = vld [vmem:[%s7491_s1 + $0x134] sm:$0xf]  ;;  %v3186_v19 = vld [vmem:[%s7491_s1 + $0x1b4] sm:$0xf0]  ;;  %v3185_v21 = vor.u32 %v4121_v13, %v3184_v12  ;;  %v4087_v22 = vld [vmem:[%s7491_s1 + $0xa0] sm:$0xf0]  ;;  %v3181_v25 = vor.u32 %v4104_v15, %v3178_v16 }
  0x3d   :  { %1715 = vmatpush.bf16.msrb.mxu2 %v3169_v51  ;;  %1701 = vmatpush.bf16.msrb.mxu1 %v3165_v56  ;;  %v3448_v51 = vld [vmem:[%s7491_s1 + $0x340] sm:$0xf]  ;;  %v4088_v24 = vld [vmem:[%s7491_s1 + $0xa8] sm:$0xf0]  ;;  %v3992_v28 = vld [vmem:[%s7491_s1 + $0x770] sm:$0xf] }
  0x3e   :  { %1729 = vmatpush.bf16.msrb.mxu3 %v3173_v60  ;;  %v3442_v56 = vld [vmem:[%s7491_s1 + $0x3bc] sm:$0xf0]  ;;  %v3449_v60 = vor.u32 %v4187_v52, %v3448_v51  ;;  %v4320_v27 = vld [vmem:[%s7491_s1 + $0x7e8] sm:$0xf0]  ;;  %v4321_v30 = vld [vmem:[%s7491_s1 + $0x7f0] sm:$0xf0] }
  0x3f   :  { %v3445_v63 = vor.u32 %v4170_v55, %v3442_v56  ;;  %v4071_v31 = vld [vmem:[%s7491_s1 + $0x24] sm:$0xf]  ;;  %v4072_v34 = vld [vmem:[%s7491_s1 + $0x2c] sm:$0xf]  ;;  %v3986_v39 = vld [vmem:[%s7491_s1 + $0x7ec] sm:$0xf0]  ;;  %v3993_v40 = vor.u32 %v4321_v30, %v3992_v28 }
  0x40   :  { %1688 = vmatpush.bf16.msrb.mxu0 %v3029_v0  ;;  %v3316_v0 = vld [vmem:[%s7491_s1 + $0x238] sm:$0xf]  ;;  %v4305_v42 = vld [vmem:[%s7491_s1 + $0x774] sm:$0xf]  ;;  %v3852_v45 = vld [vmem:[%s7491_s1 + $0x660] sm:$0xf] }
  0x41   :  { %1716 = vmatpush.bf16.msrb.mxu2 %v3037_v3  ;;  %1702 = vmatpush.bf16.msrb.mxu1 %v3033_v8  ;;  %v4137_v3 = vld [vmem:[%s7491_s1 + $0x234] sm:$0xf]  ;;  %v3317_v8 = vor.u32 %v4154_v1, %v3316_v0  ;;  %v3994_v43 = vld [vmem:[%s7491_s1 + $0x7f4] sm:$0xf0]  ;;  %v4287_v46 = vld [vmem:[%s7491_s1 + $0x6e0] sm:$0xf0] }
  0x42   :  { %1730 = vmatpush.bf16.msrb.mxu3 %v3041_v11  ;;  %v3860_v48 = vld [vmem:[%s7491_s1 + $0x668] sm:$0xf]  ;;  %v4288_v49 = vld [vmem:[%s7491_s1 + $0x6e8] sm:$0xf0]  ;;  %v4271_v51 = vld [vmem:[%s7491_s1 + $0x664] sm:$0xf] }
  0x43   :  { %1689 = vmatmul.bf16.vlgmr.msrb.gmra.mxu0 %v4609_v53  ;;  %v3854_v52 = vld [vmem:[%s7491_s1 + $0x6e4] sm:$0xf0]  ;;  %v4272_v55 = vld [vmem:[%s7491_s1 + $0x66c] sm:$0xf]  ;;  %v3862_v56 = vld [vmem:[%s7491_s1 + $0x6ec] sm:$0xf0] }
  0x44   :  { %1737 = vmatpush.bf16.msra.mxu0 %v3969_v4  ;;  %1717 = vmatmul.bf16.vlgmr.msrb.gmra.mxu2 %v4609_v53  ;;  %v3310_v4 = vld [vmem:[%s7491_s1 + $0x2b4] sm:$0xf0]  ;;  %v4254_v59 = vld [vmem:[%s7491_s1 + $0x5d8] sm:$0xf0]  ;;  %v3728_v61 = vld [vmem:[%s7491_s1 + $0x560] sm:$0xf] }
  0x45   :  { %1765 = vmatpush.bf16.msra.mxu2 %v3977_v7  ;;  %1751 = vmatpush.bf16.msra.mxu1 %v3973_v14  ;;  %v3318_v7 = vld [vmem:[%s7491_s1 + $0x2bc] sm:$0xf0]  ;;  %v3313_v11 = vor.u32 %v4137_v3, %v3310_v4  ;;  %v3720_v58 = vld [vmem:[%s7491_s1 + $0x558] sm:$0xf]  ;;  %v4255_v62 = vld [vmem:[%s7491_s1 + $0x5e0] sm:$0xf0] }
  0x46   :  { %1779 = vmatpush.bf16.msra.mxu3 %v3981_v17  ;;  %1703 = vmatmul.bf16.vlgmr.msrb.gmra.mxu1 %v4609_v53  ;;  %v3321_v14 = vor.u32 %v4138_v6, %v3318_v7  ;;  %v3177_v17 = vor.u32 %v4120_v10, %v3176_v9  ;;  %v4238_v0 = vld [vmem:[%s7491_s1 + $0x55c] sm:$0xf]  ;;  %v3722_v1 = vld [vmem:[%s7491_s1 + $0x5dc] sm:$0xf0]  ;;  %v4239_v3 = vld [vmem:[%s7491_s1 + $0x564] sm:$0xf] }
  0x47   :  { %1731 = vmatmul.bf16.vlgmr.msrb.gmra.mxu3 %v4609_v53  ;;  %v3730_v4 = vld [vmem:[%s7491_s1 + $0x5e4] sm:$0xf0]  ;;  %v3588_v6 = vld [vmem:[%s7491_s1 + $0x450] sm:$0xf]  ;;  %v4221_v7 = vld [vmem:[%s7491_s1 + $0x4d0] sm:$0xf0] }
  0x48   :  { %1738 = vmatpush.bf16.msra.mxu0 %v3837_v20  ;;  %v3044_v20 = vld [vmem:[%s7491_s1 + $0x20] sm:$0xf]  ;;  %v3596_v9 = vld [vmem:[%s7491_s1 + $0x458] sm:$0xf]  ;;  %v4222_v10 = vld [vmem:[%s7491_s1 + $0x4d8] sm:$0xf0] }
  0x49   :  { %1766 = vmatpush.bf16.msra.mxu2 %v3845_v23  ;;  %1752 = vmatpush.bf16.msra.mxu1 %v3841_v26  ;;  %v3052_v23 = vld [vmem:[%s7491_s1 + $0x28] sm:$0xf]  ;;  %v3045_v33 = vor.u32 %v4087_v22, %v3044_v20  ;;  %v4205_v12 = vld [vmem:[%s7491_s1 + $0x454] sm:$0xf]  ;;  %v3590_v13 = vld [vmem:[%s7491_s1 + $0x4d4] sm:$0xf0] }
  0x4a   :  { %1780 = vmatpush.bf16.msra.mxu3 %v3849_v29  ;;  %v3984_v26 = vld [vmem:[%s7491_s1 + $0x768] sm:$0xf]  ;;  %v3189_v29 = vor.u32 %v4105_v18, %v3186_v19  ;;  %v3053_v36 = vor.u32 %v4088_v24, %v3052_v23  ;;  %v4206_v15 = vld [vmem:[%s7491_s1 + $0x45c] sm:$0xf]  ;;  %v3598_v16 = vld [vmem:[%s7491_s1 + $0x4dc] sm:$0xf0]  ;;  %v3593_v20 = vor.u32 %v4205_v12, %v3590_v13 }
  0x4b   :  { %v3985_v37 = vor.u32 %v4320_v27, %v3984_v26  ;;  %v3456_v18 = vld [vmem:[%s7491_s1 + $0x348] sm:$0xf]  ;;  %v4188_v19 = vld [vmem:[%s7491_s1 + $0x3c8] sm:$0xf0]  ;;  %v4189_v22 = vld [vmem:[%s7491_s1 + $0x3d0] sm:$0xf0]  ;;  %v3601_v23 = vor.u32 %v4206_v15, %v3598_v16 }
  0x4c   :  { %1739 = vmatpush.bf16.msra.mxu0 %v3705_v32  ;;  %v3046_v32 = vld [vmem:[%s7491_s1 + $0xa4] sm:$0xf0]  ;;  %v4172_v24 = vld [vmem:[%s7491_s1 + $0x34c] sm:$0xf]  ;;  %v3457_v26 = vor.u32 %v4188_v19, %v3456_v18  ;;  %v4173_v27 = vld [vmem:[%s7491_s1 + $0x354] sm:$0xf] }
  0x4d   :  { %1767 = vmatpush.bf16.msra.mxu2 %v3713_v35  ;;  %1753 = vmatpush.bf16.msra.mxu1 %v3709_v38  ;;  %v3054_v35 = vld [vmem:[%s7491_s1 + $0xac] sm:$0xf0]  ;;  %v4304_v38 = vld [vmem:[%s7491_s1 + $0x76c] sm:$0xf]  ;;  %v3466_v28 = vld [vmem:[%s7491_s1 + $0x3d4] sm:$0xf0] }
  0x4e   :  { %1781 = vmatpush.bf16.msra.mxu3 %v3717_v41  ;;  %v3049_v41 = vor.u32 %v4071_v31, %v3046_v32  ;;  %v3324_v30 = vld [vmem:[%s7491_s1 + $0x240] sm:$0xf]  ;;  %v4155_v31 = vld [vmem:[%s7491_s1 + $0x2c0] sm:$0xf0]  ;;  %v4010_v13 = vld [vmem:[%s7491_s1 + $0x804] sm:$0xf0] }
  0x4f   :  { %v4307_v12 = vld [vmem:[%s7491_s1 + $0x784] sm:$0xf]  ;;  %v3868_v15 = vld [vmem:[%s7491_s1 + $0x670] sm:$0xf]  ;;  %v4289_v16 = vld [vmem:[%s7491_s1 + $0x6f0] sm:$0xf0] }
  0x50   :  { %1740 = vmatpush.bf16.msra.mxu0 %v3573_v44  ;;  %v3057_v44 = vor.u32 %v4072_v34, %v3054_v35  ;;  %v4156_v34 = vld [vmem:[%s7491_s1 + $0x2c8] sm:$0xf0]  ;;  %v3469_v35 = vor.u32 %v4173_v27, %v3466_v28  ;;  %v3876_v18 = vld [vmem:[%s7491_s1 + $0x678] sm:$0xf]  ;;  %v4290_v19 = vld [vmem:[%s7491_s1 + $0x6f8] sm:$0xf0] }
  0x51   :  { %1768 = vmatpush.bf16.msra.mxu2 %v3581_v47  ;;  %1754 = vmatpush.bf16.msra.mxu1 %v3577_v50  ;;  %v3989_v47 = vor.u32 %v4304_v38, %v3986_v39  ;;  %v3997_v50 = vor.u32 %v4305_v42, %v3994_v43  ;;  %v3325_v38 = vor.u32 %v4155_v31, %v3324_v30  ;;  %v4140_v39 = vld [vmem:[%s7491_s1 + $0x24c] sm:$0xf]  ;;  %v3192_v42 = vld [vmem:[%s7491_s1 + $0x138] sm:$0xf]  ;;  %v4122_v43 = vld [vmem:[%s7491_s1 + $0x1b8] sm:$0xf0] }
  0x52   :  { %1782 = vmatpush.bf16.msra.mxu3 %v3585_v54  ;;  %v3853_v54 = vor.u32 %v4287_v46, %v3852_v45  ;;  %v3200_v45 = vld [vmem:[%s7491_s1 + $0x140] sm:$0xf]  ;;  %v4123_v46 = vld [vmem:[%s7491_s1 + $0x1c0] sm:$0xf0]  ;;  %v3736_v27 = vld [vmem:[%s7491_s1 + $0x568] sm:$0xf] }
  0x53   :  { %v4256_v28 = vld [vmem:[%s7491_s1 + $0x5e8] sm:$0xf0]  ;;  %v3744_v30 = vld [vmem:[%s7491_s1 + $0x570] sm:$0xf]  ;;  %v4257_v31 = vld [vmem:[%s7491_s1 + $0x5f0] sm:$0xf0] }
  0x54   :  { %1741 = vmatpush.bf16.msra.mxu0 %v3441_v57  ;;  %v3861_v57 = vor.u32 %v4288_v49, %v3860_v48  ;;  %v4106_v48 = vld [vmem:[%s7491_s1 + $0x13c] sm:$0xf]  ;;  %v3194_v49 = vld [vmem:[%s7491_s1 + $0x1bc] sm:$0xf0] }
  0x55   :  { %1769 = vmatpush.bf16.msra.mxu2 %v3449_v60  ;;  %1755 = vmatpush.bf16.msra.mxu1 %v3445_v63  ;;  %v3857_v60 = vor.u32 %v4271_v51, %v3854_v52  ;;  %v3865_v63 = vor.u32 %v4272_v55, %v3862_v56  ;;  %v4107_v51 = vld [vmem:[%s7491_s1 + $0x144] sm:$0xf]  ;;  %v3202_v52 = vld [vmem:[%s7491_s1 + $0x1c4] sm:$0xf0]  ;;  %v3201_v55 = vor.u32 %v4123_v46, %v3200_v45  ;;  %v4089_v56 = vld [vmem:[%s7491_s1 + $0xb0] sm:$0xf0] }
  0x56   :  { %1783 = vmatpush.bf16.msra.mxu3 %v3453_v2  ;;  %v3721_v2 = vor.u32 %v4254_v59, %v3720_v58  ;;  %v4090_v58 = vld [vmem:[%s7491_s1 + $0xb8] sm:$0xf0]  ;;  %v3197_v59 = vor.u32 %v4106_v48, %v3194_v49  ;;  %v3606_v45 = vld [vmem:[%s7491_s1 + $0x4e4] sm:$0xf0]  ;;  %v3614_v48 = vld [vmem:[%s7491_s1 + $0x4ec] sm:$0xf0] }
  0x58   :  { %1742 = vmatpush.bf16.msra.mxu0 %v3309_v5  ;;  %v3729_v5 = vor.u32 %v4255_v62, %v3728_v61  ;;  %v4322_v61 = vld [vmem:[%s7491_s1 + $0x7f8] sm:$0xf0]  ;;  %v4008_v62 = vld [vmem:[%s7491_s1 + $0x780] sm:$0xf] }
  0x59   :  { %1770 = vmatpush.bf16.msra.mxu2 %v3317_v8  ;;  %1756 = vmatpush.bf16.msra.mxu1 %v3313_v11  ;;  %v3725_v8 = vor.u32 %v4238_v0, %v3722_v1  ;;  %v3733_v11 = vor.u32 %v4239_v3, %v3730_v4  ;;  %v4323_v0 = vld [vmem:[%s7491_s1 + $0x800] sm:$0xf0]  ;;  %v4073_v1 = vld [vmem:[%s7491_s1 + $0x34] sm:$0xf]  ;;  %v4074_v4 = vld [vmem:[%s7491_s1 + $0x3c] sm:$0xf] }
  0x5a   :  { %1784 = vmatpush.bf16.msra.mxu3 %v3321_v14  ;;  %v3589_v14 = vor.u32 %v4221_v7, %v3588_v6 }
  0x5c   :  { %1743 = vmatpush.bf16.msra.mxu0 %v3177_v17  ;;  %v3597_v17 = vor.u32 %v4222_v10, %v3596_v9  ;;  %v4002_v9 = vld [vmem:[%s7491_s1 + $0x7fc] sm:$0xf0]  ;;  %v4009_v10 = vor.u32 %v4323_v0, %v4008_v62  ;;  %v4157_v0 = vld [vmem:[%s7491_s1 + $0x2d0] sm:$0xf0] }
  0x5d   :  { %1771 = vmatpush.bf16.msra.mxu2 %v3185_v21  ;;  %1757 = vmatpush.bf16.msra.mxu1 %v3181_v25  ;;  %v3464_v21 = vld [vmem:[%s7491_s1 + $0x350] sm:$0xf] }
  0x5e   :  { %1785 = vmatpush.bf16.msra.mxu3 %v3189_v29  ;;  %v3458_v25 = vld [vmem:[%s7491_s1 + $0x3cc] sm:$0xf0]  ;;  %v3465_v29 = vor.u32 %v4189_v22, %v3464_v21  ;;  %v4273_v21 = vld [vmem:[%s7491_s1 + $0x674] sm:$0xf]  ;;  %v3870_v22 = vld [vmem:[%s7491_s1 + $0x6f4] sm:$0xf0] }
  0x5f   :  { %v3461_v32 = vor.u32 %v4172_v24, %v3458_v25  ;;  %v4274_v24 = vld [vmem:[%s7491_s1 + $0x67c] sm:$0xf]  ;;  %v3878_v25 = vld [vmem:[%s7491_s1 + $0x6fc] sm:$0xf0] }
  0x60   :  { %1744 = vmatpush.bf16.msra.mxu0 %v3045_v33  ;;  %v3332_v33 = vld [vmem:[%s7491_s1 + $0x248] sm:$0xf] }
  0x61   :  { %1772 = vmatpush.bf16.msra.mxu2 %v3053_v36  ;;  %1758 = vmatpush.bf16.msra.mxu1 %v3049_v41  ;;  %v4139_v36 = vld [vmem:[%s7491_s1 + $0x244] sm:$0xf]  ;;  %v3333_v41 = vor.u32 %v4156_v34, %v3332_v33  ;;  %v4240_v33 = vld [vmem:[%s7491_s1 + $0x56c] sm:$0xf]  ;;  %v3738_v34 = vld [vmem:[%s7491_s1 + $0x5ec] sm:$0xf0] }
  0x62   :  { %1786 = vmatpush.bf16.msra.mxu3 %v3057_v44 }
  0x63   :  { %1745 = vmatmul.bf16.vlgmr.msra.gmra.mxu0 %v4609_v53 }
  0x64   :  { %1793 = vmatpush.bf16.msrb.mxu0 %v3985_v37  ;;  %1773 = vmatmul.bf16.vlgmr.msra.gmra.mxu2 %v4609_v53  ;;  %v3326_v37 = vld [vmem:[%s7491_s1 + $0x2c4] sm:$0xf0] }
  0x65   :  { %1821 = vmatpush.bf16.msrb.mxu2 %v3993_v40  ;;  %1807 = vmatpush.bf16.msrb.mxu1 %v3989_v47  ;;  %v3334_v40 = vld [vmem:[%s7491_s1 + $0x2cc] sm:$0xf0]  ;;  %v3329_v44 = vor.u32 %v4139_v36, %v3326_v37  ;;  %v4241_v36 = vld [vmem:[%s7491_s1 + $0x574] sm:$0xf]  ;;  %v3746_v37 = vld [vmem:[%s7491_s1 + $0x5f4] sm:$0xf0] }
  0x66   :  { %1835 = vmatpush.bf16.msrb.mxu3 %v3997_v50  ;;  %1759 = vmatmul.bf16.vlgmr.msra.gmra.mxu1 %v4609_v53  ;;  %v3337_v47 = vor.u32 %v4140_v39, %v3334_v40  ;;  %v3193_v50 = vor.u32 %v4122_v43, %v3192_v42  ;;  %v3604_v39 = vld [vmem:[%s7491_s1 + $0x460] sm:$0xf]  ;;  %v3741_v40 = vor.u32 %v4240_v33, %v3738_v34  ;;  %v4224_v42 = vld [vmem:[%s7491_s1 + $0x4e8] sm:$0xf0]  ;;  %v4075_v33 = vld [vmem:[%s7491_s1 + $0x44] sm:$0xf] }
  0x67   :  { %1787 = vmatmul.bf16.vlgmr.msra.gmra.mxu3 %v4609_v53  ;;  %v3749_v43 = vor.u32 %v4241_v36, %v3746_v37  ;;  %v3078_v34 = vld [vmem:[%s7491_s1 + $0xc4] sm:$0xf0]  ;;  %v4076_v36 = vld [vmem:[%s7491_s1 + $0x4c] sm:$0xf]  ;;  %v3086_v37 = vld [vmem:[%s7491_s1 + $0xcc] sm:$0xf0] }
  0x68   :  { %1794 = vmatpush.bf16.msrb.mxu0 %v3853_v54  ;;  %v3060_v54 = vld [vmem:[%s7491_s1 + $0x30] sm:$0xf] }
  0x69   :  { %1822 = vmatpush.bf16.msrb.mxu2 %v3861_v57  ;;  %1808 = vmatpush.bf16.msrb.mxu1 %v3857_v60  ;;  %v3068_v57 = vld [vmem:[%s7491_s1 + $0x38] sm:$0xf]  ;;  %v3061_v3 = vor.u32 %v4089_v56, %v3060_v54  ;;  %v3480_v54 = vld [vmem:[%s7491_s1 + $0x360] sm:$0xf] }
  0x6a   :  { %1836 = vmatpush.bf16.msrb.mxu3 %v3865_v63  ;;  %v4000_v60 = vld [vmem:[%s7491_s1 + $0x778] sm:$0xf]  ;;  %v3205_v63 = vor.u32 %v4107_v51, %v3202_v52  ;;  %v3069_v6 = vor.u32 %v4090_v58, %v3068_v57  ;;  %v4190_v51 = vld [vmem:[%s7491_s1 + $0x3d8] sm:$0xf0]  ;;  %v3474_v58 = vld [vmem:[%s7491_s1 + $0x3dc] sm:$0xf0] }
  0x6b   :  { %v4001_v7 = vor.u32 %v4322_v61, %v4000_v60  ;;  %v4174_v57 = vld [vmem:[%s7491_s1 + $0x35c] sm:$0xf]  ;;  %v4175_v60 = vld [vmem:[%s7491_s1 + $0x364] sm:$0xf]  ;;  %v3482_v61 = vld [vmem:[%s7491_s1 + $0x3e4] sm:$0xf0] }
  0x6c   :  { %1795 = vmatpush.bf16.msrb.mxu0 %v3721_v2  ;;  %v3062_v2 = vld [vmem:[%s7491_s1 + $0xb4] sm:$0xf0] }
  0x6d   :  { %1823 = vmatpush.bf16.msrb.mxu2 %v3729_v5  ;;  %1809 = vmatpush.bf16.msrb.mxu1 %v3725_v8  ;;  %v3070_v5 = vld [vmem:[%s7491_s1 + $0xbc] sm:$0xf0]  ;;  %v4306_v8 = vld [vmem:[%s7491_s1 + $0x77c] sm:$0xf] }
  0x6e   :  { %1837 = vmatpush.bf16.msrb.mxu3 %v3733_v11  ;;  %v3065_v11 = vor.u32 %v4073_v1, %v3062_v2  ;;  %v3477_v1 = vor.u32 %v4174_v57, %v3474_v58  ;;  %v3348_v2 = vld [vmem:[%s7491_s1 + $0x258] sm:$0xf]  ;;  %v3894_v57 = vld [vmem:[%s7491_s1 + $0x70c] sm:$0xf0]  ;;  %v5398_v58 = vld [vmem:[%s7492_s0] sm:$0xff] }
  0x70   :  { %1796 = vmatpush.bf16.msrb.mxu0 %v3589_v14  ;;  %v3073_v14 = vor.u32 %v4074_v4, %v3070_v5  ;;  %v3485_v4 = vor.u32 %v4175_v60, %v3482_v61  ;;  %v4141_v5 = vld [vmem:[%s7491_s1 + $0x254] sm:$0xf]  ;;  %v3752_v60 = vld [vmem:[%s7491_s1 + $0x578] sm:$0xf]  ;;  %v4258_v61 = vld [vmem:[%s7491_s1 + $0x5f8] sm:$0xf0] }
  0x71   :  { %1824 = vmatpush.bf16.msrb.mxu2 %v3597_v17  ;;  %1810 = vmatpush.bf16.msrb.mxu1 %v3593_v20  ;;  %v4005_v17 = vor.u32 %v4306_v8, %v4002_v9  ;;  %v4013_v20 = vor.u32 %v4307_v12, %v4010_v13  ;;  %v4142_v8 = vld [vmem:[%s7491_s1 + $0x25c] sm:$0xf]  ;;  %v3350_v9 = vld [vmem:[%s7491_s1 + $0x2dc] sm:$0xf0]  ;;  %v4124_v12 = vld [vmem:[%s7491_s1 + $0x1c8] sm:$0xf0] }
  0x72   :  { %1838 = vmatpush.bf16.msrb.mxu3 %v3601_v23  ;;  %v3869_v23 = vor.u32 %v4289_v16, %v3868_v15  ;;  %v4125_v15 = vld [vmem:[%s7491_s1 + $0x1d0] sm:$0xf0]  ;;  %v3353_v16 = vor.u32 %v4142_v8, %v3350_v9  ;;  %v3620_v8 = vld [vmem:[%s7491_s1 + $0x470] sm:$0xf] }
  0x73   :  { %v4225_v9 = vld [vmem:[%s7491_s1 + $0x4f0] sm:$0xf0] }
  0x74   :  { %1797 = vmatpush.bf16.msrb.mxu0 %v3457_v26  ;;  %v3877_v26 = vor.u32 %v4290_v19, %v3876_v18  ;;  %v3210_v18 = vld [vmem:[%s7491_s1 + $0x1cc] sm:$0xf0] }
  0x75   :  { %1825 = vmatpush.bf16.msrb.mxu2 %v3465_v29  ;;  %1811 = vmatpush.bf16.msrb.mxu1 %v3461_v32  ;;  %v3873_v29 = vor.u32 %v4273_v21, %v3870_v22  ;;  %v3881_v32 = vor.u32 %v4274_v24, %v3878_v25  ;;  %v3218_v21 = vld [vmem:[%s7491_s1 + $0x1d4] sm:$0xf0]  ;;  %v3076_v22 = vld [vmem:[%s7491_s1 + $0x40] sm:$0xf]  ;;  %v4091_v24 = vld [vmem:[%s7491_s1 + $0xc0] sm:$0xf0] }
  0x76   :  { %1839 = vmatpush.bf16.msrb.mxu3 %v3469_v35  ;;  %v3737_v35 = vor.u32 %v4256_v28, %v3736_v27  ;;  %v3084_v25 = vld [vmem:[%s7491_s1 + $0x48] sm:$0xf] }
  0x77   :  { %v4016_v28 = vld [vmem:[%s7491_s1 + $0x788] sm:$0xf] }
  0x78   :  { %1798 = vmatpush.bf16.msrb.mxu0 %v3325_v38  ;;  %v3745_v38 = vor.u32 %v4257_v31, %v3744_v30  ;;  %v4024_v30 = vld [vmem:[%s7491_s1 + $0x790] sm:$0xf] }
  0x79   :  { %1826 = vmatpush.bf16.msrb.mxu2 %v3333_v41  ;;  %1812 = vmatpush.bf16.msrb.mxu1 %v3329_v44  ;;  %v3612_v41 = vld [vmem:[%s7491_s1 + $0x468] sm:$0xf]  ;;  %v4207_v44 = vld [vmem:[%s7491_s1 + $0x464] sm:$0xf] }
  0x7a   :  { %1840 = vmatpush.bf16.msrb.mxu3 %v3337_v47  ;;  %v4208_v47 = vld [vmem:[%s7491_s1 + $0x46c] sm:$0xf]  ;;  %v3613_v49 = vor.u32 %v4224_v42, %v3612_v41  ;;  %v3609_v52 = vor.u32 %v4207_v44, %v3606_v45  ;;  %v3081_v42 = vor.u32 %v4075_v33, %v3078_v34  ;;  %v4026_v44 = vld [vmem:[%s7491_s1 + $0x814] sm:$0xf0]  ;;  %v3089_v45 = vor.u32 %v4076_v36, %v3086_v37  ;;  %v4159_v33 = vld [vmem:[%s7491_s1 + $0x2e0] sm:$0xf0] }
  0x7b   :  { %v3617_v56 = vor.u32 %v4208_v47, %v3614_v48  ;;  %v4291_v47 = vld [vmem:[%s7491_s1 + $0x700] sm:$0xf0]  ;;  %v4160_v36 = vld [vmem:[%s7491_s1 + $0x2e8] sm:$0xf0] }
  0x7c   :  { %1799 = vmatpush.bf16.msrb.mxu0 %v3193_v50  ;;  %v3472_v50 = vld [vmem:[%s7491_s1 + $0x358] sm:$0xf] }
  0x7d   :  { %1827 = vmatpush.bf16.msrb.mxu2 %v3201_v55  ;;  %1813 = vmatpush.bf16.msrb.mxu1 %v3197_v59  ;;  %v4191_v55 = vld [vmem:[%s7491_s1 + $0x3e0] sm:$0xf0]  ;;  %v3473_v59 = vor.u32 %v4190_v51, %v3472_v50  ;;  %v4292_v50 = vld [vmem:[%s7491_s1 + $0x708] sm:$0xf0] }
  0x7e   :  { %1841 = vmatpush.bf16.msrb.mxu3 %v3205_v63  ;;  %v3481_v62 = vor.u32 %v4191_v55, %v3480_v54  ;;  %v3340_v63 = vld [vmem:[%s7491_s1 + $0x250] sm:$0xf]  ;;  %v3886_v54 = vld [vmem:[%s7491_s1 + $0x704] sm:$0xf0] }
  0x80   :  { %1800 = vmatpush.bf16.msrb.mxu0 %v3061_v3  ;;  %v4158_v3 = vld [vmem:[%s7491_s1 + $0x2d8] sm:$0xf0] }
  0x81   :  { %1828 = vmatpush.bf16.msrb.mxu2 %v3069_v6  ;;  %1814 = vmatpush.bf16.msrb.mxu1 %v3065_v11  ;;  %v3342_v6 = vld [vmem:[%s7491_s1 + $0x2d4] sm:$0xf0]  ;;  %v3208_v11 = vld [vmem:[%s7491_s1 + $0x148] sm:$0xf] }
  0x82   :  { %1842 = vmatpush.bf16.msrb.mxu3 %v3073_v14  ;;  %v3345_v13 = vor.u32 %v4141_v5, %v3342_v6  ;;  %v3216_v14 = vld [vmem:[%s7491_s1 + $0x150] sm:$0xf]  ;;  %v3209_v19 = vor.u32 %v4124_v12, %v3208_v11  ;;  %v4243_v5 = vld [vmem:[%s7491_s1 + $0x584] sm:$0xf]  ;;  %v3762_v6 = vld [vmem:[%s7491_s1 + $0x604] sm:$0xf0] }
  0x83   :  { %1801 = vmatmul.bf16.vlgmr.msrb.gmra.mxu0 %v4609_v53  ;;  %v3628_v11 = vld [vmem:[%s7491_s1 + $0x478] sm:$0xf]  ;;  %v4226_v12 = vld [vmem:[%s7491_s1 + $0x4f8] sm:$0xf0] }
  0x84   :  { %1849 = vmatpush.bf16.msra.mxu0 %v4001_v7  ;;  %1829 = vmatmul.bf16.vlgmr.msrb.gmra.mxu2 %v4609_v53  ;;  %v3341_v7 = vor.u32 %v4157_v0, %v3340_v63  ;;  %v3760_v63 = vld [vmem:[%s7491_s1 + $0x580] sm:$0xf]  ;;  %v4259_v0 = vld [vmem:[%s7491_s1 + $0x600] sm:$0xf0] }
  0x85   :  { %1877 = vmatpush.bf16.msra.mxu2 %v4009_v10  ;;  %1863 = vmatpush.bf16.msra.mxu1 %v4005_v17  ;;  %v3349_v10 = vor.u32 %v4158_v3, %v3348_v2  ;;  %v4108_v17 = vld [vmem:[%s7491_s1 + $0x14c] sm:$0xf]  ;;  %v4242_v2 = vld [vmem:[%s7491_s1 + $0x57c] sm:$0xf]  ;;  %v3754_v3 = vld [vmem:[%s7491_s1 + $0x5fc] sm:$0xf0] }
  0x86   :  { %1891 = vmatpush.bf16.msra.mxu3 %v4013_v20  ;;  %1815 = vmatmul.bf16.vlgmr.msrb.gmra.mxu1 %v4609_v53  ;;  %v4109_v20 = vld [vmem:[%s7491_s1 + $0x154] sm:$0xf]  ;;  %v3213_v27 = vor.u32 %v4108_v17, %v3210_v18  ;;  %v4210_v17 = vld [vmem:[%s7491_s1 + $0x47c] sm:$0xf]  ;;  %v3630_v18 = vld [vmem:[%s7491_s1 + $0x4fc] sm:$0xf0] }
  0x87   :  { %1843 = vmatmul.bf16.vlgmr.msrb.gmra.mxu3 %v4609_v53  ;;  %v4223_v53 = vld [vmem:[%s7491_s1 + $0x4e0] sm:$0xf0]  ;;  %v3221_v31 = vor.u32 %v4109_v20, %v3218_v21  ;;  %v3488_v20 = vld [vmem:[%s7491_s1 + $0x368] sm:$0xf]  ;;  %v4192_v21 = vld [vmem:[%s7491_s1 + $0x3e8] sm:$0xf0] }
  0x88   :  { %1850 = vmatpush.bf16.msra.mxu0 %v3869_v23  ;;  %v3605_v46 = vor.u32 %v4223_v53, %v3604_v39  ;;  %v3217_v23 = vor.u32 %v4125_v15, %v3216_v14  ;;  %v4308_v53 = vld [vmem:[%s7491_s1 + $0x78c] sm:$0xf]  ;;  %v4209_v14 = vld [vmem:[%s7491_s1 + $0x474] sm:$0xf]  ;;  %v3622_v15 = vld [vmem:[%s7491_s1 + $0x4f4] sm:$0xf0] }
  0x89   :  { %1878 = vmatpush.bf16.msra.mxu2 %v3877_v26  ;;  %1864 = vmatpush.bf16.msra.mxu1 %v3873_v29  ;;  %v4092_v26 = vld [vmem:[%s7491_s1 + $0xc8] sm:$0xf0] }
  0x8a   :  { %1892 = vmatpush.bf16.msra.mxu3 %v3881_v32  ;;  %v4324_v29 = vld [vmem:[%s7491_s1 + $0x808] sm:$0xf0]  ;;  %v4325_v32 = vld [vmem:[%s7491_s1 + $0x810] sm:$0xf0] }
  0x8b   :  { %v4017_v39 = vor.u32 %v4324_v29, %v4016_v28  ;;  %v4025_v41 = vor.u32 %v4325_v32, %v4024_v30  ;;  %v3489_v28 = vor.u32 %v4192_v21, %v3488_v20  ;;  %v4177_v29 = vld [vmem:[%s7491_s1 + $0x374] sm:$0xf]  ;;  %v3498_v30 = vld [vmem:[%s7491_s1 + $0x3f4] sm:$0xf0]  ;;  %v3356_v32 = vld [vmem:[%s7491_s1 + $0x260] sm:$0xf] }
  0x8c   :  { %1851 = vmatpush.bf16.msra.mxu0 %v3737_v35  ;;  %v3077_v35 = vor.u32 %v4091_v24, %v3076_v22  ;;  %v3625_v22 = vor.u32 %v4209_v14, %v3622_v15  ;;  %v4193_v24 = vld [vmem:[%s7491_s1 + $0x3f0] sm:$0xf0]  ;;  %v3501_v37 = vor.u32 %v4177_v29, %v3498_v30  ;;  %v4311_v14 = vld [vmem:[%s7491_s1 + $0x7a4] sm:$0xf]  ;;  %v4042_v15 = vld [vmem:[%s7491_s1 + $0x824] sm:$0xf0] }
  0x8d   :  { %1879 = vmatpush.bf16.msra.mxu2 %v3745_v38  ;;  %1865 = vmatpush.bf16.msra.mxu1 %v3741_v40  ;;  %v3085_v38 = vor.u32 %v4092_v26, %v3084_v25  ;;  %v4018_v40 = vld [vmem:[%s7491_s1 + $0x80c] sm:$0xf0]  ;;  %v3633_v25 = vor.u32 %v4210_v17, %v3630_v18  ;;  %v4176_v26 = vld [vmem:[%s7491_s1 + $0x36c] sm:$0xf]  ;;  %v4293_v18 = vld [vmem:[%s7491_s1 + $0x710] sm:$0xf0] }
  0x8e   :  { %1893 = vmatpush.bf16.msra.mxu3 %v3749_v43  ;;  %v4309_v43 = vld [vmem:[%s7491_s1 + $0x794] sm:$0xf]  ;;  %v4021_v48 = vor.u32 %v4308_v53, %v4018_v40  ;;  %v3357_v53 = vor.u32 %v4159_v33, %v3356_v32  ;;  %v4144_v40 = vld [vmem:[%s7491_s1 + $0x26c] sm:$0xf]  ;;  %v3900_v17 = vld [vmem:[%s7491_s1 + $0x690] sm:$0xf] }
  0x8f   :  { %v4029_v51 = vor.u32 %v4309_v43, %v4026_v44  ;;  %v3224_v43 = vld [vmem:[%s7491_s1 + $0x158] sm:$0xf]  ;;  %v4126_v44 = vld [vmem:[%s7491_s1 + $0x1d8] sm:$0xf0]  ;;  %v3768_v29 = vld [vmem:[%s7491_s1 + $0x588] sm:$0xf] }
  0x90   :  { %1852 = vmatpush.bf16.msra.mxu0 %v3605_v46  ;;  %v3884_v46 = vld [vmem:[%s7491_s1 + $0x680] sm:$0xf]  ;;  %v3908_v20 = vld [vmem:[%s7491_s1 + $0x698] sm:$0xf]  ;;  %v4294_v21 = vld [vmem:[%s7491_s1 + $0x718] sm:$0xf0] }
  0x91   :  { %1880 = vmatpush.bf16.msra.mxu2 %v3613_v49  ;;  %1866 = vmatpush.bf16.msra.mxu1 %v3609_v52  ;;  %v3892_v49 = vld [vmem:[%s7491_s1 + $0x688] sm:$0xf]  ;;  %v4275_v52 = vld [vmem:[%s7491_s1 + $0x684] sm:$0xf]  ;;  %v3885_v55 = vor.u32 %v4291_v47, %v3884_v46  ;;  %v3232_v46 = vld [vmem:[%s7491_s1 + $0x160] sm:$0xf] }
  0x92   :  { %1894 = vmatpush.bf16.msra.mxu3 %v3617_v56  ;;  %v4276_v56 = vld [vmem:[%s7491_s1 + $0x68c] sm:$0xf]  ;;  %v4127_v47 = vld [vmem:[%s7491_s1 + $0x1e0] sm:$0xf0]  ;;  %v3776_v32 = vld [vmem:[%s7491_s1 + $0x590] sm:$0xf] }
  0x93   :  { %v4260_v30 = vld [vmem:[%s7491_s1 + $0x608] sm:$0xf0]  ;;  %v4261_v33 = vld [vmem:[%s7491_s1 + $0x610] sm:$0xf0] }
  0x94   :  { %1853 = vmatpush.bf16.msra.mxu0 %v3473_v59  ;;  %v3893_v59 = vor.u32 %v4292_v50, %v3892_v49  ;;  %v4110_v49 = vld [vmem:[%s7491_s1 + $0x15c] sm:$0xf]  ;;  %v3226_v50 = vld [vmem:[%s7491_s1 + $0x1dc] sm:$0xf0] }
  0x95   :  { %1881 = vmatpush.bf16.msra.mxu2 %v3481_v62  ;;  %1867 = vmatpush.bf16.msra.mxu1 %v3477_v1  ;;  %v3889_v62 = vor.u32 %v4275_v52, %v3886_v54  ;;  %v3897_v1 = vor.u32 %v4276_v56, %v3894_v57  ;;  %v4111_v52 = vld [vmem:[%s7491_s1 + $0x164] sm:$0xf]  ;;  %v3234_v54 = vld [vmem:[%s7491_s1 + $0x1e4] sm:$0xf0]  ;;  %v3233_v56 = vor.u32 %v4127_v47, %v3232_v46  ;;  %v4093_v57 = vld [vmem:[%s7491_s1 + $0xd0] sm:$0xf0] }
  0x96   :  { %1895 = vmatpush.bf16.msra.mxu3 %v3485_v4  ;;  %v3753_v4 = vor.u32 %v4258_v61, %v3752_v60  ;;  %v4094_v60 = vld [vmem:[%s7491_s1 + $0xd8] sm:$0xf0]  ;;  %v3229_v61 = vor.u32 %v4110_v49, %v3226_v50  ;;  %v4211_v46 = vld [vmem:[%s7491_s1 + $0x484] sm:$0xf]  ;;  %v3638_v47 = vld [vmem:[%s7491_s1 + $0x504] sm:$0xf0] }
  0x97   :  { %v4212_v49 = vld [vmem:[%s7491_s1 + $0x48c] sm:$0xf]  ;;  %v3646_v50 = vld [vmem:[%s7491_s1 + $0x50c] sm:$0xf0] }
  0x98   :  { %1854 = vmatpush.bf16.msra.mxu0 %v3341_v7  ;;  %v3761_v7 = vor.u32 %v4259_v0, %v3760_v63  ;;  %v4326_v63 = vld [vmem:[%s7491_s1 + $0x818] sm:$0xf0]  ;;  %v4040_v0 = vld [vmem:[%s7491_s1 + $0x7a0] sm:$0xf] }
  0x99   :  { %1882 = vmatpush.bf16.msra.mxu2 %v3349_v10  ;;  %1868 = vmatpush.bf16.msra.mxu1 %v3345_v13  ;;  %v3757_v10 = vor.u32 %v4242_v2, %v3754_v3  ;;  %v3765_v13 = vor.u32 %v4243_v5, %v3762_v6  ;;  %v4327_v2 = vld [vmem:[%s7491_s1 + $0x820] sm:$0xf0]  ;;  %v4077_v3 = vld [vmem:[%s7491_s1 + $0x54] sm:$0xf]  ;;  %v4078_v6 = vld [vmem:[%s7491_s1 + $0x5c] sm:$0xf] }
  0x9a   :  { %1896 = vmatpush.bf16.msra.mxu3 %v3353_v16  ;;  %v3621_v16 = vor.u32 %v4225_v9, %v3620_v8 }
  0x9c   :  { %1855 = vmatpush.bf16.msra.mxu0 %v3209_v19  ;;  %v3629_v19 = vor.u32 %v4226_v12, %v3628_v11  ;;  %v4034_v11 = vld [vmem:[%s7491_s1 + $0x81c] sm:$0xf0]  ;;  %v4041_v12 = vor.u32 %v4327_v2, %v4040_v0  ;;  %v3514_v0 = vld [vmem:[%s7491_s1 + $0x404] sm:$0xf0]  ;;  %v3372_v2 = vld [vmem:[%s7491_s1 + $0x270] sm:$0xf] }
  0x9d   :  { %1883 = vmatpush.bf16.msra.mxu2 %v3217_v23  ;;  %1869 = vmatpush.bf16.msra.mxu1 %v3213_v27  ;;  %v3496_v23 = vld [vmem:[%s7491_s1 + $0x370] sm:$0xf] }
  0x9e   :  { %1897 = vmatpush.bf16.msra.mxu3 %v3221_v31  ;;  %v3490_v27 = vld [vmem:[%s7491_s1 + $0x3ec] sm:$0xf0]  ;;  %v3497_v31 = vor.u32 %v4193_v24, %v3496_v23  ;;  %v4277_v23 = vld [vmem:[%s7491_s1 + $0x694] sm:$0xf]  ;;  %v3902_v24 = vld [vmem:[%s7491_s1 + $0x714] sm:$0xf0] }
  0x9f   :  { %v3493_v34 = vor.u32 %v4176_v26, %v3490_v27  ;;  %v4278_v26 = vld [vmem:[%s7491_s1 + $0x69c] sm:$0xf]  ;;  %v3910_v27 = vld [vmem:[%s7491_s1 + $0x71c] sm:$0xf0] }
  0xa0   :  { %1856 = vmatpush.bf16.msra.mxu0 %v3077_v35  ;;  %v3364_v35 = vld [vmem:[%s7491_s1 + $0x268] sm:$0xf] }
  0xa1   :  { %1884 = vmatpush.bf16.msra.mxu2 %v3085_v38  ;;  %1870 = vmatpush.bf16.msra.mxu1 %v3081_v42  ;;  %v4143_v38 = vld [vmem:[%s7491_s1 + $0x264] sm:$0xf]  ;;  %v3365_v42 = vor.u32 %v4160_v36, %v3364_v35  ;;  %v4244_v35 = vld [vmem:[%s7491_s1 + $0x58c] sm:$0xf]  ;;  %v3770_v36 = vld [vmem:[%s7491_s1 + $0x60c] sm:$0xf0] }
  0xa2   :  { %1898 = vmatpush.bf16.msra.mxu3 %v3089_v45 }
  0xa3   :  { %1857 = vmatmul.bf16.vlgmr.msra.gmra.mxu0 %v5398_v58 }
  0xa4   :  { %1905 = vmatpush.bf16.msrb.mxu0 %v4017_v39  ;;  %1885 = vmatmul.bf16.vlgmr.msra.gmra.mxu2 %v5398_v58  ;;  %v3358_v39 = vld [vmem:[%s7491_s1 + $0x2e4] sm:$0xf0] }
  0xa5   :  { %1933 = vmatpush.bf16.msrb.mxu2 %v4025_v41  ;;  %1919 = vmatpush.bf16.msrb.mxu1 %v4021_v48  ;;  %v3366_v41 = vld [vmem:[%s7491_s1 + $0x2ec] sm:$0xf0]  ;;  %v3361_v45 = vor.u32 %v4143_v38, %v3358_v39  ;;  %v4245_v38 = vld [vmem:[%s7491_s1 + $0x594] sm:$0xf]  ;;  %v3778_v39 = vld [vmem:[%s7491_s1 + $0x614] sm:$0xf0] }
  0xa6   :  { %1947 = vmatpush.bf16.msrb.mxu3 %v4029_v51  ;;  %1871 = vmatmul.bf16.vlgmr.msra.gmra.mxu1 %v5398_v58  ;;  %v3369_v48 = vor.u32 %v4144_v40, %v3366_v41  ;;  %v3225_v51 = vor.u32 %v4126_v44, %v3224_v43  ;;  %v3636_v40 = vld [vmem:[%s7491_s1 + $0x480] sm:$0xf]  ;;  %v4227_v41 = vld [vmem:[%s7491_s1 + $0x500] sm:$0xf0]  ;;  %v3644_v43 = vld [vmem:[%s7491_s1 + $0x488] sm:$0xf] }
  0xa7   :  { %1899 = vmatmul.bf16.vlgmr.msra.gmra.mxu3 %v5398_v58  ;;  %v4228_v44 = vld [vmem:[%s7491_s1 + $0x508] sm:$0xf0] }
  0xa8   :  { %1906 = vmatpush.bf16.msrb.mxu0 %v3885_v55  ;;  %v3092_v55 = vld [vmem:[%s7491_s1 + $0x50] sm:$0xf] }
  0xa9   :  { %1934 = vmatpush.bf16.msrb.mxu2 %v3893_v59  ;;  %1920 = vmatpush.bf16.msrb.mxu1 %v3889_v62  ;;  %v3100_v59 = vld [vmem:[%s7491_s1 + $0x58] sm:$0xf]  ;;  %v3093_v5 = vor.u32 %v4093_v57, %v3092_v55  ;;  %v3641_v55 = vor.u32 %v4211_v46, %v3638_v47  ;;  %v4195_v57 = vld [vmem:[%s7491_s1 + $0x400] sm:$0xf0]  ;;  %v4313_v46 = vld [vmem:[%s7491_s1 + $0x7b4] sm:$0xf] }
  0xaa   :  { %1948 = vmatpush.bf16.msrb.mxu3 %v3897_v1  ;;  %v4032_v62 = vld [vmem:[%s7491_s1 + $0x798] sm:$0xf]  ;;  %v3237_v1 = vor.u32 %v4111_v52, %v3234_v54  ;;  %v3101_v8 = vor.u32 %v4094_v60, %v3100_v59  ;;  %v4194_v54 = vld [vmem:[%s7491_s1 + $0x3f8] sm:$0xf0]  ;;  %v3649_v59 = vor.u32 %v4212_v49, %v3646_v50  ;;  %v3916_v49 = vld [vmem:[%s7491_s1 + $0x6a0] sm:$0xf] }
  0xab   :  { %v4033_v9 = vor.u32 %v4326_v63, %v4032_v62  ;;  %v3504_v52 = vld [vmem:[%s7491_s1 + $0x378] sm:$0xf]  ;;  %v4178_v60 = vld [vmem:[%s7491_s1 + $0x37c] sm:$0xf]  ;;  %v4179_v63 = vld [vmem:[%s7491_s1 + $0x384] sm:$0xf] }
  0xac   :  { %1907 = vmatpush.bf16.msrb.mxu0 %v3753_v4  ;;  %v3094_v4 = vld [vmem:[%s7491_s1 + $0xd4] sm:$0xf0]  ;;  %v3505_v62 = vor.u32 %v4194_v54, %v3504_v52  ;;  %v4295_v50 = vld [vmem:[%s7491_s1 + $0x720] sm:$0xf0]  ;;  %v3924_v52 = vld [vmem:[%s7491_s1 + $0x6a8] sm:$0xf] }
  0xad   :  { %1935 = vmatpush.bf16.msrb.mxu2 %v3761_v7  ;;  %1921 = vmatpush.bf16.msrb.mxu1 %v3757_v10  ;;  %v3102_v7 = vld [vmem:[%s7491_s1 + $0xdc] sm:$0xf0]  ;;  %v4310_v10 = vld [vmem:[%s7491_s1 + $0x79c] sm:$0xf]  ;;  %v4058_v47 = vld [vmem:[%s7491_s1 + $0x834] sm:$0xf0] }
  0xae   :  { %1949 = vmatpush.bf16.msrb.mxu3 %v3765_v13  ;;  %v3097_v13 = vor.u32 %v4077_v3, %v3094_v4  ;;  %v4161_v3 = vld [vmem:[%s7491_s1 + $0x2f0] sm:$0xf0]  ;;  %v4296_v54 = vld [vmem:[%s7491_s1 + $0x728] sm:$0xf0] }
  0xb0   :  { %1908 = vmatpush.bf16.msrb.mxu0 %v3621_v16  ;;  %v3105_v16 = vor.u32 %v4078_v6, %v3102_v7  ;;  %v4162_v6 = vld [vmem:[%s7491_s1 + $0x2f8] sm:$0xf0]  ;;  %v3517_v7 = vor.u32 %v4179_v63, %v3514_v0  ;;  %v3784_v63 = vld [vmem:[%s7491_s1 + $0x598] sm:$0xf] }
  0xb1   :  { %1936 = vmatpush.bf16.msrb.mxu2 %v3629_v19  ;;  %1922 = vmatpush.bf16.msrb.mxu1 %v3625_v22  ;;  %v4037_v19 = vor.u32 %v4310_v10, %v4034_v11  ;;  %v4045_v22 = vor.u32 %v4311_v14, %v4042_v15  ;;  %v3373_v10 = vor.u32 %v4161_v3, %v3372_v2  ;;  %v4146_v11 = vld [vmem:[%s7491_s1 + $0x27c] sm:$0xf]  ;;  %v3240_v14 = vld [vmem:[%s7491_s1 + $0x168] sm:$0xf]  ;;  %v4128_v15 = vld [vmem:[%s7491_s1 + $0x1e8] sm:$0xf0] }
  0xb2   :  { %1950 = vmatpush.bf16.msrb.mxu3 %v3633_v25  ;;  %v3901_v25 = vor.u32 %v4293_v18, %v3900_v17  ;;  %v3248_v17 = vld [vmem:[%s7491_s1 + $0x170] sm:$0xf]  ;;  %v4129_v18 = vld [vmem:[%s7491_s1 + $0x1f0] sm:$0xf0]  ;;  %v4262_v0 = vld [vmem:[%s7491_s1 + $0x618] sm:$0xf0] }
  0xb3   :  { %v3792_v2 = vld [vmem:[%s7491_s1 + $0x5a0] sm:$0xf]  ;;  %v4263_v3 = vld [vmem:[%s7491_s1 + $0x620] sm:$0xf0] }
  0xb4   :  { %1909 = vmatpush.bf16.msrb.mxu0 %v3489_v28  ;;  %v3909_v28 = vor.u32 %v4294_v21, %v3908_v20  ;;  %v4112_v20 = vld [vmem:[%s7491_s1 + $0x16c] sm:$0xf]  ;;  %v3242_v21 = vld [vmem:[%s7491_s1 + $0x1ec] sm:$0xf0] }
  0xb5   :  { %1937 = vmatpush.bf16.msrb.mxu2 %v3497_v31  ;;  %1923 = vmatpush.bf16.msrb.mxu1 %v3493_v34  ;;  %v3905_v31 = vor.u32 %v4277_v23, %v3902_v24  ;;  %v3913_v34 = vor.u32 %v4278_v26, %v3910_v27  ;;  %v4113_v23 = vld [vmem:[%s7491_s1 + $0x174] sm:$0xf]  ;;  %v3250_v24 = vld [vmem:[%s7491_s1 + $0x1f4] sm:$0xf0]  ;;  %v3249_v26 = vor.u32 %v4129_v18, %v3248_v17  ;;  %v4095_v27 = vld [vmem:[%s7491_s1 + $0xe0] sm:$0xf0] }
  0xb6   :  { %1951 = vmatpush.bf16.msrb.mxu3 %v3501_v37  ;;  %v3769_v37 = vor.u32 %v4260_v30, %v3768_v29  ;;  %v4096_v29 = vld [vmem:[%s7491_s1 + $0xe8] sm:$0xf0]  ;;  %v3245_v30 = vor.u32 %v4112_v20, %v3242_v21  ;;  %v4213_v17 = vld [vmem:[%s7491_s1 + $0x494] sm:$0xf]  ;;  %v3654_v18 = vld [vmem:[%s7491_s1 + $0x514] sm:$0xf0] }
  0xb7   :  { %v4214_v20 = vld [vmem:[%s7491_s1 + $0x49c] sm:$0xf]  ;;  %v3662_v21 = vld [vmem:[%s7491_s1 + $0x51c] sm:$0xf0] }
  0xb8   :  { %1910 = vmatpush.bf16.msrb.mxu0 %v3357_v53  ;;  %v3777_v53 = vor.u32 %v4261_v33, %v3776_v32  ;;  %v4328_v32 = vld [vmem:[%s7491_s1 + $0x828] sm:$0xf0]  ;;  %v4056_v33 = vld [vmem:[%s7491_s1 + $0x7b0] sm:$0xf] }
  0xb9   :  { %1938 = vmatpush.bf16.msrb.mxu2 %v3365_v42  ;;  %1924 = vmatpush.bf16.msrb.mxu1 %v3361_v45  ;;  %v3773_v42 = vor.u32 %v4244_v35, %v3770_v36  ;;  %v3781_v45 = vor.u32 %v4245_v38, %v3778_v39  ;;  %v4329_v35 = vld [vmem:[%s7491_s1 + $0x830] sm:$0xf0]  ;;  %v4079_v36 = vld [vmem:[%s7491_s1 + $0x64] sm:$0xf]  ;;  %v4080_v39 = vld [vmem:[%s7491_s1 + $0x6c] sm:$0xf] }
  0xba   :  { %1952 = vmatpush.bf16.msrb.mxu3 %v3369_v48  ;;  %v3637_v48 = vor.u32 %v4227_v41, %v3636_v40 }
  0xbc   :  { %1911 = vmatpush.bf16.msrb.mxu0 %v3225_v51  ;;  %v3645_v51 = vor.u32 %v4228_v44, %v3644_v43  ;;  %v4050_v43 = vld [vmem:[%s7491_s1 + $0x82c] sm:$0xf0]  ;;  %v4057_v44 = vor.u32 %v4329_v35, %v4056_v33  ;;  %v3530_v33 = vld [vmem:[%s7491_s1 + $0x414] sm:$0xf0]  ;;  %v3388_v35 = vld [vmem:[%s7491_s1 + $0x280] sm:$0xf] }
  0xbd   :  { %1939 = vmatpush.bf16.msrb.mxu2 %v3233_v56  ;;  %1925 = vmatpush.bf16.msrb.mxu1 %v3229_v61  ;;  %v3512_v56 = vld [vmem:[%s7491_s1 + $0x380] sm:$0xf] }
  0xbe   :  { %1953 = vmatpush.bf16.msrb.mxu3 %v3237_v1  ;;  %v3506_v61 = vld [vmem:[%s7491_s1 + $0x3fc] sm:$0xf0]  ;;  %v3513_v1 = vor.u32 %v4195_v57, %v3512_v56  ;;  %v4279_v56 = vld [vmem:[%s7491_s1 + $0x6a4] sm:$0xf]  ;;  %v3918_v57 = vld [vmem:[%s7491_s1 + $0x724] sm:$0xf0] }
  0xbf   :  { %v3509_v4 = vor.u32 %v4178_v60, %v3506_v61  ;;  %v4280_v60 = vld [vmem:[%s7491_s1 + $0x6ac] sm:$0xf]  ;;  %v3926_v61 = vld [vmem:[%s7491_s1 + $0x72c] sm:$0xf0] }
  0xc0   :  { %1912 = vmatpush.bf16.msrb.mxu0 %v3093_v5  ;;  %v3380_v5 = vld [vmem:[%s7491_s1 + $0x278] sm:$0xf] }
  0xc1   :  { %1940 = vmatpush.bf16.msrb.mxu2 %v3101_v8  ;;  %1926 = vmatpush.bf16.msrb.mxu1 %v3097_v13  ;;  %v4145_v8 = vld [vmem:[%s7491_s1 + $0x274] sm:$0xf]  ;;  %v3381_v13 = vor.u32 %v4162_v6, %v3380_v5  ;;  %v4246_v5 = vld [vmem:[%s7491_s1 + $0x59c] sm:$0xf]  ;;  %v3786_v6 = vld [vmem:[%s7491_s1 + $0x61c] sm:$0xf0] }
  0xc2   :  { %1954 = vmatpush.bf16.msrb.mxu3 %v3105_v16 }
  0xc3   :  { %1913 = vmatmul.bf16.vlgmr.msrb.gmra.mxu0 %v5398_v58 }
  0xc4   :  { %1961 = vmatpush.bf16.msra.mxu0 %v4033_v9  ;;  %1941 = vmatmul.bf16.vlgmr.msrb.gmra.mxu2 %v5398_v58  ;;  %v3374_v9 = vld [vmem:[%s7491_s1 + $0x2f4] sm:$0xf0] }
  0xc5   :  { %1989 = vmatpush.bf16.msra.mxu2 %v4041_v12  ;;  %1975 = vmatpush.bf16.msra.mxu1 %v4037_v19  ;;  %v3382_v12 = vld [vmem:[%s7491_s1 + $0x2fc] sm:$0xf0]  ;;  %v3377_v16 = vor.u32 %v4145_v8, %v3374_v9  ;;  %v4247_v8 = vld [vmem:[%s7491_s1 + $0x5a4] sm:$0xf]  ;;  %v3794_v9 = vld [vmem:[%s7491_s1 + $0x624] sm:$0xf0] }
  0xc6   :  { %2003 = vmatpush.bf16.msra.mxu3 %v4045_v22  ;;  %1927 = vmatmul.bf16.vlgmr.msrb.gmra.mxu1 %v5398_v58  ;;  %v3385_v19 = vor.u32 %v4146_v11, %v3382_v12  ;;  %v3241_v22 = vor.u32 %v4128_v15, %v3240_v14  ;;  %v3652_v11 = vld [vmem:[%s7491_s1 + $0x490] sm:$0xf]  ;;  %v4229_v12 = vld [vmem:[%s7491_s1 + $0x510] sm:$0xf0]  ;;  %v3660_v14 = vld [vmem:[%s7491_s1 + $0x498] sm:$0xf] }
  0xc7   :  { %1955 = vmatmul.bf16.vlgmr.msrb.gmra.mxu3 %v5398_v58  ;;  %v4230_v15 = vld [vmem:[%s7491_s1 + $0x518] sm:$0xf0] }
  0xc8   :  { %1962 = vmatpush.bf16.msra.mxu0 %v3901_v25  ;;  %v3108_v25 = vld [vmem:[%s7491_s1 + $0x60] sm:$0xf] }
  0xc9   :  { %1990 = vmatpush.bf16.msra.mxu2 %v3909_v28  ;;  %1976 = vmatpush.bf16.msra.mxu1 %v3905_v31  ;;  %v3116_v28 = vld [vmem:[%s7491_s1 + $0x68] sm:$0xf]  ;;  %v3109_v38 = vor.u32 %v4095_v27, %v3108_v25  ;;  %v3657_v25 = vor.u32 %v4213_v17, %v3654_v18  ;;  %v4197_v27 = vld [vmem:[%s7491_s1 + $0x410] sm:$0xf0]  ;;  %v4264_v17 = vld [vmem:[%s7491_s1 + $0x628] sm:$0xf0] }
  0xca   :  { %2004 = vmatpush.bf16.msra.mxu3 %v3913_v34  ;;  %v4048_v31 = vld [vmem:[%s7491_s1 + $0x7a8] sm:$0xf]  ;;  %v3253_v34 = vor.u32 %v4113_v23, %v3250_v24  ;;  %v3117_v40 = vor.u32 %v4096_v29, %v3116_v28  ;;  %v4196_v24 = vld [vmem:[%s7491_s1 + $0x408] sm:$0xf0]  ;;  %v3665_v28 = vor.u32 %v4214_v20, %v3662_v21  ;;  %v4231_v20 = vld [vmem:[%s7491_s1 + $0x520] sm:$0xf0] }
  0xcb   :  { %v4049_v41 = vor.u32 %v4328_v32, %v4048_v31  ;;  %v3520_v23 = vld [vmem:[%s7491_s1 + $0x388] sm:$0xf]  ;;  %v4180_v29 = vld [vmem:[%s7491_s1 + $0x38c] sm:$0xf]  ;;  %v4181_v32 = vld [vmem:[%s7491_s1 + $0x394] sm:$0xf] }
  0xcc   :  { %1963 = vmatpush.bf16.msra.mxu0 %v3769_v37  ;;  %v3110_v37 = vld [vmem:[%s7491_s1 + $0xe4] sm:$0xf0]  ;;  %v3521_v31 = vor.u32 %v4196_v24, %v3520_v23  ;;  %v4198_v23 = vld [vmem:[%s7491_s1 + $0x418] sm:$0xf0]  ;;  %v5974_v24 = vpop.f32.mrf.mxu0 }
  0xcd   :  { %1991 = vmatpush.bf16.msra.mxu2 %v3777_v53  ;;  %1977 = vmatpush.bf16.msra.mxu1 %v3773_v42  ;;  %v3118_v53 = vld [vmem:[%s7491_s1 + $0xec] sm:$0xf0]  ;;  %v4312_v42 = vld [vmem:[%s7491_s1 + $0x7ac] sm:$0xf] }
  0xce   :  { %2005 = vmatpush.bf16.msra.mxu3 %v3781_v45  ;;  %v3113_v45 = vor.u32 %v4079_v36, %v3110_v37  ;;  %v4163_v36 = vld [vmem:[%s7491_s1 + $0x300] sm:$0xf0] }
  0xd0   :  { %1964 = vmatpush.bf16.msra.mxu0 %v3637_v48  ;;  %v3121_v48 = vor.u32 %v4080_v39, %v3118_v53  ;;  %v4164_v39 = vld [vmem:[%s7491_s1 + $0x308] sm:$0xf0]  ;;  %v3533_v53 = vor.u32 %v4181_v32, %v3530_v33  ;;  %v5990_v32 = vpop.f32.mrf.mxu2 }
  0xd1   :  { %1992 = vmatpush.bf16.msra.mxu2 %v3645_v51  ;;  %1978 = vmatpush.bf16.msra.mxu1 %v3641_v55  ;;  %v4053_v51 = vor.u32 %v4312_v42, %v4050_v43  ;;  %v4061_v55 = vor.u32 %v4313_v46, %v4058_v47  ;;  %v3389_v42 = vor.u32 %v4163_v36, %v3388_v35  ;;  %v4148_v43 = vld [vmem:[%s7491_s1 + $0x28c] sm:$0xf]  ;;  %v3256_v46 = vld [vmem:[%s7491_s1 + $0x178] sm:$0xf]  ;;  %v4130_v47 = vld [vmem:[%s7491_s1 + $0x1f8] sm:$0xf0] }
  0xd2   :  { %2006 = vmatpush.bf16.msra.mxu3 %v3649_v59  ;;  %v3917_v59 = vor.u32 %v4295_v50, %v3916_v49  ;;  %v3264_v49 = vld [vmem:[%s7491_s1 + $0x180] sm:$0xf]  ;;  %v4131_v50 = vld [vmem:[%s7491_s1 + $0x200] sm:$0xf0] }
  0xd3   :  { %v3140_v35 = vld [vmem:[%s7491_s1 + $0x80] sm:$0xf]  ;;  %v4099_v36 = vld [vmem:[%s7491_s1 + $0x100] sm:$0xf0] }
  0xd4   :  { %1965 = vmatpush.bf16.msra.mxu0 %v3505_v62  ;;  %v3925_v62 = vor.u32 %v4296_v54, %v3924_v52  ;;  %v4114_v52 = vld [vmem:[%s7491_s1 + $0x17c] sm:$0xf]  ;;  %v3258_v54 = vld [vmem:[%s7491_s1 + $0x1fc] sm:$0xf0]  ;;  %v5992_v33 = vpop.f32.mrf.mxu0 }
  0xd5   :  { %1993 = vmatpush.bf16.msra.mxu2 %v3513_v1  ;;  %1979 = vmatpush.bf16.msra.mxu1 %v3509_v4  ;;  %v3921_v1 = vor.u32 %v4279_v56, %v3918_v57  ;;  %v3929_v4 = vor.u32 %v4280_v60, %v3926_v61  ;;  %v4115_v56 = vld [vmem:[%s7491_s1 + $0x184] sm:$0xf]  ;;  %v3266_v57 = vld [vmem:[%s7491_s1 + $0x204] sm:$0xf0]  ;;  %v3124_v60 = vld [vmem:[%s7491_s1 + $0x70] sm:$0xf] }
  0xd6   :  { %2007 = vmatpush.bf16.msra.mxu3 %v3517_v7  ;;  %v3785_v7 = vor.u32 %v4262_v0, %v3784_v63  ;;  %v4097_v61 = vld [vmem:[%s7491_s1 + $0xf0] sm:$0xf0]  ;;  %v3261_v63 = vor.u32 %v4114_v52, %v3258_v54  ;;  %v4098_v0 = vld [vmem:[%s7491_s1 + $0xf8] sm:$0xf0] }
  0xd8   :  { %1966 = vmatpush.bf16.msra.mxu0 %v3373_v10  ;;  %v3793_v10 = vor.u32 %v4263_v3, %v3792_v2  ;;  %v4330_v2 = vld [vmem:[%s7491_s1 + $0x838] sm:$0xf0]  ;;  %v3269_v3 = vor.u32 %v4115_v56, %v3266_v57 }
  0xd9   :  { %1994 = vmatpush.bf16.msra.mxu2 %v3381_v13  ;;  %1980 = vmatpush.bf16.msra.mxu1 %v3377_v16  ;;  %v3789_v13 = vor.u32 %v4246_v5, %v3786_v6  ;;  %v3797_v16 = vor.u32 %v4247_v8, %v3794_v9  ;;  %v3126_v5 = vld [vmem:[%s7491_s1 + $0xf4] sm:$0xf0]  ;;  %v3125_v6 = vor.u32 %v4097_v61, %v3124_v60  ;;  %v3134_v8 = vld [vmem:[%s7491_s1 + $0xfc] sm:$0xf0] }
  0xda   :  { %2008 = vmatpush.bf16.msra.mxu3 %v3385_v19  ;;  %v3653_v19 = vor.u32 %v4229_v12, %v3652_v11  ;;  %v3932_v12 = vld [vmem:[%s7491_s1 + $0x6b0] sm:$0xf] }
  0xdc   :  { %1967 = vmatpush.bf16.msra.mxu0 %v3241_v22  ;;  %v3661_v22 = vor.u32 %v4230_v15, %v3660_v14 }
  0xdd   :  { %1995 = vmatpush.bf16.msra.mxu2 %v3249_v26  ;;  %1981 = vmatpush.bf16.msra.mxu1 %v3245_v30  ;;  %v3528_v26 = vld [vmem:[%s7491_s1 + $0x390] sm:$0xf] }
  0xde   :  { %2009 = vmatpush.bf16.msra.mxu3 %v3253_v34  ;;  %v3522_v30 = vld [vmem:[%s7491_s1 + $0x40c] sm:$0xf0]  ;;  %v3529_v34 = vor.u32 %v4197_v27, %v3528_v26  ;;  %v4165_v27 = vld [vmem:[%s7491_s1 + $0x310] sm:$0xf0] }
  0xdf   :  { %v3525_v37 = vor.u32 %v4180_v29, %v3522_v30  ;;  %v3404_v26 = vld [vmem:[%s7491_s1 + $0x290] sm:$0xf]  ;;  %v3272_v30 = vld [vmem:[%s7491_s1 + $0x188] sm:$0xf] }
  0xe0   :  { %1968 = vmatpush.bf16.msra.mxu0 %v3109_v38  ;;  %v3396_v38 = vld [vmem:[%s7491_s1 + $0x288] sm:$0xf]  ;;  %v3405_v29 = vor.u32 %v4165_v27, %v3404_v26 }
  0xe1   :  { %1996 = vmatpush.bf16.msra.mxu2 %v3117_v40  ;;  %1982 = vmatpush.bf16.msra.mxu1 %v3113_v45  ;;  %v4147_v40 = vld [vmem:[%s7491_s1 + $0x284] sm:$0xf]  ;;  %v3397_v45 = vor.u32 %v4164_v39, %v3396_v38  ;;  %v3141_v38 = vor.u32 %v4099_v36, %v3140_v35 }
  0xe2   :  { %2010 = vmatpush.bf16.msra.mxu3 %v3121_v48 }
  0xe3   :  { %1969 = vmatmul.bf16.vlgmr.msra.gmra.mxu0 %v5398_v58 }
  0xe4   :  { %2017 = vmatpush.bf16.msrb.mxu0 %v4049_v41  ;;  %1997 = vmatmul.bf16.vlgmr.msra.gmra.mxu2 %v5398_v58  ;;  %v3390_v41 = vld [vmem:[%s7491_s1 + $0x304] sm:$0xf0] }
  0xe5   :  { %2045 = vmatpush.bf16.msrb.mxu2 %v4057_v44  ;;  %2031 = vmatpush.bf16.msrb.mxu1 %v4053_v51  ;;  %v3398_v44 = vld [vmem:[%s7491_s1 + $0x30c] sm:$0xf0]  ;;  %v3393_v48 = vor.u32 %v4147_v40, %v3390_v41  ;;  %v6006_v40 = vpop.f32.mrf.mxu0 }
  0xe6   :  { %2059 = vmatpush.bf16.msrb.mxu3 %v4061_v55  ;;  %1983 = vmatmul.bf16.vlgmr.msra.gmra.mxu1 %v5398_v58  ;;  %v3401_v51 = vor.u32 %v4148_v43, %v3398_v44  ;;  %v3257_v55 = vor.u32 %v4130_v47, %v3256_v46 }
  0xe7   :  { %2011 = vmatmul.bf16.vlgmr.msra.gmra.mxu3 %v5398_v58 }
  0xe8   :  { %2018 = vmatpush.bf16.msrb.mxu0 %v3917_v59  ;;  %v3265_v59 = vor.u32 %v4131_v50, %v3264_v49 }
  0xe9   :  { %2046 = vmatpush.bf16.msrb.mxu2 %v3925_v62  ;;  %2032 = vmatpush.bf16.msrb.mxu1 %v3921_v1  ;;  %v3132_v62 = vld [vmem:[%s7491_s1 + $0x78] sm:$0xf] }
  0xea   :  { %2060 = vmatpush.bf16.msrb.mxu3 %v3929_v4  ;;  %v4064_v1 = vld [vmem:[%s7491_s1 + $0x7b8] sm:$0xf]  ;;  %v4081_v4 = vld [vmem:[%s7491_s1 + $0x74] sm:$0xf]  ;;  %v3133_v9 = vor.u32 %v4098_v0, %v3132_v62 }
  0xeb   :  { %v3129_v11 = vor.u32 %v4081_v4, %v3126_v5 }
  0xec   :  { %2019 = vmatpush.bf16.msrb.mxu0 %v3785_v7  ;;  %v4082_v7 = vld [vmem:[%s7491_s1 + $0x7c] sm:$0xf] }
  0xed   :  { %2047 = vmatpush.bf16.msrb.mxu2 %v3793_v10  ;;  %2033 = vmatpush.bf16.msrb.mxu1 %v3789_v13  ;;  %v4065_v10 = vor.u32 %v4330_v2, %v4064_v1  ;;  %v4297_v13 = vld [vmem:[%s7491_s1 + $0x730] sm:$0xf0]  ;;  %v3137_v14 = vor.u32 %v4082_v7, %v3134_v8  ;;  %v6015_v44 = vpop.f32.mrf.mxu0 }
  0xee   :  { %2061 = vmatpush.bf16.msrb.mxu3 %v3797_v16  ;;  %v3933_v15 = vor.u32 %v4297_v13, %v3932_v12  ;;  %v3800_v16 = vld [vmem:[%s7491_s1 + $0x5a8] sm:$0xf] }
  0xef   :  { %v3801_v18 = vor.u32 %v4264_v17, %v3800_v16 }
  0xf0   :  { %2020 = vmatpush.bf16.msrb.mxu0 %v3653_v19  ;;  %v3668_v19 = vld [vmem:[%s7491_s1 + $0x4a0] sm:$0xf] }
  0xf1   :  { %2048 = vmatpush.bf16.msrb.mxu2 %v3661_v22  ;;  %2034 = vmatpush.bf16.msrb.mxu1 %v3657_v25  ;;  %v3669_v21 = vor.u32 %v4231_v20, %v3668_v19  ;;  %v3536_v22 = vld [vmem:[%s7491_s1 + $0x398] sm:$0xf] }
  0xf2   :  { %2062 = vmatpush.bf16.msrb.mxu3 %v3665_v28  ;;  %v3537_v25 = vor.u32 %v4198_v23, %v3536_v22  ;;  %v5982_v28 = vpop.f32.mrf.mxu1 }
  0xf3   :  { %v2087_v52 = vadd.f32 %v5982_v28, %v5974_v24 }
  0xf4   :  { %2021 = vmatpush.bf16.msrb.mxu0 %v3521_v31  ;;  %v4132_v31 = vld [vmem:[%s7491_s1 + $0x208] sm:$0xf0] }
  0xf5   :  { %2049 = vmatpush.bf16.msrb.mxu2 %v3529_v34  ;;  %2035 = vmatpush.bf16.msrb.mxu1 %v3525_v37  ;;  %v3273_v34 = vor.u32 %v4132_v31, %v3272_v30  ;;  %v6000_v37 = vpop.f32.mrf.mxu3 }
  0xf6   :  { %2063 = vmatpush.bf16.msrb.mxu3 %v3533_v53  ;;  %v6004_v53 = vpop.f32.mrf.mxu2 }
  0xf8   :  { %2022 = vmatpush.bf16.msrb.mxu0 %v3389_v42 }
  0xf9   :  { %2050 = vmatpush.bf16.msrb.mxu2 %v3397_v45  ;;  %2036 = vmatpush.bf16.msrb.mxu1 %v3393_v48  ;;  %v6023_v48 = vpop.f32.mrf.mxu0 }
  0xfa   :  { %2064 = vmatpush.bf16.msrb.mxu3 %v3401_v51  ;;  %v6002_v39 = vpop.f32.mrf.mxu1 }
  0xfb   :  { %v2121_v62 = vadd.f32 %v6002_v39, %v5992_v33 }
  0xfc   :  { %2023 = vmatpush.bf16.msrb.mxu0 %v3257_v55  ;;  %v2088_v55 = vadd.f32 %v2087_v52, %v5990_v32 }
  0xfd   :  { %2051 = vmatpush.bf16.msrb.mxu2 %v3265_v59  ;;  %2037 = vmatpush.bf16.msrb.mxu1 %v3261_v63  ;;  %v6009_v41 = vpop.f32.mrf.mxu3  ;;  %v2122_v2 = vadd.f32 %v2121_v62, %v6004_v53 }
  0xfe   :  { %2065 = vmatpush.bf16.msrb.mxu3 %v3269_v3  ;;  %v6013_v43 = vpop.f32.mrf.mxu2  ;;  %v2089_v60 = vadd.f32 %v2088_v55, %v6000_v37 }
 0x100   :  { %2024 = vmatpush.bf16.msrb.mxu0 %v3125_v6  ;;  %v2090_v63 = vadd.f32 %v2089_v60, %v6006_v40  ;;  %v2123_v6 = vadd.f32 %v2122_v2, %v6009_v41 }
 0x101   :  { %2052 = vmatpush.bf16.msrb.mxu2 %v3133_v9  ;;  %2038 = vmatpush.bf16.msrb.mxu1 %v3129_v11  ;;  %v6031_v51 = vpop.f32.mrf.mxu0 }
 0x102   :  { %2066 = vmatpush.bf16.msrb.mxu3 %v3137_v14  ;;  %v6011_v42 = vpop.f32.mrf.mxu1  ;;  %v2124_v8 = vadd.f32 %v2123_v6, %v6015_v44 }
 0x103   :  { %2025 = vmatmul.bf16.vlgmr.msrb.gmra.mxu0 %v5398_v58  ;;  %v2091_v3 = vadd.f32 %v2090_v63, %v6011_v42 }
 0x104   :  { %2073 = vmatpush.bf16.msra.mxu0 %v4065_v10  ;;  %2053 = vmatmul.bf16.vlgmr.msrb.gmra.mxu2 %v5398_v58 }
 0x105   :  { %2039 = vmatmul.bf16.vlgmr.msrb.gmra.mxu1 %v5398_v58  ;;  %2067 = vmatmul.bf16.vlgmr.msrb.gmra.mxu3 %v5398_v58  ;;  %v6017_v45 = vpop.f32.mrf.mxu3  ;;  %v2092_v7 = vadd.f32 %v2091_v3, %v6013_v43 }
 0x106   :  { %v6021_v47 = vpop.f32.mrf.mxu2 }
 0x107   :  { %v2093_v10 = vadd.f32 %v2092_v7, %v6017_v45 }
 0x108   :  { %2074 = vmatpush.bf16.msra.mxu0 %v3933_v15 }
 0x109   :  { %v6042_v59 = vpop.f32.mrf.mxu0  ;;  %v2094_v14 = vadd.f32 %v2093_v10, %v6023_v48 }
 0x10a   :  { %v6019_v46 = vpop.f32.mrf.mxu1 }
 0x10b   :  { %v2125_v13 = vadd.f32 %v2124_v8, %v6019_v46 }
 0x10c   :  { %2075 = vmatpush.bf16.msra.mxu0 %v3801_v18 }
 0x10d   :  { %v6025_v49 = vpop.f32.mrf.mxu3  ;;  %v2126_v15 = vadd.f32 %v2125_v13, %v6021_v47 }
 0x10f   :  { %v2127_v19 = vadd.f32 %v2126_v15, %v6025_v49 }
 0x110   :  { %2076 = vmatpush.bf16.msra.mxu0 %v3669_v21 }
 0x111   :  { %v6056_v4 = vpop.f32.mrf.mxu0  ;;  %v2128_v22 = vadd.f32 %v2127_v19, %v6031_v51 }
 0x112   :  { %v6027_v50 = vpop.f32.mrf.mxu1 }
 0x113   :  { %v2095_v17 = vadd.f32 %v2094_v14, %v6027_v50 }
 0x114   :  { %2077 = vmatpush.bf16.msra.mxu0 %v3537_v25 }
 0x115   :  { %v6035_v54 = vpop.f32.mrf.mxu3 }
 0x118   :  { %2078 = vmatpush.bf16.msra.mxu0 %v3405_v29 }
 0x11a   :  { %v6038_v56 = vpop.f32.mrf.mxu1 }
 0x11b   :  { %v2129_v27 = vadd.f32 %v2128_v22, %v6038_v56 }
 0x11c   :  { %2079 = vmatpush.bf16.msra.mxu0 %v3273_v34 }
 0x11d   :  { %v6045_v61 = vpop.f32.mrf.mxu3 }
 0x120   :  { %2080 = vmatpush.bf16.msra.mxu0 %v3141_v38  ;;  %v6068_v12 = vpop.f32.mrf.mxu0 }
 0x122   :  { %v6050_v0 = vpop.f32.mrf.mxu1 }
 0x123   :  { %2081 = vmatmul.bf16.vlgmr.msra.gmra.mxu0 %v5398_v58  ;;  %v6029_v58 = vpop.f32.mrf.mxu2 }
 0x124   :  { %v2096_v20 = vadd.f32 %v2095_v17, %v6029_v58 }
 0x125   :  { %v6058_v5 = vpop.f32.mrf.mxu3 }
 0x126   :  { %v2097_v25 = vadd.f32 %v2096_v20, %v6035_v54 }
 0x128   :  { %v6083_v23 = vpop.f32.mrf.mxu0  ;;  %v2098_v29 = vadd.f32 %v2097_v25, %v6042_v59 }
 0x12a   :  { %v6063_v9 = vpop.f32.mrf.mxu1  ;;  %v2099_v34 = vadd.f32 %v2098_v29, %v6050_v0 }
 0x12b   :  { %v6040_v57 = vpop.f32.mrf.mxu2 }
 0x12c   :  { %v2130_v30 = vadd.f32 %v2129_v27, %v6040_v57 }
 0x12d   :  { %v6073_v16 = vpop.f32.mrf.mxu3 }
 0x12e   :  { %v2131_v38 = vadd.f32 %v2130_v30, %v6045_v61 }
 0x130   :  { %v2132_v55 = vadd.f32 %v2131_v38, %v6056_v4 }
 0x132   :  { %v6076_v18 = vpop.f32.mrf.mxu1  ;;  %v2133_v2 = vadd.f32 %v2132_v55, %v6063_v9 }
 0x133   :  { %v6052_v1 = vpop.f32.mrf.mxu2 }
 0x134   :  { %v2100_v52 = vadd.f32 %v2099_v34, %v6052_v1 }
 0x135   :  { %v6086_v26 = vpop.f32.mrf.mxu3 }
 0x136   :  { %v2101_v62 = vadd.f32 %v2100_v52, %v6058_v5 }
 0x138   :  { %v2102_v3 = vadd.f32 %v2101_v62, %v6068_v12 }
 0x13a   :  { %v6091_v31 = vpop.f32.mrf.mxu1  ;;  %v2103_v10 = vadd.f32 %v2102_v3, %v6076_v18 }
 0x13b   :  { %v6066_v11 = vpop.f32.mrf.mxu2 }
 0x13c   :  { %v2134_v7 = vadd.f32 %v2133_v2, %v6066_v11 }
 0x13d   :  { %v6101_v60 = vpop.f32.mrf.mxu3 }
 0x13e   :  { %7528 = vst [vmem:[#allocation2_spill] sm:$0xff] %v6101_v60  ;;  %v2135_v14 = vadd.f32 %v2134_v7, %v6073_v16 }
 0x140   :  { %v6096_v36 = vpop.f32.mrf.mxu0  ;;  %v2136_v17 = vadd.f32 %v2135_v14, %v6083_v23 }
 0x142   :  { %v2137_v27 = vadd.f32 %v2136_v17, %v6091_v31 }
 0x143   :  { %v6080_v21 = vpop.f32.mrf.mxu2  ;;  %v6104_v63 = vpop.f32.mrf.mxu1 }
 0x144   :  { %v2104_v15 = vadd.f32 %v2103_v10, %v6080_v21 }
 0x146   :  { %v2105_v20 = vadd.f32 %v2104_v15, %v6086_v26 }
 0x148   :  { %v6111_v8 = vpop.f32.mrf.mxu0  ;;  %v2106_v29 = vadd.f32 %v2105_v20, %v6096_v36 }
 0x149   :  { %7529 = vst [vmem:[#allocation3_spill] sm:$0xff] %v6111_v8 }
 0x14a   :  { %v6114_v13 = vpop.f32.mrf.mxu3  ;;  %v2107_v38 = vadd.f32 %v2106_v29, %v6104_v63 }
 0x14b   :  { %v6094_v35 = vpop.f32.mrf.mxu2  ;;  %v6119_v19 = vpop.f32.mrf.mxu1 }
 0x14c   :  { %7530 = vst [vmem:[#allocation4_spill] sm:$0xff] %v6119_v19  ;;  %v2138_v30 = vadd.f32 %v2137_v27, %v6094_v35 }
 0x14e   :  { %v2139_v55 = vadd.f32 %v2138_v30, %v6101_v60 }
 0x150   :  { %v2140_v3 = vadd.f32 %v2139_v55, %v6111_v8 }
 0x152   :  { %v6129_v34 = vpop.f32.mrf.mxu3  ;;  %v2141_v15 = vadd.f32 %v2140_v3, %v6119_v19 }
 0x153   :  { %v6108_v6 = vpop.f32.mrf.mxu2  ;;  %7532 = vst [vmem:[#allocation6_spill] sm:$0xff] %v6129_v34 }
 0x154   :  { %v2108_v62 = vadd.f32 %v2107_v38, %v6108_v6 }
 0x156   :  { %v2109_v10 = vadd.f32 %v2108_v62, %v6114_v13 }
 0x15b   :  { %v6122_v22 = vpop.f32.mrf.mxu2 }
 0x15c   :  { %7531 = vst [vmem:[#allocation5_spill] sm:$0xff] %v6122_v22  ;;  %v2142_v20 = vadd.f32 %v2141_v15, %v6122_v22 }
 0x15e   :  { %v2143_v55 = vadd.f32 %v2142_v20, %v6129_v34 }
 0x160   :  { %v6124_v25 = vpop.f32.mrf.mxu0 }
 0x161   :  { %v2110_v17 = vadd.f32 %v2109_v10, %v6124_v25 }
 0x163   :  { %v6132_v52 = vpop.f32.mrf.mxu1 }
 0x164   :  { %7533 = vst [vmem:[#allocation7_spill] sm:$0xff] %v6132_v52  ;;  %v2111_v29 = vadd.f32 %v2110_v17, %v6132_v52 }
 0x167   :  { %v6136_v2 = vpop.f32.mrf.mxu2 }
 0x168   :  { %v6139_v7 = vpop.f32.mrf.mxu0  ;;  %v2112_v62 = vadd.f32 %v2111_v29, %v6136_v2 }
 0x169   :  { %7534 = vst [vmem:[#allocation8_spill] sm:$0xff] %v6139_v7  ;;  %v2144_v8 = vadd.f32 %v2143_v55, %v6139_v7 }
 0x16a   :  { %v6142_v14 = vpop.f32.mrf.mxu3 }
 0x16b   :  { %v6147_v27 = vpop.f32.mrf.mxu1  ;;  %v2113_v3 = vadd.f32 %v2112_v62, %v6142_v14 }
 0x16c   :  { %7535 = vst [vmem:[#allocation9_spill] sm:$0xff] %v6147_v27  ;;  %v2145_v15 = vadd.f32 %v2144_v8, %v6147_v27 }
 0x16f   :  { %v6150_v30 = vpop.f32.mrf.mxu2 }
 0x170   :  { %7536 = vst [vmem:[#allocation10_spill] sm:$0xff] %v6150_v30  ;;  %v2146_v19 = vadd.f32 %v2145_v15, %v6150_v30 }
 0x172   :  { %v6157_v60 = vpop.f32.mrf.mxu3 }
 0x173   :  { %7537 = vst [vmem:[#allocation11_spill] sm:$0xff] %v6157_v60  ;;  %v2147_v55 = vadd.f32 %v2146_v19, %v6157_v60 }
 0x180   :  { %v6152_v38 = vpop.f32.mrf.mxu0 }
 0x181   :  { %v2114_v17 = vadd.f32 %v2113_v3, %v6152_v38 }
 0x182   :  { %v6160_v10 = vpop.f32.mrf.mxu1 }
 0x183   :  { %v2115_v20 = vadd.f32 %v2114_v17, %v6160_v10 }
 0x187   :  { %v6164_v22 = vpop.f32.mrf.mxu2 }
 0x188   :  { %v6167_v52 = vpop.f32.mrf.mxu0  ;;  %v6170_v29 = vpop.f32.mrf.mxu3  ;;  %v2116_v62 = vadd.f32 %v2115_v20, %v6164_v22 }
 0x189   :  { %7538 = vst [vmem:[#allocation12_spill] sm:$0xff] %v6167_v52  ;;  %v2148_v7 = vadd.f32 %v2147_v55, %v6167_v52 }
 0x18a   :  { %v6175_v34 = vpop.f32.mrf.mxu1  ;;  %v2117_v8 = vadd.f32 %v2116_v62, %v6170_v29 }
 0x18b   :  { %v2149_v15 = vadd.f32 %v2148_v7, %v6175_v34 }
 0x18f   :  { %v6178_v3 = vpop.f32.mrf.mxu2 }
 0x190   :  { %v2150_v30 = vadd.f32 %v2149_v15, %v6178_v3  ;;  %v6185_v19 = vpop.f32.mrf.mxu3 }
 0x192   :  { %v2151_v20 = vadd.f32 %v2150_v30, %v6185_v19 }
 0x1a0   :  { %v6180_v27 = vpop.f32.mrf.mxu0 }
 0x1a1   :  { %v2118_v17 = vadd.f32 %v2117_v8, %v6180_v27 }
 0x1a3   :  { %2119 = vadd.xlane.f32.xlu0 %v2118_v17 }
 0x1a8   :  { %v6188_v55 = vpop.f32.mrf.mxu0 }
 0x1a9   :  { %v2152_v52 = vadd.f32 %v2151_v20, %v6188_v55 }
 0x1ab   :  { %2153 = vadd.xlane.f32.xlu0 %v2152_v52 }
 0x216   :  { %v2120_v62 = vpop.xlane.xlu0 %2119 }
 0x217   :  { %v6191_v60 = vmul.f32 0.00024038462, %v2120_v62 }
 0x219   :  { %v6195_v7 = vsub.f32 %v5974_v24, %v6191_v60  ;;  %v6199_v8 = vsub.f32 %v5982_v28, %v6191_v60  ;;  %v6203_v30 = vsub.f32 %v5990_v32, %v6191_v60  ;;  %v6211_v20 = vsub.f32 %v6000_v37, %v6191_v60 }
 0x21a   :  { %v6217_v28 = vsub.f32 %v6006_v40, %v6191_v60 }
 0x21b   :  { %7539 = vst [vmem:[#allocation13_spill] sm:$0xff] %v6195_v7  ;;  %v2356_v17 = vmul.f32 %v6195_v7, %v6195_v7  ;;  %v2357_v52 = vmul.f32 %v6199_v8, %v6199_v8  ;;  %v2358_v32 = vmul.f32 %v6203_v30, %v6203_v30  ;;  %v6223_v7 = vsub.f32 %v6011_v42, %v6191_v60 }
 0x21c   :  { %7540 = vst [vmem:[#allocation14_spill] sm:$0xff] %v6199_v8  ;;  %v2359_v40 = vmul.f32 %v6211_v20, %v6211_v20  ;;  %v2360_v42 = vmul.f32 %v6217_v28, %v6217_v28 }
 0x21d   :  { %7541 = vst [vmem:[#allocation15_spill] sm:$0xff] %v6203_v30  ;;  %v2422_v62 = vadd.f32 %v2357_v52, %v2356_v17  ;;  %v6237_v30 = vsub.f32 %v6013_v43, %v6191_v60 }
 0x21e   :  { %v2154_v15 = vpop.xlane.xlu0 %2153 }
 0x21f   :  { %v6213_v24 = vmul.f32 0.00024038462, %v2154_v15  ;;  %v2423_v15 = vadd.f32 %v2422_v62, %v2358_v32  ;;  %7544 = vst [vmem:[#allocation18_spill] sm:$0xff] %v6237_v30 }
 0x221   :  { %v6227_v8 = vsub.f32 %v5992_v33, %v6213_v24  ;;  %v6231_v37 = vsub.f32 %v6002_v39, %v6213_v24  ;;  %v2424_v17 = vadd.f32 %v2423_v15, %v2359_v40  ;;  %v6243_v33 = vsub.f32 %v6017_v45, %v6191_v60 }
 0x222   :  { %v2361_v39 = vmul.f32 %v6223_v7, %v6223_v7  ;;  %v6249_v52 = vsub.f32 %v6004_v53, %v6213_v24  ;;  %v6257_v40 = vsub.f32 %v6023_v48, %v6191_v60  ;;  %v6261_v45 = vsub.f32 %v6009_v41, %v6213_v24 }
 0x223   :  { %7542 = vst [vmem:[#allocation16_spill] sm:$0xff] %v6227_v8  ;;  %v2425_v32 = vadd.f32 %v2424_v17, %v2360_v42  ;;  %v2389_v43 = vmul.f32 %v6227_v8, %v6227_v8  ;;  %v2390_v62 = vmul.f32 %v6231_v37, %v6231_v37  ;;  %v2362_v15 = vmul.f32 %v6237_v30, %v6237_v30 }
 0x224   :  { %7543 = vst [vmem:[#allocation17_spill] sm:$0xff] %v6231_v37  ;;  %v6267_v42 = vsub.f32 %v6027_v50, %v6191_v60  ;;  %v6271_v17 = vsub.f32 %v6015_v44, %v6213_v24  ;;  %v2363_v48 = vmul.f32 %v6243_v33, %v6243_v33  ;;  %v2391_v41 = vmul.f32 %v6249_v52, %v6249_v52 }
 0x225   :  { %v2426_v53 = vadd.f32 %v2425_v32, %v2361_v39  ;;  %v2456_v8 = vadd.f32 %v2390_v62, %v2389_v43  ;;  %v6279_v30 = vsub.f32 %v6029_v58, %v6191_v60  ;;  %v6283_v50 = vsub.f32 %v6019_v46, %v6213_v24 }
 0x226   :  { %v2364_v44 = vmul.f32 %v6257_v40, %v6257_v40  ;;  %v2392_v32 = vmul.f32 %v6261_v45, %v6261_v45  ;;  %v6295_v58 = vsub.f32 %v6021_v47, %v6213_v24  ;;  %v2365_v46 = vmul.f32 %v6267_v42, %v6267_v42 }
 0x227   :  { %v2427_v37 = vadd.f32 %v2426_v53, %v2362_v15  ;;  %v2457_v15 = vadd.f32 %v2456_v8, %v2391_v41  ;;  %v6291_v53 = vsub.f32 %v6035_v54, %v6191_v60  ;;  %v2393_v62 = vmul.f32 %v6271_v17, %v6271_v17 }
 0x228   :  { %v6307_v54 = vsub.f32 %v6025_v49, %v6213_v24  ;;  %v2366_v47 = vmul.f32 %v6279_v30, %v6279_v30  ;;  %v2394_v41 = vmul.f32 %v6283_v50, %v6283_v50 }
 0x229   :  { %v2428_v39 = vadd.f32 %v2427_v37, %v2363_v48  ;;  %v2458_v37 = vadd.f32 %v2457_v15, %v2392_v32  ;;  %v6303_v48 = vsub.f32 %v6042_v59, %v6191_v60  ;;  %v6319_v59 = vsub.f32 %v6031_v51, %v6213_v24 }
 0x22a   :  { %v2367_v49 = vmul.f32 %v6291_v53, %v6291_v53  ;;  %v2395_v15 = vmul.f32 %v6295_v58, %v6295_v58 }
 0x22b   :  { %v2429_v43 = vadd.f32 %v2428_v39, %v2364_v44  ;;  %v2459_v44 = vadd.f32 %v2458_v37, %v2393_v62  ;;  %v6315_v39 = vsub.f32 %v6050_v0, %v6191_v60  ;;  %v6331_v0 = vsub.f32 %v6038_v56, %v6213_v24 }
 0x22c   :  { %v2368_v51 = vmul.f32 %v6303_v48, %v6303_v48  ;;  %v2396_v37 = vmul.f32 %v6307_v54, %v6307_v54 }
 0x22d   :  { %v2430_v8 = vadd.f32 %v2429_v43, %v2365_v46  ;;  %v2460_v46 = vadd.f32 %v2459_v44, %v2394_v41  ;;  %v6327_v43 = vsub.f32 %v6052_v1, %v6191_v60  ;;  %v6343_v1 = vsub.f32 %v6040_v57, %v6213_v24 }
 0x22e   :  { %v2369_v56 = vmul.f32 %v6315_v39, %v6315_v39  ;;  %v2397_v44 = vmul.f32 %v6319_v59, %v6319_v59 }
 0x22f   :  { %v2431_v32 = vadd.f32 %v2430_v8, %v2366_v47  ;;  %v2461_v47 = vadd.f32 %v2460_v46, %v2395_v15  ;;  %v6339_v8 = vsub.f32 %v6058_v5, %v6191_v60  ;;  %v6355_v5 = vsub.f32 %v6045_v61, %v6213_v24 }
 0x230   :  { %v2370_v57 = vmul.f32 %v6327_v43, %v6327_v43  ;;  %v2398_v46 = vmul.f32 %v6331_v0, %v6331_v0 }
 0x231   :  { %v2432_v62 = vadd.f32 %v2431_v32, %v2367_v49  ;;  %v2462_v49 = vadd.f32 %v2461_v47, %v2396_v37  ;;  %v6351_v32 = vsub.f32 %v6068_v12, %v6191_v60  ;;  %7545 = vst [vmem:[#allocation19_spill] sm:$0xff] %v6355_v5  ;;  %v6367_v12 = vsub.f32 %v6056_v4, %v6213_v24 }
 0x232   :  { %v2371_v61 = vmul.f32 %v6339_v8, %v6339_v8  ;;  %v2399_v47 = vmul.f32 %v6343_v1, %v6343_v1 }
 0x233   :  { %v2433_v41 = vadd.f32 %v2432_v62, %v2368_v51  ;;  %v2463_v51 = vadd.f32 %v2462_v49, %v2397_v44  ;;  %v6363_v62 = vsub.f32 %v6076_v18, %v6191_v60  ;;  %7546 = vst [vmem:[#allocation20_spill] sm:$0xff] %v6367_v12  ;;  %v6379_v18 = vsub.f32 %v6063_v9, %v6213_v24 }
 0x234   :  { %v2372_v4 = vmul.f32 %v6351_v32, %v6351_v32  ;;  %v2400_v49 = vmul.f32 %v6355_v5, %v6355_v5 }
 0x235   :  { %v2434_v15 = vadd.f32 %v2433_v41, %v2369_v56  ;;  %v2464_v56 = vadd.f32 %v2463_v51, %v2398_v46  ;;  %v6375_v41 = vsub.f32 %v6080_v21, %v6191_v60  ;;  %7547 = vst [vmem:[#allocation21_spill] sm:$0xff] %v6379_v18  ;;  %v6391_v21 = vsub.f32 %v6066_v11, %v6213_v24 }
 0x236   :  { %v2373_v9 = vmul.f32 %v6363_v62, %v6363_v62  ;;  %v2401_v51 = vmul.f32 %v6367_v12, %v6367_v12 }
 0x237   :  { %v2435_v37 = vadd.f32 %v2434_v15, %v2370_v57  ;;  %v2465_v57 = vadd.f32 %v2464_v56, %v2399_v47  ;;  %v6387_v15 = vsub.f32 %v6086_v26, %v6191_v60  ;;  %7548 = vst [vmem:[#allocation22_spill] sm:$0xff] %v6391_v21  ;;  %v6403_v26 = vsub.f32 %v6073_v16, %v6213_v24 }
 0x238   :  { %v2374_v11 = vmul.f32 %v6375_v41, %v6375_v41  ;;  %v2402_v56 = vmul.f32 %v6379_v18, %v6379_v18 }
 0x239   :  { %v2436_v44 = vadd.f32 %v2435_v37, %v2371_v61  ;;  %v2466_v61 = vadd.f32 %v2465_v57, %v2400_v49  ;;  %v6399_v37 = vsub.f32 %v6096_v36, %v6191_v60  ;;  %7549 = vst [vmem:[#allocation23_spill] sm:$0xff] %v6403_v26  ;;  %v6415_v36 = vsub.f32 %v6083_v23, %v6213_v24 }
 0x23a   :  { %v2375_v16 = vmul.f32 %v6387_v15, %v6387_v15  ;;  %v2403_v57 = vmul.f32 %v6391_v21, %v6391_v21 }
 0x23b   :  { %v2437_v46 = vadd.f32 %v2436_v44, %v2372_v4  ;;  %v2467_v4 = vadd.f32 %v2466_v61, %v2401_v51  ;;  %v6411_v44 = vsub.f32 %v6104_v63, %v6191_v60  ;;  %7550 = vst [vmem:[#allocation24_spill] sm:$0xff] %v6415_v36  ;;  %v6427_v63 = vsub.f32 %v6091_v31, %v6213_v24 }
 0x23c   :  { %v2376_v23 = vmul.f32 %v6399_v37, %v6399_v37  ;;  %v2404_v61 = vmul.f32 %v6403_v26, %v6403_v26 }
 0x23d   :  { %v2438_v47 = vadd.f32 %v2437_v46, %v2373_v9  ;;  %v2468_v9 = vadd.f32 %v2467_v4, %v2402_v56  ;;  %v6423_v46 = vsub.f32 %v6108_v6, %v6191_v60  ;;  %7551 = vst [vmem:[#allocation25_spill] sm:$0xff] %v6427_v63  ;;  %v6439_v6 = vsub.f32 %v6094_v35, %v6213_v24 }
 0x23e   :  { %v2377_v31 = vmul.f32 %v6411_v44, %v6411_v44  ;;  %v2405_v4 = vmul.f32 %v6415_v36, %v6415_v36  ;;  %v2406_v26 = vmul.f32 %v6427_v63, %v6427_v63  ;;  %v7554_v36 = vld [vmem:[#allocation7_spill] sm:$0xff] }
 0x23f   :  { %v2439_v49 = vadd.f32 %v2438_v47, %v2374_v11  ;;  %v2469_v11 = vadd.f32 %v2468_v9, %v2403_v57  ;;  %v6435_v47 = vsub.f32 %v6114_v13, %v6191_v60  ;;  %7552 = vst [vmem:[#allocation26_spill] sm:$0xff] %v6439_v6  ;;  %v7553_v57 = vld [vmem:[#allocation2_spill] sm:$0xff]  ;;  %v2378_v35 = vmul.f32 %v6423_v46, %v6423_v46 }
 0x240   :  { %v6451_v13 = vsub.f32 %v7553_v57, %v6213_v24 }
 0x241   :  { %v2440_v51 = vadd.f32 %v2439_v49, %v2375_v16  ;;  %v2470_v16 = vadd.f32 %v2469_v11, %v2404_v61  ;;  %v6447_v49 = vsub.f32 %v6124_v25, %v6191_v60  ;;  %v6459_v61 = vsub.f32 %v7554_v36, %v6191_v60  ;;  %v7555_v25 = vld [vmem:[#allocation3_spill] sm:$0xff] }
 0x242   :  { %v6463_v11 = vsub.f32 %v7555_v25, %v6213_v24  ;;  %v2379_v57 = vmul.f32 %v6435_v47, %v6435_v47  ;;  %v6474_v36 = vsub.f32 %v6136_v2, %v6191_v60  ;;  %v6486_v2 = vsub.f32 %v6142_v14, %v6191_v60 }
 0x243   :  { %v2441_v56 = vadd.f32 %v2440_v51, %v2376_v23  ;;  %v2471_v23 = vadd.f32 %v2470_v16, %v2405_v4  ;;  %v2223_v51 = vlaneseq  ;;  %v2658_v4 = vld [vmem:[%s7493_s3] sm:$0xff]  ;;  %v7557_v16 = vld [vmem:[#allocation4_spill] sm:$0xff]  ;;  %v2380_v63 = vmul.f32 %v6447_v49, %v6447_v49 }
 0x244   :  { %7556 = vst [vmem:[#allocation2_spill] sm:$0xff] %v6463_v11  ;;  %v6478_v25 = vsub.f32 %v7557_v16, %v6213_v24  ;;  %v7559_v16 = vld [vmem:[#allocation5_spill] sm:$0xff]  ;;  %v2381_v12 = vmul.f32 %v6459_v61, %v6459_v61 }
 0x245   :  { %v2442_v9 = vadd.f32 %v2441_v56, %v2377_v31  ;;  %v2407_v31 = vmul.f32 %v6439_v6, %v6439_v6  ;;  %v2472_v56 = vadd.f32 %v2471_v23, %v2406_v26  ;;  %v2408_v26 = vmul.f32 %v6451_v13, %v6451_v13 }
 0x246   :  { %7558 = vst [vmem:[#allocation7_spill] sm:$0xff] %v6478_v25  ;;  %v2224_v6 = vand.u32 127, %v2223_v51  ;;  %v6490_v18 = vsub.f32 %v7559_v16, %v6213_v24  ;;  %v7561_v51 = vld [vmem:[#allocation6_spill] sm:$0xff]  ;;  %v2383_v16 = vmul.f32 %v6486_v2, %v6486_v2 }
 0x247   :  { %v2443_v21 = vadd.f32 %v2442_v9, %v2378_v35  ;;  %v4340_v35 = vmov 0   ;;  %v2473_v23 = vadd.f32 %v2472_v56, %v2407_v31  ;;  %v6498_v31 = vsub.f32 %v6152_v38, %v6191_v60  ;;  %v7563_v38 = vld [vmem:[#allocation8_spill] sm:$0xff] }
 0x248   :  { %4333 = vset.pattern.permute.xlu0 %v4340_v35  ;;  %4334 = vset.pattern.permute.xlu1 %v4340_v35  ;;  %7560 = vst [vmem:[#allocation3_spill] sm:$0xff] %v6490_v18  ;;  %v6502_v14 = vsub.f32 %v7561_v51, %v6213_v24  ;;  %v2382_v56 = vmul.f32 %v6474_v36, %v6474_v36 }
 0x249   :  { %v2444_v9 = vadd.f32 %v2443_v21, %v2379_v57  ;;  %2662 = vperm.xlu0 %4333, %v2658_v4   ;;  %4332 = vset.pattern.permute.xlu2 %v4340_v35  ;;  %v2409_v21 = vmul.f32 %v6463_v11, %v6463_v11  ;;  %v2474_v57 = vadd.f32 %v2473_v23, %v2408_v26 }
 0x24a   :  { %7562 = vst [vmem:[#allocation4_spill] sm:$0xff] %v6502_v14  ;;  %v2410_v35 = vmul.f32 %v6478_v25, %v6478_v25  ;;  %v6510_v26 = vsub.f32 %v6160_v10, %v6191_v60  ;;  %v6514_v23 = vsub.f32 %v7563_v38, %v6213_v24  ;;  %v2412_v25 = vmul.f32 %v6502_v14, %v6502_v14 }
 0x24b   :  { %v2445_v5 = vadd.f32 %v2444_v9, %v2380_v63  ;;  %v2475_v63 = vadd.f32 %v2474_v57, %v2409_v21  ;;  %v2256_v9 = vadd.s32 4096, %v2224_v6  ;;  %v6522_v21 = vsub.f32 %v6164_v22, %v6191_v60  ;;  %v7564_v6 = vld [vmem:[#allocation9_spill] sm:$0xff] }
 0x24c   :  { %v6526_v10 = vsub.f32 %v7564_v6, %v6213_v24  ;;  %v2384_v57 = vmul.f32 %v6498_v31, %v6498_v31  ;;  %v2189_v22 = vsub.f32 %v6180_v27, %v6191_v60  ;;  %v2385_v6 = vmul.f32 %v6510_v26, %v6510_v26 }
 0x24d   :  { %v2446_v4 = vadd.f32 %v2445_v5, %v2381_v12  ;;  %v2411_v5 = vmul.f32 %v6490_v18, %v6490_v18  ;;  %v2476_v12 = vadd.f32 %v2475_v63, %v2410_v35  ;;  %vm2289_vm0 = vcmp.lt.s32.totalorder %v2256_v9, 4160  ;;  %v7565_v35 = vld [vmem:[#allocation10_spill] sm:$0xff]  ;;  %v7567_v18 = vld [vmem:[#allocation12_spill] sm:$0xff]  ;;  %v2581_v9 = vld [vmem:[%s7494_s2 + $0x8] sm:$0xff] }
 0x24e   :  { %v6540_v63 = vsub.f32 %v7565_v35, %v6213_v24  ;;  %v2414_v27 = vmul.f32 %v6526_v10, %v6526_v10  ;;  %v6556_v11 = vsub.f32 %v7567_v18, %v6213_v24 }
 0x24f   :  { %v2447_v51 = vadd.f32 %v2446_v4, %v2382_v56  ;;  %v2477_v56 = vadd.f32 %v2476_v12, %v2411_v5  ;;  %v6534_v4 = vsub.f32 %v6170_v29, %v6191_v60  ;;  %v7566_v12 = vld [vmem:[#allocation11_spill] sm:$0xff]  ;;  %v2386_v29 = vmul.f32 %v6522_v21, %v6522_v21 }
 0x250   :  { %v6548_v14 = vsub.f32 %v7566_v12, %v6213_v24 }
 0x251   :  { %v2448_v38 = vadd.f32 %v2447_v51, %v2383_v16  ;;  %v2413_v51 = vmul.f32 %v6514_v23, %v6514_v23  ;;  %v2478_v5 = vadd.f32 %v2477_v56, %v2412_v25  ;;  %v2387_v25 = vmul.f32 %v6534_v4, %v6534_v4 }
 0x252   :  { %v2415_v56 = vmul.f32 %v6540_v63, %v6540_v63 }
 0x253   :  { %v2449_v16 = vadd.f32 %v2448_v38, %v2384_v57  ;;  %v2479_v35 = vadd.f32 %v2478_v5, %v2413_v51  ;;  %v6559_v57 = vsel %vm2289_vm0, %v2189_v22, 0.0  ;;  %v2416_v22 = vmul.f32 %v6548_v14, %v6548_v14 }
 0x254   :  { %v6575_v5 = vsub.f32 %v6178_v3, %v6213_v24 }
 0x255   :  { %v2450_v60 = vadd.f32 %v2449_v16, %v2385_v6  ;;  %v2480_v12 = vadd.f32 %v2479_v35, %v2414_v27  ;;  %v6567_v6 = vsub.f32 %v6175_v34, %v6213_v24  ;;  %v2388_v16 = vmul.f32 %v6559_v57, %v6559_v57 }
 0x256   :  { %7568 = vst [vmem:[#allocation5_spill] sm:$0xff] %v6575_v5  ;;  %v2222_v34 = vsub.f32 %v6188_v55, %v6213_v24  ;;  %v6583_v35 = vsub.f32 %v6185_v19, %v6213_v24  ;;  %v2419_v3 = vmul.f32 %v6575_v5, %v6575_v5  ;;  %v2580_v55 = vld [vmem:[%s7494_s2] sm:$0xff]  ;;  %v7573_v5 = vld [vmem:[#allocation15_spill] sm:$0xff] }
 0x257   :  { %v2451_v38 = vadd.f32 %v2450_v60, %v2386_v29  ;;  %v2481_v51 = vadd.f32 %v2480_v12, %v2415_v56  ;;  %v2417_v60 = vmul.f32 %v6556_v11, %v6556_v11  ;;  %2584 = vperm.xlu2 %4332, %v2580_v55  }
 0x258   :  { %7569 = vst [vmem:[#allocation6_spill] sm:$0xff] %v6583_v35  ;;  %v6590_v12 = vsel %vm2289_vm0, %v2222_v34, 0.0  ;;  %v2420_v19 = vmul.f32 %v6583_v35, %v6583_v35 }
 0x259   :  { %v2452_v18 = vadd.f32 %v2451_v38, %v2387_v25  ;;  %v2482_v27 = vadd.f32 %v2481_v51, %v2416_v22  ;;  %v2418_v25 = vmul.f32 %v6567_v6, %v6567_v6  ;;  %7570 = vst [vmem:[#allocation8_spill] sm:$0xff] %v6590_v12  ;;  %v2659_v51 = vld [vmem:[%s7493_s3 + $0x8] sm:$0xff] }
 0x25b   :  { %v2453_v29 = vadd.f32 %v2452_v18, %v2388_v16  ;;  %v2483_v38 = vadd.f32 %v2482_v27, %v2417_v60  ;;  %v2421_v16 = vmul.f32 %v6590_v12, %v6590_v12 }
 0x25d   :  { %2454 = vadd.xlane.f32.xlu1 %v2453_v29  ;;  %v2484_v56 = vadd.f32 %v2483_v38, %v2418_v25 }
 0x25f   :  { %v2485_v24 = vadd.f32 %v2484_v56, %v2419_v3  ;;  %2589 = vperm.xlu2 %4332, %v2581_v9  }
 0x261   :  { %v2486_v18 = vadd.f32 %v2485_v24, %v2420_v19 }
 0x263   :  { %v2487_v22 = vadd.f32 %v2486_v18, %v2421_v16 }
 0x265   :  { %2488 = vadd.xlane.f32.xlu1 %v2487_v22 }
 0x27e   :  { %2667 = vperm.xlu1 %4334, %v2659_v51  }
 0x2d0   :  { %v2455_v29 = vpop.xlane.xlu1 %2454 }
 0x2d1   :  { %v2490_v60 = vmul.f32 0.00024038462, %v2455_v29 }
 0x2d3   :  { %v2492_v27 = vadd.f32 1e-05, %v2490_v60 }
 0x2d5   :  { %4335 = vrsqrt.f32 %v2492_v27  ;;  %vm2500_vm2 = vweird.f32 %v2492_v27 }
 0x2d8   :  { %v2489_v34 = vpop.xlane.xlu1 %2488 }
 0x2d9   :  { %v2491_v25 = vmul.f32 0.00024038462, %v2489_v34  ;;  %v7571_v34 = vld [vmem:[#allocation13_spill] sm:$0xff] }
 0x2db   :  { %v4336_v38 = vpop.eup %4335  ;;  %v2493_v3 = vadd.f32 1e-05, %v2491_v25  ;;  %v7572_v25 = vld [vmem:[#allocation14_spill] sm:$0xff] }
 0x2dc   :  { %v2495_v56 = vmul.f32 %v4336_v38, %v2492_v27  ;;  %vm2501_vm1 = vweird.f32 %v4336_v38 }
 0x2dd   :  { %4337 = vrsqrt.f32 %v2493_v3  ;;  %vm2502_vm3 = vmor %vm2500_vm2, %vm2501_vm1  ;;  %vm2510_vm4 = vweird.f32 %v2493_v3 }
 0x2de   :  { %v2496_v55 = vmul.f32 %v4336_v38, %v2495_v56 }
 0x2e0   :  { %v2497_v24 = vmul.f32 0.5, %v2496_v55 }
 0x2e2   :  { %v2498_v18 = vsub.f32 1.5, %v2497_v24 }
 0x2e3   :  { %v4338_v19 = vpop.eup %4337 }
 0x2e4   :  { %v2505_v16 = vmul.f32 %v4338_v19, %v2493_v3  ;;  %v2499_v9 = vmul.f32 %v4336_v38, %v2498_v18  ;;  %vm2511_vm5 = vweird.f32 %v4338_v19 }
 0x2e5   :  { %vm2512_vm6 = vmor %vm2510_vm4, %vm2511_vm5 }
 0x2e6   :  { %v2506_v22 = vmul.f32 %v4338_v19, %v2505_v16  ;;  %v2503_v29 = vsel %vm2502_vm3, %v4336_v38, %v2499_v9  ;;  %v7574_v38 = vld [vmem:[#allocation18_spill] sm:$0xff] }
 0x2e7   :  { %v2514_v12 = vmul.f32 %v2503_v29, %v7571_v34  ;;  %v2515_v35 = vmul.f32 %v2503_v29, %v7572_v25  ;;  %v6608_v56 = vmul.f32 %v2503_v29, %v7573_v5  ;;  %v6611_v55 = vmul.f32 %v2503_v29, %v6211_v20  ;;  %v7581_v34 = vld [vmem:[#allocation17_spill] sm:$0xff] }
 0x2e8   :  { %v2507_v51 = vmul.f32 0.5, %v2506_v22  ;;  %v6614_v24 = vmul.f32 %v2503_v29, %v6217_v28  ;;  %v6617_v27 = vmul.f32 %v2503_v29, %v6223_v7  ;;  %v6620_v16 = vmul.f32 %v2503_v29, %v7574_v38 }
 0x2e9   :  { %v6623_v18 = vmul.f32 %v2503_v29, %v6243_v33  ;;  %v6626_v22 = vmul.f32 %v2503_v29, %v6257_v40  ;;  %v6629_v9 = vmul.f32 %v2503_v29, %v6267_v42  ;;  %v6632_v20 = vmul.f32 %v2503_v29, %v6279_v30 }
 0x2ea   :  { %v2508_v60 = vsub.f32 1.5, %v2507_v51  ;;  %v6635_v28 = vmul.f32 %v2503_v29, %v6291_v53  ;;  %v6638_v7 = vmul.f32 %v2503_v29, %v6303_v48  ;;  %v6641_v51 = vmul.f32 %v2503_v29, %v6315_v39 }
 0x2eb   :  { %v6644_v33 = vmul.f32 %v2503_v29, %v6327_v43  ;;  %v6647_v40 = vmul.f32 %v2503_v29, %v6339_v8  ;;  %v6650_v42 = vmul.f32 %v2503_v29, %v6351_v32  ;;  %v6653_v30 = vmul.f32 %v2503_v29, %v6363_v62 }
 0x2ec   :  { %v2509_v5 = vmul.f32 %v4338_v19, %v2508_v60  ;;  %v6656_v53 = vmul.f32 %v2503_v29, %v6375_v41  ;;  %v6659_v48 = vmul.f32 %v2503_v29, %v6387_v15  ;;  %v6664_v39 = vmul.f32 %v2503_v29, %v6399_v37  ;;  %v6675_v41 = vpop.permute.xlu2 %2584 }
 0x2ed   :  { %v6667_v43 = vmul.f32 %v2503_v29, %v6411_v44  ;;  %v6670_v8 = vmul.f32 %v2503_v29, %v6423_v46  ;;  %v6673_v32 = vmul.f32 %v2503_v29, %v6435_v47  ;;  %v6678_v15 = vmul.f32 %v2503_v29, %v6447_v49 }
 0x2ee   :  { %v2513_v62 = vsel %vm2512_vm6, %v4338_v19, %v2509_v5  ;;  %v6681_v3 = vmul.f32 %v2503_v29, %v6459_v61  ;;  %v6684_v37 = vmul.f32 %v2503_v29, %v6474_v36  ;;  %v6687_v44 = vmul.f32 %v2503_v29, %v6486_v2 }
 0x2ef   :  { %v6690_v46 = vmul.f32 %v2503_v29, %v6498_v31  ;;  %v6693_v47 = vmul.f32 %v2503_v29, %v6510_v26  ;;  %v6696_v19 = vmul.f32 %v2503_v29, %v6522_v21  ;;  %v6699_v49 = vmul.f32 %v2503_v29, %v6534_v4  ;;  %v7580_v31 = vld [vmem:[#allocation16_spill] sm:$0xff] }
 0x2f0   :  { %v6702_v61 = vmul.f32 %v2503_v29, %v6559_v57  ;;  %v6705_v36 = vmul.f32 %v6675_v41, %v2514_v12  ;;  %v6708_v2 = vmul.f32 %v6675_v41, %v2515_v35  ;;  %v2547_v60 = vmul.f32 %v2513_v62, %v7580_v31  ;;  %v7582_v31 = vld [vmem:[#allocation19_spill] sm:$0xff] }
 0x2f1   :  { %7575 = vst [vmem:[#allocation9_spill] sm:$0xff] %v6696_v19  ;;  %v2548_v26 = vmul.f32 %v2513_v62, %v7581_v34  ;;  %v2549_v25 = vmul.f32 %v2513_v62, %v6249_v52  ;;  %v2550_v21 = vmul.f32 %v2513_v62, %v6261_v45  ;;  %v2551_v4 = vmul.f32 %v2513_v62, %v6271_v17 }
 0x2f2   :  { %7576 = vst [vmem:[#allocation10_spill] sm:$0xff] %v6699_v49  ;;  %v2552_v38 = vmul.f32 %v2513_v62, %v6283_v50  ;;  %v2553_v57 = vmul.f32 %v2513_v62, %v6295_v58  ;;  %v2554_v12 = vmul.f32 %v2513_v62, %v6307_v54  ;;  %v2555_v29 = vmul.f32 %v2513_v62, %v6319_v59  ;;  %v7587_v50 = vld [vmem:[#allocation23_spill] sm:$0xff]  ;;  %v7589_v58 = vld [vmem:[#allocation24_spill] sm:$0xff]  ;;  %v7591_v59 = vld [vmem:[#allocation25_spill] sm:$0xff] }
 0x2f3   :  { %7577 = vst [vmem:[#allocation11_spill] sm:$0xff] %v6702_v61  ;;  %v2556_v35 = vmul.f32 %v2513_v62, %v6331_v0  ;;  %v2557_v5 = vmul.f32 %v2513_v62, %v6343_v1  ;;  %v2558_v34 = vmul.f32 %v2513_v62, %v7582_v31  ;;  %v7585_v61 = vld [vmem:[#allocation22_spill] sm:$0xff]  ;;  %v6728_v49 = vmul.f32 %v2513_v62, %v7587_v50  ;;  %v7596_v50 = vld [vmem:[#allocation3_spill] sm:$0xff] }
 0x2f4   :  { %7578 = vst [vmem:[#allocation12_spill] sm:$0xff] %v6705_v36  ;;  %v7584_v36 = vld [vmem:[#allocation21_spill] sm:$0xff]  ;;  %v6725_v17 = vmul.f32 %v2513_v62, %v7585_v61  ;;  %v6731_v54 = vmul.f32 %v2513_v62, %v7589_v58  ;;  %v6734_v19 = vmul.f32 %v2513_v62, %v7591_v59  ;;  %v7592_v0 = vld [vmem:[#allocation26_spill] sm:$0xff]  ;;  %v6740_v31 = vmul.f32 %v2513_v62, %v6451_v13  ;;  %v7594_v61 = vld [vmem:[#allocation7_spill] sm:$0xff] }
 0x2f5   :  { %7579 = vst [vmem:[#allocation13_spill] sm:$0xff] %v6708_v2  ;;  %v7583_v2 = vld [vmem:[#allocation20_spill] sm:$0xff]  ;;  %v2560_v45 = vmul.f32 %v2513_v62, %v7584_v36  ;;  %v6737_v1 = vmul.f32 %v2513_v62, %v7592_v0  ;;  %v6755_v59 = vmul.f32 %v2513_v62, %v6514_v23  ;;  %v6758_v0 = vmul.f32 %v2513_v62, %v6526_v10 }
 0x2f6   :  { %v2559_v52 = vmul.f32 %v2513_v62, %v7583_v2  ;;  %7586 = vst [vmem:[#allocation14_spill] sm:$0xff] %v6725_v17  ;;  %v7593_v2 = vld [vmem:[#allocation2_spill] sm:$0xff]  ;;  %v6746_v17 = vmul.f32 %v2513_v62, %v7594_v61  ;;  %v7598_v58 = vld [vmem:[#allocation4_spill] sm:$0xff]  ;;  %v6761_v13 = vmul.f32 %v2513_v62, %v6540_v63  ;;  %v6766_v61 = vpop.permute.xlu2 %2589 }
 0x2f7   :  { %7588 = vst [vmem:[#allocation15_spill] sm:$0xff] %v6728_v49  ;;  %v6743_v36 = vmul.f32 %v2513_v62, %v7593_v2  ;;  %v6749_v49 = vmul.f32 %v2513_v62, %v7596_v50  ;;  %v6764_v2 = vmul.f32 %v2513_v62, %v6548_v14  ;;  %v6769_v50 = vmul.f32 %v2513_v62, %v6556_v11 }
 0x2f8   :  { %7590 = vst [vmem:[#allocation18_spill] sm:$0xff] %v6731_v54  ;;  %v6752_v54 = vmul.f32 %v2513_v62, %v7598_v58  ;;  %v6772_v58 = vmul.f32 %v2513_v62, %v6567_v6  ;;  %v6784_v14 = vmul.f32 %v6766_v61, %v2547_v60  ;;  %v6790_v11 = vmul.f32 %v6766_v61, %v2549_v25 }
 0x2f9   :  { %7595 = vst [vmem:[#allocation16_spill] sm:$0xff] %v6746_v17  ;;  %v6793_v6 = vmul.f32 %v6766_v61, %v2550_v21  ;;  %v6805_v60 = vmul.f32 %v6766_v61, %v2554_v12  ;;  %v6811_v25 = vmul.f32 %v6766_v61, %v2556_v35  ;;  %v6814_v21 = vmul.f32 %v6766_v61, %v2557_v5 }
 0x2fa   :  { %7597 = vst [vmem:[#allocation17_spill] sm:$0xff] %v6749_v49  ;;  %v2594_v12 = vmul.f32 %v6675_v41, %v6608_v56  ;;  %v2596_v35 = vmul.f32 %v6675_v41, %v6614_v24  ;;  %v2597_v5 = vmul.f32 %v6675_v41, %v6617_v27  ;;  %v2601_v56 = vmul.f32 %v6675_v41, %v6629_v9 }
 0x2fb   :  { %7599 = vst [vmem:[#allocation19_spill] sm:$0xff] %v6752_v54  ;;  %v7606_v54 = vld [vmem:[#allocation5_spill] sm:$0xff]  ;;  %v2603_v24 = vmul.f32 %v6675_v41, %v6635_v28  ;;  %v2604_v27 = vmul.f32 %v6675_v41, %v6638_v7  ;;  %v2608_v9 = vmul.f32 %v6675_v41, %v6650_v42  ;;  %v2610_v28 = vmul.f32 %v6675_v41, %v6656_v53 }
 0x2fc   :  { %7600 = vst [vmem:[#allocation20_spill] sm:$0xff] %v6755_v59  ;;  %v6775_v23 = vmul.f32 %v2513_v62, %v7606_v54  ;;  %v7608_v59 = vld [vmem:[#allocation6_spill] sm:$0xff]  ;;  %v6796_v54 = vmul.f32 %v6766_v61, %v2551_v4  ;;  %v6817_v4 = vmul.f32 %v6766_v61, %v2558_v34  ;;  %v2598_v34 = vmul.f32 %v6675_v41, %v6620_v16 }
 0x2fd   :  { %7601 = vst [vmem:[#allocation21_spill] sm:$0xff] %v6758_v0  ;;  %v6778_v10 = vmul.f32 %v2513_v62, %v7608_v59  ;;  %v7610_v0 = vld [vmem:[#allocation8_spill] sm:$0xff]  ;;  %v6799_v59 = vmul.f32 %v6766_v61, %v2552_v38  ;;  %v6820_v38 = vmul.f32 %v6766_v61, %v2559_v52  ;;  %v2599_v52 = vmul.f32 %v6675_v41, %v6623_v18 }
 0x2fe   :  { %7602 = vst [vmem:[#allocation22_spill] sm:$0xff] %v6761_v13  ;;  %v6781_v63 = vmul.f32 %v2513_v62, %v7610_v0  ;;  %v6802_v62 = vmul.f32 %v6766_v61, %v2553_v57  ;;  %v6823_v57 = vmul.f32 %v6766_v61, %v2560_v45  ;;  %v2600_v45 = vmul.f32 %v6675_v41, %v6626_v22  ;;  %v2663_v0 = vpop.permute.xlu0 %2662 }
 0x2ff   :  { %7603 = vst [vmem:[#allocation23_spill] sm:$0xff] %v6764_v2  ;;  %v6787_v2 = vmul.f32 %v6766_v61, %v2548_v26  ;;  %v6808_v26 = vmul.f32 %v6766_v61, %v2555_v29  ;;  %v2595_v29 = vmul.f32 %v6675_v41, %v6611_v55  ;;  %v2602_v55 = vmul.f32 %v6675_v41, %v6632_v20 }
 0x300   :  { %7604 = vst [vmem:[#allocation24_spill] sm:$0xff] %v6769_v50  ;;  %v2605_v16 = vmul.f32 %v6675_v41, %v6641_v51  ;;  %v2606_v18 = vmul.f32 %v6675_v41, %v6644_v33  ;;  %v2607_v22 = vmul.f32 %v6675_v41, %v6647_v40  ;;  %v2609_v20 = vmul.f32 %v6675_v41, %v6653_v30 }
 0x301   :  { %7605 = vst [vmem:[#allocation25_spill] sm:$0xff] %v6772_v58  ;;  %v2611_v7 = vmul.f32 %v6675_v41, %v6659_v48  ;;  %v2612_v51 = vmul.f32 %v6675_v41, %v6664_v39  ;;  %v2613_v33 = vmul.f32 %v6675_v41, %v6667_v43  ;;  %v2614_v40 = vmul.f32 %v6675_v41, %v6670_v8 }
 0x302   :  { %7607 = vst [vmem:[#allocation26_spill] sm:$0xff] %v6775_v23  ;;  %v2615_v42 = vmul.f32 %v6675_v41, %v6673_v32  ;;  %v2616_v30 = vmul.f32 %v6675_v41, %v6678_v15  ;;  %v2617_v53 = vmul.f32 %v6675_v41, %v6681_v3  ;;  %v2618_v48 = vmul.f32 %v6675_v41, %v6684_v37 }
 0x303   :  { %7609 = vst [vmem:[#allocation2_spill] sm:$0xff] %v6778_v10  ;;  %v2619_v39 = vmul.f32 %v6675_v41, %v6687_v44  ;;  %v2620_v43 = vmul.f32 %v6675_v41, %v6690_v46  ;;  %v2621_v8 = vmul.f32 %v6675_v41, %v6693_v47  ;;  %v6891_v44 = vadd.f32 %v2663_v0, %v2594_v12 }
 0x304   :  { %7611 = vst [vmem:[#allocation7_spill] sm:$0xff] %v6781_v63  ;;  %v6893_v46 = vadd.f32 %v2663_v0, %v2595_v29  ;;  %v6897_v47 = vadd.f32 %v2663_v0, %v2597_v5  ;;  %v6913_v12 = vadd.f32 %v2663_v0, %v2605_v16  ;;  %v6915_v29 = vadd.f32 %v2663_v0, %v2606_v18 }
 0x305   :  { %7612 = vst [vmem:[#allocation3_spill] sm:$0xff] %v6784_v14  ;;  %v6919_v5 = vadd.f32 %v2663_v0, %v2608_v9  ;;  %v6935_v16 = vadd.f32 %v2663_v0, %v2616_v30  ;;  %v6937_v18 = vadd.f32 %v2663_v0, %v2617_v53  ;;  %v6941_v9 = vadd.f32 %v2663_v0, %v2619_v39 }
 0x306   :  { %7613 = vst [vmem:[#allocation4_spill] sm:$0xff] %v6787_v2  ;;  %vm2738_vm9 = vcmp.gt.f32.partialorder %v6891_v44, 0.0  ;;  %vm2739_vm10 = vcmp.gt.f32.partialorder %v6893_v46, 0.0  ;;  %vm2741_vm12 = vcmp.gt.f32.partialorder %v6897_v47, 0.0  ;;  %vm2749_vm4 = vcmp.gt.f32.partialorder %v6913_v12, 0.0 }
 0x307   :  { %7614 = vst [vmem:[#allocation5_spill] sm:$0xff] %v6790_v11  ;;  %v2805_v30 = vmul.f32 0.2, %v6893_v46  ;;  %v2818_v11 = vmul.f32 0.2, %v6919_v5  ;;  %vm2763_vm6 = vcmp.gt.f32.partialorder %v6941_v9, 0.0 }
 0x308   :  { %7615 = vst [vmem:[#allocation6_spill] sm:$0xff] %v6793_v6 }
 0x309   :  { %7616 = vst [vmem:[#allocation8_spill] sm:$0xff] %v6796_v54  ;;  %v2815_v54 = vmul.f32 0.2, %v6913_v12  ;;  %v2871_v2 = vsel %vm2739_vm10, %v6893_v46, %v2805_v30 }
 0x30a   :  { %7617 = vst [vmem:[#allocation27_spill] sm:$0xff] %v6799_v59 }
 0x30b   :  { %7618 = vst [vmem:[#allocation28_spill] sm:$0xff] %v6802_v62  ;;  %v6901_v62 = vadd.f32 %v2663_v0, %v2599_v52  ;;  %v6923_v52 = vadd.f32 %v2663_v0, %v2610_v28  ;;  %v6945_v28 = vadd.f32 %v2663_v0, %v2621_v8 }
 0x30c   :  { %7619 = vst [vmem:[#allocation29_spill] sm:$0xff] %v6805_v60  ;;  %v6895_v60 = vadd.f32 %v2663_v0, %v2596_v35  ;;  %v6917_v35 = vadd.f32 %v2663_v0, %v2607_v22  ;;  %v6939_v22 = vadd.f32 %v2663_v0, %v2618_v48  ;;  %v2807_v48 = vmul.f32 0.2, %v6897_v47 }
 0x30d   :  { %7620 = vst [vmem:[#allocation30_spill] sm:$0xff] %v6808_v26  ;;  %vm2743_vm14 = vcmp.gt.f32.partialorder %v6901_v62, 0.0  ;;  %vm2754_vm5 = vcmp.gt.f32.partialorder %v6923_v52, 0.0 }
 0x30e   :  { %7621 = vst [vmem:[#allocation31_spill] sm:$0xff] %v6811_v25  ;;  %v7630_v25 = vld [vmem:[#allocation13_spill] sm:$0xff]  ;;  %vm2740_vm11 = vcmp.gt.f32.partialorder %v6895_v60, 0.0  ;;  %v2806_v53 = vmul.f32 0.2, %v6895_v60  ;;  %v2873_v23 = vsel %vm2741_vm12, %v6897_v47, %v2807_v48 }
 0x30f   :  { %7622 = vst [vmem:[#allocation32_spill] sm:$0xff] %v6814_v21  ;;  %v7629_v21 = vld [vmem:[#allocation12_spill] sm:$0xff]  ;;  %v6889_v26 = vadd.f32 %v2663_v0, %v7630_v25  ;;  %v6909_v25 = vadd.f32 %v2663_v0, %v2603_v24  ;;  %v6931_v24 = vadd.f32 %v2663_v0, %v2614_v40  ;;  %v2827_v47 = vmul.f32 0.2, %v6937_v18 }
 0x310   :  { %7623 = vst [vmem:[#allocation33_spill] sm:$0xff] %v6817_v4  ;;  %v7628_v4 = vld [vmem:[#allocation11_spill] sm:$0xff]  ;;  %v2670_v37 = vadd.f32 %v2663_v0, %v7629_v21  ;;  %v6907_v21 = vadd.f32 %v2663_v0, %v2602_v55  ;;  %v6929_v55 = vadd.f32 %v2663_v0, %v2613_v33  ;;  %v2872_v63 = vsel %vm2740_vm11, %v6895_v60, %v2806_v53 }
 0x311   :  { %7624 = vst [vmem:[#allocation34_spill] sm:$0xff] %v6820_v38  ;;  %v7627_v38 = vld [vmem:[#allocation10_spill] sm:$0xff]  ;;  %v2624_v3 = vmul.f32 %v6675_v41, %v7628_v4  ;;  %v6911_v4 = vadd.f32 %v2663_v0, %v2604_v27  ;;  %v6933_v27 = vadd.f32 %v2663_v0, %v2615_v42  ;;  %vm2737_vm8 = vcmp.gt.f32.partialorder %v6889_v26, 0.0 }
 0x312   :  { %7625 = vst [vmem:[#allocation35_spill] sm:$0xff] %v6823_v57  ;;  %v7626_v57 = vld [vmem:[#allocation9_spill] sm:$0xff]  ;;  %v2623_v15 = vmul.f32 %v6675_v41, %v7627_v38  ;;  %v6903_v38 = vadd.f32 %v2663_v0, %v2600_v45  ;;  %v6925_v45 = vadd.f32 %v2663_v0, %v2611_v7  ;;  %vm2736_vm7 = vcmp.gt.f32.partialorder %v2670_v37, 0.0 }
 0x313   :  { %v2622_v32 = vmul.f32 %v6675_v41, %v7626_v57  ;;  %v6899_v57 = vadd.f32 %v2663_v0, %v2598_v34  ;;  %v6905_v41 = vadd.f32 %v2663_v0, %v2601_v56  ;;  %v6921_v34 = vadd.f32 %v2663_v0, %v2609_v20 }
 0x314   :  { %v6927_v56 = vadd.f32 %v2663_v0, %v2612_v51  ;;  %v6943_v20 = vadd.f32 %v2663_v0, %v2620_v43  ;;  %v6949_v51 = vadd.f32 %v2663_v0, %v2623_v15  ;;  %v6951_v33 = vadd.f32 %v2663_v0, %v2624_v3 }
 0x315   :  { %v6947_v7 = vadd.f32 %v2663_v0, %v2622_v32  ;;  %vm2742_vm13 = vcmp.gt.f32.partialorder %v6899_v57, 0.0  ;;  %v2802_v40 = vmul.f32 0.2, %v2670_v37  ;;  %vm2744_vm15 = vcmp.gt.f32.partialorder %v6903_v38, 0.0 }
 0x316   :  { %v2803_v0 = vmul.f32 0.2, %v6889_v26  ;;  %vm2747_vm2 = vcmp.gt.f32.partialorder %v6909_v25, 0.0  ;;  %vm2748_vm3 = vcmp.gt.f32.partialorder %v6911_v4, 0.0  ;;  %v2804_v42 = vmul.f32 0.2, %v6891_v44 }
 0x317   :  { %v2808_v39 = vmul.f32 0.2, %v6899_v57  ;;  %v2809_v43 = vmul.f32 0.2, %v6901_v62  ;;  %v2868_v8 = vsel %vm2736_vm7, %v2670_v37, %v2802_v40  ;;  %v2810_v32 = vmul.f32 0.2, %v6903_v38 }
 0x318   :  { %v2811_v15 = vmul.f32 0.2, %v6905_v41  ;;  %v2812_v3 = vmul.f32 0.2, %v6907_v21  ;;  %v2869_v59 = vsel %vm2737_vm8, %v6889_v26, %v2803_v0  ;;  %vm2756_vm0 = vcmp.gt.f32.partialorder %v6927_v56, 0.0 }
 0x319   :  { %v2813_v37 = vmul.f32 0.2, %v6909_v25  ;;  %v2814_v40 = vmul.f32 0.2, %v6911_v4  ;;  %v2870_v6 = vsel %vm2738_vm9, %v6891_v44, %v2804_v42  ;;  %vm2758_vm7 = vcmp.gt.f32.partialorder %v6931_v24, 0.0 }
 0x31a   :  { %v2816_v26 = vmul.f32 0.2, %v6915_v29  ;;  %v2817_v0 = vmul.f32 0.2, %v6917_v35  ;;  %vm2760_vm8 = vcmp.gt.f32.partialorder %v6935_v16, 0.0  ;;  %vm2762_vm9 = vcmp.gt.f32.partialorder %v6939_v22, 0.0 }
 0x31b   :  { %v2819_v44 = vmul.f32 0.2, %v6921_v34  ;;  %v2820_v42 = vmul.f32 0.2, %v6923_v52  ;;  %v2821_v14 = vmul.f32 0.2, %v6925_v45  ;;  %v2874_v58 = vsel %vm2742_vm13, %v6899_v57, %v2808_v39 }
 0x31c   :  { %v2822_v46 = vmul.f32 0.2, %v6927_v56  ;;  %v2823_v30 = vmul.f32 0.2, %v6929_v55  ;;  %v2824_v10 = vmul.f32 0.2, %v6931_v24  ;;  %v2875_v50 = vsel %vm2743_vm14, %v6901_v62, %v2809_v43 }
 0x31d   :  { %vm2764_vm10 = vcmp.gt.f32.partialorder %v6943_v20, 0.0  ;;  %v2825_v60 = vmul.f32 0.2, %v6933_v27  ;;  %v2826_v53 = vmul.f32 0.2, %v6935_v16  ;;  %vm2766_vm11 = vcmp.gt.f32.partialorder %v6947_v7, 0.0 }
 0x31e   :  { %vm2767_vm12 = vcmp.gt.f32.partialorder %v6949_v51, 0.0  ;;  %v2828_v48 = vmul.f32 0.2, %v6939_v22  ;;  %v2876_v13 = vsel %vm2744_vm15, %v6903_v38, %v2810_v32  ;;  %vm7631_vm1 = vcmp.gt.f32.partialorder %v6905_v41, 0.0 }
 0x31f   :  { %v2877_v57 = vsel %vm7631_vm1, %v6905_v41, %v2811_v15  ;;  %vm7632_vm13 = vcmp.gt.f32.partialorder %v6907_v21, 0.0  ;;  %v2879_v39 = vsel %vm2747_vm2, %v6909_v25, %v2813_v37  ;;  %v2934_v43 = vpack.c.bf16 %v2869_v59, %v2868_v8 }
 0x320   :  { %v2878_v62 = vsel %vm7632_vm13, %v6907_v21, %v2812_v3  ;;  %v2935_v49 = vpack.c.bf16 %v2871_v2, %v2870_v6  ;;  %v2880_v17 = vsel %vm2748_vm3, %v6911_v4, %v2814_v40  ;;  %v2881_v38 = vsel %vm2749_vm4, %v6913_v12, %v2815_v54 }
 0x321   :  { %v2936_v32 = vpack.c.bf16 %v2873_v23, %v2872_v63  ;;  %v2937_v41 = vpack.c.bf16 %v2875_v50, %v2874_v58  ;;  %v2829_v15 = vmul.f32 0.2, %v6941_v9  ;;  %vm7633_vm14 = vcmp.gt.f32.partialorder %v6915_v29, 0.0  ;;  %2968 = vst [vmem:[%s7495_s4] sm:$0xff] %v2934_v43 }
 0x322   :  { %v2882_v21 = vsel %vm7633_vm14, %v6915_v29, %v2816_v26  ;;  %vm7634_vm15 = vcmp.gt.f32.partialorder %v6917_v35, 0.0  ;;  %v2938_v6 = vpack.c.bf16 %v2877_v57, %v2876_v13  ;;  %v2830_v59 = vmul.f32 0.2, %v6943_v20  ;;  %2969 = vst [vmem:[%s7495_s4 + $0x8] sm:$0xff] %v2935_v49  ;;  %v7649_v57 = vld [vmem:[#allocation21_spill] sm:$0xff] }
 0x323   :  { %v2883_v2 = vsel %vm7634_vm15, %v6917_v35, %v2817_v0  ;;  %vm7635_vm1 = vcmp.gt.f32.partialorder %v6919_v5, 0.0  ;;  %vm7636_vm2 = vcmp.gt.f32.partialorder %v6921_v34, 0.0  ;;  %v2939_v23 = vpack.c.bf16 %v2879_v39, %v2878_v62  ;;  %2970 = vst [vmem:[%s7495_s4 + $0x10] sm:$0xff] %v2936_v32  ;;  %v7650_v39 = vld [vmem:[#allocation22_spill] sm:$0xff]  ;;  %v7651_v32 = vld [vmem:[#allocation23_spill] sm:$0xff] }
 0x324   :  { %v2884_v50 = vsel %vm7635_vm1, %v6919_v5, %v2818_v11  ;;  %v2885_v58 = vsel %vm7636_vm2, %v6921_v34, %v2819_v44  ;;  %v2831_v13 = vmul.f32 0.2, %v6945_v28  ;;  %v2886_v63 = vsel %vm2754_vm5, %v6923_v52, %v2820_v42  ;;  %2971 = vst [vmem:[%s7495_s4 + $0x18] sm:$0xff] %v2937_v41 }
 0x325   :  { %vm7637_vm3 = vcmp.gt.f32.partialorder %v6925_v45, 0.0  ;;  %v2940_v11 = vpack.c.bf16 %v2881_v38, %v2880_v17  ;;  %v2832_v25 = vmul.f32 0.2, %v6947_v7  ;;  %v2888_v49 = vsel %vm2756_vm0, %v6927_v56, %v2822_v46  ;;  %2972 = vst [vmem:[%s7495_s4 + $0x20] sm:$0xff] %v2938_v6 }
 0x326   :  { %v2887_v54 = vsel %vm7637_vm3, %v6925_v45, %v2821_v14  ;;  %vm7638_vm4 = vcmp.gt.f32.partialorder %v6929_v55, 0.0  ;;  %v2941_v12 = vpack.c.bf16 %v2883_v2, %v2882_v21  ;;  %v2833_v17 = vmul.f32 0.2, %v6949_v51  ;;  %2973 = vst [vmem:[%s7495_s4 + $0x28] sm:$0xff] %v2939_v23  ;;  %v7653_v2 = vld [vmem:[#allocation25_spill] sm:$0xff] }
 0x327   :  { %v2889_v4 = vsel %vm7638_vm4, %v6929_v55, %v2823_v30  ;;  %v2890_v14 = vsel %vm2758_vm7, %v6931_v24, %v2824_v10  ;;  %vm7639_vm5 = vcmp.gt.f32.partialorder %v6933_v27, 0.0  ;;  %v2942_v35 = vpack.c.bf16 %v2885_v58, %v2884_v50  ;;  %2974 = vst [vmem:[%s7495_s4 + $0x30] sm:$0xff] %v2940_v11  ;;  %v7641_v24 = vld [vmem:[#allocation14_spill] sm:$0xff]  ;;  %v7646_v30 = vld [vmem:[#allocation17_spill] sm:$0xff] }
 0x328   :  { %v2891_v29 = vsel %vm7639_vm5, %v6933_v27, %v2825_v60  ;;  %v2834_v5 = vmul.f32 0.2, %v6951_v33  ;;  %v2892_v34 = vsel %vm2760_vm8, %v6935_v16, %v2826_v53  ;;  %vm7640_vm0 = vcmp.gt.f32.partialorder %v6937_v18, 0.0  ;;  %2975 = vst [vmem:[%s7495_s4 + $0x38] sm:$0xff] %v2941_v12  ;;  %v7647_v53 = vld [vmem:[#allocation19_spill] sm:$0xff]  ;;  %v7655_v58 = vld [vmem:[#allocation2_spill] sm:$0xff] }
 0x329   :  { %v2893_v52 = vsel %vm7640_vm0, %v6937_v18, %v2827_v47  ;;  %v2943_v10 = vpack.c.bf16 %v2887_v54, %v2886_v63  ;;  %vm2768_vm7 = vcmp.gt.f32.partialorder %v6951_v33, 0.0  ;;  %v2894_v45 = vsel %vm2762_vm9, %v6939_v22, %v2828_v48  ;;  %2976 = vst [vmem:[%s7495_s4 + $0x40] sm:$0xff] %v2942_v35  ;;  %v7657_v54 = vld [vmem:[#allocation3_spill] sm:$0xff] }
 0x32a   :  { %v2895_v56 = vsel %vm2763_vm6, %v6941_v9, %v2829_v15  ;;  %v2944_v55 = vpack.c.bf16 %v2889_v4, %v2888_v49  ;;  %v2639_v27 = vmul.f32 %v6766_v61, %v7641_v24  ;;  %v2896_v16 = vsel %vm2764_vm10, %v6943_v20, %v2830_v59  ;;  %v7643_v9 = vld [vmem:[#allocation15_spill] sm:$0xff]  ;;  %v7652_v15 = vld [vmem:[#allocation24_spill] sm:$0xff]  ;;  %v7654_v59 = vld [vmem:[#allocation26_spill] sm:$0xff] }
 0x32b   :  { %vm7642_vm8 = vcmp.gt.f32.partialorder %v6945_v28, 0.0  ;;  %v2945_v22 = vpack.c.bf16 %v2891_v29, %v2890_v14  ;;  %v2640_v8 = vmul.f32 %v6766_v61, %v7643_v9  ;;  %v2898_v3 = vsel %vm2766_vm11, %v6947_v7, %v2832_v25  ;;  %2977 = vst [vmem:[%s7495_s4 + $0x48] sm:$0xff] %v2943_v10  ;;  %v7658_v25 = vld [vmem:[#allocation4_spill] sm:$0xff]  ;;  %v7659_v4 = vld [vmem:[#allocation5_spill] sm:$0xff]  ;;  %v7662_v35 = vld [vmem:[#allocation27_spill] sm:$0xff] }
 0x32c   :  { %v2897_v18 = vsel %vm7642_vm8, %v6945_v28, %v2831_v13  ;;  %v2899_v20 = vsel %vm2767_vm12, %v6949_v51, %v2833_v17  ;;  %v2946_v37 = vpack.c.bf16 %v2893_v52, %v2892_v34  ;;  %v7644_v28 = vld [vmem:[#allocation18_spill] sm:$0xff]  ;;  %v2642_v26 = vmul.f32 %v6766_v61, %v6734_v19  ;;  %2978 = vst [vmem:[%s7495_s4 + $0x50] sm:$0xff] %v2944_v55  ;;  %v7645_v19 = vld [vmem:[#allocation16_spill] sm:$0xff]  ;;  %v7656_v13 = vld [vmem:[#allocation7_spill] sm:$0xff] }
 0x32d   :  { %v2641_v40 = vmul.f32 %v6766_v61, %v7644_v28  ;;  %v2900_v0 = vsel %vm2768_vm7, %v6951_v33, %v2834_v5  ;;  %v2947_v7 = vpack.c.bf16 %v2895_v56, %v2894_v45  ;;  %v2643_v51 = vmul.f32 %v6766_v61, %v6737_v1  ;;  %2979 = vst [vmem:[%s7495_s4 + $0x58] sm:$0xff] %v2945_v22  ;;  %v7660_v17 = vld [vmem:[#allocation6_spill] sm:$0xff]  ;;  %v7663_v34 = vld [vmem:[#allocation28_spill] sm:$0xff]  ;;  %v7664_v10 = vld [vmem:[#allocation29_spill] sm:$0xff] }
 0x32e   :  { %v2644_v44 = vmul.f32 %v6766_v61, %v6740_v31  ;;  %v2645_v42 = vmul.f32 %v6766_v61, %v6743_v36  ;;  %v2948_v46 = vpack.c.bf16 %v2897_v18, %v2896_v16  ;;  %v2646_v33 = vmul.f32 %v6766_v61, %v7645_v19  ;;  %v2668_v31 = vpop.permute.xlu1 %2667  ;;  %v7648_v36 = vld [vmem:[#allocation20_spill] sm:$0xff]  ;;  %2980 = vst [vmem:[%s7495_s4 + $0x60] sm:$0xff] %v2946_v37  ;;  %v7665_v56 = vld [vmem:[#allocation30_spill] sm:$0xff]  ;;  %v7666_v24 = vld [vmem:[#allocation31_spill] sm:$0xff] }
 0x32f   :  { %v2647_v60 = vmul.f32 %v6766_v61, %v7646_v30  ;;  %v2648_v1 = vmul.f32 %v6766_v61, %v7647_v53  ;;  %v2949_v47 = vpack.c.bf16 %v2899_v20, %v2898_v3  ;;  %v2649_v48 = vmul.f32 %v6766_v61, %v7648_v36  ;;  %2981 = vst [vmem:[%s7495_s4 + $0x68] sm:$0xff] %v2947_v7  ;;  %v7667_v18 = vld [vmem:[#allocation32_spill] sm:$0xff]  ;;  %v7668_v9 = vld [vmem:[#allocation33_spill] sm:$0xff]  ;;  %v7669_v20 = vld [vmem:[#allocation34_spill] sm:$0xff] }
 0x330   :  { %v2650_v62 = vmul.f32 %v6766_v61, %v7649_v57  ;;  %v2651_v43 = vmul.f32 %v6766_v61, %v7650_v39  ;;  %v2950_v38 = vpack.c.bf16 %v2900_v0, %v2900_v0  ;;  %v2652_v41 = vmul.f32 %v6766_v61, %v7651_v32  ;;  %2982 = vst [vmem:[%s7495_s4 + $0x70] sm:$0xff] %v2948_v46  ;;  %v7670_v28 = vld [vmem:[#allocation35_spill] sm:$0xff] }
 0x331   :  { %v2653_v21 = vmul.f32 %v6766_v61, %v7652_v15  ;;  %v2654_v6 = vmul.f32 %v6766_v61, %v7653_v2  ;;  %v2655_v50 = vmul.f32 %v6766_v61, %v7654_v59  ;;  %v2656_v23 = vmul.f32 %v6766_v61, %v7655_v58  ;;  %2983 = vst [vmem:[%s7495_s4 + $0x78] sm:$0xff] %v2949_v47 }
 0x332   :  { %v2657_v63 = vmul.f32 %v6766_v61, %v7656_v13  ;;  %v2703_v11 = vadd.f32 %v2668_v31, %v7657_v54  ;;  %v7199_v49 = vadd.f32 %v2668_v31, %v7658_v25  ;;  %v7205_v12 = vadd.f32 %v2668_v31, %v7659_v4  ;;  %v7661_v61 = vld [vmem:[#allocation8_spill] sm:$0xff]  ;;  %2984 = vst [vmem:[%s7495_s4 + $0x80] sm:$0xf] %v2950_v38 }
 0x333   :  { %v7208_v14 = vadd.f32 %v2668_v31, %v7660_v17  ;;  %v7211_v29 = vadd.f32 %v2668_v31, %v7661_v61  ;;  %v7214_v5 = vadd.f32 %v2668_v31, %v7662_v35  ;;  %v7220_v52 = vadd.f32 %v2668_v31, %v7663_v34 }
 0x334   :  { %v7223_v45 = vadd.f32 %v2668_v31, %v7664_v10  ;;  %v7226_v55 = vadd.f32 %v2668_v31, %v7665_v56  ;;  %v7229_v16 = vadd.f32 %v2668_v31, %v7666_v24  ;;  %v7232_v22 = vadd.f32 %v2668_v31, %v7667_v18 }
 0x335   :  { %v7235_v3 = vadd.f32 %v2668_v31, %v7668_v9  ;;  %v7238_v37 = vadd.f32 %v2668_v31, %v7669_v20  ;;  %v7241_v0 = vadd.f32 %v2668_v31, %v7670_v28  ;;  %v7243_v7 = vadd.f32 %v2668_v31, %v2639_v27 }
 0x336   :  { %v7245_v46 = vadd.f32 %v2668_v31, %v2640_v8  ;;  %v7247_v19 = vadd.f32 %v2668_v31, %v2641_v40  ;;  %v7249_v30 = vadd.f32 %v2668_v31, %v2642_v26  ;;  %v7251_v53 = vadd.f32 %v2668_v31, %v2643_v51 }
 0x337   :  { %v7253_v47 = vadd.f32 %v2668_v31, %v2644_v44  ;;  %v7255_v36 = vadd.f32 %v2668_v31, %v2645_v42  ;;  %v7257_v57 = vadd.f32 %v2668_v31, %v2646_v33  ;;  %v7259_v39 = vadd.f32 %v2668_v31, %v2647_v60 }
 0x338   :  { %v7261_v38 = vadd.f32 %v2668_v31, %v2648_v1  ;;  %v7263_v27 = vadd.f32 %v2668_v31, %v2649_v48  ;;  %v7265_v8 = vadd.f32 %v2668_v31, %v2650_v62  ;;  %v7267_v40 = vadd.f32 %v2668_v31, %v2651_v43 }
 0x339   :  { %v7269_v26 = vadd.f32 %v2668_v31, %v2652_v41  ;;  %v7271_v51 = vadd.f32 %v2668_v31, %v2653_v21  ;;  %v7273_v44 = vadd.f32 %v2668_v31, %v2654_v6  ;;  %v7275_v42 = vadd.f32 %v2668_v31, %v2655_v50 }
 0x33a   :  { %v7277_v33 = vadd.f32 %v2668_v31, %v2656_v23  ;;  %v7279_v60 = vadd.f32 %v2668_v31, %v2657_v63  ;;  %vm2769_vm6 = vcmp.gt.f32.partialorder %v2703_v11, 0.0  ;;  %vm2770_vm9 = vcmp.gt.f32.partialorder %v7199_v49, 0.0 }
 0x33b   :  { %vm2771_vm10 = vcmp.gt.f32.partialorder %v7205_v12, 0.0  ;;  %vm2772_vm11 = vcmp.gt.f32.partialorder %v7208_v14, 0.0  ;;  %vm2773_vm12 = vcmp.gt.f32.partialorder %v7211_v29, 0.0  ;;  %vm2774_vm13 = vcmp.gt.f32.partialorder %v7214_v5, 0.0 }
 0x33c   :  { %vm2775_vm14 = vcmp.gt.f32.partialorder %v7220_v52, 0.0  ;;  %vm2776_vm15 = vcmp.gt.f32.partialorder %v7223_v45, 0.0  ;;  %v2835_v1 = vmul.f32 0.2, %v2703_v11  ;;  %vm2777_vm1 = vcmp.gt.f32.partialorder %v7226_v55, 0.0 }
 0x33d   :  { %v2836_v31 = vmul.f32 0.2, %v7199_v49  ;;  %vm2780_vm4 = vcmp.gt.f32.partialorder %v7235_v3, 0.0  ;;  %vm2781_vm5 = vcmp.gt.f32.partialorder %v7238_v37, 0.0  ;;  %vm2782_vm0 = vcmp.gt.f32.partialorder %v7241_v0, 0.0 }
 0x33e   :  { %v2837_v48 = vmul.f32 0.2, %v7205_v12  ;;  %v2838_v62 = vmul.f32 0.2, %v7208_v14  ;;  %v2839_v43 = vmul.f32 0.2, %v7211_v29  ;;  %v2901_v21 = vsel %vm2769_vm6, %v2703_v11, %v2835_v1 }
 0x33f   :  { %v2840_v32 = vmul.f32 0.2, %v7214_v5  ;;  %v2841_v41 = vmul.f32 0.2, %v7220_v52  ;;  %v2842_v15 = vmul.f32 0.2, %v7223_v45  ;;  %v2902_v50 = vsel %vm2770_vm9, %v7199_v49, %v2836_v31 }
 0x340   :  { %vm2787_vm7 = vcmp.gt.f32.partialorder %v7251_v53, 0.0  ;;  %v2843_v2 = vmul.f32 0.2, %v7226_v55  ;;  %v2844_v6 = vmul.f32 0.2, %v7229_v16  ;;  %vm2789_vm2 = vcmp.gt.f32.partialorder %v7255_v36, 0.0 }
 0x341   :  { %v2845_v59 = vmul.f32 0.2, %v7232_v22  ;;  %v2846_v58 = vmul.f32 0.2, %v7235_v3  ;;  %v2847_v23 = vmul.f32 0.2, %v7238_v37  ;;  %v2903_v63 = vsel %vm2771_vm10, %v7205_v12, %v2837_v48 }
 0x342   :  { %v2848_v13 = vmul.f32 0.2, %v7241_v0  ;;  %vm2791_vm6 = vcmp.gt.f32.partialorder %v7259_v39, 0.0  ;;  %v2849_v54 = vmul.f32 0.2, %v7243_v7  ;;  %v2904_v49 = vsel %vm2772_vm11, %v7208_v14, %v2838_v62 }
 0x343   :  { %v2850_v11 = vmul.f32 0.2, %v7245_v46  ;;  %v2851_v25 = vmul.f32 0.2, %v7247_v19  ;;  %vm2793_vm9 = vcmp.gt.f32.partialorder %v7263_v27, 0.0  ;;  %v2905_v61 = vsel %vm2773_vm12, %v7211_v29, %v2839_v43 }
 0x344   :  { %v2852_v4 = vmul.f32 0.2, %v7249_v30  ;;  %v2853_v12 = vmul.f32 0.2, %v7251_v53  ;;  %v2854_v17 = vmul.f32 0.2, %v7253_v47  ;;  %v2906_v10 = vsel %vm2774_vm13, %v7214_v5, %v2840_v32 }
 0x345   :  { %vm2795_vm10 = vcmp.gt.f32.partialorder %v7267_v40, 0.0  ;;  %vm2796_vm8 = vcmp.gt.f32.partialorder %v7269_v26, 0.0  ;;  %v2855_v14 = vmul.f32 0.2, %v7255_v36  ;;  %v2856_v35 = vmul.f32 0.2, %v7257_v57 }
 0x346   :  { %v2857_v34 = vmul.f32 0.2, %v7259_v39  ;;  %vm2797_vm11 = vcmp.gt.f32.partialorder %v7271_v51, 0.0  ;;  %v2858_v29 = vmul.f32 0.2, %v7261_v38  ;;  %v2907_v24 = vsel %vm2775_vm14, %v7220_v52, %v2841_v41 }
 0x347   :  { %v2859_v56 = vmul.f32 0.2, %v7263_v27  ;;  %v2908_v18 = vsel %vm2776_vm15, %v7223_v45, %v2842_v15  ;;  %vm2799_vm12 = vcmp.gt.f32.partialorder %v7275_v42, 0.0  ;;  %vm2800_vm13 = vcmp.gt.f32.partialorder %v7277_v33, 0.0 }
 0x348   :  { %v2860_v5 = vmul.f32 0.2, %v7265_v8  ;;  %v2909_v9 = vsel %vm2777_vm1, %v7226_v55, %v2843_v2  ;;  %vm7671_vm3 = vcmp.gt.f32.partialorder %v7229_v16, 0.0  ;;  %vm7672_vm14 = vcmp.gt.f32.partialorder %v7232_v22, 0.0 }
 0x349   :  { %v2910_v20 = vsel %vm7671_vm3, %v7229_v16, %v2844_v6  ;;  %v2911_v52 = vsel %vm7672_vm14, %v7232_v22, %v2845_v59  ;;  %v2912_v45 = vsel %vm2780_vm4, %v7235_v3, %v2846_v58  ;;  %v2951_v28 = vpack.c.bf16 %v2902_v50, %v2901_v21 }
 0x34a   :  { %v2952_v1 = vpack.c.bf16 %v2904_v49, %v2903_v63  ;;  %v2953_v31 = vpack.c.bf16 %v2906_v10, %v2905_v61  ;;  %v2861_v48 = vmul.f32 0.2, %v7267_v40  ;;  %v2913_v55 = vsel %vm2781_vm5, %v7238_v37, %v2847_v23 }
 0x34b   :  { %v2914_v16 = vsel %vm2782_vm0, %v7241_v0, %v2848_v13  ;;  %v2954_v62 = vpack.c.bf16 %v2908_v18, %v2907_v24  ;;  %v2862_v22 = vmul.f32 0.2, %v7269_v26  ;;  %vm7673_vm15 = vcmp.gt.f32.partialorder %v7243_v7, 0.0  ;;  %2985 = vst [vmem:[%s7495_s4 + $0x84] sm:$0xff] %v2951_v28 }
 0x34c   :  { %v2915_v3 = vsel %vm7673_vm15, %v7243_v7, %v2849_v54  ;;  %vm7674_vm1 = vcmp.gt.f32.partialorder %v7245_v46, 0.0  ;;  %v2955_v32 = vpack.c.bf16 %v2910_v20, %v2909_v9  ;;  %v2863_v37 = vmul.f32 0.2, %v7271_v51  ;;  %2986 = vst [vmem:[%s7495_s4 + $0x8c] sm:$0xff] %v2952_v1 }
 0x34d   :  { %v2916_v43 = vsel %vm7674_vm1, %v7245_v46, %v2850_v11  ;;  %vm7675_vm3 = vcmp.gt.f32.partialorder %v7247_v19, 0.0  ;;  %vm7676_vm4 = vcmp.gt.f32.partialorder %v7249_v30, 0.0  ;;  %v2956_v7 = vpack.c.bf16 %v2912_v45, %v2911_v52  ;;  %2987 = vst [vmem:[%s7495_s4 + $0x94] sm:$0xff] %v2953_v31 }
 0x34e   :  { %v2917_v0 = vsel %vm7675_vm3, %v7247_v19, %v2851_v25  ;;  %v2918_v41 = vsel %vm7676_vm4, %v7249_v30, %v2852_v4  ;;  %v2864_v46 = vmul.f32 0.2, %v7273_v44  ;;  %v2919_v15 = vsel %vm2787_vm7, %v7251_v53, %v2853_v12  ;;  %2988 = vst [vmem:[%s7495_s4 + $0x9c] sm:$0xff] %v2954_v62 }
 0x34f   :  { %vm7677_vm5 = vcmp.gt.f32.partialorder %v7253_v47, 0.0  ;;  %v2957_v19 = vpack.c.bf16 %v2914_v16, %v2913_v55  ;;  %v2865_v30 = vmul.f32 0.2, %v7275_v42  ;;  %v2921_v2 = vsel %vm2789_vm2, %v7255_v36, %v2855_v14  ;;  %2989 = vst [vmem:[%s7495_s4 + $0xa4] sm:$0xff] %v2955_v32 }
 0x350   :  { %v2920_v21 = vsel %vm7677_vm5, %v7253_v47, %v2854_v17  ;;  %vm7678_vm0 = vcmp.gt.f32.partialorder %v7257_v57, 0.0  ;;  %v2958_v53 = vpack.c.bf16 %v2916_v43, %v2915_v3  ;;  %v2866_v47 = vmul.f32 0.2, %v7277_v33  ;;  %2990 = vst [vmem:[%s7495_s4 + $0xac] sm:$0xff] %v2956_v7 }
 0x351   :  { %v2922_v6 = vsel %vm7678_vm0, %v7257_v57, %v2856_v35  ;;  %v2923_v59 = vsel %vm2791_vm6, %v7259_v39, %v2857_v34  ;;  %vm7679_vm7 = vcmp.gt.f32.partialorder %v7261_v38, 0.0  ;;  %v2959_v36 = vpack.c.bf16 %v2918_v41, %v2917_v0  ;;  %2991 = vst [vmem:[%s7495_s4 + $0xb4] sm:$0xff] %v2957_v19 }
 0x352   :  { %v2924_v50 = vsel %vm7679_vm7, %v7261_v38, %v2858_v29  ;;  %v2867_v57 = vmul.f32 0.2, %v7279_v60  ;;  %v2925_v58 = vsel %vm2793_vm9, %v7263_v27, %v2859_v56  ;;  %vm7680_vm2 = vcmp.gt.f32.partialorder %v7265_v8, 0.0  ;;  %2992 = vst [vmem:[%s7495_s4 + $0xbc] sm:$0xff] %v2958_v53 }
 0x353   :  { %v2926_v23 = vsel %vm7680_vm2, %v7265_v8, %v2860_v5  ;;  %v2960_v39 = vpack.c.bf16 %v2920_v21, %v2919_v15  ;;  %vm2801_vm6 = vcmp.gt.f32.partialorder %v7279_v60, 0.0  ;;  %v2927_v38 = vsel %vm2795_vm10, %v7267_v40, %v2861_v48  ;;  %2993 = vst [vmem:[%s7495_s4 + $0xc4] sm:$0xff] %v2959_v36 }
 0x354   :  { %v2928_v13 = vsel %vm2796_vm8, %v7269_v26, %v2862_v22  ;;  %v2961_v27 = vpack.c.bf16 %v2922_v6, %v2921_v2  ;;  %v2929_v8 = vsel %vm2797_vm11, %v7271_v51, %v2863_v37  ;;  %vm7681_vm9 = vcmp.gt.f32.partialorder %v7273_v44, 0.0 }
 0x355   :  { %v2930_v63 = vsel %vm7681_vm9, %v7273_v44, %v2864_v46  ;;  %v2962_v54 = vpack.c.bf16 %v2924_v50, %v2923_v59  ;;  %v2931_v40 = vsel %vm2799_vm12, %v7275_v42, %v2865_v30  ;;  %v2932_v26 = vsel %vm2800_vm13, %v7277_v33, %v2866_v47  ;;  %2994 = vst [vmem:[%s7495_s4 + $0xcc] sm:$0xff] %v2960_v39 }
 0x356   :  { %v2963_v11 = vpack.c.bf16 %v2926_v23, %v2925_v58  ;;  %v2933_v51 = vsel %vm2801_vm6, %v7279_v60, %v2867_v57  ;;  %v2964_v44 = vpack.c.bf16 %v2928_v13, %v2927_v38  ;;  %v2965_v25 = vpack.c.bf16 %v2930_v63, %v2929_v8  ;;  %2995 = vst [vmem:[%s7495_s4 + $0xd4] sm:$0xff] %v2961_v27 }
 0x357   :  { %v2966_v42 = vpack.c.bf16 %v2932_v26, %v2931_v40  ;;  %2996 = vst [vmem:[%s7495_s4 + $0xdc] sm:$0xff] %v2962_v54  ;;  %v2967_v33 = vpack.c.bf16 %v2933_v51, %v2933_v51 }
 0x358   :  { %2997 = vst [vmem:[%s7495_s4 + $0xe4] sm:$0xff] %v2963_v11 }
 0x359   :  { %2998 = vst [vmem:[%s7495_s4 + $0xec] sm:$0xff] %v2964_v44 }
 0x35a   :  { %2999 = vst [vmem:[%s7495_s4 + $0xf4] sm:$0xff] %v2965_v25 }
 0x35b   :  { %3000 = vst [vmem:[%s7495_s4 + $0xfc] sm:$0xff] %v2966_v42 }
 0x35c   :  { %3001 = vst [vmem:[%s7495_s4 + $0x104] sm:$0xf] %v2967_v33 }

// kernel: discriminator_forward.7
= control target key start
LH: loop header
LB: loop body
LE: loop exit
PB: predicated region body
PF: predicated region fallthrough
CT: control target
= control target key end

     0   :  { %s4095_s1 = inlined_call_operand.vmem [shape: bf16[256,1152], index: 1, kind: input, shape index: {}]   ;;  %s4096_s0 = inlined_call_operand.vmem [shape: bf16[32,256], index: 0, kind: input, shape index: {}]   ;;  %s4097_s2 = inlined_call_operand.vmem [shape: f32[32,1], index: 2, kind: input, shape index: {}]   ;;  %s4098_s3 = inlined_call_operand.vmem [shape: f32[32,1], index: 3, kind: input, shape index: {}]   ;;  %s4099_s4 = inlined_call_operand.vmem [shape: bf16[32,1152], index: 4, kind: output, shape index: {}]  }
   0x1   :  { %v2116_v0 = vld [vmem:[%s4095_s1 + $0x1f8] sm:$0xf]  ;;  %v2509_v1 = vld [vmem:[%s4095_s1 + $0x218] sm:$0xf0]  ;;  %v2118_v6 = vld [vmem:[%s4095_s1 + $0x21c] sm:$0xf0] }
   0x2   :  { %v2404_v2 = vld [vmem:[%s4095_s1 + $0x438] sm:$0xf]  ;;  %v2117_v3 = vor.u32 %v2509_v1, %v2116_v0  ;;  %v2581_v4 = vld [vmem:[%s4095_s1 + $0x458] sm:$0xf0]  ;;  %v2406_v10 = vld [vmem:[%s4095_s1 + $0x45c] sm:$0xf0] }
   0x3   :  { %v2505_v5 = vld [vmem:[%s4095_s1 + $0x1fc] sm:$0xf]  ;;  %v2405_v7 = vor.u32 %v2581_v4, %v2404_v2  ;;  %v2080_v11 = vld [vmem:[%s4095_s1 + $0x1b0] sm:$0xf]  ;;  %v2500_v13 = vld [vmem:[%s4095_s1 + $0x1d0] sm:$0xf0] }
   0x4   :  { %v2121_v8 = vor.u32 %v2505_v5, %v2118_v6  ;;  %v2577_v9 = vld [vmem:[%s4095_s1 + $0x43c] sm:$0xf]  ;;  %937 = vmatpush.bf16.msra.mxu0 %v2117_v3  ;;  %v2368_v14 = vld [vmem:[%s4095_s1 + $0x3f0] sm:$0xf]  ;;  %v2572_v15 = vld [vmem:[%s4095_s1 + $0x410] sm:$0xf0]  ;;  %v2081_v16 = vor.u32 %v2500_v13, %v2080_v11 }
   0x5   :  { %v2409_v12 = vor.u32 %v2577_v9, %v2406_v10  ;;  %956 = vmatpush.bf16.msra.mxu1 %v2405_v7  ;;  %v2369_v17 = vor.u32 %v2572_v15, %v2368_v14  ;;  %v2496_v18 = vld [vmem:[%s4095_s1 + $0x1b4] sm:$0xf]  ;;  %v2082_v19 = vld [vmem:[%s4095_s1 + $0x1d4] sm:$0xf0]  ;;  %v2044_v23 = vld [vmem:[%s4095_s1 + $0x168] sm:$0xf] }
   0x6   :  { %975 = vmatpush.bf16.msra.mxu2 %v2121_v8  ;;  %v2568_v20 = vld [vmem:[%s4095_s1 + $0x3f4] sm:$0xf]  ;;  %v2085_v21 = vor.u32 %v2496_v18, %v2082_v19  ;;  %v2370_v22 = vld [vmem:[%s4095_s1 + $0x414] sm:$0xf0]  ;;  %v2491_v24 = vld [vmem:[%s4095_s1 + $0x188] sm:$0xf0] }
   0x7   :  { %994 = vmatpush.bf16.msra.mxu3 %v2409_v12  ;;  %v2373_v25 = vor.u32 %v2568_v20, %v2370_v22  ;;  %v2332_v26 = vld [vmem:[%s4095_s1 + $0x3a8] sm:$0xf]  ;;  %v2563_v27 = vld [vmem:[%s4095_s1 + $0x3c8] sm:$0xf0]  ;;  %v2045_v29 = vor.u32 %v2491_v24, %v2044_v23  ;;  %v2046_v30 = vld [vmem:[%s4095_s1 + $0x18c] sm:$0xf0] }
   0x8   :  { %v2487_v28 = vld [vmem:[%s4095_s1 + $0x16c] sm:$0xf]  ;;  %938 = vmatpush.bf16.msra.mxu0 %v2081_v16  ;;  %v2334_v32 = vld [vmem:[%s4095_s1 + $0x3cc] sm:$0xf0]  ;;  %v2333_v33 = vor.u32 %v2563_v27, %v2332_v26  ;;  %v2008_v35 = vld [vmem:[%s4095_s1 + $0x120] sm:$0xf] }
   0x9   :  { %v2559_v31 = vld [vmem:[%s4095_s1 + $0x3ac] sm:$0xf]  ;;  %957 = vmatpush.bf16.msra.mxu1 %v2369_v17  ;;  %v2049_v34 = vor.u32 %v2487_v28, %v2046_v30  ;;  %v2482_v36 = vld [vmem:[%s4095_s1 + $0x140] sm:$0xf0]  ;;  %v2296_v37 = vld [vmem:[%s4095_s1 + $0x360] sm:$0xf] }
   0xa   :  { %976 = vmatpush.bf16.msra.mxu2 %v2085_v21  ;;  %v2337_v38 = vor.u32 %v2559_v31, %v2334_v32  ;;  %v2554_v39 = vld [vmem:[%s4095_s1 + $0x380] sm:$0xf0]  ;;  %v2010_v41 = vld [vmem:[%s4095_s1 + $0x144] sm:$0xf0]  ;;  %v2009_v44 = vor.u32 %v2482_v36, %v2008_v35  ;;  %v1972_v47 = vld [vmem:[%s4095_s1 + $0xd8] sm:$0xf] }
   0xb   :  { %995 = vmatpush.bf16.msra.mxu3 %v2373_v25  ;;  %v2478_v40 = vld [vmem:[%s4095_s1 + $0x124] sm:$0xf]  ;;  %v2298_v43 = vld [vmem:[%s4095_s1 + $0x384] sm:$0xf0]  ;;  %v2297_v45 = vor.u32 %v2554_v39, %v2296_v37  ;;  %v2473_v48 = vld [vmem:[%s4095_s1 + $0xf8] sm:$0xf0] }
   0xc   :  { %v2550_v42 = vld [vmem:[%s4095_s1 + $0x364] sm:$0xf]  ;;  %939 = vmatpush.bf16.msra.mxu0 %v2045_v29  ;;  %v2013_v46 = vor.u32 %v2478_v40, %v2010_v41  ;;  %v2260_v49 = vld [vmem:[%s4095_s1 + $0x318] sm:$0xf]  ;;  %v2545_v51 = vld [vmem:[%s4095_s1 + $0x338] sm:$0xf0]  ;;  %v1973_v56 = vor.u32 %v2473_v48, %v1972_v47 }
   0xd   :  { %958 = vmatpush.bf16.msra.mxu1 %v2333_v33  ;;  %v2301_v50 = vor.u32 %v2550_v42, %v2298_v43  ;;  %v2469_v52 = vld [vmem:[%s4095_s1 + $0xdc] sm:$0xf]  ;;  %v1974_v53 = vld [vmem:[%s4095_s1 + $0xfc] sm:$0xf0]  ;;  %v2261_v57 = vor.u32 %v2545_v51, %v2260_v49  ;;  %v1936_v59 = vld [vmem:[%s4095_s1 + $0x90] sm:$0xf] }
   0xe   :  { %977 = vmatpush.bf16.msra.mxu2 %v2049_v34  ;;  %v2541_v54 = vld [vmem:[%s4095_s1 + $0x31c] sm:$0xf]  ;;  %v2262_v55 = vld [vmem:[%s4095_s1 + $0x33c] sm:$0xf0]  ;;  %v1977_v58 = vor.u32 %v2469_v52, %v1974_v53  ;;  %v2464_v60 = vld [vmem:[%s4095_s1 + $0xb0] sm:$0xf0] }
   0xf   :  { %996 = vmatpush.bf16.msra.mxu3 %v2337_v38  ;;  %v2224_v61 = vld [vmem:[%s4095_s1 + $0x2d0] sm:$0xf]  ;;  %v2265_v62 = vor.u32 %v2541_v54, %v2262_v55  ;;  %v2536_v63 = vld [vmem:[%s4095_s1 + $0x2f0] sm:$0xf0]  ;;  %v1938_v1 = vld [vmem:[%s4095_s1 + $0xb4] sm:$0xf0]  ;;  %v1937_v4 = vor.u32 %v2464_v60, %v1936_v59 }
  0x10   :  { %940 = vmatpush.bf16.msra.mxu0 %v2009_v44  ;;  %v2460_v0 = vld [vmem:[%s4095_s1 + $0x94] sm:$0xf]  ;;  %v2226_v3 = vld [vmem:[%s4095_s1 + $0x2f4] sm:$0xf0]  ;;  %v2225_v5 = vor.u32 %v2536_v63, %v2224_v61  ;;  %v1900_v7 = vld [vmem:[%s4095_s1 + $0x48] sm:$0xf] }
  0x11   :  { %959 = vmatpush.bf16.msra.mxu1 %v2297_v45  ;;  %v2532_v2 = vld [vmem:[%s4095_s1 + $0x2d4] sm:$0xf]  ;;  %v1941_v6 = vor.u32 %v2460_v0, %v1938_v1  ;;  %v2455_v8 = vld [vmem:[%s4095_s1 + $0x68] sm:$0xf0]  ;;  %v2188_v9 = vld [vmem:[%s4095_s1 + $0x288] sm:$0xf] }
  0x12   :  { %978 = vmatpush.bf16.msra.mxu2 %v2013_v46  ;;  %v2229_v10 = vor.u32 %v2532_v2, %v2226_v3  ;;  %v2527_v11 = vld [vmem:[%s4095_s1 + $0x2a8] sm:$0xf0]  ;;  %v1902_v13 = vld [vmem:[%s4095_s1 + $0x6c] sm:$0xf0]  ;;  %v1901_v16 = vor.u32 %v2455_v8, %v1900_v7  ;;  %v1864_v17 = vld [vmem:[%s4095_s1] sm:$0xf] }
  0x13   :  { %997 = vmatpush.bf16.msra.mxu3 %v2301_v50  ;;  %v2451_v12 = vld [vmem:[%s4095_s1 + $0x4c] sm:$0xf]  ;;  %v2190_v15 = vld [vmem:[%s4095_s1 + $0x2ac] sm:$0xf0]  ;;  %v2446_v18 = vld [vmem:[%s4095_s1 + $0x20] sm:$0xf0]  ;;  %v2189_v19 = vor.u32 %v2527_v11, %v2188_v9 }
  0x14   :  { %941 = vmatpush.bf16.msra.mxu0 %v1973_v56  ;;  %v2523_v14 = vld [vmem:[%s4095_s1 + $0x28c] sm:$0xf]  ;;  %v1905_v20 = vor.u32 %v2451_v12, %v1902_v13  ;;  %v2152_v21 = vld [vmem:[%s4095_s1 + $0x240] sm:$0xf]  ;;  %v2518_v22 = vld [vmem:[%s4095_s1 + $0x260] sm:$0xf0]  ;;  %v1865_v31 = vor.u32 %v2446_v18, %v1864_v17 }
  0x15   :  { %960 = vmatpush.bf16.msra.mxu1 %v2261_v57  ;;  %v2442_v23 = vld [vmem:[%s4095_s1 + $0x4] sm:$0xf]  ;;  %v2193_v24 = vor.u32 %v2523_v14, %v2190_v15  ;;  %v1866_v25 = vld [vmem:[%s4095_s1 + $0x24] sm:$0xf0]  ;;  %v1848_v28 = vld [vmem:[%s4096_s0] sm:$0xf]  ;;  %v2153_v35 = vor.u32 %v2518_v22, %v2152_v21 }
  0x16   :  { %979 = vmatpush.bf16.msra.mxu2 %v1977_v58  ;;  %v2514_v26 = vld [vmem:[%s4095_s1 + $0x244] sm:$0xf]  ;;  %v2154_v27 = vld [vmem:[%s4095_s1 + $0x264] sm:$0xf0]  ;;  %v2124_v29 = vld [vmem:[%s4095_s1 + $0x200] sm:$0xf]  ;;  %v1869_v36 = vor.u32 %v2442_v23, %v1866_v25 }
  0x17   :  { %998 = vmatpush.bf16.msra.mxu3 %v2265_v62  ;;  %v2510_v30 = vld [vmem:[%s4095_s1 + $0x220] sm:$0xf0]  ;;  %v2439_v32 = vld [vmem:[%s4096_s0 + $0x4] sm:$0xf0]  ;;  %v2412_v33 = vld [vmem:[%s4095_s1 + $0x440] sm:$0xf]  ;;  %v2157_v39 = vor.u32 %v2514_v26, %v2154_v27 }
  0x18   :  { %942 = vmatpush.bf16.msra.mxu0 %v1937_v4  ;;  %v2582_v34 = vld [vmem:[%s4095_s1 + $0x460] sm:$0xf0]  ;;  %v1850_v38 = vld [vmem:[%s4096_s0 + $0x8] sm:$0xf0]  ;;  %v2125_v40 = vor.u32 %v2510_v30, %v2124_v29  ;;  %v2126_v42 = vld [vmem:[%s4095_s1 + $0x224] sm:$0xf0]  ;;  %v2865_v44 = vor.u32 %v2439_v32, %v1848_v28 }
  0x19   :  { %961 = vmatpush.bf16.msra.mxu1 %v2225_v5  ;;  %v2438_v37 = vld [vmem:[%s4096_s0 + $0x4] sm:$0xf]  ;;  %v2413_v45 = vor.u32 %v2582_v34, %v2412_v33  ;;  %v2414_v46 = vld [vmem:[%s4095_s1 + $0x464] sm:$0xf0]  ;;  %v2088_v47 = vld [vmem:[%s4095_s1 + $0x1b8] sm:$0xf] }
  0x1a   :  { %980 = vmatpush.bf16.msra.mxu2 %v1941_v6  ;;  %v2506_v41 = vld [vmem:[%s4095_s1 + $0x204] sm:$0xf]  ;;  %v2501_v48 = vld [vmem:[%s4095_s1 + $0x1d8] sm:$0xf0]  ;;  %v2876_v49 = vor.u32 %v2438_v37, %v1850_v38  ;;  %v2376_v50 = vld [vmem:[%s4095_s1 + $0x3f8] sm:$0xf] }
  0x1b   :  { %999 = vmatpush.bf16.msra.mxu3 %v2229_v10  ;;  %v2578_v43 = vld [vmem:[%s4095_s1 + $0x444] sm:$0xf]  ;;  %v2573_v51 = vld [vmem:[%s4095_s1 + $0x418] sm:$0xf0]  ;;  %v2129_v52 = vor.u32 %v2506_v41, %v2126_v42  ;;  %v2089_v54 = vor.u32 %v2501_v48, %v2088_v47  ;;  %v2090_v56 = vld [vmem:[%s4095_s1 + $0x1dc] sm:$0xf0] }
  0x1c   :  { %943 = vmatpush.bf16.msra.mxu0 %v1901_v16  ;;  %v2417_v53 = vor.u32 %v2578_v43, %v2414_v46  ;;  %v2497_v55 = vld [vmem:[%s4095_s1 + $0x1bc] sm:$0xf]  ;;  %v2377_v58 = vor.u32 %v2573_v51, %v2376_v50  ;;  %v2378_v59 = vld [vmem:[%s4095_s1 + $0x41c] sm:$0xf0]  ;;  %v2052_v60 = vld [vmem:[%s4095_s1 + $0x170] sm:$0xf] }
  0x1d   :  { %962 = vmatpush.bf16.msra.mxu1 %v2189_v19  ;;  %v2569_v57 = vld [vmem:[%s4095_s1 + $0x3fc] sm:$0xf]  ;;  %v2492_v61 = vld [vmem:[%s4095_s1 + $0x190] sm:$0xf0]  ;;  %v2340_v62 = vld [vmem:[%s4095_s1 + $0x3b0] sm:$0xf]  ;;  %v2093_v0 = vor.u32 %v2497_v55, %v2090_v56 }
  0x1e   :  { %981 = vmatpush.bf16.msra.mxu2 %v1905_v20  ;;  %v2564_v63 = vld [vmem:[%s4095_s1 + $0x3d0] sm:$0xf0]  ;;  %v2381_v1 = vor.u32 %v2569_v57, %v2378_v59  ;;  %v2053_v2 = vor.u32 %v2492_v61, %v2052_v60  ;;  %v2054_v4 = vld [vmem:[%s4095_s1 + $0x194] sm:$0xf0]  ;;  %v2016_v8 = vld [vmem:[%s4095_s1 + $0x128] sm:$0xf] }
  0x1f   :  { %1000 = vmatpush.bf16.msra.mxu3 %v2193_v24  ;;  %v2488_v3 = vld [vmem:[%s4095_s1 + $0x174] sm:$0xf]  ;;  %v2341_v6 = vor.u32 %v2564_v63, %v2340_v62  ;;  %v2342_v7 = vld [vmem:[%s4095_s1 + $0x3d4] sm:$0xf0]  ;;  %v2483_v9 = vld [vmem:[%s4095_s1 + $0x148] sm:$0xf0] }
  0x20   :  { %944 = vmatpush.bf16.msra.mxu0 %v1865_v31  ;;  %v2560_v5 = vld [vmem:[%s4095_s1 + $0x3b4] sm:$0xf]  ;;  %v2304_v10 = vld [vmem:[%s4095_s1 + $0x368] sm:$0xf]  ;;  %v2555_v11 = vld [vmem:[%s4095_s1 + $0x388] sm:$0xf0]  ;;  %v2057_v12 = vor.u32 %v2488_v3, %v2054_v4  ;;  %v2017_v15 = vor.u32 %v2483_v9, %v2016_v8 }
  0x21   :  { %963 = vmatpush.bf16.msra.mxu1 %v2153_v35  ;;  %v2479_v13 = vld [vmem:[%s4095_s1 + $0x12c] sm:$0xf]  ;;  %v2345_v14 = vor.u32 %v2560_v5, %v2342_v7  ;;  %v2018_v16 = vld [vmem:[%s4095_s1 + $0x14c] sm:$0xf0]  ;;  %v2305_v19 = vor.u32 %v2555_v11, %v2304_v10  ;;  %v1980_v21 = vld [vmem:[%s4095_s1 + $0xe0] sm:$0xf] }
  0x22   :  { %982 = vmatpush.bf16.msra.mxu2 %v1869_v36  ;;  %v2551_v17 = vld [vmem:[%s4095_s1 + $0x36c] sm:$0xf]  ;;  %v2306_v18 = vld [vmem:[%s4095_s1 + $0x38c] sm:$0xf0]  ;;  %v2474_v22 = vld [vmem:[%s4095_s1 + $0x100] sm:$0xf0]  ;;  %v2021_v26 = vor.u32 %v2479_v13, %v2018_v16 }
  0x23   :  { %1001 = vmatpush.bf16.msra.mxu3 %v2157_v39  ;;  %945 = vmatmul.bf16.vlgmr.msra.gmra.mxu0 %v2865_v44  ;;  %v1856_v20 = vld [vmem:[%s4096_s0 + $0x10] sm:$0xf]  ;;  %v2441_v23 = vld [vmem:[%s4096_s0 + $0x14] sm:$0xf0]  ;;  %v2268_v24 = vld [vmem:[%s4095_s1 + $0x320] sm:$0xf]  ;;  %v2309_v29 = vor.u32 %v2551_v17, %v2306_v18  ;;  %v1981_v30 = vor.u32 %v2474_v22, %v1980_v21 }
  0x24   :  { %1013 = vmatpush.bf16.msrb.mxu0 %v2125_v40  ;;  %964 = vmatmul.bf16.vlgmr.msra.gmra.mxu1 %v2876_v49  ;;  %v2546_v25 = vld [vmem:[%s4095_s1 + $0x340] sm:$0xf0]  ;;  %v2440_v27 = vld [vmem:[%s4096_s0 + $0x14] sm:$0xf]  ;;  %v1858_v28 = vld [vmem:[%s4096_s0 + $0x18] sm:$0xf0]  ;;  %v2981_v34 = vor.u32 %v2441_v23, %v1856_v20 }
  0x25   :  { %1032 = vmatpush.bf16.msrb.mxu1 %v2413_v45  ;;  %983 = vmatmul.bf16.vlgmr.msra.gmra.mxu2 %v2865_v44  ;;  %v2470_v31 = vld [vmem:[%s4095_s1 + $0xe4] sm:$0xf]  ;;  %v1982_v32 = vld [vmem:[%s4095_s1 + $0x104] sm:$0xf0]  ;;  %v2269_v35 = vor.u32 %v2546_v25, %v2268_v24  ;;  %v1944_v37 = vld [vmem:[%s4095_s1 + $0x98] sm:$0xf]  ;;  %v2992_v39 = vor.u32 %v2440_v27, %v1858_v28 }
  0x26   :  { %1002 = vmatmul.bf16.vlgmr.msra.gmra.mxu3 %v2876_v49  ;;  %1051 = vmatpush.bf16.msrb.mxu2 %v2129_v52  ;;  %v2542_v33 = vld [vmem:[%s4095_s1 + $0x324] sm:$0xf]  ;;  %v2270_v36 = vld [vmem:[%s4095_s1 + $0x344] sm:$0xf0]  ;;  %v2465_v38 = vld [vmem:[%s4095_s1 + $0xb8] sm:$0xf0]  ;;  %v1985_v42 = vor.u32 %v2470_v31, %v1982_v32 }
  0x27   :  { %1070 = vmatpush.bf16.msrb.mxu3 %v2417_v53  ;;  %v2232_v40 = vld [vmem:[%s4095_s1 + $0x2d8] sm:$0xf]  ;;  %v2537_v41 = vld [vmem:[%s4095_s1 + $0x2f8] sm:$0xf0]  ;;  %v2273_v43 = vor.u32 %v2542_v33, %v2270_v36  ;;  %v1945_v45 = vor.u32 %v2465_v38, %v1944_v37  ;;  %v1946_v47 = vld [vmem:[%s4095_s1 + $0xbc] sm:$0xf0] }
  0x28   :  { %1014 = vmatpush.bf16.msrb.mxu0 %v2089_v54  ;;  %v2461_v46 = vld [vmem:[%s4095_s1 + $0x9c] sm:$0xf]  ;;  %v2233_v50 = vor.u32 %v2537_v41, %v2232_v40  ;;  %v2234_v51 = vld [vmem:[%s4095_s1 + $0x2fc] sm:$0xf0]  ;;  %v1908_v52 = vld [vmem:[%s4095_s1 + $0x50] sm:$0xf] }
  0x29   :  { %1033 = vmatpush.bf16.msrb.mxu1 %v2377_v58  ;;  %v2533_v48 = vld [vmem:[%s4095_s1 + $0x2dc] sm:$0xf]  ;;  %v2456_v53 = vld [vmem:[%s4095_s1 + $0x70] sm:$0xf0]  ;;  %v2196_v54 = vld [vmem:[%s4095_s1 + $0x290] sm:$0xf]  ;;  %v1949_v56 = vor.u32 %v2461_v46, %v1946_v47 }
  0x2a   :  { %1052 = vmatpush.bf16.msrb.mxu2 %v2093_v0  ;;  %v2528_v55 = vld [vmem:[%s4095_s1 + $0x2b0] sm:$0xf0]  ;;  %v2237_v58 = vor.u32 %v2533_v48, %v2234_v51  ;;  %v1909_v59 = vor.u32 %v2456_v53, %v1908_v52  ;;  %v1910_v60 = vld [vmem:[%s4095_s1 + $0x74] sm:$0xf0]  ;;  %v1872_v0 = vld [vmem:[%s4095_s1 + $0x8] sm:$0xf] }
  0x2b   :  { %1071 = vmatpush.bf16.msrb.mxu3 %v2381_v1  ;;  %v2452_v57 = vld [vmem:[%s4095_s1 + $0x54] sm:$0xf]  ;;  %v2198_v62 = vld [vmem:[%s4095_s1 + $0x2b4] sm:$0xf0]  ;;  %v2197_v63 = vor.u32 %v2528_v55, %v2196_v54  ;;  %v2447_v1 = vld [vmem:[%s4095_s1 + $0x28] sm:$0xf0] }
  0x2c   :  { %1015 = vmatpush.bf16.msrb.mxu0 %v2053_v2  ;;  %v2524_v61 = vld [vmem:[%s4095_s1 + $0x294] sm:$0xf]  ;;  %v2160_v2 = vld [vmem:[%s4095_s1 + $0x248] sm:$0xf]  ;;  %v2519_v3 = vld [vmem:[%s4095_s1 + $0x268] sm:$0xf0]  ;;  %v1873_v10 = vor.u32 %v2447_v1, %v1872_v0 }
  0x2d   :  { %1034 = vmatpush.bf16.msrb.mxu1 %v2341_v6  ;;  %v2132_v4 = vld [vmem:[%s4095_s1 + $0x208] sm:$0xf]  ;;  %v2511_v5 = vld [vmem:[%s4095_s1 + $0x228] sm:$0xf0]  ;;  %v1913_v6 = vor.u32 %v2452_v57, %v1910_v60  ;;  %v2201_v9 = vor.u32 %v2524_v61, %v2198_v62  ;;  %v2134_v18 = vld [vmem:[%s4095_s1 + $0x22c] sm:$0xf0] }
  0x2e   :  { %1053 = vmatpush.bf16.msrb.mxu2 %v2057_v12  ;;  %v2420_v7 = vld [vmem:[%s4095_s1 + $0x448] sm:$0xf]  ;;  %v2583_v8 = vld [vmem:[%s4095_s1 + $0x468] sm:$0xf0]  ;;  %v1874_v12 = vld [vmem:[%s4095_s1 + $0x2c] sm:$0xf0]  ;;  %v2133_v16 = vor.u32 %v2511_v5, %v2132_v4 }
  0x2f   :  { %1072 = vmatpush.bf16.msrb.mxu3 %v2345_v14  ;;  %v2443_v11 = vld [vmem:[%s4095_s1 + $0xc] sm:$0xf]  ;;  %v2161_v14 = vor.u32 %v2519_v3, %v2160_v2  ;;  %v2422_v21 = vld [vmem:[%s4095_s1 + $0x46c] sm:$0xf0]  ;;  %v2096_v25 = vld [vmem:[%s4095_s1 + $0x1c0] sm:$0xf] }
  0x30   :  { %1016 = vmatpush.bf16.msrb.mxu0 %v2017_v15  ;;  %v2515_v13 = vld [vmem:[%s4095_s1 + $0x24c] sm:$0xf]  ;;  %v2162_v15 = vld [vmem:[%s4095_s1 + $0x26c] sm:$0xf0]  ;;  %v1877_v22 = vor.u32 %v2443_v11, %v1874_v12  ;;  %v2384_v27 = vld [vmem:[%s4095_s1 + $0x400] sm:$0xf] }
  0x31   :  { %1035 = vmatpush.bf16.msrb.mxu1 %v2305_v19  ;;  %v2507_v17 = vld [vmem:[%s4095_s1 + $0x20c] sm:$0xf]  ;;  %v2421_v19 = vor.u32 %v2583_v8, %v2420_v7  ;;  %v2165_v23 = vor.u32 %v2515_v13, %v2162_v15  ;;  %v2098_v31 = vld [vmem:[%s4095_s1 + $0x1e4] sm:$0xf0]  ;;  %v2570_v32 = vld [vmem:[%s4095_s1 + $0x404] sm:$0xf] }
  0x32   :  { %1054 = vmatpush.bf16.msrb.mxu2 %v2021_v26  ;;  %v2579_v20 = vld [vmem:[%s4095_s1 + $0x44c] sm:$0xf]  ;;  %v2137_v24 = vor.u32 %v2507_v17, %v2134_v18  ;;  %v2502_v26 = vld [vmem:[%s4095_s1 + $0x1e0] sm:$0xf0]  ;;  %v2386_v33 = vld [vmem:[%s4095_s1 + $0x424] sm:$0xf0] }
  0x33   :  { %1073 = vmatpush.bf16.msrb.mxu3 %v2309_v29  ;;  %950 = vmatmul.bf16.gmra.mxu0 %v2981_v34  ;;  %v2425_v28 = vor.u32 %v2579_v20, %v2422_v21  ;;  %v2574_v29 = vld [vmem:[%s4095_s1 + $0x420] sm:$0xf0]  ;;  %v2060_v38 = vld [vmem:[%s4095_s1 + $0x178] sm:$0xf]  ;;  %v2493_v40 = vld [vmem:[%s4095_s1 + $0x198] sm:$0xf0] }
  0x34   :  { %1017 = vmatpush.bf16.msrb.mxu0 %v1981_v30  ;;  %969 = vmatmul.bf16.gmra.mxu1 %v2992_v39  ;;  %v2498_v30 = vld [vmem:[%s4095_s1 + $0x1c4] sm:$0xf]  ;;  %v2385_v36 = vor.u32 %v2574_v29, %v2384_v27  ;;  %v2348_v41 = vld [vmem:[%s4095_s1 + $0x3b8] sm:$0xf]  ;;  %v2062_v46 = vld [vmem:[%s4095_s1 + $0x19c] sm:$0xf0] }
  0x35   :  { %1036 = vmatpush.bf16.msrb.mxu1 %v2269_v35  ;;  %988 = vmatmul.bf16.gmra.mxu2 %v2981_v34  ;;  %v2097_v35 = vor.u32 %v2502_v26, %v2096_v25  ;;  %v2101_v37 = vor.u32 %v2498_v30, %v2098_v31  ;;  %v2561_v47 = vld [vmem:[%s4095_s1 + $0x3bc] sm:$0xf]  ;;  %v2350_v48 = vld [vmem:[%s4095_s1 + $0x3dc] sm:$0xf0]  ;;  %v2024_v53 = vld [vmem:[%s4095_s1 + $0x130] sm:$0xf] }
  0x36   :  { %1007 = vmatmul.bf16.gmra.mxu3 %v2992_v39  ;;  %1055 = vmatpush.bf16.msrb.mxu2 %v1985_v42  ;;  %v2389_v42 = vor.u32 %v2570_v32, %v2386_v33  ;;  %v2484_v54 = vld [vmem:[%s4095_s1 + $0x150] sm:$0xf0]  ;;  %v2312_v55 = vld [vmem:[%s4095_s1 + $0x370] sm:$0xf]  ;;  %v2314_v61 = vld [vmem:[%s4095_s1 + $0x394] sm:$0xf0] }
  0x37   :  { %1074 = vmatpush.bf16.msrb.mxu3 %v2273_v43  ;;  %v2565_v43 = vld [vmem:[%s4095_s1 + $0x3d8] sm:$0xf0]  ;;  %v2556_v57 = vld [vmem:[%s4095_s1 + $0x390] sm:$0xf0]  ;;  %v2025_v62 = vor.u32 %v2484_v54, %v2024_v53  ;;  %v1988_v1 = vld [vmem:[%s4095_s1 + $0xe8] sm:$0xf] }
  0x38   :  { %1018 = vmatpush.bf16.msrb.mxu0 %v1945_v45  ;;  %v2489_v45 = vld [vmem:[%s4095_s1 + $0x17c] sm:$0xf]  ;;  %v2349_v51 = vor.u32 %v2565_v43, %v2348_v41  ;;  %v2552_v60 = vld [vmem:[%s4095_s1 + $0x374] sm:$0xf]  ;;  %v2475_v2 = vld [vmem:[%s4095_s1 + $0x108] sm:$0xf0] }
  0x39   :  { %1037 = vmatpush.bf16.msrb.mxu1 %v2233_v50  ;;  %v2061_v50 = vor.u32 %v2493_v40, %v2060_v38  ;;  %v2065_v52 = vor.u32 %v2489_v45, %v2062_v46  ;;  %v2276_v3 = vld [vmem:[%s4095_s1 + $0x328] sm:$0xf]  ;;  %v2317_v4 = vor.u32 %v2552_v60, %v2314_v61  ;;  %v2547_v5 = vld [vmem:[%s4095_s1 + $0x348] sm:$0xf0]  ;;  %v1990_v7 = vld [vmem:[%s4095_s1 + $0x10c] sm:$0xf0] }
  0x3a   :  { %1056 = vmatpush.bf16.msrb.mxu2 %v1949_v56  ;;  %v2353_v56 = vor.u32 %v2561_v47, %v2350_v48  ;;  %v2543_v8 = vld [vmem:[%s4095_s1 + $0x32c] sm:$0xf]  ;;  %v2277_v11 = vor.u32 %v2547_v5, %v2276_v3  ;;  %v1952_v13 = vld [vmem:[%s4095_s1 + $0xa0] sm:$0xf]  ;;  %v2538_v17 = vld [vmem:[%s4095_s1 + $0x300] sm:$0xf0] }
  0x3b   :  { %1075 = vmatpush.bf16.msrb.mxu3 %v2237_v58  ;;  %v2480_v58 = vld [vmem:[%s4095_s1 + $0x134] sm:$0xf]  ;;  %v2240_v15 = vld [vmem:[%s4095_s1 + $0x2e0] sm:$0xf]  ;;  %v2462_v18 = vld [vmem:[%s4095_s1 + $0xa4] sm:$0xf] }
  0x3c   :  { %1019 = vmatpush.bf16.msrb.mxu0 %v1909_v59  ;;  %v2026_v59 = vld [vmem:[%s4095_s1 + $0x154] sm:$0xf0]  ;;  %v2534_v20 = vld [vmem:[%s4095_s1 + $0x2e4] sm:$0xf]  ;;  %v2242_v21 = vld [vmem:[%s4095_s1 + $0x304] sm:$0xf0] }
  0x3d   :  { %1038 = vmatpush.bf16.msrb.mxu1 %v2197_v63  ;;  %v2313_v63 = vor.u32 %v2556_v57, %v2312_v55  ;;  %v2029_v0 = vor.u32 %v2480_v58, %v2026_v59  ;;  %v1916_v25 = vld [vmem:[%s4095_s1 + $0x58] sm:$0xf]  ;;  %v2457_v26 = vld [vmem:[%s4095_s1 + $0x78] sm:$0xf0]  ;;  %v1918_v31 = vld [vmem:[%s4095_s1 + $0x7c] sm:$0xf0] }
  0x3e   :  { %1057 = vmatpush.bf16.msrb.mxu2 %v1913_v6  ;;  %v2471_v6 = vld [vmem:[%s4095_s1 + $0xec] sm:$0xf]  ;;  %v2204_v27 = vld [vmem:[%s4095_s1 + $0x298] sm:$0xf]  ;;  %v2529_v29 = vld [vmem:[%s4095_s1 + $0x2b8] sm:$0xf0] }
  0x3f   :  { %1076 = vmatpush.bf16.msrb.mxu3 %v2201_v9  ;;  %v2278_v9 = vld [vmem:[%s4095_s1 + $0x34c] sm:$0xf0]  ;;  %v1993_v12 = vor.u32 %v2471_v6, %v1990_v7  ;;  %v2453_v30 = vld [vmem:[%s4095_s1 + $0x5c] sm:$0xf]  ;;  %v2206_v33 = vld [vmem:[%s4095_s1 + $0x2bc] sm:$0xf0]  ;;  %v2205_v38 = vor.u32 %v2529_v29, %v2204_v27 }
  0x40   :  { %1020 = vmatpush.bf16.msrb.mxu0 %v1873_v10  ;;  %v1989_v10 = vor.u32 %v2475_v2, %v1988_v1  ;;  %v2525_v32 = vld [vmem:[%s4095_s1 + $0x29c] sm:$0xf]  ;;  %v1921_v40 = vor.u32 %v2453_v30, %v1918_v31  ;;  %v2168_v41 = vld [vmem:[%s4095_s1 + $0x250] sm:$0xf]  ;;  %v2444_v43 = vld [vmem:[%s4095_s1 + $0x14] sm:$0xf] }
  0x41   :  { %1039 = vmatpush.bf16.msrb.mxu1 %v2161_v14  ;;  %v2466_v14 = vld [vmem:[%s4095_s1 + $0xc0] sm:$0xf0]  ;;  %v2209_v45 = vor.u32 %v2525_v32, %v2206_v33  ;;  %v1882_v46 = vld [vmem:[%s4095_s1 + $0x34] sm:$0xf0]  ;;  %v2516_v47 = vld [vmem:[%s4095_s1 + $0x254] sm:$0xf] }
  0x42   :  { %1058 = vmatpush.bf16.msrb.mxu2 %v1877_v22  ;;  %v1953_v22 = vor.u32 %v2466_v14, %v1952_v13  ;;  %v2170_v48 = vld [vmem:[%s4095_s1 + $0x274] sm:$0xf0]  ;;  %v2584_v54 = vld [vmem:[%s4095_s1 + $0x470] sm:$0xf0]  ;;  %v1885_v58 = vor.u32 %v2444_v43, %v1882_v46  ;;  %v2104_v2 = vld [vmem:[%s4095_s1 + $0x1c8] sm:$0xf] }
  0x43   :  { %1077 = vmatpush.bf16.msrb.mxu3 %v2165_v23  ;;  %1021 = vmatmul.bf16.vlgmr.msrb.gmra.mxu0 %v2865_v44  ;;  %v2241_v23 = vor.u32 %v2538_v17, %v2240_v15  ;;  %v2508_v55 = vld [vmem:[%s4095_s1 + $0x214] sm:$0xf]  ;;  %v2430_v60 = vld [vmem:[%s4095_s1 + $0x474] sm:$0xf0]  ;;  %v2173_v61 = vor.u32 %v2516_v47, %v2170_v48  ;;  %v2503_v3 = vld [vmem:[%s4095_s1 + $0x1e8] sm:$0xf0] }
  0x44   :  { %1089 = vmatpush.bf16.msra.mxu0 %v2133_v16  ;;  %1040 = vmatmul.bf16.vlgmr.msrb.gmra.mxu1 %v2876_v49  ;;  %v2281_v16 = vor.u32 %v2543_v8, %v2278_v9  ;;  %v2580_v59 = vld [vmem:[%s4095_s1 + $0x454] sm:$0xf]  ;;  %v2575_v5 = vld [vmem:[%s4095_s1 + $0x428] sm:$0xf0]  ;;  %v2106_v7 = vld [vmem:[%s4095_s1 + $0x1ec] sm:$0xf0] }
  0x45   :  { %1108 = vmatpush.bf16.msra.mxu1 %v2421_v19  ;;  %1059 = vmatmul.bf16.vlgmr.msrb.gmra.mxu2 %v2865_v44  ;;  %v1954_v19 = vld [vmem:[%s4095_s1 + $0xc4] sm:$0xf0]  ;;  %v2433_v1 = vor.u32 %v2580_v59, %v2430_v60  ;;  %v2499_v6 = vld [vmem:[%s4095_s1 + $0x1cc] sm:$0xf]  ;;  %v2394_v9 = vld [vmem:[%s4095_s1 + $0x42c] sm:$0xf0] }
  0x46   :  { %1127 = vmatpush.bf16.msra.mxu2 %v2137_v24  ;;  %1078 = vmatmul.bf16.vlgmr.msrb.gmra.mxu3 %v2876_v49  ;;  %v1957_v24 = vor.u32 %v2462_v18, %v1954_v19  ;;  %v2571_v8 = vld [vmem:[%s4095_s1 + $0x40c] sm:$0xf]  ;;  %v2068_v13 = vld [vmem:[%s4095_s1 + $0x180] sm:$0xf]  ;;  %v2494_v14 = vld [vmem:[%s4095_s1 + $0x1a0] sm:$0xf0] }
  0x47   :  { %1146 = vmatpush.bf16.msra.mxu3 %v2425_v28  ;;  %v2245_v28 = vor.u32 %v2534_v20, %v2242_v21  ;;  %v2356_v15 = vld [vmem:[%s4095_s1 + $0x3c0] sm:$0xf]  ;;  %v2566_v17 = vld [vmem:[%s4095_s1 + $0x3e0] sm:$0xf0]  ;;  %v2070_v19 = vld [vmem:[%s4095_s1 + $0x1a4] sm:$0xf0] }
  0x48   :  { %1090 = vmatpush.bf16.msra.mxu0 %v2097_v35  ;;  %v1917_v35 = vor.u32 %v2457_v26, %v1916_v25  ;;  %v2490_v18 = vld [vmem:[%s4095_s1 + $0x184] sm:$0xf]  ;;  %v2358_v21 = vld [vmem:[%s4095_s1 + $0x3e4] sm:$0xf0]  ;;  %v2032_v25 = vld [vmem:[%s4095_s1 + $0x138] sm:$0xf] }
  0x49   :  { %1109 = vmatpush.bf16.msra.mxu1 %v2385_v36  ;;  %v1880_v36 = vld [vmem:[%s4095_s1 + $0x10] sm:$0xf]  ;;  %v2562_v20 = vld [vmem:[%s4095_s1 + $0x3c4] sm:$0xf]  ;;  %v2485_v26 = vld [vmem:[%s4095_s1 + $0x158] sm:$0xf0] }
  0x4a   :  { %1128 = vmatpush.bf16.msra.mxu2 %v2101_v37  ;;  %v2448_v37 = vld [vmem:[%s4095_s1 + $0x30] sm:$0xf0]  ;;  %v2320_v27 = vld [vmem:[%s4095_s1 + $0x378] sm:$0xf]  ;;  %v2557_v29 = vld [vmem:[%s4095_s1 + $0x398] sm:$0xf0] }
  0x4b   :  { %1147 = vmatpush.bf16.msra.mxu3 %v2389_v42  ;;  %v2520_v42 = vld [vmem:[%s4095_s1 + $0x270] sm:$0xf0]  ;;  %v1881_v53 = vor.u32 %v2448_v37, %v1880_v36  ;;  %v2481_v30 = vld [vmem:[%s4095_s1 + $0x13c] sm:$0xf]  ;;  %v2034_v31 = vld [vmem:[%s4095_s1 + $0x15c] sm:$0xf0]  ;;  %v2321_v36 = vor.u32 %v2557_v29, %v2320_v27 }
  0x4c   :  { %1091 = vmatpush.bf16.msra.mxu0 %v2061_v50  ;;  %v2140_v50 = vld [vmem:[%s4095_s1 + $0x210] sm:$0xf]  ;;  %v2169_v57 = vor.u32 %v2520_v42, %v2168_v41  ;;  %v2553_v32 = vld [vmem:[%s4095_s1 + $0x37c] sm:$0xf]  ;;  %v2322_v33 = vld [vmem:[%s4095_s1 + $0x39c] sm:$0xf0]  ;;  %v2037_v37 = vor.u32 %v2481_v30, %v2034_v31 }
  0x4d   :  { %1110 = vmatpush.bf16.msra.mxu1 %v2349_v51  ;;  %v2512_v51 = vld [vmem:[%s4095_s1 + $0x230] sm:$0xf0]  ;;  %v2284_v41 = vld [vmem:[%s4095_s1 + $0x330] sm:$0xf]  ;;  %v2325_v42 = vor.u32 %v2553_v32, %v2322_v33  ;;  %v1998_v46 = vld [vmem:[%s4095_s1 + $0x114] sm:$0xf0] }
  0x4e   :  { %1129 = vmatpush.bf16.msra.mxu2 %v2065_v52  ;;  %v2428_v52 = vld [vmem:[%s4095_s1 + $0x450] sm:$0xf]  ;;  %v2548_v43 = vld [vmem:[%s4095_s1 + $0x350] sm:$0xf0]  ;;  %v2286_v48 = vld [vmem:[%s4095_s1 + $0x354] sm:$0xf0] }
  0x4f   :  { %1148 = vmatpush.bf16.msra.mxu3 %v2353_v56  ;;  %v2142_v56 = vld [vmem:[%s4095_s1 + $0x234] sm:$0xf0]  ;;  %v2544_v47 = vld [vmem:[%s4095_s1 + $0x334] sm:$0xf]  ;;  %v1962_v59 = vld [vmem:[%s4095_s1 + $0xcc] sm:$0xf0] }
  0x50   :  { %1092 = vmatpush.bf16.msra.mxu0 %v2025_v62  ;;  %v2141_v62 = vor.u32 %v2512_v51, %v2140_v50  ;;  %v2285_v51 = vor.u32 %v2548_v43, %v2284_v41  ;;  %v2535_v60 = vld [vmem:[%s4095_s1 + $0x2ec] sm:$0xf]  ;;  %v2112_v32 = vld [vmem:[%s4095_s1 + $0x1d0] sm:$0xf]  ;;  %v2504_v33 = vld [vmem:[%s4095_s1 + $0x1f0] sm:$0xf0] }
  0x51   :  { %1111 = vmatpush.bf16.msra.mxu1 %v2313_v63  ;;  %v2429_v63 = vor.u32 %v2584_v54, %v2428_v52  ;;  %v2467_v54 = vld [vmem:[%s4095_s1 + $0xc8] sm:$0xf0] }
  0x52   :  { %1130 = vmatpush.bf16.msra.mxu2 %v2029_v0  ;;  %v2145_v0 = vor.u32 %v2508_v55, %v2142_v56  ;;  %v2248_v55 = vld [vmem:[%s4095_s1 + $0x2e8] sm:$0xf]  ;;  %v2289_v56 = vor.u32 %v2544_v47, %v2286_v48  ;;  %v2495_v41 = vld [vmem:[%s4095_s1 + $0x1a8] sm:$0xf0]  ;;  %v2040_v47 = vld [vmem:[%s4095_s1 + $0x140] sm:$0xf] }
  0x53   :  { %1149 = vmatpush.bf16.msra.mxu3 %v2317_v4  ;;  %1026 = vmatmul.bf16.gmra.mxu0 %v2981_v34  ;;  %v2392_v4 = vld [vmem:[%s4095_s1 + $0x408] sm:$0xf]  ;;  %v2567_v43 = vld [vmem:[%s4095_s1 + $0x3e8] sm:$0xf0]  ;;  %v2486_v48 = vld [vmem:[%s4095_s1 + $0x160] sm:$0xf0] }
  0x54   :  { %1093 = vmatpush.bf16.msra.mxu0 %v1989_v10  ;;  %1045 = vmatmul.bf16.gmra.mxu1 %v2992_v39  ;;  %v2105_v10 = vor.u32 %v2503_v3, %v2104_v2  ;;  %v2458_v2 = vld [vmem:[%s4095_s1 + $0x80] sm:$0xf0]  ;;  %v2212_v3 = vld [vmem:[%s4095_s1 + $0x2a0] sm:$0xf] }
  0x55   :  { %1112 = vmatpush.bf16.msra.mxu1 %v2277_v11  ;;  %1064 = vmatmul.bf16.gmra.mxu2 %v2981_v34  ;;  %v2393_v11 = vor.u32 %v2575_v5, %v2392_v4  ;;  %v2530_v5 = vld [vmem:[%s4095_s1 + $0x2c0] sm:$0xf0] }
  0x56   :  { %1131 = vmatpush.bf16.msra.mxu2 %v1993_v12  ;;  %1083 = vmatmul.bf16.gmra.mxu3 %v2992_v39  ;;  %v2109_v12 = vor.u32 %v2499_v6, %v2106_v7  ;;  %v2454_v6 = vld [vmem:[%s4095_s1 + $0x64] sm:$0xf]  ;;  %v1926_v7 = vld [vmem:[%s4095_s1 + $0x84] sm:$0xf0] }
  0x57   :  { %1150 = vmatpush.bf16.msra.mxu3 %v2281_v16  ;;  %v2397_v16 = vor.u32 %v2571_v8, %v2394_v9  ;;  %v2526_v8 = vld [vmem:[%s4095_s1 + $0x2a4] sm:$0xf]  ;;  %v2214_v9 = vld [vmem:[%s4095_s1 + $0x2c4] sm:$0xf0] }
  0x58   :  { %1094 = vmatpush.bf16.msra.mxu0 %v1953_v22  ;;  %v2069_v22 = vor.u32 %v2494_v14, %v2068_v13  ;;  %v1929_v13 = vor.u32 %v2454_v6, %v1926_v7  ;;  %v2449_v14 = vld [vmem:[%s4095_s1 + $0x38] sm:$0xf0] }
  0x59   :  { %1113 = vmatpush.bf16.msra.mxu1 %v2241_v23  ;;  %v2357_v23 = vor.u32 %v2566_v17, %v2356_v15  ;;  %v2176_v15 = vld [vmem:[%s4095_s1 + $0x258] sm:$0xf]  ;;  %v2217_v17 = vor.u32 %v2526_v8, %v2214_v9  ;;  %v1896_v8 = vld [vmem:[%s4095_s1 + $0x20] sm:$0xf]  ;;  %v2450_v9 = vld [vmem:[%s4095_s1 + $0x40] sm:$0xf0] }
  0x5a   :  { %1132 = vmatpush.bf16.msra.mxu2 %v1957_v24  ;;  %v2073_v24 = vor.u32 %v2490_v18, %v2070_v19  ;;  %v2445_v18 = vld [vmem:[%s4095_s1 + $0x1c] sm:$0xf]  ;;  %v1890_v19 = vld [vmem:[%s4095_s1 + $0x3c] sm:$0xf0] }
  0x5b   :  { %1151 = vmatpush.bf16.msra.mxu3 %v2245_v28  ;;  %v2361_v28 = vor.u32 %v2562_v20, %v2358_v21  ;;  %v2517_v20 = vld [vmem:[%s4095_s1 + $0x25c] sm:$0xf]  ;;  %v2178_v21 = vld [vmem:[%s4095_s1 + $0x27c] sm:$0xf0] }
  0x5c   :  { %1095 = vmatpush.bf16.msra.mxu0 %v1917_v35  ;;  %v2033_v35 = vor.u32 %v2485_v26, %v2032_v25  ;;  %v2436_v25 = vld [vmem:[%s4095_s1 + $0x458] sm:$0xf]  ;;  %v2585_v26 = vld [vmem:[%s4095_s1 + $0x478] sm:$0xf0]  ;;  %v2181_v29 = vor.u32 %v2517_v20, %v2178_v21 }
  0x5d   :  { %1114 = vmatpush.bf16.msra.mxu1 %v2205_v38  ;;  %v1996_v38 = vld [vmem:[%s4095_s1 + $0xf0] sm:$0xf]  ;;  %v2437_v31 = vor.u32 %v2585_v26, %v2436_v25 }
  0x5e   :  { %1133 = vmatpush.bf16.msra.mxu2 %v1921_v40  ;;  %v2476_v40 = vld [vmem:[%s4095_s1 + $0x110] sm:$0xf0] }
  0x5f   :  { %1152 = vmatpush.bf16.msra.mxu3 %v2209_v45  ;;  %v2472_v45 = vld [vmem:[%s4095_s1 + $0xf4] sm:$0xf]  ;;  %v1997_v50 = vor.u32 %v2476_v40, %v1996_v38  ;;  %v2076_v40 = vld [vmem:[%s4095_s1 + $0x188] sm:$0xf] }
  0x60   :  { %1096 = vmatpush.bf16.msra.mxu0 %v1881_v53  ;;  %v2001_v52 = vor.u32 %v2472_v45, %v1998_v46  ;;  %v1960_v53 = vld [vmem:[%s4095_s1 + $0xa8] sm:$0xf]  ;;  %v2077_v45 = vor.u32 %v2495_v41, %v2076_v40 }
  0x61   :  { %1115 = vmatpush.bf16.msra.mxu1 %v2169_v57  ;;  %v2539_v57 = vld [vmem:[%s4095_s1 + $0x308] sm:$0xf0] }
  0x62   :  { %1134 = vmatpush.bf16.msra.mxu2 %v1885_v58  ;;  %v2463_v58 = vld [vmem:[%s4095_s1 + $0xac] sm:$0xf] }
  0x63   :  { %1153 = vmatpush.bf16.msra.mxu3 %v2173_v61  ;;  %1097 = vmatmul.bf16.vlgmr.msra.gmra.mxu0 %v2865_v44  ;;  %v2250_v61 = vld [vmem:[%s4095_s1 + $0x30c] sm:$0xf0] }
  0x64   :  { %1165 = vmatpush.bf16.msrb.mxu0 %v2141_v62  ;;  %1116 = vmatmul.bf16.vlgmr.msra.gmra.mxu1 %v2876_v49  ;;  %v1961_v62 = vor.u32 %v2467_v54, %v1960_v53  ;;  %v2253_v4 = vor.u32 %v2535_v60, %v2250_v61  ;;  %v2004_v54 = vld [vmem:[%s4095_s1 + $0xf8] sm:$0xf]  ;;  %v1968_v60 = vld [vmem:[%s4095_s1 + $0xb0] sm:$0xf]  ;;  %v2468_v61 = vld [vmem:[%s4095_s1 + $0xd0] sm:$0xf0] }
  0x65   :  { %1184 = vmatpush.bf16.msrb.mxu1 %v2429_v63  ;;  %1135 = vmatmul.bf16.vlgmr.msra.gmra.mxu2 %v2865_v44  ;;  %v2249_v63 = vor.u32 %v2539_v57, %v2248_v55  ;;  %v2477_v55 = vld [vmem:[%s4095_s1 + $0x118] sm:$0xf0] }
  0x66   :  { %1203 = vmatpush.bf16.msrb.mxu2 %v2145_v0  ;;  %1154 = vmatmul.bf16.vlgmr.msra.gmra.mxu3 %v2876_v49  ;;  %v1965_v0 = vor.u32 %v2463_v58, %v1962_v59  ;;  %v2549_v57 = vld [vmem:[%s4095_s1 + $0x358] sm:$0xf0]  ;;  %v2005_v58 = vor.u32 %v2477_v55, %v2004_v54 }
  0x67   :  { %1222 = vmatpush.bf16.msrb.mxu3 %v2433_v1  ;;  %v1924_v1 = vld [vmem:[%s4095_s1 + $0x60] sm:$0xf] }
  0x68   :  { %1166 = vmatpush.bf16.msrb.mxu0 %v2105_v10  ;;  %v1925_v10 = vor.u32 %v2458_v2, %v1924_v1  ;;  %v1932_v2 = vld [vmem:[%s4095_s1 + $0x68] sm:$0xf] }
  0x69   :  { %1185 = vmatpush.bf16.msrb.mxu1 %v2393_v11  ;;  %v1888_v11 = vld [vmem:[%s4095_s1 + $0x18] sm:$0xf] }
  0x6a   :  { %1204 = vmatpush.bf16.msrb.mxu2 %v2109_v12  ;;  %v2213_v12 = vor.u32 %v2530_v5, %v2212_v3  ;;  %v2459_v3 = vld [vmem:[%s4095_s1 + $0x88] sm:$0xf0] }
  0x6b   :  { %1223 = vmatpush.bf16.msrb.mxu3 %v2397_v16  ;;  %v2521_v16 = vld [vmem:[%s4095_s1 + $0x278] sm:$0xf0]  ;;  %v2531_v5 = vld [vmem:[%s4095_s1 + $0x2c8] sm:$0xf0]  ;;  %v1933_v6 = vor.u32 %v2459_v3, %v1932_v2 }
  0x6c   :  { %1167 = vmatpush.bf16.msrb.mxu0 %v2069_v22  ;;  %v2148_v22 = vld [vmem:[%s4095_s1 + $0x218] sm:$0xf]  ;;  %v2177_v27 = vor.u32 %v2521_v16, %v2176_v15 }
  0x6d   :  { %1186 = vmatpush.bf16.msrb.mxu1 %v2357_v23  ;;  %v2513_v23 = vld [vmem:[%s4095_s1 + $0x238] sm:$0xf0] }
  0x6e   :  { %1205 = vmatpush.bf16.msrb.mxu2 %v2073_v24  ;;  %v1889_v24 = vor.u32 %v2449_v14, %v1888_v11  ;;  %v2149_v30 = vor.u32 %v2513_v23, %v2148_v22  ;;  %v2522_v11 = vld [vmem:[%s4095_s1 + $0x280] sm:$0xf0] }
  0x6f   :  { %1224 = vmatpush.bf16.msrb.mxu3 %v2361_v28  ;;  %v1893_v28 = vor.u32 %v2445_v18, %v1890_v19 }
  0x70   :  { %1168 = vmatpush.bf16.msrb.mxu0 %v2033_v35  ;;  %v2400_v35 = vld [vmem:[%s4095_s1 + $0x410] sm:$0xf] }
  0x71   :  { %1187 = vmatpush.bf16.msrb.mxu1 %v2321_v36  ;;  %v2576_v36 = vld [vmem:[%s4095_s1 + $0x430] sm:$0xf0] }
  0x72   :  { %1206 = vmatpush.bf16.msrb.mxu2 %v2037_v37  ;;  %v2113_v37 = vor.u32 %v2504_v33, %v2112_v32  ;;  %v2401_v38 = vor.u32 %v2576_v36, %v2400_v35 }
  0x73   :  { %1225 = vmatpush.bf16.msrb.mxu3 %v2325_v42  ;;  %1102 = vmatmul.bf16.gmra.mxu0 %v2981_v34  ;;  %v2364_v42 = vld [vmem:[%s4095_s1 + $0x3c8] sm:$0xf] }
  0x74   :  { %1169 = vmatpush.bf16.msrb.mxu0 %v1997_v50  ;;  %1121 = vmatmul.bf16.gmra.mxu1 %v2992_v39  ;;  %v2365_v46 = vor.u32 %v2567_v43, %v2364_v42  ;;  %v2328_v50 = vld [vmem:[%s4095_s1 + $0x380] sm:$0xf] }
  0x75   :  { %1188 = vmatpush.bf16.msrb.mxu1 %v2285_v51  ;;  %1140 = vmatmul.bf16.gmra.mxu2 %v2981_v34  ;;  %v2558_v51 = vld [vmem:[%s4095_s1 + $0x3a0] sm:$0xf0] }
  0x76   :  { %1207 = vmatpush.bf16.msrb.mxu2 %v2001_v52  ;;  %1159 = vmatmul.bf16.gmra.mxu3 %v2992_v39  ;;  %v2041_v52 = vor.u32 %v2486_v48, %v2040_v47  ;;  %v2329_v53 = vor.u32 %v2558_v51, %v2328_v50 }
  0x77   :  { %1226 = vmatpush.bf16.msrb.mxu3 %v2289_v56  ;;  %v2292_v56 = vld [vmem:[%s4095_s1 + $0x338] sm:$0xf] }
  0x78   :  { %1170 = vmatpush.bf16.msrb.mxu0 %v1961_v62  ;;  %v2293_v59 = vor.u32 %v2549_v57, %v2292_v56  ;;  %v2256_v62 = vld [vmem:[%s4095_s1 + $0x2f0] sm:$0xf] }
  0x79   :  { %1189 = vmatpush.bf16.msrb.mxu1 %v2249_v63  ;;  %v2540_v63 = vld [vmem:[%s4095_s1 + $0x310] sm:$0xf0] }
  0x7a   :  { %1208 = vmatpush.bf16.msrb.mxu2 %v1965_v0  ;;  %v1969_v0 = vor.u32 %v2468_v61, %v1968_v60  ;;  %v2257_v1 = vor.u32 %v2540_v63, %v2256_v62 }
  0x7b   :  { %1227 = vmatpush.bf16.msrb.mxu3 %v2253_v4  ;;  %v2220_v4 = vld [vmem:[%s4095_s1 + $0x2a8] sm:$0xf] }
  0x7c   :  { %1171 = vmatpush.bf16.msrb.mxu0 %v1925_v10  ;;  %v2221_v7 = vor.u32 %v2531_v5, %v2220_v4  ;;  %v2184_v10 = vld [vmem:[%s4095_s1 + $0x260] sm:$0xf] }
  0x7d   :  { %1190 = vmatpush.bf16.msrb.mxu1 %v2213_v12  ;;  %v1897_v12 = vor.u32 %v2450_v9, %v1896_v8 }
  0x7e   :  { %1209 = vmatpush.bf16.msrb.mxu2 %v1929_v13  ;;  %v2185_v13 = vor.u32 %v2522_v11, %v2184_v10 }
  0x7f   :  { %1228 = vmatpush.bf16.msrb.mxu3 %v2217_v17 }
  0x80   :  { %1172 = vmatpush.bf16.msrb.mxu0 %v1889_v24 }
  0x81   :  { %1191 = vmatpush.bf16.msrb.mxu1 %v2177_v27 }
  0x82   :  { %1210 = vmatpush.bf16.msrb.mxu2 %v1893_v28 }
  0x83   :  { %1229 = vmatpush.bf16.msrb.mxu3 %v2181_v29  ;;  %1173 = vmatmul.bf16.vlgmr.msrb.gmra.mxu0 %v2865_v44 }
  0x84   :  { %1241 = vmatpush.bf16.msra.mxu0 %v2149_v30  ;;  %1192 = vmatmul.bf16.vlgmr.msrb.gmra.mxu1 %v2876_v49 }
  0x85   :  { %1260 = vmatpush.bf16.msra.mxu1 %v2437_v31  ;;  %1211 = vmatmul.bf16.vlgmr.msrb.gmra.mxu2 %v2865_v44 }
  0x86   :  { %2586 = vmatpush.bf16.msra.mxu2 %v2149_v30  ;;  %1230 = vmatmul.bf16.vlgmr.msrb.gmra.mxu3 %v2876_v49 }
  0x87   :  { %2594 = vmatpush.bf16.msra.mxu3 %v2437_v31 }
  0x88   :  { %1242 = vmatpush.bf16.msra.mxu0 %v2113_v37 }
  0x89   :  { %1261 = vmatpush.bf16.msra.mxu1 %v2401_v38 }
  0x8a   :  { %2587 = vmatpush.bf16.msra.mxu2 %v2113_v37 }
  0x8b   :  { %2595 = vmatpush.bf16.msra.mxu3 %v2401_v38 }
  0x8c   :  { %1243 = vmatpush.bf16.msra.mxu0 %v2077_v45 }
  0x8d   :  { %1262 = vmatpush.bf16.msra.mxu1 %v2365_v46 }
  0x8e   :  { %2588 = vmatpush.bf16.msra.mxu2 %v2077_v45 }
  0x8f   :  { %2596 = vmatpush.bf16.msra.mxu3 %v2365_v46 }
  0x90   :  { %1244 = vmatpush.bf16.msra.mxu0 %v2041_v52 }
  0x91   :  { %1263 = vmatpush.bf16.msra.mxu1 %v2329_v53 }
  0x92   :  { %2589 = vmatpush.bf16.msra.mxu2 %v2041_v52 }
  0x93   :  { %2597 = vmatpush.bf16.msra.mxu3 %v2329_v53  ;;  %1178 = vmatmul.bf16.gmra.mxu0 %v2981_v34 }
  0x94   :  { %1245 = vmatpush.bf16.msra.mxu0 %v2005_v58  ;;  %1197 = vmatmul.bf16.gmra.mxu1 %v2992_v39 }
  0x95   :  { %1264 = vmatpush.bf16.msra.mxu1 %v2293_v59  ;;  %1216 = vmatmul.bf16.gmra.mxu2 %v2981_v34 }
  0x96   :  { %2590 = vmatpush.bf16.msra.mxu2 %v2005_v58  ;;  %1235 = vmatmul.bf16.gmra.mxu3 %v2992_v39 }
  0x97   :  { %2598 = vmatpush.bf16.msra.mxu3 %v2293_v59 }
  0x98   :  { %1246 = vmatpush.bf16.msra.mxu0 %v1969_v0 }
  0x99   :  { %1265 = vmatpush.bf16.msra.mxu1 %v2257_v1 }
  0x9a   :  { %2591 = vmatpush.bf16.msra.mxu2 %v1969_v0 }
  0x9b   :  { %2599 = vmatpush.bf16.msra.mxu3 %v2257_v1 }
  0x9c   :  { %1247 = vmatpush.bf16.msra.mxu0 %v1933_v6 }
  0x9d   :  { %1266 = vmatpush.bf16.msra.mxu1 %v2221_v7 }
  0x9e   :  { %2592 = vmatpush.bf16.msra.mxu2 %v1933_v6 }
  0x9f   :  { %2600 = vmatpush.bf16.msra.mxu3 %v2221_v7 }
  0xa0   :  { %1248 = vmatpush.bf16.msra.mxu0 %v1897_v12  ;;  %v946_v14 = vpop.f32.mrf.mxu0 }
  0xa1   :  { %1267 = vmatpush.bf16.msra.mxu1 %v2185_v13  ;;  %v965_v15 = vpop.f32.mrf.mxu1 }
  0xa2   :  { %2593 = vmatpush.bf16.msra.mxu2 %v1897_v12  ;;  %v3568_v16 = vadd.f32 %v965_v15, %v946_v14 }
  0xa3   :  { %2601 = vmatpush.bf16.msra.mxu3 %v2185_v13  ;;  %1249 = vmatmul.bf16.vlgmr.msra.gmra.mxu0 %v2865_v44 }
  0xa4   :  { %1268 = vmatmul.bf16.vlgmr.msra.gmra.mxu1 %v2876_v49 }
  0xa5   :  { %1254 = vmatmul.bf16.vlgmr.msra.gmra.mxu2 %v2981_v34 }
  0xa6   :  { %1273 = vmatmul.bf16.vlgmr.msra.gmra.mxu3 %v2992_v39 }
  0xa8   :  { %v984_v17 = vpop.f32.mrf.mxu2  ;;  %v948_v19 = vpop.f32.mrf.mxu0 }
  0xa9   :  { %v1003_v18 = vpop.f32.mrf.mxu3  ;;  %v967_v21 = vpop.f32.mrf.mxu1 }
  0xaa   :  { %v3574_v20 = vadd.f32 %v1003_v18, %v984_v17  ;;  %v3576_v22 = vadd.f32 %v967_v21, %v948_v19 }
  0xb0   :  { %v986_v23 = vpop.f32.mrf.mxu2  ;;  %v951_v25 = vpop.f32.mrf.mxu0 }
  0xb1   :  { %v1005_v24 = vpop.f32.mrf.mxu3  ;;  %v970_v44 = vpop.f32.mrf.mxu1 }
  0xb2   :  { %v3578_v26 = vadd.f32 %v1005_v24, %v986_v23  ;;  %v3580_v27 = vadd.f32 %v970_v44, %v951_v25 }
  0xb8   :  { %v989_v34 = vpop.f32.mrf.mxu2  ;;  %v953_v28 = vpop.f32.mrf.mxu0 }
  0xb9   :  { %v1008_v49 = vpop.f32.mrf.mxu3  ;;  %v972_v29 = vpop.f32.mrf.mxu1 }
  0xba   :  { %v3582_v39 = vadd.f32 %v1008_v49, %v989_v34  ;;  %v3584_v30 = vadd.f32 %v972_v29, %v953_v28  ;;  %v1574_v34 = vld [vmem:[%s4097_s2] sm:$0xff]  ;;  %v1279_v49 = vadd.f32 %v3574_v20, %v3568_v16  ;;  %v2614_v28 = vmov 0  }
  0xbb   :  { %2603 = vset.pattern.permute.xlu2 %v2614_v28  ;;  %2605 = vset.pattern.permute.xlu1 %v2614_v28 }
  0xbc   :  { %1580 = vperm.xlu2 %2603, %v1574_v34   ;;  %2604 = vset.pattern.permute.xlu0 %v2614_v28 }
  0xc0   :  { %v991_v31 = vpop.f32.mrf.mxu2  ;;  %v1022_v33 = vpop.f32.mrf.mxu0 }
  0xc1   :  { %v1010_v32 = vpop.f32.mrf.mxu3  ;;  %v1041_v36 = vpop.f32.mrf.mxu1 }
  0xc2   :  { %v3586_v35 = vadd.f32 %v1010_v32, %v991_v31  ;;  %v3588_v37 = vadd.f32 %v1041_v36, %v1022_v33 }
  0xc4   :  { %v1280_v31 = vadd.f32 %v1279_v49, %v3588_v37 }
  0xc8   :  { %v1060_v38 = vpop.f32.mrf.mxu2  ;;  %v1024_v41 = vpop.f32.mrf.mxu0 }
  0xc9   :  { %v1079_v40 = vpop.f32.mrf.mxu3  ;;  %v1043_v43 = vpop.f32.mrf.mxu1 }
  0xca   :  { %v3590_v42 = vadd.f32 %v1079_v40, %v1060_v38  ;;  %v3592_v45 = vadd.f32 %v1043_v43, %v1024_v41 }
  0xcc   :  { %v1281_v40 = vadd.f32 %v1280_v31, %v3590_v42 }
  0xd0   :  { %v1062_v46 = vpop.f32.mrf.mxu2  ;;  %v1027_v48 = vpop.f32.mrf.mxu0 }
  0xd1   :  { %v1081_v47 = vpop.f32.mrf.mxu3  ;;  %v1046_v51 = vpop.f32.mrf.mxu1 }
  0xd2   :  { %v3594_v50 = vadd.f32 %v1081_v47, %v1062_v46  ;;  %v3596_v52 = vadd.f32 %v1046_v51, %v1027_v48  ;;  %v1299_v47 = vadd.f32 %v3582_v39, %v3580_v27  ;;  %v1289_v48 = vadd.f32 %v3578_v26, %v3576_v22 }
  0xd8   :  { %v1065_v53 = vpop.f32.mrf.mxu2  ;;  %v1029_v55 = vpop.f32.mrf.mxu0 }
  0xd9   :  { %v1084_v54 = vpop.f32.mrf.mxu3  ;;  %v1048_v57 = vpop.f32.mrf.mxu1 }
  0xda   :  { %v3598_v56 = vadd.f32 %v1084_v54, %v1065_v53  ;;  %v3600_v58 = vadd.f32 %v1048_v57, %v1029_v55  ;;  %v1300_v54 = vadd.f32 %v1299_v47, %v3596_v52 }
  0xe0   :  { %v1067_v59 = vpop.f32.mrf.mxu2  ;;  %v1098_v61 = vpop.f32.mrf.mxu0 }
  0xe1   :  { %v1086_v60 = vpop.f32.mrf.mxu3  ;;  %v1117_v63 = vpop.f32.mrf.mxu1 }
  0xe2   :  { %v3602_v62 = vadd.f32 %v1086_v60, %v1067_v59  ;;  %v3616_v32 = vadd.f32 %v1117_v63, %v1098_v61  ;;  %v1290_v59 = vadd.f32 %v1289_v48, %v3592_v45 }
  0xe4   :  { %v1282_v43 = vadd.f32 %v1281_v40, %v3616_v32 }
  0xe8   :  { %v1136_v0 = vpop.f32.mrf.mxu2  ;;  %v1100_v2 = vpop.f32.mrf.mxu0 }
  0xe9   :  { %v1155_v1 = vpop.f32.mrf.mxu3  ;;  %v1119_v3 = vpop.f32.mrf.mxu1 }
  0xea   :  { %v3619_v41 = vadd.f32 %v1155_v1, %v1136_v0  ;;  %v3635_v60 = vadd.f32 %v1119_v3, %v1100_v2  ;;  %v1301_v1 = vadd.f32 %v1300_v54, %v3598_v56 }
  0xec   :  { %v1283_v51 = vadd.f32 %v1282_v43, %v3619_v41 }
  0xf0   :  { %v1138_v4 = vpop.f32.mrf.mxu2  ;;  %v1103_v6 = vpop.f32.mrf.mxu0 }
  0xf1   :  { %v1157_v5 = vpop.f32.mrf.mxu3  ;;  %v1122_v7 = vpop.f32.mrf.mxu1 }
  0xf2   :  { %v3632_v55 = vadd.f32 %v1122_v7, %v1103_v6 }
  0xf4   :  { %v1302_v2 = vadd.f32 %v1301_v1, %v3632_v55 }
  0xf8   :  { %v1141_v8 = vpop.f32.mrf.mxu2  ;;  %v3604_v10 = vpop.f32.mrf.mxu0 }
  0xf9   :  { %v1160_v9 = vpop.f32.mrf.mxu3  ;;  %v1124_v11 = vpop.f32.mrf.mxu1 }
 0x100   :  { %v3606_v12 = vpop.f32.mrf.mxu2  ;;  %v1174_v14 = vpop.f32.mrf.mxu0 }
 0x101   :  { %v3608_v13 = vpop.f32.mrf.mxu3  ;;  %v1193_v15 = vpop.f32.mrf.mxu1 }
 0x102   :  { %v3622_v46 = vadd.f32 %v1193_v15, %v1174_v14  ;;  %v3639_v14 = vadd.f32 %v1160_v9, %v1141_v8  ;;  %v1309_v9 = vadd.f32 %v3586_v35, %v3584_v30 }
 0x104   :  { %v1284_v61 = vadd.f32 %v1283_v51, %v3622_v46 }
 0x108   :  { %v1212_v17 = vpop.f32.mrf.mxu2  ;;  %v1176_v19 = vpop.f32.mrf.mxu0 }
 0x109   :  { %v1231_v18 = vpop.f32.mrf.mxu3  ;;  %v1195_v21 = vpop.f32.mrf.mxu1 }
 0x10a   :  { %v3629_v53 = vadd.f32 %v1231_v18, %v1212_v17  ;;  %v1291_v17 = vadd.f32 %v1290_v59, %v3594_v50  ;;  %v3642_v18 = vadd.f32 %v1157_v5, %v1138_v4  ;;  %v3651_v49 = vadd.f32 %v1195_v21, %v1176_v19 }
 0x10b   :  { %v1303_v4 = vadd.f32 %v1302_v2, %v3639_v14 }
 0x10c   :  { %v1285_v7 = vadd.f32 %v1284_v61, %v3629_v53  ;;  %v1292_v34 = vadd.f32 %v1291_v17, %v3635_v60 }
 0x10e   :  { %v1293_v28 = vadd.f32 %v1292_v34, %v3642_v18 }
 0x110   :  { %v1214_v23 = vpop.f32.mrf.mxu2  ;;  %v1179_v25 = vpop.f32.mrf.mxu0  ;;  %v1294_v40 = vadd.f32 %v1293_v28, %v3651_v49 }
 0x111   :  { %v1233_v24 = vpop.f32.mrf.mxu3  ;;  %v1198_v44 = vpop.f32.mrf.mxu1 }
 0x112   :  { %v3648_v3 = vadd.f32 %v1198_v44, %v1179_v25  ;;  %v3660_v31 = vadd.f32 %v1233_v24, %v1214_v23  ;;  %v1310_v25 = vadd.f32 %v1309_v9, %v3600_v58  ;;  %v3664_v44 = vadd.f32 %v1124_v11, %v3604_v10 }
 0x114   :  { %v1304_v19 = vadd.f32 %v1303_v4, %v3648_v3  ;;  %v1295_v10 = vadd.f32 %v1294_v40, %v3660_v31 }
 0x118   :  { %v1217_v29 = vpop.f32.mrf.mxu2  ;;  %v1181_v36 = vpop.f32.mrf.mxu0 }
 0x119   :  { %v1236_v33 = vpop.f32.mrf.mxu3  ;;  %v1200_v38 = vpop.f32.mrf.mxu1 }
 0x11a   :  { %v3657_v5 = vadd.f32 %v1236_v33, %v1217_v29  ;;  %v1311_v29 = vadd.f32 %v1310_v25, %v3602_v62  ;;  %v3671_v33 = vadd.f32 %v3608_v13, %v3606_v12  ;;  %v3680_v54 = vadd.f32 %v1200_v38, %v1181_v36  ;;  %v1576_v38 = vld [vmem:[%s4097_s2 + $0x10] sm:$0xff] }
 0x11c   :  { %v1305_v48 = vadd.f32 %v1304_v19, %v3657_v5  ;;  %v1312_v51 = vadd.f32 %v1311_v29, %v3664_v44 }
 0x11e   :  { %v1313_v12 = vadd.f32 %v1312_v51, %v3671_v33 }
 0x120   :  { %v1219_v57 = vpop.f32.mrf.mxu2  ;;  %v1250_v0 = vpop.f32.mrf.mxu0 }
 0x121   :  { %v1238_v63 = vpop.f32.mrf.mxu3  ;;  %v1269_v15 = vpop.f32.mrf.mxu1 }
 0x122   :  { %v3644_v6 = vadd.f32 %v1269_v15, %v1250_v0  ;;  %v3685_v13 = vadd.f32 %v1238_v63, %v1219_v57  ;;  %v1314_v0 = vadd.f32 %v1313_v12, %v3680_v54  ;;  %v1635_v57 = vld [vmem:[%s4098_s3 + $0x8] sm:$0xff]  ;;  %v1359_v63 = vlaneseq }
 0x124   :  { %v1286_v8 = vadd.f32 %v1285_v7, %v3644_v6  ;;  %v1315_v17 = vadd.f32 %v1314_v0, %v3685_v13  ;;  %v1360_v28 = vand.u32 127, %v1359_v63 }
 0x126   :  { %1287 = vadd.xlane.f32.xlu0 %v1286_v8 }
 0x128   :  { %v1255_v21 = vpop.f32.mrf.mxu2  ;;  %v1252_v47 = vpop.f32.mrf.mxu0 }
 0x129   :  { %v1274_v43 = vpop.f32.mrf.mxu3  ;;  %v1271_v24 = vpop.f32.mrf.mxu1 }
 0x12a   :  { %v3673_v23 = vadd.f32 %v1274_v43, %v1255_v21  ;;  %v3677_v11 = vadd.f32 %v1271_v24, %v1252_v47  ;;  %v3717_v43 = vadd.s32 1024, %v1360_v28 }
 0x12c   :  { %v1306_v59 = vadd.f32 %v1305_v48, %v3673_v23  ;;  %v1296_v61 = vadd.f32 %v1295_v10, %v3677_v11  ;;  %vm1377_vm0 = vcmp.lt.s32.totalorder %v3717_v43, 1040 }
 0x12e   :  { %1307 = vadd.xlane.f32.xlu1 %v1306_v59  ;;  %1297 = vadd.xlane.f32.xlu0 %v1296_v61 }
 0x130   :  { %v1257_v1 = vpop.f32.mrf.mxu2 }
 0x131   :  { %v1276_v15 = vpop.f32.mrf.mxu3 }
 0x132   :  { %v3689_v7 = vadd.f32 %v1276_v15, %v1257_v1 }
 0x134   :  { %v1316_v36 = vadd.f32 %v1315_v17, %v3689_v7 }
 0x136   :  { %1317 = vadd.xlane.f32.xlu1 %v1316_v36 }
 0x14f   :  { %1590 = vperm.xlu1 %2605, %v1576_v38  }
 0x157   :  { %1645 = vperm.xlu1 %2605, %v1635_v57  }
 0x199   :  { %v1288_v2 = vpop.xlane.xlu0 %1287 }
 0x19a   :  { %v1319_v34 = vmul.f32 0.00096153846, %v1288_v2 }
 0x19c   :  { %v3699_v8 = vsub.f32 %v3568_v16, %v1319_v34  ;;  %v3702_v9 = vsub.f32 %v3574_v20, %v1319_v34  ;;  %v3705_v4 = vsub.f32 %v3588_v37, %v1319_v34  ;;  %v3708_v25 = vsub.f32 %v3590_v42, %v1319_v34 }
 0x19d   :  { %v3715_v16 = vsub.f32 %v3616_v32, %v1319_v34  ;;  %v3722_v42 = vsub.f32 %v3619_v41, %v1319_v34  ;;  %v3727_v48 = vsub.f32 %v3622_v46, %v1319_v34  ;;  %v1331_v32 = vsub.f32 %v3644_v6, %v1319_v34 }
 0x19e   :  { %v1414_v19 = vmul.f32 %v3699_v8, %v3699_v8  ;;  %v1415_v21 = vmul.f32 %v3702_v9, %v3702_v9  ;;  %v1416_v20 = vmul.f32 %v3705_v4, %v3705_v4  ;;  %v1417_v29 = vmul.f32 %v3708_v25, %v3708_v25 }
 0x19f   :  { %v1418_v41 = vmul.f32 %v3715_v16, %v3715_v16  ;;  %v3743_v46 = vsub.f32 %v3629_v53, %v1319_v34  ;;  %v1420_v53 = vmul.f32 %v3727_v48, %v3727_v48 }
 0x1a0   :  { %v1450_v37 = vadd.f32 %v1415_v21, %v1414_v19 }
 0x1a1   :  { %v1308_v40 = vpop.xlane.xlu1 %1307 }
 0x1a2   :  { %v1321_v47 = vmul.f32 0.00096153846, %v1308_v40  ;;  %v1451_v24 = vadd.f32 %v1450_v37, %v1416_v20 }
 0x1a4   :  { %v3731_v10 = vsub.f32 %v3580_v27, %v1321_v47  ;;  %v3734_v51 = vsub.f32 %v3582_v39, %v1321_v47  ;;  %v1452_v59 = vadd.f32 %v1451_v24, %v1417_v29  ;;  %v3740_v61 = vsub.f32 %v3596_v52, %v1321_v47 }
 0x1a5   :  { %v1419_v39 = vmul.f32 %v3722_v42, %v3722_v42  ;;  %v3752_v0 = vsub.f32 %v3598_v56, %v1321_v47  ;;  %v3756_v52 = vsel %vm1377_vm0, %v1331_v32, 0.0  ;;  %v3761_v17 = vsub.f32 %v3632_v55, %v1321_v47 }
 0x1a6   :  { %v1432_v6 = vmul.f32 %v3731_v10, %v3731_v10  ;;  %v1433_v27 = vmul.f32 %v3734_v51, %v3734_v51  ;;  %v1453_v12 = vadd.f32 %v1452_v59, %v1418_v41  ;;  %v1434_v36 = vmul.f32 %v3740_v61, %v3740_v61 }
 0x1a7   :  { %v1421_v56 = vmul.f32 %v3743_v46, %v3743_v46  ;;  %v3768_v2 = vsub.f32 %v3639_v14, %v1321_v47  ;;  %v1435_v34 = vmul.f32 %v3752_v0, %v3752_v0  ;;  %v1422_v55 = vmul.f32 %v3756_v52, %v3756_v52 }
 0x1a8   :  { %v1454_v15 = vadd.f32 %v1453_v12, %v1419_v39  ;;  %v1470_v38 = vadd.f32 %v1433_v27, %v1432_v6  ;;  %v3781_v20 = vsub.f32 %v3648_v3, %v1321_v47  ;;  %v1436_v14 = vmul.f32 %v3761_v17, %v3761_v17 }
 0x1a9   :  { %v1318_v1 = vpop.xlane.xlu1 %1317  ;;  %v3786_v29 = vsub.f32 %v3657_v5, %v1321_v47  ;;  %v1349_v24 = vsub.f32 %v3673_v23, %v1321_v47  ;;  %v1437_v3 = vmul.f32 %v3768_v2, %v3768_v2 }
 0x1aa   :  { %v1322_v57 = vmul.f32 0.00096153846, %v1318_v1  ;;  %v1455_v63 = vadd.f32 %v1454_v15, %v1420_v53  ;;  %v1471_v28 = vadd.f32 %v1470_v38, %v1434_v36  ;;  %v1438_v5 = vmul.f32 %v3781_v20, %v3781_v20 }
 0x1ab   :  { %v3805_v23 = vsel %vm1377_vm0, %v1349_v24, 0.0 }
 0x1ac   :  { %v3775_v19 = vsub.f32 %v3584_v30, %v1322_v57  ;;  %v3778_v21 = vsub.f32 %v3586_v35, %v1322_v57  ;;  %v1456_v40 = vadd.f32 %v1455_v63, %v1421_v56  ;;  %v1472_v37 = vadd.f32 %v1471_v28, %v1435_v34 }
 0x1ad   :  { %v3790_v32 = vsub.f32 %v3600_v58, %v1322_v57  ;;  %v3799_v6 = vsub.f32 %v3602_v62, %v1322_v57  ;;  %v3808_v47 = vsub.f32 %v3664_v44, %v1322_v57  ;;  %v1439_v62 = vmul.f32 %v3786_v29, %v3786_v29 }
 0x1ae   :  { %v1441_v30 = vmul.f32 %v3775_v19, %v3775_v19  ;;  %v1457_v35 = vadd.f32 %v1456_v40, %v1422_v55  ;;  %v1473_v41 = vadd.f32 %v1472_v37, %v1436_v14  ;;  %v1442_v59 = vmul.f32 %v3778_v21, %v3778_v21 }
 0x1af   :  { %v1443_v27 = vmul.f32 %v3790_v32, %v3790_v32  ;;  %v3815_v53 = vsub.f32 %v3671_v33, %v1322_v57  ;;  %v1444_v1 = vmul.f32 %v3799_v6, %v3799_v6  ;;  %v1440_v36 = vmul.f32 %v3805_v23, %v3805_v23 }
 0x1b0   :  { %1458 = vadd.xlane.f32.xlu2 %v1457_v35  ;;  %v1474_v58 = vadd.f32 %v1473_v41, %v1437_v3  ;;  %v1480_v39 = vadd.f32 %v1442_v59, %v1441_v30  ;;  %v3822_v38 = vsub.f32 %v3680_v54, %v1322_v57  ;;  %v1445_v56 = vmul.f32 %v3808_v47, %v3808_v47  ;;  %v1577_v35 = vld [vmem:[%s4097_s2 + $0x18] sm:$0xff]  ;;  %v1298_v3 = vpop.xlane.xlu0 %1297  ;;  %v1634_v41 = vld [vmem:[%s4098_s3] sm:$0xff] }
 0x1b1   :  { %v1358_v28 = vsub.f32 %v3689_v7, %v1322_v57  ;;  %v3828_v33 = vsub.f32 %v3685_v13, %v1322_v57  ;;  %v1446_v55 = vmul.f32 %v3815_v53, %v3815_v53  ;;  %v1320_v59 = vmul.f32 0.00096153846, %v1298_v3 }
 0x1b2   :  { %v1475_v12 = vadd.f32 %v1474_v58, %v1438_v5  ;;  %v1481_v15 = vadd.f32 %v1480_v39, %v1443_v27  ;;  %v1447_v14 = vmul.f32 %v3822_v38, %v3822_v38  ;;  %v1637_v27 = vld [vmem:[%s4098_s3 + $0x18] sm:$0xff] }
 0x1b3   :  { %v3836_v37 = vsel %vm1377_vm0, %v1358_v28, 0.0  ;;  %v1448_v24 = vmul.f32 %v3828_v33, %v3828_v33  ;;  %v3849_v5 = vsub.f32 %v3576_v22, %v1320_v59  ;;  %v3852_v58 = vsub.f32 %v3578_v26, %v1320_v59 }
 0x1b4   :  { %v1476_v44 = vadd.f32 %v1475_v12, %v1439_v62  ;;  %v1482_v63 = vadd.f32 %v1481_v15, %v1444_v1  ;;  %v1449_v13 = vmul.f32 %v3836_v37, %v3836_v37  ;;  %v3862_v12 = vsub.f32 %v3592_v45, %v1320_v59 }
 0x1b5   :  { %v1423_v39 = vmul.f32 %v3849_v5, %v3849_v5  ;;  %v1424_v62 = vmul.f32 %v3852_v58, %v3852_v58  ;;  %v3865_v22 = vsub.f32 %v3594_v50, %v1320_v59  ;;  %v3880_v50 = vsub.f32 %v3651_v49, %v1320_v59  ;;  %v1575_v49 = vld [vmem:[%s4097_s2 + $0x8] sm:$0xff] }
 0x1b6   :  { %v1477_v34 = vadd.f32 %v1476_v44, %v1440_v36  ;;  %v1483_v40 = vadd.f32 %v1482_v63, %v1445_v56  ;;  %v1425_v26 = vmul.f32 %v3862_v12, %v3862_v12  ;;  %v3870_v36 = vsub.f32 %v3635_v60, %v1320_v59 }
 0x1b7   :  { %v1460_v1 = vadd.f32 %v1424_v62, %v1423_v39  ;;  %v1426_v44 = vmul.f32 %v3865_v22, %v3865_v22  ;;  %v3875_v63 = vsub.f32 %v3642_v18, %v1320_v59  ;;  %v3885_v60 = vsub.f32 %v3660_v31, %v1320_v59 }
 0x1b8   :  { %1478 = vadd.xlane.f32.xlu0 %v1477_v34  ;;  %v1484_v54 = vadd.f32 %v1483_v40, %v1446_v55  ;;  %v1427_v45 = vmul.f32 %v3870_v36, %v3870_v36  ;;  %v1429_v40 = vmul.f32 %v3880_v50, %v3880_v50  ;;  %v1340_v18 = vsub.f32 %v3677_v11, %v1320_v59  ;;  %v1636_v11 = vld [vmem:[%s4098_s3 + $0x10] sm:$0xff] }
 0x1b9   :  { %v1461_v15 = vadd.f32 %v1460_v1, %v1425_v26  ;;  %v1428_v28 = vmul.f32 %v3875_v63, %v3875_v63 }
 0x1ba   :  { %v1485_v7 = vadd.f32 %v1484_v54, %v1447_v14  ;;  %v1430_v54 = vmul.f32 %v3885_v60, %v3885_v60 }
 0x1bb   :  { %v1462_v56 = vadd.f32 %v1461_v15, %v1426_v44 }
 0x1bc   :  { %v1486_v57 = vadd.f32 %v1485_v7, %v1448_v24  ;;  %v3897_v24 = vsel %vm1377_vm0, %v1340_v18, 0.0 }
 0x1bd   :  { %v1463_v34 = vadd.f32 %v1462_v56, %v1427_v45  ;;  %v1431_v7 = vmul.f32 %v3897_v24, %v3897_v24 }
 0x1be   :  { %v1487_v30 = vadd.f32 %v1486_v57, %v1449_v13  ;;  %v1581_v57 = vpop.permute.xlu2 %1580 }
 0x1bf   :  { %v1464_v55 = vadd.f32 %v1463_v34, %v1428_v28 }
 0x1c0   :  { %1488 = vadd.xlane.f32.xlu1 %v1487_v30 }
 0x1c1   :  { %v1465_v14 = vadd.f32 %v1464_v55, %v1429_v40  ;;  %v3904_v30 = vpop.permute.xlu1 %1590 }
 0x1c3   :  { %v1466_v31 = vadd.f32 %v1465_v14, %v1430_v54 }
 0x1c5   :  { %v1467_v13 = vadd.f32 %v1466_v31, %v1431_v7 }
 0x1c8   :  { %1595 = vperm.xlu2 %2603, %v1577_v35  }
 0x1cc   :  { %1585 = vperm.xlu0 %2604, %v1575_v49  }
 0x1d0   :  { %1640 = vperm.xlu2 %2603, %v1634_v41   ;;  %v3906_v41 = vpop.permute.xlu1 %1645 }
 0x1d9   :  { %1655 = vperm.xlu1 %2605, %v1637_v27  }
 0x1f9   :  { %1468 = vadd.xlane.f32.xlu2 %v1467_v13 }
 0x211   :  { %1650 = vperm.xlu2 %2603, %v1636_v11  }
 0x223   :  { %v1459_v35 = vpop.xlane.xlu2 %1458 }
 0x224   :  { %v1490_v3 = vmul.f32 0.00096153846, %v1459_v35 }
 0x226   :  { %v1494_v43 = vadd.f32 1e-05, %v1490_v3 }
 0x228   :  { %2606 = vrsqrt.f32 %v1494_v43  ;;  %vm1504_vm2 = vweird.f32 %v1494_v43 }
 0x22b   :  { %v3908_v1 = vpop.permute.xlu2 %1595  ;;  %v1479_v56 = vpop.xlane.xlu0 %1478 }
 0x22c   :  { %v1492_v55 = vmul.f32 0.00096153846, %v1479_v56 }
 0x22e   :  { %v2607_v59 = vpop.eup %2606 }
 0x22f   :  { %v1499_v27 = vmul.f32 %v2607_v59, %v1494_v43  ;;  %vm1505_vm1 = vweird.f32 %v2607_v59  ;;  %v3922_v43 = vadd.f32 1e-05, %v1492_v55 }
 0x230   :  { %vm1506_vm3 = vmor %vm1504_vm2, %vm1505_vm1 }
 0x231   :  { %v1500_v39 = vmul.f32 %v2607_v59, %v1499_v27 }
 0x233   :  { %v1501_v62 = vmul.f32 0.5, %v1500_v39  ;;  %v1489_v26 = vpop.xlane.xlu1 %1488 }
 0x234   :  { %v1493_v44 = vmul.f32 0.00096153846, %v1489_v26 }
 0x235   :  { %v1502_v15 = vsub.f32 1.5, %v1501_v62 }
 0x236   :  { %v3910_v34 = vadd.f32 1e-05, %v1493_v44 }
 0x237   :  { %v1503_v45 = vmul.f32 %v2607_v59, %v1502_v15 }
 0x238   :  { %2608 = vrsqrt.f32 %v3910_v34  ;;  %vm1534_vm4 = vweird.f32 %v3910_v34 }
 0x239   :  { %v1507_v28 = vsel %vm1506_vm3, %v2607_v59, %v1503_v45  ;;  %2610 = vrsqrt.f32 %v3922_v43 }
 0x23a   :  { %v1538_v40 = vmul.f32 %v1507_v28, %v3699_v8  ;;  %v1539_v18 = vmul.f32 %v1507_v28, %v3702_v9  ;;  %v1540_v14 = vmul.f32 %v1507_v28, %v3705_v4  ;;  %v1541_v54 = vmul.f32 %v1507_v28, %v3708_v25 }
 0x23b   :  { %v1542_v49 = vmul.f32 %v1507_v28, %v3715_v16  ;;  %v1543_v31 = vmul.f32 %v1507_v28, %v3722_v42  ;;  %v1544_v7 = vmul.f32 %v1507_v28, %v3727_v48  ;;  %v1545_v13 = vmul.f32 %v1507_v28, %v3743_v46  ;;  %v1641_v16 = vpop.permute.xlu2 %1640 }
 0x23c   :  { %v1546_v11 = vmul.f32 %v1507_v28, %v3756_v52  ;;  %v1598_v35 = vmul.f32 %v1581_v57, %v1538_v40  ;;  %v1599_v3 = vmul.f32 %v1581_v57, %v1539_v18  ;;  %v1600_v8 = vmul.f32 %v1581_v57, %v1540_v14 }
 0x23d   :  { %v1601_v9 = vmul.f32 %v1581_v57, %v1541_v54  ;;  %v1602_v59 = vmul.f32 %v1581_v57, %v1542_v49  ;;  %v1603_v4 = vmul.f32 %v1581_v57, %v1543_v31  ;;  %v1604_v27 = vmul.f32 %v1581_v57, %v1544_v7 }
 0x23e   :  { %v1605_v25 = vmul.f32 %v1581_v57, %v1545_v13  ;;  %v1606_v39 = vmul.f32 %v1581_v57, %v1546_v11  ;;  %v2609_v62 = vpop.eup %2608  ;;  %v1658_v42 = vadd.f32 %v1641_v16, %v1598_v35  ;;  %v1659_v26 = vadd.f32 %v1641_v16, %v1599_v3 }
 0x23f   :  { %v1660_v48 = vadd.f32 %v1641_v16, %v1600_v8  ;;  %v1529_v46 = vmul.f32 %v2609_v62, %v3910_v34  ;;  %v1661_v15 = vadd.f32 %v1641_v16, %v1601_v9  ;;  %v1662_v52 = vadd.f32 %v1641_v16, %v1602_v59  ;;  %v3927_v7 = vpop.eup %2610 }
 0x240   :  { %v1663_v44 = vadd.f32 %v1641_v16, %v1603_v4  ;;  %v1664_v56 = vadd.f32 %v1641_v16, %v1604_v27  ;;  %v1665_v45 = vadd.f32 %v1641_v16, %v1605_v25  ;;  %v1666_v55 = vadd.f32 %v1641_v16, %v1606_v39 }
 0x241   :  { %v1530_v28 = vmul.f32 %v2609_v62, %v1529_v46  ;;  %vm1694_vm5 = vcmp.gt.f32.partialorder %v1658_v42, 0.0  ;;  %vm1695_vm6 = vcmp.gt.f32.partialorder %v1659_v26, 0.0  ;;  %vm1696_vm7 = vcmp.gt.f32.partialorder %v1660_v48, 0.0 }
 0x242   :  { %vm1697_vm8 = vcmp.gt.f32.partialorder %v1661_v15, 0.0  ;;  %vm1698_vm9 = vcmp.gt.f32.partialorder %v1662_v52, 0.0  ;;  %vm1699_vm10 = vcmp.gt.f32.partialorder %v1663_v44, 0.0  ;;  %vm1700_vm11 = vcmp.gt.f32.partialorder %v1664_v56, 0.0 }
 0x243   :  { %v1531_v57 = vmul.f32 0.5, %v1530_v28  ;;  %vm1701_vm12 = vcmp.gt.f32.partialorder %v1665_v45, 0.0  ;;  %vm1535_vm13 = vweird.f32 %v2609_v62  ;;  %v1730_v40 = vmul.f32 0.2, %v1658_v42 }
 0x244   :  { %v1731_v18 = vmul.f32 0.2, %v1659_v26  ;;  %v1732_v14 = vmul.f32 0.2, %v1660_v48  ;;  %vm1702_vm14 = vcmp.gt.f32.partialorder %v1666_v55, 0.0  ;;  %vm1536_vm15 = vmor %vm1534_vm4, %vm1535_vm13 }
 0x245   :  { %v1532_v54 = vsub.f32 1.5, %v1531_v57  ;;  %v1733_v49 = vmul.f32 0.2, %v1661_v15  ;;  %v1734_v31 = vmul.f32 0.2, %v1662_v52  ;;  %v1766_v3 = vsel %vm1694_vm5, %v1658_v42, %v1730_v40 }
 0x246   :  { %v1735_v13 = vmul.f32 0.2, %v1663_v44  ;;  %v1736_v11 = vmul.f32 0.2, %v1664_v56  ;;  %v1737_v35 = vmul.f32 0.2, %v1665_v45  ;;  %v1767_v59 = vsel %vm1695_vm6, %v1659_v26, %v1731_v18 }
 0x247   :  { %v1533_v8 = vmul.f32 %v2609_v62, %v1532_v54  ;;  %v1738_v9 = vmul.f32 0.2, %v1666_v55  ;;  %v1768_v4 = vsel %vm1696_vm7, %v1660_v48, %v1732_v14  ;;  %v1769_v27 = vsel %vm1697_vm8, %v1661_v15, %v1733_v49 }
 0x248   :  { %v1770_v25 = vsel %vm1698_vm9, %v1662_v52, %v1734_v31  ;;  %v1771_v39 = vsel %vm1699_vm10, %v1663_v44, %v1735_v13  ;;  %v1772_v16 = vsel %vm1700_vm11, %v1664_v56, %v1736_v11  ;;  %v1773_v42 = vsel %vm1701_vm12, %v1665_v45, %v1737_v35 }
 0x249   :  { %v1537_v46 = vsel %vm1536_vm15, %v2609_v62, %v1533_v8  ;;  %v1774_v28 = vsel %vm1702_vm14, %v1666_v55, %v1738_v9  ;;  %v1802_v26 = vpack.c.bf16 %v1767_v59, %v1766_v3  ;;  %v1803_v57 = vpack.c.bf16 %v1769_v27, %v1768_v4 }
 0x24a   :  { %v1804_v48 = vpack.c.bf16 %v1771_v39, %v1770_v25  ;;  %v1805_v40 = vpack.c.bf16 %v1773_v42, %v1772_v16  ;;  %v1806_v18 = vpack.c.bf16 %v1774_v28, %v1774_v28  ;;  %v1565_v34 = vmul.f32 %v1537_v46, %v3775_v19 }
 0x24b   :  { %1822 = vst [vmem:[%s4099_s4] sm:$0xff] %v1802_v26  ;;  %v1566_v15 = vmul.f32 %v1537_v46, %v3778_v21  ;;  %v1567_v52 = vmul.f32 %v1537_v46, %v3790_v32  ;;  %v1568_v62 = vmul.f32 %v1537_v46, %v3799_v6  ;;  %v1569_v44 = vmul.f32 %v1537_v46, %v3808_v47  ;;  %v1656_v47 = vpop.permute.xlu1 %1655 }
 0x24c   :  { %1823 = vst [vmem:[%s4099_s4 + $0x8] sm:$0xff] %v1803_v57  ;;  %v1570_v56 = vmul.f32 %v1537_v46, %v3815_v53  ;;  %v1571_v45 = vmul.f32 %v1537_v46, %v3822_v38  ;;  %v1572_v55 = vmul.f32 %v1537_v46, %v3828_v33  ;;  %v1573_v19 = vmul.f32 %v1537_v46, %v3836_v37 }
 0x24d   :  { %1824 = vst [vmem:[%s4099_s4 + $0x10] sm:$0xff] %v1804_v48  ;;  %v1625_v21 = vmul.f32 %v3908_v1, %v1565_v34  ;;  %v1626_v32 = vmul.f32 %v3908_v1, %v1566_v15  ;;  %v1627_v6 = vmul.f32 %v3908_v1, %v1567_v52  ;;  %v1628_v53 = vmul.f32 %v3908_v1, %v1568_v62 }
 0x24e   :  { %1825 = vst [vmem:[%s4099_s4 + $0x18] sm:$0xff] %v1805_v40  ;;  %v1629_v38 = vmul.f32 %v3908_v1, %v1569_v44  ;;  %v1630_v33 = vmul.f32 %v3908_v1, %v1570_v56  ;;  %v1631_v14 = vmul.f32 %v3908_v1, %v1571_v45  ;;  %v1632_v37 = vmul.f32 %v3908_v1, %v1572_v55 }
 0x24f   :  { %1826 = vst [vmem:[%s4099_s4 + $0x20] sm:$0xf] %v1806_v18  ;;  %v1633_v54 = vmul.f32 %v3908_v1, %v1573_v19  ;;  %v1685_v49 = vadd.f32 %v1656_v47, %v1625_v21  ;;  %v1686_v31 = vadd.f32 %v1656_v47, %v1626_v32  ;;  %v1687_v13 = vadd.f32 %v1656_v47, %v1627_v6 }
 0x250   :  { %v1688_v11 = vadd.f32 %v1656_v47, %v1628_v53  ;;  %v1689_v35 = vadd.f32 %v1656_v47, %v1629_v38  ;;  %v1690_v3 = vadd.f32 %v1656_v47, %v1630_v33  ;;  %v1691_v8 = vadd.f32 %v1656_v47, %v1631_v14 }
 0x251   :  { %v1692_v9 = vadd.f32 %v1656_v47, %v1632_v37  ;;  %v1693_v59 = vadd.f32 %v1656_v47, %v1633_v54  ;;  %vm1721_vm0 = vcmp.gt.f32.partialorder %v1685_v49, 0.0  ;;  %vm1722_vm1 = vcmp.gt.f32.partialorder %v1686_v31, 0.0 }
 0x252   :  { %vm1723_vm2 = vcmp.gt.f32.partialorder %v1687_v13, 0.0  ;;  %vm1724_vm3 = vcmp.gt.f32.partialorder %v1688_v11, 0.0  ;;  %vm1725_vm4 = vcmp.gt.f32.partialorder %v1689_v35, 0.0  ;;  %vm1726_vm5 = vcmp.gt.f32.partialorder %v1690_v3, 0.0 }
 0x253   :  { %vm1727_vm6 = vcmp.gt.f32.partialorder %v1691_v8, 0.0  ;;  %vm1728_vm7 = vcmp.gt.f32.partialorder %v1692_v9, 0.0  ;;  %vm1729_vm8 = vcmp.gt.f32.partialorder %v1693_v59, 0.0  ;;  %v1757_v4 = vmul.f32 0.2, %v1685_v49 }
 0x254   :  { %v1758_v1 = vmul.f32 0.2, %v1686_v31  ;;  %v1759_v27 = vmul.f32 0.2, %v1687_v13  ;;  %v1519_v25 = vmul.f32 %v3927_v7, %v3922_v43  ;;  %v1760_v39 = vmul.f32 0.2, %v1688_v11 }
 0x255   :  { %v1761_v16 = vmul.f32 0.2, %v1689_v35  ;;  %v1762_v46 = vmul.f32 0.2, %v1690_v3  ;;  %v1763_v42 = vmul.f32 0.2, %v1691_v8  ;;  %v1793_v57 = vsel %vm1721_vm0, %v1685_v49, %v1757_v4 }
 0x256   :  { %v1764_v28 = vmul.f32 0.2, %v1692_v9  ;;  %v1765_v26 = vmul.f32 0.2, %v1693_v59  ;;  %v1794_v48 = vsel %vm1722_vm1, %v1686_v31, %v1758_v1  ;;  %v1795_v40 = vsel %vm1723_vm2, %v1687_v13, %v1759_v27 }
 0x257   :  { %v1796_v18 = vsel %vm1724_vm3, %v1688_v11, %v1760_v39  ;;  %v1797_v34 = vsel %vm1725_vm4, %v1689_v35, %v1761_v16  ;;  %v1798_v15 = vsel %vm1726_vm5, %v1690_v3, %v1762_v46  ;;  %v1799_v52 = vsel %vm1727_vm6, %v1691_v8, %v1763_v42 }
 0x258   :  { %v1800_v62 = vsel %vm1728_vm7, %v1692_v9, %v1764_v28  ;;  %v1801_v44 = vsel %vm1729_vm8, %v1693_v59, %v1765_v26  ;;  %v1817_v56 = vpack.c.bf16 %v1794_v48, %v1793_v57  ;;  %v1818_v45 = vpack.c.bf16 %v1796_v18, %v1795_v40 }
 0x259   :  { %v1819_v55 = vpack.c.bf16 %v1798_v15, %v1797_v34  ;;  %v1520_v19 = vmul.f32 %v3927_v7, %v1519_v25  ;;  %v1820_v21 = vpack.c.bf16 %v1800_v62, %v1799_v52  ;;  %v1821_v32 = vpack.c.bf16 %v1801_v44, %v1801_v44 }
 0x25a   :  { %1837 = vst [vmem:[%s4099_s4 + $0x6c] sm:$0xff] %v1817_v56  ;;  %vm1525_vm9 = vweird.f32 %v3927_v7  ;;  %vm1524_vm10 = vweird.f32 %v3922_v43 }
 0x25b   :  { %1838 = vst [vmem:[%s4099_s4 + $0x74] sm:$0xff] %v1818_v45  ;;  %v1521_v6 = vmul.f32 0.5, %v1520_v19  ;;  %vm1526_vm11 = vmor %vm1524_vm10, %vm1525_vm9 }
 0x25c   :  { %1839 = vst [vmem:[%s4099_s4 + $0x7c] sm:$0xff] %v1819_v55 }
 0x25d   :  { %1840 = vst [vmem:[%s4099_s4 + $0x84] sm:$0xff] %v1820_v21  ;;  %v1522_v47 = vsub.f32 1.5, %v1521_v6 }
 0x25e   :  { %1841 = vst [vmem:[%s4099_s4 + $0x8c] sm:$0xf] %v1821_v32 }
 0x25f   :  { %v1523_v53 = vmul.f32 %v3927_v7, %v1522_v47 }
 0x261   :  { %v1527_v38 = vsel %vm1526_vm11, %v3927_v7, %v1523_v53 }
 0x262   :  { %v1556_v37 = vmul.f32 %v1527_v38, %v3731_v10  ;;  %v1557_v54 = vmul.f32 %v1527_v38, %v3734_v51  ;;  %v1558_v31 = vmul.f32 %v1527_v38, %v3740_v61  ;;  %v1559_v13 = vmul.f32 %v1527_v38, %v3752_v0 }
 0x263   :  { %v1560_v11 = vmul.f32 %v1527_v38, %v3761_v17  ;;  %v1561_v35 = vmul.f32 %v1527_v38, %v3768_v2  ;;  %v1562_v43 = vmul.f32 %v1527_v38, %v3781_v20  ;;  %v1563_v7 = vmul.f32 %v1527_v38, %v3786_v29 }
 0x264   :  { %v1564_v3 = vmul.f32 %v1527_v38, %v3805_v23  ;;  %v1616_v10 = vmul.f32 %v3904_v30, %v1556_v37  ;;  %v1617_v51 = vmul.f32 %v3904_v30, %v1557_v54  ;;  %v1618_v61 = vmul.f32 %v3904_v30, %v1558_v31 }
 0x265   :  { %v1619_v0 = vmul.f32 %v3904_v30, %v1559_v13  ;;  %v1620_v17 = vmul.f32 %v3904_v30, %v1560_v11  ;;  %v1621_v2 = vmul.f32 %v3904_v30, %v1561_v35  ;;  %v1622_v20 = vmul.f32 %v3904_v30, %v1562_v43  ;;  %v1586_v35 = vpop.permute.xlu0 %1585 }
 0x266   :  { %v1623_v29 = vmul.f32 %v3904_v30, %v1563_v7  ;;  %v1624_v23 = vmul.f32 %v3904_v30, %v1564_v3 }
 0x26c   :  { %v1469_v33 = vpop.xlane.xlu2 %1468 }
 0x26d   :  { %v1491_v14 = vmul.f32 0.00096153846, %v1469_v33 }
 0x26f   :  { %v4007_v49 = vadd.f32 1e-05, %v1491_v14 }
 0x271   :  { %2612 = vrsqrt.f32 %v4007_v49  ;;  %vm1514_vm6 = vweird.f32 %v4007_v49 }
 0x274   :  { %v1651_v8 = vpop.permute.xlu2 %1650 }
 0x275   :  { %v1676_v9 = vadd.f32 %v1651_v8, %v1616_v10  ;;  %v1677_v59 = vadd.f32 %v1651_v8, %v1617_v51  ;;  %v1678_v4 = vadd.f32 %v1651_v8, %v1618_v61  ;;  %v1679_v1 = vadd.f32 %v1651_v8, %v1619_v0 }
 0x276   :  { %v1680_v27 = vadd.f32 %v1651_v8, %v1620_v17  ;;  %v1681_v25 = vadd.f32 %v1651_v8, %v1621_v2  ;;  %v1682_v39 = vadd.f32 %v1651_v8, %v1622_v20  ;;  %v1683_v16 = vadd.f32 %v1651_v8, %v1623_v29 }
 0x277   :  { %v2613_v46 = vpop.eup %2612  ;;  %v1684_v42 = vadd.f32 %v1651_v8, %v1624_v23  ;;  %vm1712_vm12 = vcmp.gt.f32.partialorder %v1676_v9, 0.0  ;;  %vm1713_vm13 = vcmp.gt.f32.partialorder %v1677_v59, 0.0  ;;  %vm1714_vm14 = vcmp.gt.f32.partialorder %v1678_v4, 0.0 }
 0x278   :  { %v1509_v28 = vmul.f32 %v2613_v46, %v4007_v49  ;;  %vm1715_vm15 = vcmp.gt.f32.partialorder %v1679_v1, 0.0  ;;  %vm1716_vm0 = vcmp.gt.f32.partialorder %v1680_v27, 0.0  ;;  %vm1717_vm1 = vcmp.gt.f32.partialorder %v1681_v25, 0.0 }
 0x279   :  { %vm1718_vm2 = vcmp.gt.f32.partialorder %v1682_v39, 0.0  ;;  %vm1719_vm3 = vcmp.gt.f32.partialorder %v1683_v16, 0.0  ;;  %vm1720_vm4 = vcmp.gt.f32.partialorder %v1684_v42, 0.0  ;;  %v1748_v26 = vmul.f32 0.2, %v1676_v9 }
 0x27a   :  { %v1510_v30 = vmul.f32 %v2613_v46, %v1509_v28  ;;  %v1749_v57 = vmul.f32 0.2, %v1677_v59  ;;  %v1750_v48 = vmul.f32 0.2, %v1678_v4  ;;  %vm1515_vm5 = vweird.f32 %v2613_v46 }
 0x27b   :  { %v1751_v40 = vmul.f32 0.2, %v1679_v1  ;;  %v1752_v18 = vmul.f32 0.2, %v1680_v27  ;;  %v1753_v34 = vmul.f32 0.2, %v1681_v25  ;;  %v1784_v44 = vsel %vm1712_vm12, %v1676_v9, %v1748_v26  ;;  %vm1516_vm7 = vmor %vm1514_vm6, %vm1515_vm5 }
 0x27c   :  { %v1511_v15 = vmul.f32 0.5, %v1510_v30  ;;  %v1754_v52 = vmul.f32 0.2, %v1682_v39  ;;  %v1755_v62 = vmul.f32 0.2, %v1683_v16  ;;  %v1785_v45 = vsel %vm1713_vm13, %v1677_v59, %v1749_v57 }
 0x27d   :  { %v1756_v56 = vmul.f32 0.2, %v1684_v42  ;;  %v1786_v55 = vsel %vm1714_vm14, %v1678_v4, %v1750_v48  ;;  %v1787_v19 = vsel %vm1715_vm15, %v1679_v1, %v1751_v40  ;;  %v1788_v32 = vsel %vm1716_vm0, %v1680_v27, %v1752_v18 }
 0x27e   :  { %v1512_v21 = vsub.f32 1.5, %v1511_v15  ;;  %v1789_v6 = vsel %vm1717_vm1, %v1681_v25, %v1753_v34  ;;  %v1790_v47 = vsel %vm1718_vm2, %v1682_v39, %v1754_v52  ;;  %v1791_v53 = vsel %vm1719_vm3, %v1683_v16, %v1755_v62 }
 0x27f   :  { %v1792_v38 = vsel %vm1720_vm4, %v1684_v42, %v1756_v56  ;;  %v1812_v33 = vpack.c.bf16 %v1785_v45, %v1784_v44  ;;  %v1813_v14 = vpack.c.bf16 %v1787_v19, %v1786_v55  ;;  %v1814_v54 = vpack.c.bf16 %v1789_v6, %v1788_v32 }
 0x280   :  { %v1513_v37 = vmul.f32 %v2613_v46, %v1512_v21  ;;  %v1815_v31 = vpack.c.bf16 %v1791_v53, %v1790_v47  ;;  %v1816_v13 = vpack.c.bf16 %v1792_v38, %v1792_v38 }
 0x281   :  { %1832 = vst [vmem:[%s4099_s4 + $0x48] sm:$0xff] %v1812_v33 }
 0x282   :  { %v1517_v11 = vsel %vm1516_vm7, %v2613_v46, %v1513_v37  ;;  %1833 = vst [vmem:[%s4099_s4 + $0x50] sm:$0xff] %v1813_v14 }
 0x283   :  { %1834 = vst [vmem:[%s4099_s4 + $0x58] sm:$0xff] %v1814_v54  ;;  %v1547_v49 = vmul.f32 %v1517_v11, %v3849_v5  ;;  %v1548_v43 = vmul.f32 %v1517_v11, %v3852_v58  ;;  %v1549_v7 = vmul.f32 %v1517_v11, %v3862_v12  ;;  %v1550_v3 = vmul.f32 %v1517_v11, %v3865_v22 }
 0x284   :  { %1835 = vst [vmem:[%s4099_s4 + $0x60] sm:$0xff] %v1815_v31  ;;  %v1551_v10 = vmul.f32 %v1517_v11, %v3870_v36  ;;  %v1552_v51 = vmul.f32 %v1517_v11, %v3875_v63  ;;  %v1553_v61 = vmul.f32 %v1517_v11, %v3880_v50  ;;  %v1554_v0 = vmul.f32 %v1517_v11, %v3885_v60 }
 0x285   :  { %1836 = vst [vmem:[%s4099_s4 + $0x68] sm:$0xf] %v1816_v13  ;;  %v1555_v5 = vmul.f32 %v1517_v11, %v3897_v24  ;;  %v1607_v58 = vmul.f32 %v1586_v35, %v1547_v49  ;;  %v1608_v12 = vmul.f32 %v1586_v35, %v1548_v43  ;;  %v1609_v22 = vmul.f32 %v1586_v35, %v1549_v7 }
 0x286   :  { %v1610_v17 = vmul.f32 %v1586_v35, %v1550_v3  ;;  %v1611_v8 = vmul.f32 %v1586_v35, %v1551_v10  ;;  %v1612_v2 = vmul.f32 %v1586_v35, %v1552_v51  ;;  %v1613_v20 = vmul.f32 %v1586_v35, %v1553_v61 }
 0x287   :  { %v1614_v36 = vmul.f32 %v1586_v35, %v1554_v0  ;;  %v1615_v29 = vmul.f32 %v1586_v35, %v1555_v5  ;;  %v1667_v63 = vadd.f32 %v3906_v41, %v1607_v58  ;;  %v1668_v50 = vadd.f32 %v3906_v41, %v1608_v12 }
 0x288   :  { %v1669_v60 = vadd.f32 %v3906_v41, %v1609_v22  ;;  %v1670_v23 = vadd.f32 %v3906_v41, %v1610_v17  ;;  %v1671_v9 = vadd.f32 %v3906_v41, %v1611_v8  ;;  %v1672_v24 = vadd.f32 %v3906_v41, %v1612_v2 }
 0x289   :  { %v1673_v59 = vadd.f32 %v3906_v41, %v1613_v20  ;;  %v1674_v4 = vadd.f32 %v3906_v41, %v1614_v36  ;;  %v1675_v1 = vadd.f32 %v3906_v41, %v1615_v29  ;;  %vm1703_vm8 = vcmp.gt.f32.partialorder %v1667_v63, 0.0 }
 0x28a   :  { %vm1704_vm9 = vcmp.gt.f32.partialorder %v1668_v50, 0.0  ;;  %vm1705_vm10 = vcmp.gt.f32.partialorder %v1669_v60, 0.0  ;;  %vm1706_vm11 = vcmp.gt.f32.partialorder %v1670_v23, 0.0  ;;  %vm1707_vm12 = vcmp.gt.f32.partialorder %v1671_v9, 0.0 }
 0x28b   :  { %vm1708_vm13 = vcmp.gt.f32.partialorder %v1672_v24, 0.0  ;;  %vm1709_vm14 = vcmp.gt.f32.partialorder %v1673_v59, 0.0  ;;  %vm1710_vm15 = vcmp.gt.f32.partialorder %v1674_v4, 0.0  ;;  %vm1711_vm0 = vcmp.gt.f32.partialorder %v1675_v1, 0.0 }
 0x28c   :  { %v1739_v27 = vmul.f32 0.2, %v1667_v63  ;;  %v1740_v25 = vmul.f32 0.2, %v1668_v50  ;;  %v1741_v39 = vmul.f32 0.2, %v1669_v60 }
 0x28d   :  { %v1742_v16 = vmul.f32 0.2, %v1670_v23  ;;  %v1743_v46 = vmul.f32 0.2, %v1671_v9  ;;  %v1744_v42 = vmul.f32 0.2, %v1672_v24 }
 0x28e   :  { %v1745_v28 = vmul.f32 0.2, %v1673_v59  ;;  %v1746_v30 = vmul.f32 0.2, %v1674_v4  ;;  %v1747_v26 = vmul.f32 0.2, %v1675_v1  ;;  %v1775_v41 = vsel %vm1703_vm8, %v1667_v63, %v1739_v27 }
 0x28f   :  { %v1776_v57 = vsel %vm1704_vm9, %v1668_v50, %v1740_v25  ;;  %v1777_v48 = vsel %vm1705_vm10, %v1669_v60, %v1741_v39  ;;  %v1778_v40 = vsel %vm1706_vm11, %v1670_v23, %v1742_v16  ;;  %v1779_v18 = vsel %vm1707_vm12, %v1671_v9, %v1743_v46 }
 0x290   :  { %v1780_v34 = vsel %vm1708_vm13, %v1672_v24, %v1744_v42  ;;  %v1781_v15 = vsel %vm1709_vm14, %v1673_v59, %v1745_v28  ;;  %v1782_v52 = vsel %vm1710_vm15, %v1674_v4, %v1746_v30  ;;  %v1783_v62 = vsel %vm1711_vm0, %v1675_v1, %v1747_v26 }
 0x291   :  { %v1807_v44 = vpack.c.bf16 %v1776_v57, %v1775_v41  ;;  %v1808_v56 = vpack.c.bf16 %v1778_v40, %v1777_v48  ;;  %v1809_v45 = vpack.c.bf16 %v1780_v34, %v1779_v18  ;;  %v1810_v55 = vpack.c.bf16 %v1782_v52, %v1781_v15 }
 0x292   :  { %v1811_v19 = vpack.c.bf16 %v1783_v62, %v1783_v62 }
 0x293   :  { %1827 = vst [vmem:[%s4099_s4 + $0x24] sm:$0xff] %v1807_v44 }
 0x294   :  { %1828 = vst [vmem:[%s4099_s4 + $0x2c] sm:$0xff] %v1808_v56 }
 0x295   :  { %1829 = vst [vmem:[%s4099_s4 + $0x34] sm:$0xff] %v1809_v45 }
 0x296   :  { %1830 = vst [vmem:[%s4099_s4 + $0x3c] sm:$0xff] %v1810_v55 }
 0x297   :  { %1831 = vst [vmem:[%s4099_s4 + $0x44] sm:$0xf] %v1811_v19 }

// kernel: discriminator_forward.8
= control target key start
LH: loop header
LB: loop body
LE: loop exit
PB: predicated region body
PF: predicated region fallthrough
CT: control target
= control target key end

     0   :  { %s3453_s1 = inlined_call_operand.vmem [shape: bf16[512,384], index: 1, kind: input, shape index: {}]   ;;  %s3454_s0 = inlined_call_operand.vmem [shape: bf16[64,512], index: 0, kind: input, shape index: {}]   ;;  %s3455_s2 = inlined_call_operand.vmem [shape: f32[64,1], index: 2, kind: input, shape index: {}]   ;;  %s3456_s3 = inlined_call_operand.vmem [shape: f32[64,1], index: 3, kind: input, shape index: {}]   ;;  %s3457_s4 = inlined_call_operand.vmem [shape: bf16[64,384], index: 4, kind: output, shape index: {}]  }
   0x1   :  { %v1774_v0 = vld [vmem:[%s3453_s1 + $0xa8] sm:$0xf]  ;;  %v2110_v1 = vld [vmem:[%s3453_s1 + $0xb0] sm:$0xf0]  ;;  %v1762_v11 = vld [vmem:[%s3453_s1 + $0x90] sm:$0xf] }
   0x2   :  { %v1870_v2 = vld [vmem:[%s3453_s1 + $0x168] sm:$0xf]  ;;  %v1775_v3 = vor.u32 %v2110_v1, %v1774_v0  ;;  %v2134_v4 = vld [vmem:[%s3453_s1 + $0x170] sm:$0xf0]  ;;  %v2107_v13 = vld [vmem:[%s3453_s1 + $0x98] sm:$0xf0] }
   0x3   :  { %v1966_v5 = vld [vmem:[%s3453_s1 + $0x228] sm:$0xf]  ;;  %v2158_v6 = vld [vmem:[%s3453_s1 + $0x230] sm:$0xf0]  ;;  %v1871_v7 = vor.u32 %v2134_v4, %v1870_v2  ;;  %v1858_v14 = vld [vmem:[%s3453_s1 + $0x150] sm:$0xf]  ;;  %v1763_v16 = vor.u32 %v2107_v13, %v1762_v11 }
   0x4   :  { %v1967_v8 = vor.u32 %v2158_v6, %v1966_v5  ;;  %v2062_v9 = vld [vmem:[%s3453_s1 + $0x2e8] sm:$0xf]  ;;  %v2182_v10 = vld [vmem:[%s3453_s1 + $0x2f0] sm:$0xf0]  ;;  %753 = vmatpush.bf16.msra.mxu0 %v1775_v3  ;;  %v2131_v15 = vld [vmem:[%s3453_s1 + $0x158] sm:$0xf0] }
   0x5   :  { %v2063_v12 = vor.u32 %v2182_v10, %v2062_v9  ;;  %782 = vmatpush.bf16.msra.mxu1 %v1871_v7  ;;  %v1859_v17 = vor.u32 %v2131_v15, %v1858_v14  ;;  %v1954_v18 = vld [vmem:[%s3453_s1 + $0x210] sm:$0xf]  ;;  %v2155_v19 = vld [vmem:[%s3453_s1 + $0x218] sm:$0xf0]  ;;  %v1750_v23 = vld [vmem:[%s3453_s1 + $0x78] sm:$0xf] }
   0x6   :  { %811 = vmatpush.bf16.msra.mxu2 %v1967_v8  ;;  %v2050_v20 = vld [vmem:[%s3453_s1 + $0x2d0] sm:$0xf]  ;;  %v1955_v21 = vor.u32 %v2155_v19, %v1954_v18  ;;  %v2179_v22 = vld [vmem:[%s3453_s1 + $0x2d8] sm:$0xf0]  ;;  %v2104_v24 = vld [vmem:[%s3453_s1 + $0x80] sm:$0xf0] }
   0x7   :  { %840 = vmatpush.bf16.msra.mxu3 %v2063_v12  ;;  %v2051_v25 = vor.u32 %v2179_v22, %v2050_v20  ;;  %v1846_v26 = vld [vmem:[%s3453_s1 + $0x138] sm:$0xf]  ;;  %v2128_v27 = vld [vmem:[%s3453_s1 + $0x140] sm:$0xf0]  ;;  %v1751_v29 = vor.u32 %v2104_v24, %v1750_v23  ;;  %v1738_v35 = vld [vmem:[%s3453_s1 + $0x60] sm:$0xf] }
   0x8   :  { %v1942_v28 = vld [vmem:[%s3453_s1 + $0x1f8] sm:$0xf]  ;;  %754 = vmatpush.bf16.msra.mxu0 %v1763_v16  ;;  %v2152_v30 = vld [vmem:[%s3453_s1 + $0x200] sm:$0xf0]  ;;  %v1847_v33 = vor.u32 %v2128_v27, %v1846_v26  ;;  %v2101_v36 = vld [vmem:[%s3453_s1 + $0x68] sm:$0xf0] }
   0x9   :  { %v2038_v31 = vld [vmem:[%s3453_s1 + $0x2b8] sm:$0xf]  ;;  %v2176_v32 = vld [vmem:[%s3453_s1 + $0x2c0] sm:$0xf0]  ;;  %783 = vmatpush.bf16.msra.mxu1 %v1859_v17  ;;  %v1943_v34 = vor.u32 %v2152_v30, %v1942_v28  ;;  %v1834_v37 = vld [vmem:[%s3453_s1 + $0x120] sm:$0xf]  ;;  %v1739_v44 = vor.u32 %v2101_v36, %v1738_v35 }
   0xa   :  { %812 = vmatpush.bf16.msra.mxu2 %v1955_v21  ;;  %v2039_v38 = vor.u32 %v2176_v32, %v2038_v31  ;;  %v2125_v39 = vld [vmem:[%s3453_s1 + $0x128] sm:$0xf0]  ;;  %v1930_v40 = vld [vmem:[%s3453_s1 + $0x1e0] sm:$0xf]  ;;  %v1726_v47 = vld [vmem:[%s3453_s1 + $0x48] sm:$0xf] }
   0xb   :  { %841 = vmatpush.bf16.msra.mxu3 %v2051_v25  ;;  %v2149_v41 = vld [vmem:[%s3453_s1 + $0x1e8] sm:$0xf0]  ;;  %v2026_v42 = vld [vmem:[%s3453_s1 + $0x2a0] sm:$0xf]  ;;  %v1835_v45 = vor.u32 %v2125_v39, %v1834_v37  ;;  %v2098_v48 = vld [vmem:[%s3453_s1 + $0x50] sm:$0xf0] }
   0xc   :  { %v2173_v43 = vld [vmem:[%s3453_s1 + $0x2a8] sm:$0xf0]  ;;  %755 = vmatpush.bf16.msra.mxu0 %v1751_v29  ;;  %v1931_v46 = vor.u32 %v2149_v41, %v1930_v40  ;;  %v1822_v49 = vld [vmem:[%s3453_s1 + $0x108] sm:$0xf]  ;;  %v2122_v51 = vld [vmem:[%s3453_s1 + $0x110] sm:$0xf0]  ;;  %v1727_v56 = vor.u32 %v2098_v48, %v1726_v47 }
   0xd   :  { %784 = vmatpush.bf16.msra.mxu1 %v1847_v33  ;;  %v2027_v50 = vor.u32 %v2173_v43, %v2026_v42  ;;  %v1918_v52 = vld [vmem:[%s3453_s1 + $0x1c8] sm:$0xf]  ;;  %v2146_v53 = vld [vmem:[%s3453_s1 + $0x1d0] sm:$0xf0]  ;;  %v1823_v57 = vor.u32 %v2122_v51, %v1822_v49  ;;  %v1714_v59 = vld [vmem:[%s3453_s1 + $0x30] sm:$0xf] }
   0xe   :  { %813 = vmatpush.bf16.msra.mxu2 %v1943_v34  ;;  %v2014_v54 = vld [vmem:[%s3453_s1 + $0x288] sm:$0xf]  ;;  %v2170_v55 = vld [vmem:[%s3453_s1 + $0x290] sm:$0xf0]  ;;  %v1919_v58 = vor.u32 %v2146_v53, %v1918_v52  ;;  %v2095_v60 = vld [vmem:[%s3453_s1 + $0x38] sm:$0xf0] }
   0xf   :  { %842 = vmatpush.bf16.msra.mxu3 %v2039_v38  ;;  %v1810_v61 = vld [vmem:[%s3453_s1 + $0xf0] sm:$0xf]  ;;  %v2015_v62 = vor.u32 %v2170_v55, %v2014_v54  ;;  %v2119_v63 = vld [vmem:[%s3453_s1 + $0xf8] sm:$0xf0]  ;;  %v1715_v4 = vor.u32 %v2095_v60, %v1714_v59  ;;  %v1702_v7 = vld [vmem:[%s3453_s1 + $0x18] sm:$0xf] }
  0x10   :  { %756 = vmatpush.bf16.msra.mxu0 %v1739_v44  ;;  %v1906_v0 = vld [vmem:[%s3453_s1 + $0x1b0] sm:$0xf]  ;;  %v2143_v1 = vld [vmem:[%s3453_s1 + $0x1b8] sm:$0xf0]  ;;  %v1811_v5 = vor.u32 %v2119_v63, %v1810_v61  ;;  %v2092_v8 = vld [vmem:[%s3453_s1 + $0x20] sm:$0xf0] }
  0x11   :  { %785 = vmatpush.bf16.msra.mxu1 %v1835_v45  ;;  %v2002_v2 = vld [vmem:[%s3453_s1 + $0x270] sm:$0xf]  ;;  %v2167_v3 = vld [vmem:[%s3453_s1 + $0x278] sm:$0xf0]  ;;  %v1907_v6 = vor.u32 %v2143_v1, %v1906_v0  ;;  %v1798_v9 = vld [vmem:[%s3453_s1 + $0xd8] sm:$0xf]  ;;  %v1703_v17 = vor.u32 %v2092_v8, %v1702_v7 }
  0x12   :  { %814 = vmatpush.bf16.msra.mxu2 %v1931_v46  ;;  %v2003_v10 = vor.u32 %v2167_v3, %v2002_v2  ;;  %v2116_v11 = vld [vmem:[%s3453_s1 + $0xe0] sm:$0xf0]  ;;  %v1894_v12 = vld [vmem:[%s3453_s1 + $0x198] sm:$0xf]  ;;  %v1690_v16 = vld [vmem:[%s3453_s1] sm:$0xf] }
  0x13   :  { %843 = vmatpush.bf16.msra.mxu3 %v2027_v50  ;;  %v2140_v13 = vld [vmem:[%s3453_s1 + $0x1a0] sm:$0xf0]  ;;  %v1990_v14 = vld [vmem:[%s3453_s1 + $0x258] sm:$0xf]  ;;  %v2089_v18 = vld [vmem:[%s3453_s1 + $0x8] sm:$0xf0]  ;;  %v1799_v21 = vor.u32 %v2116_v11, %v1798_v9 }
  0x14   :  { %757 = vmatpush.bf16.msra.mxu0 %v1727_v56  ;;  %v2164_v15 = vld [vmem:[%s3453_s1 + $0x260] sm:$0xf0]  ;;  %v1786_v19 = vld [vmem:[%s3453_s1 + $0xc0] sm:$0xf]  ;;  %v2113_v20 = vld [vmem:[%s3453_s1 + $0xc8] sm:$0xf0]  ;;  %v1895_v22 = vor.u32 %v2140_v13, %v1894_v12  ;;  %v1691_v34 = vor.u32 %v2089_v18, %v1690_v16 }
  0x15   :  { %786 = vmatpush.bf16.msra.mxu1 %v1823_v57  ;;  %v1882_v23 = vld [vmem:[%s3453_s1 + $0x180] sm:$0xf]  ;;  %v2137_v24 = vld [vmem:[%s3453_s1 + $0x188] sm:$0xf0]  ;;  %v1991_v26 = vor.u32 %v2164_v15, %v1990_v14  ;;  %v2074_v29 = vld [vmem:[%s3454_s0 + $0xc] sm:$0xf0]  ;;  %v1787_v38 = vor.u32 %v2113_v20, %v1786_v19 }
  0x16   :  { %815 = vmatpush.bf16.msra.mxu2 %v1919_v58  ;;  %v1978_v25 = vld [vmem:[%s3453_s1 + $0x240] sm:$0xf]  ;;  %v2161_v27 = vld [vmem:[%s3453_s1 + $0x248] sm:$0xf0]  ;;  %v2072_v30 = vld [vmem:[%s3454_s0 + $0x4] sm:$0xf]  ;;  %v1883_v39 = vor.u32 %v2137_v24, %v1882_v23 }
  0x17   :  { %844 = vmatpush.bf16.msra.mxu3 %v2015_v62  ;;  %v1626_v28 = vld [vmem:[%s3454_s0] sm:$0xf]  ;;  %v1628_v31 = vld [vmem:[%s3454_s0 + $0x10] sm:$0xf0]  ;;  %v2157_v32 = vld [vmem:[%s3453_s1 + $0x22c] sm:$0xf]  ;;  %v1979_v43 = vor.u32 %v2161_v27, %v1978_v25 }
  0x18   :  { %758 = vmatpush.bf16.msra.mxu0 %v1715_v4  ;;  %v1968_v33 = vld [vmem:[%s3453_s1 + $0x234] sm:$0xf0]  ;;  %v1634_v35 = vld [vmem:[%s3454_s0 + $0x8] sm:$0xf]  ;;  %v2181_v36 = vld [vmem:[%s3453_s1 + $0x2ec] sm:$0xf]  ;;  %v2467_v48 = vor.u32 %v2074_v29, %v1626_v28  ;;  %v2478_v53 = vor.u32 %v2072_v30, %v1628_v31 }
  0x19   :  { %787 = vmatpush.bf16.msra.mxu1 %v1811_v5  ;;  %v2064_v37 = vld [vmem:[%s3453_s1 + $0x2f4] sm:$0xf0]  ;;  %v2073_v41 = vld [vmem:[%s3454_s0 + $0xc] sm:$0xf]  ;;  %v1636_v42 = vld [vmem:[%s3454_s0 + $0x18] sm:$0xf0]  ;;  %v1971_v44 = vor.u32 %v2157_v32, %v1968_v33 }
  0x1a   :  { %816 = vmatpush.bf16.msra.mxu2 %v1907_v6  ;;  %v2075_v40 = vld [vmem:[%s3454_s0 + $0x14] sm:$0xf0]  ;;  %v2109_v45 = vld [vmem:[%s3453_s1 + $0xac] sm:$0xf]  ;;  %v2067_v49 = vor.u32 %v2181_v36, %v2064_v37  ;;  %v2154_v51 = vld [vmem:[%s3453_s1 + $0x214] sm:$0xf]  ;;  %v2488_v57 = vor.u32 %v2073_v41, %v1636_v42 }
  0x1b   :  { %845 = vmatpush.bf16.msra.mxu3 %v2003_v10  ;;  %v1776_v46 = vld [vmem:[%s3453_s1 + $0xb4] sm:$0xf0]  ;;  %v2133_v47 = vld [vmem:[%s3453_s1 + $0x16c] sm:$0xf]  ;;  %v1956_v52 = vld [vmem:[%s3453_s1 + $0x21c] sm:$0xf0]  ;;  %v2480_v54 = vor.u32 %v2075_v40, %v1634_v35 }
  0x1c   :  { %759 = vmatpush.bf16.msra.mxu0 %v1703_v17  ;;  %v1872_v50 = vld [vmem:[%s3453_s1 + $0x174] sm:$0xf0]  ;;  %v2178_v55 = vld [vmem:[%s3453_s1 + $0x2d4] sm:$0xf]  ;;  %v2052_v56 = vld [vmem:[%s3453_s1 + $0x2dc] sm:$0xf0]  ;;  %v1779_v58 = vor.u32 %v2109_v45, %v1776_v46  ;;  %v1959_v60 = vor.u32 %v2154_v51, %v1956_v52 }
  0x1d   :  { %788 = vmatpush.bf16.msra.mxu1 %v1799_v21  ;;  %v1875_v59 = vor.u32 %v2133_v47, %v1872_v50  ;;  %v2106_v61 = vld [vmem:[%s3453_s1 + $0x94] sm:$0xf]  ;;  %v1764_v62 = vld [vmem:[%s3453_s1 + $0x9c] sm:$0xf0]  ;;  %v2055_v0 = vor.u32 %v2178_v55, %v2052_v56  ;;  %v2151_v2 = vld [vmem:[%s3453_s1 + $0x1fc] sm:$0xf] }
  0x1e   :  { %817 = vmatpush.bf16.msra.mxu2 %v1895_v22  ;;  %v2130_v63 = vld [vmem:[%s3453_s1 + $0x154] sm:$0xf]  ;;  %v1860_v1 = vld [vmem:[%s3453_s1 + $0x15c] sm:$0xf0]  ;;  %v1944_v3 = vld [vmem:[%s3453_s1 + $0x204] sm:$0xf0]  ;;  %v1767_v6 = vor.u32 %v2106_v61, %v1764_v62 }
  0x1f   :  { %846 = vmatpush.bf16.msra.mxu3 %v1991_v26  ;;  %v2175_v4 = vld [vmem:[%s3453_s1 + $0x2bc] sm:$0xf]  ;;  %v2040_v5 = vld [vmem:[%s3453_s1 + $0x2c4] sm:$0xf0]  ;;  %v1863_v7 = vor.u32 %v2130_v63, %v1860_v1  ;;  %v1947_v8 = vor.u32 %v2151_v2, %v1944_v3  ;;  %v2148_v14 = vld [vmem:[%s3453_s1 + $0x1e4] sm:$0xf] }
  0x20   :  { %760 = vmatpush.bf16.msra.mxu0 %v1691_v34  ;;  %v2103_v9 = vld [vmem:[%s3453_s1 + $0x7c] sm:$0xf]  ;;  %v1752_v10 = vld [vmem:[%s3453_s1 + $0x84] sm:$0xf0]  ;;  %v2043_v12 = vor.u32 %v2175_v4, %v2040_v5  ;;  %v1932_v15 = vld [vmem:[%s3453_s1 + $0x1ec] sm:$0xf0] }
  0x21   :  { %789 = vmatpush.bf16.msra.mxu1 %v1787_v38  ;;  %v2127_v11 = vld [vmem:[%s3453_s1 + $0x13c] sm:$0xf]  ;;  %v1848_v13 = vld [vmem:[%s3453_s1 + $0x144] sm:$0xf0]  ;;  %v2172_v16 = vld [vmem:[%s3453_s1 + $0x2a4] sm:$0xf]  ;;  %v1755_v18 = vor.u32 %v2103_v9, %v1752_v10  ;;  %v1935_v22 = vor.u32 %v2148_v14, %v1932_v15 }
  0x22   :  { %818 = vmatpush.bf16.msra.mxu2 %v1883_v39  ;;  %v2028_v17 = vld [vmem:[%s3453_s1 + $0x2ac] sm:$0xf0]  ;;  %v1642_v19 = vld [vmem:[%s3454_s0 + $0x20] sm:$0xf]  ;;  %v1851_v21 = vor.u32 %v2127_v11, %v1848_v13  ;;  %v2100_v23 = vld [vmem:[%s3453_s1 + $0x64] sm:$0xf] }
  0x23   :  { %847 = vmatpush.bf16.msra.mxu3 %v1979_v43  ;;  %761 = vmatmul.bf16.vlgmr.msra.gmra.mxu0 %v2467_v48  ;;  %v2078_v20 = vld [vmem:[%s3454_s0 + $0x2c] sm:$0xf0]  ;;  %v2124_v25 = vld [vmem:[%s3453_s1 + $0x124] sm:$0xf]  ;;  %v1644_v27 = vld [vmem:[%s3454_s0 + $0x30] sm:$0xf0]  ;;  %v2031_v28 = vor.u32 %v2172_v16, %v2028_v17 }
  0x24   :  { %790 = vmatmul.bf16.vlgmr.msra.gmra.mxu1 %v2478_v53  ;;  %869 = vmatpush.bf16.msrb.mxu0 %v1779_v58  ;;  %v1740_v24 = vld [vmem:[%s3453_s1 + $0x6c] sm:$0xf0]  ;;  %v2076_v26 = vld [vmem:[%s3454_s0 + $0x24] sm:$0xf]  ;;  %v2145_v30 = vld [vmem:[%s3453_s1 + $0x1cc] sm:$0xf] }
  0x25   :  { %819 = vmatmul.bf16.vlgmr.msra.gmra.mxu2 %v2480_v54  ;;  %898 = vmatpush.bf16.msrb.mxu1 %v1875_v59  ;;  %v1836_v29 = vld [vmem:[%s3453_s1 + $0x12c] sm:$0xf0]  ;;  %v1920_v31 = vld [vmem:[%s3453_s1 + $0x1d4] sm:$0xf0]  ;;  %v1650_v32 = vld [vmem:[%s3454_s0 + $0x28] sm:$0xf]  ;;  %v1743_v38 = vor.u32 %v2100_v23, %v1740_v24  ;;  %v2610_v50 = vor.u32 %v2076_v26, %v1644_v27 }
  0x26   :  { %927 = vmatpush.bf16.msrb.mxu2 %v1971_v44  ;;  %848 = vmatmul.bf16.vlgmr.msra.gmra.mxu3 %v2488_v57  ;;  %v2169_v33 = vld [vmem:[%s3453_s1 + $0x28c] sm:$0xf]  ;;  %v2016_v34 = vld [vmem:[%s3453_s1 + $0x294] sm:$0xf0]  ;;  %v1652_v37 = vld [vmem:[%s3454_s0 + $0x38] sm:$0xf0]  ;;  %v1839_v39 = vor.u32 %v2124_v25, %v1836_v29  ;;  %v1923_v40 = vor.u32 %v2145_v30, %v1920_v31  ;;  %v2599_v44 = vor.u32 %v2078_v20, %v1642_v19 }
  0x27   :  { %956 = vmatpush.bf16.msrb.mxu3 %v2067_v49  ;;  %v2079_v35 = vld [vmem:[%s3454_s0 + $0x34] sm:$0xf0]  ;;  %v2077_v36 = vld [vmem:[%s3454_s0 + $0x2c] sm:$0xf]  ;;  %v2019_v45 = vor.u32 %v2169_v33, %v2016_v34  ;;  %v2142_v47 = vld [vmem:[%s3453_s1 + $0x1b4] sm:$0xf] }
  0x28   :  { %870 = vmatpush.bf16.msrb.mxu0 %v1767_v6  ;;  %v2097_v41 = vld [vmem:[%s3453_s1 + $0x4c] sm:$0xf]  ;;  %v1728_v42 = vld [vmem:[%s3453_s1 + $0x54] sm:$0xf0]  ;;  %v1908_v49 = vld [vmem:[%s3453_s1 + $0x1bc] sm:$0xf0]  ;;  %v2612_v51 = vor.u32 %v2079_v35, %v1650_v32  ;;  %v2620_v56 = vor.u32 %v2077_v36, %v1652_v37 }
  0x29   :  { %899 = vmatpush.bf16.msrb.mxu1 %v1863_v7  ;;  %v2121_v43 = vld [vmem:[%s3453_s1 + $0x10c] sm:$0xf]  ;;  %v1824_v46 = vld [vmem:[%s3453_s1 + $0x114] sm:$0xf0]  ;;  %v2166_v52 = vld [vmem:[%s3453_s1 + $0x274] sm:$0xf]  ;;  %v1731_v58 = vor.u32 %v2097_v41, %v1728_v42 }
  0x2a   :  { %928 = vmatpush.bf16.msrb.mxu2 %v1959_v60  ;;  %v2004_v55 = vld [vmem:[%s3453_s1 + $0x27c] sm:$0xf0]  ;;  %v1827_v59 = vor.u32 %v2121_v43, %v1824_v46  ;;  %v1911_v60 = vor.u32 %v2142_v47, %v1908_v49  ;;  %v2094_v61 = vld [vmem:[%s3453_s1 + $0x34] sm:$0xf]  ;;  %v2139_v3 = vld [vmem:[%s3453_s1 + $0x19c] sm:$0xf] }
  0x2b   :  { %957 = vmatpush.bf16.msrb.mxu3 %v2055_v0  ;;  %v1716_v62 = vld [vmem:[%s3453_s1 + $0x3c] sm:$0xf0]  ;;  %v2007_v63 = vor.u32 %v2166_v52, %v2004_v55  ;;  %v2118_v0 = vld [vmem:[%s3453_s1 + $0xf4] sm:$0xf]  ;;  %v1896_v4 = vld [vmem:[%s3453_s1 + $0x1a4] sm:$0xf0] }
  0x2c   :  { %871 = vmatpush.bf16.msrb.mxu0 %v1755_v18  ;;  %v1812_v1 = vld [vmem:[%s3453_s1 + $0xfc] sm:$0xf0]  ;;  %v1719_v2 = vor.u32 %v2094_v61, %v1716_v62  ;;  %v2163_v5 = vld [vmem:[%s3453_s1 + $0x25c] sm:$0xf]  ;;  %v1899_v7 = vor.u32 %v2139_v3, %v1896_v4  ;;  %v1704_v10 = vld [vmem:[%s3453_s1 + $0x24] sm:$0xf0] }
  0x2d   :  { %900 = vmatpush.bf16.msrb.mxu1 %v1851_v21  ;;  %v1815_v6 = vor.u32 %v2118_v0, %v1812_v1  ;;  %v2091_v9 = vld [vmem:[%s3453_s1 + $0x1c] sm:$0xf]  ;;  %v1800_v13 = vld [vmem:[%s3453_s1 + $0xe4] sm:$0xf0]  ;;  %v2136_v14 = vld [vmem:[%s3453_s1 + $0x184] sm:$0xf] }
  0x2e   :  { %929 = vmatpush.bf16.msrb.mxu2 %v1947_v8  ;;  %v1992_v8 = vld [vmem:[%s3453_s1 + $0x264] sm:$0xf0]  ;;  %v1884_v15 = vld [vmem:[%s3453_s1 + $0x18c] sm:$0xf0]  ;;  %v2160_v16 = vld [vmem:[%s3453_s1 + $0x244] sm:$0xf]  ;;  %v1707_v18 = vor.u32 %v2091_v9, %v1704_v10 }
  0x2f   :  { %958 = vmatpush.bf16.msrb.mxu3 %v2043_v12  ;;  %v1995_v11 = vor.u32 %v2163_v5, %v1992_v8  ;;  %v2115_v12 = vld [vmem:[%s3453_s1 + $0xdc] sm:$0xf]  ;;  %v1980_v17 = vld [vmem:[%s3453_s1 + $0x24c] sm:$0xf0]  ;;  %v1887_v20 = vor.u32 %v2136_v14, %v1884_v15  ;;  %v2088_v21 = vld [vmem:[%s3453_s1 + $0x4] sm:$0xf] }
  0x30   :  { %872 = vmatpush.bf16.msrb.mxu0 %v1743_v38  ;;  %v1803_v19 = vor.u32 %v2115_v12, %v1800_v13  ;;  %v1983_v23 = vor.u32 %v2160_v16, %v1980_v17  ;;  %v2112_v24 = vld [vmem:[%s3453_s1 + $0xc4] sm:$0xf]  ;;  %v1788_v25 = vld [vmem:[%s3453_s1 + $0xcc] sm:$0xf0]  ;;  %v1658_v26 = vld [vmem:[%s3454_s0 + $0x40] sm:$0xf] }
  0x31   :  { %901 = vmatpush.bf16.msrb.mxu1 %v1839_v39  ;;  %v2082_v27 = vld [vmem:[%s3454_s0 + $0x4c] sm:$0xf0]  ;;  %v1660_v29 = vld [vmem:[%s3454_s0 + $0x50] sm:$0xf0]  ;;  %v1666_v30 = vld [vmem:[%s3454_s0 + $0x48] sm:$0xf]  ;;  %v1791_v35 = vor.u32 %v2112_v24, %v1788_v25 }
  0x32   :  { %930 = vmatpush.bf16.msrb.mxu2 %v1935_v22  ;;  %v1692_v22 = vld [vmem:[%s3453_s1 + $0xc] sm:$0xf0]  ;;  %v2083_v31 = vld [vmem:[%s3454_s0 + $0x54] sm:$0xf0]  ;;  %v2081_v33 = vld [vmem:[%s3454_s0 + $0x4c] sm:$0xf]  ;;  %v2710_v36 = vor.u32 %v2082_v27, %v1658_v26 }
  0x33   :  { %959 = vmatpush.bf16.msrb.mxu3 %v2031_v28  ;;  %766 = vmatmul.bf16.gmra.mxu0 %v2599_v44  ;;  %v2080_v28 = vld [vmem:[%s3454_s0 + $0x44] sm:$0xf]  ;;  %v1695_v32 = vor.u32 %v2088_v21, %v1692_v22  ;;  %v1668_v34 = vld [vmem:[%s3454_s0 + $0x58] sm:$0xf0]  ;;  %v2714_v38 = vor.u32 %v2083_v31, %v1666_v30  ;;  %v2070_v42 = vld [vmem:[%s3453_s1 + $0x2f0] sm:$0xf] }
  0x34   :  { %795 = vmatmul.bf16.gmra.mxu1 %v2610_v50  ;;  %873 = vmatpush.bf16.msrb.mxu0 %v1731_v58  ;;  %v2712_v37 = vor.u32 %v2080_v28, %v1660_v29  ;;  %v2716_v39 = vor.u32 %v2081_v33, %v1668_v34  ;;  %v2159_v41 = vld [vmem:[%s3453_s1 + $0x238] sm:$0xf0]  ;;  %v1782_v46 = vld [vmem:[%s3453_s1 + $0xb0] sm:$0xf]  ;;  %v2156_v61 = vld [vmem:[%s3453_s1 + $0x220] sm:$0xf0] }
  0x35   :  { %824 = vmatmul.bf16.gmra.mxu2 %v2612_v51  ;;  %902 = vmatpush.bf16.msrb.mxu1 %v1827_v59  ;;  %v2111_v47 = vld [vmem:[%s3453_s1 + $0xb8] sm:$0xf0]  ;;  %v1878_v55 = vld [vmem:[%s3453_s1 + $0x170] sm:$0xf]  ;;  %v1962_v59 = vld [vmem:[%s3453_s1 + $0x218] sm:$0xf] }
  0x36   :  { %931 = vmatpush.bf16.msrb.mxu2 %v1923_v40  ;;  %853 = vmatmul.bf16.gmra.mxu3 %v2620_v56  ;;  %v1974_v40 = vld [vmem:[%s3453_s1 + $0x230] sm:$0xf]  ;;  %v1783_v52 = vor.u32 %v2111_v47, %v1782_v46  ;;  %v2135_v58 = vld [vmem:[%s3453_s1 + $0x178] sm:$0xf0]  ;;  %v2058_v62 = vld [vmem:[%s3453_s1 + $0x2d8] sm:$0xf]  ;;  %v1963_v0 = vor.u32 %v2156_v61, %v1962_v59 }
  0x37   :  { %960 = vmatpush.bf16.msrb.mxu3 %v2019_v45  ;;  %v1975_v43 = vor.u32 %v2159_v41, %v1974_v40  ;;  %v2183_v45 = vld [vmem:[%s3453_s1 + $0x2f8] sm:$0xf0]  ;;  %v2108_v3 = vld [vmem:[%s3453_s1 + $0xa0] sm:$0xf0]  ;;  %v1866_v4 = vld [vmem:[%s3453_s1 + $0x158] sm:$0xf] }
  0x38   :  { %874 = vmatpush.bf16.msrb.mxu0 %v1719_v2  ;;  %v2071_v49 = vor.u32 %v2183_v45, %v2070_v42  ;;  %v1770_v2 = vld [vmem:[%s3453_s1 + $0x98] sm:$0xf]  ;;  %v1674_v8 = vld [vmem:[%s3454_s0 + $0x60] sm:$0xf]  ;;  %v2086_v9 = vld [vmem:[%s3454_s0 + $0x6c] sm:$0xf0] }
  0x39   :  { %903 = vmatpush.bf16.msrb.mxu1 %v1815_v6  ;;  %v1771_v5 = vor.u32 %v2108_v3, %v1770_v2  ;;  %v2132_v6 = vld [vmem:[%s3453_s1 + $0x160] sm:$0xf0]  ;;  %v1682_v12 = vld [vmem:[%s3454_s0 + $0x68] sm:$0xf]  ;;  %v2087_v13 = vld [vmem:[%s3454_s0 + $0x74] sm:$0xf0]  ;;  %v2794_v16 = vor.u32 %v2086_v9, %v1674_v8 }
  0x3a   :  { %932 = vmatpush.bf16.msrb.mxu2 %v1911_v60  ;;  %v1879_v60 = vor.u32 %v2135_v58, %v1878_v55  ;;  %v2084_v10 = vld [vmem:[%s3454_s0 + $0x64] sm:$0xf]  ;;  %v2085_v14 = vld [vmem:[%s3454_s0 + $0x6c] sm:$0xf]  ;;  %v1684_v15 = vld [vmem:[%s3454_s0 + $0x78] sm:$0xf0] }
  0x3b   :  { %961 = vmatpush.bf16.msrb.mxu3 %v2007_v63  ;;  %v2180_v63 = vld [vmem:[%s3453_s1 + $0x2e0] sm:$0xf0]  ;;  %v2153_v21 = vld [vmem:[%s3453_s1 + $0x208] sm:$0xf0]  ;;  %v2046_v22 = vld [vmem:[%s3453_s1 + $0x2c0] sm:$0xf] }
  0x3c   :  { %875 = vmatpush.bf16.msrb.mxu0 %v1707_v18  ;;  %v2059_v1 = vor.u32 %v2180_v63, %v2058_v62  ;;  %v2798_v18 = vor.u32 %v2087_v13, %v1682_v12  ;;  %v2177_v24 = vld [vmem:[%s3453_s1 + $0x2c8] sm:$0xf0]  ;;  %v1758_v25 = vld [vmem:[%s3453_s1 + $0x80] sm:$0xf]  ;;  %v1938_v31 = vld [vmem:[%s3453_s1 + $0x1e8] sm:$0xf] }
  0x3d   :  { %904 = vmatpush.bf16.msrb.mxu1 %v1803_v19  ;;  %v2800_v19 = vor.u32 %v2085_v14, %v1684_v15  ;;  %v2105_v26 = vld [vmem:[%s3453_s1 + $0x88] sm:$0xf0]  ;;  %v2047_v27 = vor.u32 %v2177_v24, %v2046_v22  ;;  %v1854_v29 = vld [vmem:[%s3453_s1 + $0x140] sm:$0xf]  ;;  %v2150_v33 = vld [vmem:[%s3453_s1 + $0x1f0] sm:$0xf0] }
  0x3e   :  { %933 = vmatpush.bf16.msrb.mxu2 %v1899_v7  ;;  %v1867_v7 = vor.u32 %v2132_v6, %v1866_v4  ;;  %v1759_v28 = vor.u32 %v2105_v26, %v1758_v25  ;;  %v2129_v30 = vld [vmem:[%s3453_s1 + $0x148] sm:$0xf0]  ;;  %v2034_v34 = vld [vmem:[%s3453_s1 + $0x2a8] sm:$0xf]  ;;  %v1939_v40 = vor.u32 %v2150_v33, %v1938_v31  ;;  %v2126_v47 = vld [vmem:[%s3453_s1 + $0x130] sm:$0xf0] }
  0x3f   :  { %962 = vmatpush.bf16.msrb.mxu3 %v1995_v11  ;;  %v1676_v11 = vld [vmem:[%s3454_s0 + $0x70] sm:$0xf0]  ;;  %v1746_v42 = vld [vmem:[%s3453_s1 + $0x68] sm:$0xf]  ;;  %v2147_v55 = vld [vmem:[%s3453_s1 + $0x1d8] sm:$0xf0] }
  0x40   :  { %876 = vmatpush.bf16.msrb.mxu0 %v1695_v32  ;;  %v2796_v17 = vor.u32 %v2084_v10, %v1676_v11  ;;  %v1855_v32 = vor.u32 %v2129_v30, %v1854_v29  ;;  %v1842_v45 = vld [vmem:[%s3453_s1 + $0x128] sm:$0xf]  ;;  %v2022_v58 = vld [vmem:[%s3453_s1 + $0x290] sm:$0xf]  ;;  %v2099_v62 = vld [vmem:[%s3453_s1 + $0x58] sm:$0xf0] }
  0x41   :  { %905 = vmatpush.bf16.msrb.mxu1 %v1791_v35  ;;  %v2174_v35 = vld [vmem:[%s3453_s1 + $0x2b0] sm:$0xf0]  ;;  %v1734_v61 = vld [vmem:[%s3453_s1 + $0x50] sm:$0xf]  ;;  %v2123_v2 = vld [vmem:[%s3453_s1 + $0x118] sm:$0xf0] }
  0x42   :  { %934 = vmatpush.bf16.msrb.mxu2 %v1887_v20  ;;  %v1950_v20 = vld [vmem:[%s3453_s1 + $0x200] sm:$0xf]  ;;  %v2035_v41 = vor.u32 %v2174_v35, %v2034_v34  ;;  %v1914_v3 = vld [vmem:[%s3453_s1 + $0x1b8] sm:$0xf]  ;;  %v2096_v11 = vld [vmem:[%s3453_s1 + $0x40] sm:$0xf0] }
  0x43   :  { %963 = vmatpush.bf16.msrb.mxu3 %v1983_v23  ;;  %771 = vmatmul.bf16.gmra.mxu0 %v2710_v36  ;;  %v1951_v23 = vor.u32 %v2153_v21, %v1950_v20  ;;  %v2010_v6 = vld [vmem:[%s3453_s1 + $0x278] sm:$0xf]  ;;  %v2120_v14 = vld [vmem:[%s3453_s1 + $0x100] sm:$0xf0]  ;;  %v1902_v20 = vld [vmem:[%s3453_s1 + $0x1a0] sm:$0xf] }
  0x44   :  { %800 = vmatmul.bf16.gmra.mxu1 %v2712_v37  ;;  %985 = vmatpush.bf16.msra.mxu0 %v1783_v52  ;;  %v1926_v52 = vld [vmem:[%s3453_s1 + $0x1d0] sm:$0xf]  ;;  %v1722_v10 = vld [vmem:[%s3453_s1 + $0x38] sm:$0xf]  ;;  %v2141_v21 = vld [vmem:[%s3453_s1 + $0x1a8] sm:$0xf0] }
  0x45   :  { %829 = vmatmul.bf16.gmra.mxu2 %v2714_v38  ;;  %1014 = vmatpush.bf16.msra.mxu1 %v1879_v60  ;;  %v1927_v59 = vor.u32 %v2147_v55, %v1926_v52  ;;  %v2171_v60 = vld [vmem:[%s3453_s1 + $0x298] sm:$0xf0]  ;;  %v1818_v12 = vld [vmem:[%s3453_s1 + $0xf8] sm:$0xf]  ;;  %v1723_v13 = vor.u32 %v2096_v11, %v1722_v10  ;;  %v1998_v22 = vld [vmem:[%s3453_s1 + $0x260] sm:$0xf] }
  0x46   :  { %858 = vmatmul.bf16.gmra.mxu3 %v2716_v39  ;;  %1043 = vmatpush.bf16.msra.mxu2 %v1975_v43  ;;  %v2102_v43 = vld [vmem:[%s3453_s1 + $0x70] sm:$0xf0]  ;;  %v2023_v63 = vor.u32 %v2171_v60, %v2022_v58  ;;  %v1819_v15 = vor.u32 %v2120_v14, %v1818_v12  ;;  %v2165_v24 = vld [vmem:[%s3453_s1 + $0x268] sm:$0xf0]  ;;  %v1710_v25 = vld [vmem:[%s3453_s1 + $0x20] sm:$0xf] }
  0x47   :  { %1072 = vmatpush.bf16.msra.mxu3 %v2071_v49  ;;  %v1747_v46 = vor.u32 %v2102_v43, %v1746_v42  ;;  %v1843_v49 = vor.u32 %v2126_v47, %v1842_v45  ;;  %v2093_v26 = vld [vmem:[%s3453_s1 + $0x28] sm:$0xf0]  ;;  %v1806_v29 = vld [vmem:[%s3453_s1 + $0xe0] sm:$0xf]  ;;  %v1890_v31 = vld [vmem:[%s3453_s1 + $0x188] sm:$0xf] }
  0x48   :  { %986 = vmatpush.bf16.msra.mxu0 %v1771_v5  ;;  %v2144_v5 = vld [vmem:[%s3453_s1 + $0x1c0] sm:$0xf0]  ;;  %v2117_v30 = vld [vmem:[%s3453_s1 + $0xe8] sm:$0xf0]  ;;  %v2138_v33 = vld [vmem:[%s3453_s1 + $0x190] sm:$0xf0] }
  0x49   :  { %1015 = vmatpush.bf16.msra.mxu1 %v1867_v7  ;;  %v2168_v7 = vld [vmem:[%s3453_s1 + $0x280] sm:$0xf0]  ;;  %v1915_v8 = vor.u32 %v2144_v5, %v1914_v3  ;;  %v1986_v34 = vld [vmem:[%s3453_s1 + $0x248] sm:$0xf]  ;;  %v2162_v35 = vld [vmem:[%s3453_s1 + $0x250] sm:$0xf0] }
  0x4a   :  { %1044 = vmatpush.bf16.msra.mxu2 %v1963_v0  ;;  %v1735_v0 = vor.u32 %v2099_v62, %v1734_v61  ;;  %v2011_v9 = vor.u32 %v2168_v7, %v2010_v6  ;;  %v1698_v42 = vld [vmem:[%s3453_s1 + $0x8] sm:$0xf]  ;;  %v2090_v43 = vld [vmem:[%s3453_s1 + $0x10] sm:$0xf0] }
  0x4b   :  { %1073 = vmatpush.bf16.msra.mxu3 %v2059_v1  ;;  %v1830_v1 = vld [vmem:[%s3453_s1 + $0x110] sm:$0xf]  ;;  %v1794_v45 = vld [vmem:[%s3453_s1 + $0xc8] sm:$0xf]  ;;  %v2114_v47 = vld [vmem:[%s3453_s1 + $0xd0] sm:$0xf0] }
  0x4c   :  { %987 = vmatpush.bf16.msra.mxu0 %v1759_v28  ;;  %v1831_v4 = vor.u32 %v2123_v2, %v1830_v1  ;;  %v1711_v28 = vor.u32 %v2093_v26, %v1710_v25 }
  0x4d   :  { %1016 = vmatpush.bf16.msra.mxu1 %v1855_v32  ;;  %v1807_v32 = vor.u32 %v2117_v30, %v1806_v29 }
  0x4e   :  { %1045 = vmatpush.bf16.msra.mxu2 %v1951_v23  ;;  %v1903_v23 = vor.u32 %v2141_v21, %v1902_v20 }
  0x4f   :  { %1074 = vmatpush.bf16.msra.mxu3 %v2047_v27  ;;  %v1999_v27 = vor.u32 %v2165_v24, %v1998_v22 }
  0x50   :  { %988 = vmatpush.bf16.msra.mxu0 %v1747_v46  ;;  %v1699_v46 = vor.u32 %v2090_v43, %v1698_v42 }
  0x51   :  { %1017 = vmatpush.bf16.msra.mxu1 %v1843_v49  ;;  %v1795_v49 = vor.u32 %v2114_v47, %v1794_v45  ;;  %v1376_v47 = vld [vmem:[%s3455_s2 + $0x20] sm:$0xff] }
  0x52   :  { %1046 = vmatpush.bf16.msra.mxu2 %v1939_v40  ;;  %v1891_v40 = vor.u32 %v2138_v33, %v1890_v31 }
  0x53   :  { %776 = vmatmul.bf16.gmra.mxu0 %v2794_v16  ;;  %1075 = vmatpush.bf16.msra.mxu3 %v2035_v41  ;;  %v1987_v41 = vor.u32 %v2162_v35, %v1986_v34 }
  0x54   :  { %805 = vmatmul.bf16.gmra.mxu1 %v2796_v17  ;;  %989 = vmatpush.bf16.msra.mxu0 %v1735_v0 }
  0x55   :  { %834 = vmatmul.bf16.gmra.mxu2 %v2798_v18  ;;  %1018 = vmatpush.bf16.msra.mxu1 %v1831_v4 }
  0x56   :  { %863 = vmatmul.bf16.gmra.mxu3 %v2800_v19  ;;  %1047 = vmatpush.bf16.msra.mxu2 %v1927_v59 }
  0x57   :  { %1076 = vmatpush.bf16.msra.mxu3 %v2023_v63 }
  0x58   :  { %990 = vmatpush.bf16.msra.mxu0 %v1723_v13 }
  0x59   :  { %1019 = vmatpush.bf16.msra.mxu1 %v1819_v15 }
  0x5a   :  { %1048 = vmatpush.bf16.msra.mxu2 %v1915_v8 }
  0x5b   :  { %1077 = vmatpush.bf16.msra.mxu3 %v2011_v9 }
  0x5c   :  { %991 = vmatpush.bf16.msra.mxu0 %v1711_v28 }
  0x5d   :  { %1020 = vmatpush.bf16.msra.mxu1 %v1807_v32 }
  0x5e   :  { %1049 = vmatpush.bf16.msra.mxu2 %v1903_v23 }
  0x5f   :  { %1078 = vmatpush.bf16.msra.mxu3 %v1999_v27 }
  0x60   :  { %992 = vmatpush.bf16.msra.mxu0 %v1699_v46  ;;  %v1445_v46 = vld [vmem:[%s3456_s3 + $0x8] sm:$0xff] }
  0x61   :  { %1021 = vmatpush.bf16.msra.mxu1 %v1795_v49  ;;  %v1373_v49 = vld [vmem:[%s3455_s2 + $0x8] sm:$0xff] }
  0x62   :  { %1050 = vmatpush.bf16.msra.mxu2 %v1891_v40  ;;  %v2204_v40 = vmov 0  }
  0x63   :  { %877 = vmatmul.bf16.vlgmr.msrb.gmra.mxu0 %v2467_v48  ;;  %1079 = vmatpush.bf16.msra.mxu3 %v1987_v41 }
  0x64   :  { %906 = vmatmul.bf16.vlgmr.msrb.gmra.mxu1 %v2478_v53  ;;  %2187 = vset.pattern.permute.xlu0 %v2204_v40 }
  0x65   :  { %935 = vmatmul.bf16.vlgmr.msrb.gmra.mxu2 %v2480_v54  ;;  %2185 = vset.pattern.permute.xlu1 %v2204_v40 }
  0x66   :  { %964 = vmatmul.bf16.vlgmr.msrb.gmra.mxu3 %v2488_v57  ;;  %2186 = vset.pattern.permute.xlu2 %v2204_v40 }
  0x67   :  { %1387 = vperm.xlu2 %2186, %v1373_v49  }
  0x73   :  { %882 = vmatmul.bf16.gmra.mxu0 %v2599_v44 }
  0x74   :  { %911 = vmatmul.bf16.gmra.mxu1 %v2610_v50 }
  0x75   :  { %940 = vmatmul.bf16.gmra.mxu2 %v2612_v51 }
  0x76   :  { %969 = vmatmul.bf16.gmra.mxu3 %v2620_v56 }
  0x83   :  { %887 = vmatmul.bf16.gmra.mxu0 %v2710_v36 }
  0x84   :  { %916 = vmatmul.bf16.gmra.mxu1 %v2712_v37 }
  0x85   :  { %945 = vmatmul.bf16.gmra.mxu2 %v2714_v38 }
  0x86   :  { %974 = vmatmul.bf16.gmra.mxu3 %v2716_v39 }
  0x93   :  { %892 = vmatmul.bf16.gmra.mxu0 %v2794_v16 }
  0x94   :  { %921 = vmatmul.bf16.gmra.mxu1 %v2796_v17 }
  0x95   :  { %950 = vmatmul.bf16.gmra.mxu2 %v2798_v18 }
  0x96   :  { %979 = vmatmul.bf16.gmra.mxu3 %v2800_v19 }
  0xa0   :  { %v762_v52 = vpop.f32.mrf.mxu0 }
  0xa1   :  { %v791_v55 = vpop.f32.mrf.mxu1 }
  0xa2   :  { %v792_v58 = vadd.f32 %v791_v55, %v762_v52 }
  0xa3   :  { %993 = vmatmul.bf16.vlgmr.msra.gmra.mxu0 %v2467_v48 }
  0xa4   :  { %1022 = vmatmul.bf16.vlgmr.msra.gmra.mxu1 %v2478_v53 }
  0xa5   :  { %1051 = vmatmul.bf16.vlgmr.msra.gmra.mxu2 %v2480_v54 }
  0xa6   :  { %1080 = vmatmul.bf16.vlgmr.msra.gmra.mxu3 %v2488_v57 }
  0xa8   :  { %v820_v59 = vpop.f32.mrf.mxu2  ;;  %v764_v62 = vpop.f32.mrf.mxu0 }
  0xa9   :  { %v821_v60 = vadd.f32 %v820_v59, %v792_v58  ;;  %v849_v61 = vpop.f32.mrf.mxu3  ;;  %v793_v63 = vpop.f32.mrf.mxu1 }
  0xaa   :  { %v794_v1 = vadd.f32 %v793_v63, %v764_v62 }
  0xab   :  { %v2970_v0 = vadd.f32 %v849_v61, %v821_v60  ;;  %v1378_v60 = vld [vmem:[%s3455_s2 + $0x30] sm:$0xff]  ;;  %v1375_v61 = vld [vmem:[%s3455_s2 + $0x18] sm:$0xff] }
  0xac   :  { %1397 = vperm.xlu2 %2186, %v1375_v61  }
  0xb0   :  { %v822_v2 = vpop.f32.mrf.mxu2  ;;  %v767_v5 = vpop.f32.mrf.mxu0 }
  0xb1   :  { %v823_v3 = vadd.f32 %v822_v2, %v794_v1  ;;  %v851_v4 = vpop.f32.mrf.mxu3  ;;  %v796_v6 = vpop.f32.mrf.mxu1 }
  0xb2   :  { %v797_v53 = vadd.f32 %v796_v6, %v767_v5 }
  0xb3   :  { %v2972_v48 = vadd.f32 %v851_v4, %v823_v3  ;;  %998 = vmatmul.bf16.gmra.mxu0 %v2599_v44  ;;  %v1444_v3 = vld [vmem:[%s3456_s3] sm:$0xff]  ;;  %v1377_v4 = vld [vmem:[%s3455_s2 + $0x28] sm:$0xff] }
  0xb4   :  { %1027 = vmatmul.bf16.gmra.mxu1 %v2610_v50  ;;  %1407 = vperm.xlu2 %2186, %v1377_v4  }
  0xb5   :  { %1056 = vmatmul.bf16.gmra.mxu2 %v2612_v51 }
  0xb6   :  { %1085 = vmatmul.bf16.gmra.mxu3 %v2620_v56 }
  0xb8   :  { %v825_v54 = vpop.f32.mrf.mxu2  ;;  %v769_v8 = vpop.f32.mrf.mxu0 }
  0xb9   :  { %v826_v57 = vadd.f32 %v825_v54, %v797_v53  ;;  %v854_v7 = vpop.f32.mrf.mxu3  ;;  %v798_v9 = vpop.f32.mrf.mxu1 }
  0xba   :  { %v799_v11 = vadd.f32 %v798_v9, %v769_v8 }
  0xbb   :  { %v2978_v10 = vadd.f32 %v854_v7, %v826_v57  ;;  %v1379_v57 = vld [vmem:[%s3455_s2 + $0x38] sm:$0xff] }
  0xbc   :  { %1417 = vperm.xlu2 %2186, %v1379_v57  }
  0xc0   :  { %v827_v12 = vpop.f32.mrf.mxu2  ;;  %v772_v15 = vpop.f32.mrf.mxu0 }
  0xc1   :  { %v828_v13 = vadd.f32 %v827_v12, %v799_v11  ;;  %v856_v14 = vpop.f32.mrf.mxu3  ;;  %v801_v20 = vpop.f32.mrf.mxu1 }
  0xc2   :  { %v802_v50 = vadd.f32 %v801_v20, %v772_v15 }
  0xc3   :  { %v2980_v44 = vadd.f32 %v856_v14, %v828_v13  ;;  %1003 = vmatmul.bf16.gmra.mxu0 %v2710_v36 }
  0xc4   :  { %1032 = vmatmul.bf16.gmra.mxu1 %v2712_v37 }
  0xc5   :  { %1061 = vmatmul.bf16.gmra.mxu2 %v2714_v38 }
  0xc6   :  { %1090 = vmatmul.bf16.gmra.mxu3 %v2716_v39 }
  0xc8   :  { %v830_v51 = vpop.f32.mrf.mxu2  ;;  %v774_v22 = vpop.f32.mrf.mxu0 }
  0xc9   :  { %v831_v56 = vadd.f32 %v830_v51, %v802_v50  ;;  %v859_v21 = vpop.f32.mrf.mxu3  ;;  %v803_v23 = vpop.f32.mrf.mxu1 }
  0xca   :  { %v804_v25 = vadd.f32 %v803_v23, %v774_v22 }
  0xcb   :  { %v2986_v24 = vadd.f32 %v859_v21, %v831_v56 }
  0xd0   :  { %v832_v26 = vpop.f32.mrf.mxu2  ;;  %v777_v29 = vpop.f32.mrf.mxu0 }
  0xd1   :  { %v833_v27 = vadd.f32 %v832_v26, %v804_v25  ;;  %v861_v28 = vpop.f32.mrf.mxu3  ;;  %v806_v30 = vpop.f32.mrf.mxu1 }
  0xd2   :  { %v807_v37 = vadd.f32 %v806_v30, %v777_v29 }
  0xd3   :  { %v2988_v36 = vadd.f32 %v861_v28, %v833_v27  ;;  %1008 = vmatmul.bf16.gmra.mxu0 %v2794_v16  ;;  %v1374_v16 = vld [vmem:[%s3455_s2 + $0x10] sm:$0xff] }
  0xd4   :  { %1037 = vmatmul.bf16.gmra.mxu1 %v2796_v17  ;;  %v1372_v17 = vld [vmem:[%s3455_s2] sm:$0xff]  ;;  %1392 = vperm.xlu0 %2187, %v1374_v16  }
  0xd5   :  { %1066 = vmatmul.bf16.gmra.mxu2 %v2798_v18  ;;  %1382 = vperm.xlu1 %2185, %v1372_v17  }
  0xd6   :  { %1095 = vmatmul.bf16.gmra.mxu3 %v2800_v19 }
  0xd8   :  { %v835_v38 = vpop.f32.mrf.mxu2  ;;  %v779_v32 = vpop.f32.mrf.mxu0 }
  0xd9   :  { %v836_v39 = vadd.f32 %v835_v38, %v807_v37  ;;  %v864_v31 = vpop.f32.mrf.mxu3  ;;  %v808_v33 = vpop.f32.mrf.mxu1 }
  0xda   :  { %v809_v35 = vadd.f32 %v808_v33, %v779_v32 }
  0xdb   :  { %v2994_v34 = vadd.f32 %v864_v31, %v836_v39 }
  0xdc   :  { %1459 = vperm.xlu0 %2187, %v1445_v46  }
  0xdd   :  { %1402 = vperm.xlu1 %2185, %v1376_v47  }
  0xe0   :  { %v837_v18 = vpop.f32.mrf.mxu2  ;;  %v878_v42 = vpop.f32.mrf.mxu0 }
  0xe1   :  { %v838_v19 = vadd.f32 %v837_v18, %v809_v35  ;;  %v866_v41 = vpop.f32.mrf.mxu3  ;;  %v907_v43 = vpop.f32.mrf.mxu1 }
  0xe2   :  { %v908_v26 = vadd.f32 %v907_v43, %v878_v42 }
  0xe3   :  { %v3002_v45 = vadd.f32 %v866_v41, %v838_v19 }
  0xe5   :  { %1412 = vperm.xlu1 %2185, %v1378_v60  }
  0xe8   :  { %v936_v52 = vpop.f32.mrf.mxu2  ;;  %v880_v58 = vpop.f32.mrf.mxu0 }
  0xe9   :  { %v965_v55 = vpop.f32.mrf.mxu3  ;;  %v909_v59 = vpop.f32.mrf.mxu1  ;;  %v937_v37 = vadd.f32 %v936_v52, %v908_v26 }
  0xea   :  { %v910_v32 = vadd.f32 %v909_v59, %v880_v58 }
  0xeb   :  { %v3056_v39 = vadd.f32 %v965_v55, %v937_v37 }
  0xed   :  { %1454 = vperm.xlu1 %2185, %v1444_v3   ;;  %v1101_v17 = vadd.f32 %v3056_v39, %v2970_v0 }
  0xf0   :  { %v938_v62 = vpop.f32.mrf.mxu2  ;;  %v883_v1 = vpop.f32.mrf.mxu0 }
  0xf1   :  { %v967_v63 = vpop.f32.mrf.mxu3  ;;  %v912_v2 = vpop.f32.mrf.mxu1  ;;  %v939_v18 = vadd.f32 %v938_v62, %v910_v32 }
  0xf2   :  { %v913_v43 = vadd.f32 %v912_v2, %v883_v1 }
  0xf3   :  { %v3063_v42 = vadd.f32 %v967_v63, %v939_v18 }
  0xf5   :  { %v1105_v59 = vadd.f32 %v3063_v42, %v2972_v48 }
  0xf8   :  { %v941_v5 = vpop.f32.mrf.mxu2  ;;  %v885_v53 = vpop.f32.mrf.mxu0 }
  0xf9   :  { %v970_v6 = vpop.f32.mrf.mxu3  ;;  %v914_v54 = vpop.f32.mrf.mxu1  ;;  %v942_v60 = vadd.f32 %v941_v5, %v913_v43 }
  0xfa   :  { %v915_v1 = vadd.f32 %v914_v54, %v885_v53 }
  0xfb   :  { %v3070_v4 = vadd.f32 %v970_v6, %v942_v60 }
 0x100   :  { %v943_v7 = vpop.f32.mrf.mxu2  ;;  %v888_v9 = vpop.f32.mrf.mxu0 }
 0x101   :  { %v972_v8 = vpop.f32.mrf.mxu3  ;;  %v917_v11 = vpop.f32.mrf.mxu1  ;;  %v944_v37 = vadd.f32 %v943_v7, %v915_v1 }
 0x102   :  { %v918_v32 = vadd.f32 %v917_v11, %v888_v9 }
 0x108   :  { %v3028_v12 = vpop.f32.mrf.mxu2  ;;  %v3032_v14 = vpop.f32.mrf.mxu0 }
 0x109   :  { %v3030_v13 = vpop.f32.mrf.mxu3  ;;  %v3034_v15 = vpop.f32.mrf.mxu1 }
 0x10a   :  { %v920_v11 = vadd.f32 %v3034_v15, %v3032_v14 }
 0x110   :  { %v3036_v20 = vpop.f32.mrf.mxu2  ;;  %v3040_v51 = vpop.f32.mrf.mxu0 }
 0x111   :  { %v3038_v50 = vpop.f32.mrf.mxu3  ;;  %v3042_v56 = vpop.f32.mrf.mxu1 }
 0x118   :  { %v3044_v21 = vpop.f32.mrf.mxu2  ;;  %v3048_v23 = vpop.f32.mrf.mxu0 }
 0x119   :  { %v3046_v22 = vpop.f32.mrf.mxu3  ;;  %v3050_v25 = vpop.f32.mrf.mxu1 }
 0x120   :  { %v3052_v27 = vpop.f32.mrf.mxu2  ;;  %v994_v29 = vpop.f32.mrf.mxu0 }
 0x121   :  { %v3054_v28 = vpop.f32.mrf.mxu3  ;;  %v1023_v30 = vpop.f32.mrf.mxu1 }
 0x122   :  { %v1024_v38 = vadd.f32 %v1023_v30, %v994_v29  ;;  %v1109_v30 = vadd.f32 %v3070_v4, %v2978_v10 }
 0x128   :  { %v1052_v31 = vpop.f32.mrf.mxu2  ;;  %v996_v40 = vpop.f32.mrf.mxu0 }
 0x129   :  { %v1053_v33 = vadd.f32 %v1052_v31, %v1024_v38  ;;  %v1081_v35 = vpop.f32.mrf.mxu3  ;;  %v1025_v16 = vpop.f32.mrf.mxu1  ;;  %v3077_v31 = vadd.f32 %v972_v8, %v944_v37 }
 0x12a   :  { %v1026_v46 = vadd.f32 %v1025_v16, %v996_v40 }
 0x12b   :  { %v3060_v19 = vadd.f32 %v1081_v35, %v1053_v33  ;;  %v1113_v16 = vadd.f32 %v3077_v31, %v2980_v44 }
 0x12d   :  { %v1102_v41 = vadd.f32 %v1101_v17, %v3060_v19  ;;  %v947_v17 = vadd.f32 %v3028_v12, %v918_v32 }
 0x12f   :  { %1103 = vadd.xlane.f32.xlu0 %v1102_v41  ;;  %v3086_v8 = vadd.f32 %v3030_v13, %v947_v17  ;;  %v1447_v17 = vld [vmem:[%s3456_s3 + $0x18] sm:$0xff] }
 0x130   :  { %v1054_v47 = vpop.f32.mrf.mxu2  ;;  %v999_v55 = vpop.f32.mrf.mxu0 }
 0x131   :  { %v1055_v49 = vadd.f32 %v1054_v47, %v1026_v46  ;;  %v1083_v52 = vpop.f32.mrf.mxu3  ;;  %v1028_v58 = vpop.f32.mrf.mxu1  ;;  %v1117_v12 = vadd.f32 %v3086_v8, %v2986_v24 }
 0x132   :  { %v1029_v62 = vadd.f32 %v1028_v58, %v999_v55 }
 0x133   :  { %v3067_v61 = vadd.f32 %v1083_v52, %v1055_v49  ;;  %v949_v52 = vadd.f32 %v3036_v20, %v920_v11  ;;  %v1165_v11 = vlaneseq }
 0x135   :  { %v1106_v3 = vadd.f32 %v1105_v59, %v3067_v61  ;;  %v3097_v13 = vadd.f32 %v3038_v50, %v949_v52  ;;  %v923_v59 = vadd.f32 %v3042_v56, %v3040_v51  ;;  %v925_v56 = vadd.f32 %v3050_v25, %v3048_v23 }
 0x137   :  { %1107 = vadd.xlane.f32.xlu0 %v1106_v3  ;;  %v1121_v20 = vadd.f32 %v3097_v13, %v2988_v36  ;;  %v952_v1 = vadd.f32 %v3044_v21, %v923_v59  ;;  %v954_v21 = vadd.f32 %v3052_v27, %v925_v56 }
 0x138   :  { %v1057_v63 = vpop.f32.mrf.mxu2  ;;  %v1001_v26 = vpop.f32.mrf.mxu0 }
 0x139   :  { %v1058_v2 = vadd.f32 %v1057_v63, %v1029_v62  ;;  %v1086_v57 = vpop.f32.mrf.mxu3  ;;  %v1030_v29 = vpop.f32.mrf.mxu1 }
 0x13a   :  { %v1031_v6 = vadd.f32 %v1030_v29, %v1001_v26  ;;  %v3108_v26 = vadd.f32 %v3046_v22, %v952_v1  ;;  %v3119_v22 = vadd.f32 %v3054_v28, %v954_v21  ;;  %v1448_v28 = vld [vmem:[%s3456_s3 + $0x20] sm:$0xff] }
 0x13b   :  { %v3074_v38 = vadd.f32 %v1086_v57, %v1058_v2 }
 0x13c   :  { %v1125_v37 = vadd.f32 %v3108_v26, %v2994_v34 }
 0x13d   :  { %v1110_v5 = vadd.f32 %v1109_v30, %v3074_v38 }
 0x13f   :  { %1111 = vadd.xlane.f32.xlu1 %v1110_v5 }
 0x140   :  { %v1059_v33 = vpop.f32.mrf.mxu2  ;;  %v1004_v54 = vpop.f32.mrf.mxu0 }
 0x141   :  { %v1060_v35 = vadd.f32 %v1059_v33, %v1031_v6  ;;  %v1088_v53 = vpop.f32.mrf.mxu3  ;;  %v1033_v40 = vpop.f32.mrf.mxu1 }
 0x142   :  { %v1034_v18 = vadd.f32 %v1033_v40, %v1004_v54  ;;  %v1129_v54 = vadd.f32 %v3119_v22, %v3002_v45 }
 0x143   :  { %v3082_v7 = vadd.f32 %v1088_v53, %v1060_v35 }
 0x145   :  { %v1114_v41 = vadd.f32 %v1113_v16, %v3082_v7  ;;  %v1446_v16 = vld [vmem:[%s3456_s3 + $0x10] sm:$0xff] }
 0x147   :  { %1115 = vadd.xlane.f32.xlu1 %v1114_v41  ;;  %v3137_v41 = vpop.permute.xlu0 %1392 }
 0x148   :  { %v1062_v9 = vpop.f32.mrf.mxu2  ;;  %v1006_v47 = vpop.f32.mrf.mxu0 }
 0x149   :  { %v1063_v43 = vadd.f32 %v1062_v9, %v1034_v18  ;;  %v1091_v46 = vpop.f32.mrf.mxu3  ;;  %v1035_v49 = vpop.f32.mrf.mxu1 }
 0x14a   :  { %v1036_v14 = vadd.f32 %v1035_v49, %v1006_v47  ;;  %v3135_v18 = vpop.permute.xlu1 %1382  ;;  %v1166_v47 = vand.u32 127, %v1165_v11 }
 0x14b   :  { %v3093_v55 = vadd.f32 %v1091_v46, %v1063_v43  ;;  %v3143_v46 = vpop.permute.xlu2 %1387 }
 0x14d   :  { %v1118_v58 = vadd.f32 %v1117_v12, %v3093_v55  ;;  %v3147_v12 = vadd.s32 256, %v1166_v47 }
 0x14f   :  { %1119 = vadd.xlane.f32.xlu2 %v1118_v58  ;;  %v3141_v43 = vpop.permute.xlu0 %1459  ;;  %vm1171_vm0 = vcmp.lt.s32.totalorder %v3147_v12, 260  ;;  %v1451_v12 = vld [vmem:[%s3456_s3 + $0x38] sm:$0xff] }
 0x150   :  { %v1064_v15 = vpop.f32.mrf.mxu2  ;;  %v1009_v3 = vpop.f32.mrf.mxu0 }
 0x151   :  { %v1065_v60 = vadd.f32 %v1064_v15, %v1036_v14  ;;  %v1093_v62 = vpop.f32.mrf.mxu3  ;;  %v1038_v63 = vpop.f32.mrf.mxu1 }
 0x152   :  { %v1039_v57 = vadd.f32 %v1038_v63, %v1009_v3  ;;  %v3139_v9 = vpop.permute.xlu1 %1402 }
 0x153   :  { %v3104_v2 = vadd.f32 %v1093_v62, %v1065_v60  ;;  %v3157_v60 = vpop.permute.xlu2 %1397 }
 0x155   :  { %v1122_v50 = vadd.f32 %v1121_v20, %v3104_v2 }
 0x157   :  { %1123 = vadd.xlane.f32.xlu2 %v1122_v50 }
 0x158   :  { %v1067_v51 = vpop.f32.mrf.mxu2  ;;  %v1011_v32 = vpop.f32.mrf.mxu0 }
 0x159   :  { %v1068_v29 = vadd.f32 %v1067_v51, %v1039_v57  ;;  %v1096_v30 = vpop.f32.mrf.mxu3  ;;  %v1040_v6 = vpop.f32.mrf.mxu1 }
 0x15a   :  { %v1041_v35 = vadd.f32 %v1040_v6, %v1011_v32  ;;  %v3145_v49 = vpop.permute.xlu1 %1412 }
 0x15b   :  { %v3115_v5 = vadd.f32 %v1096_v30, %v1068_v29  ;;  %v3186_v21 = vpop.permute.xlu2 %1407 }
 0x15d   :  { %v1126_v33 = vadd.f32 %v1125_v37, %v3115_v5 }
 0x15f   :  { %1127 = vadd.xlane.f32.xlu0 %v1126_v33 }
 0x160   :  { %v1069_v53 = vpop.f32.mrf.mxu2 }
 0x161   :  { %v1070_v23 = vadd.f32 %v1069_v53, %v1041_v35  ;;  %v1098_v25 = vpop.f32.mrf.mxu3 }
 0x163   :  { %v3123_v40 = vadd.f32 %v1098_v25, %v1070_v23 }
 0x165   :  { %v1130_v27 = vadd.f32 %v1129_v54, %v3123_v40 }
 0x167   :  { %1131 = vadd.xlane.f32.xlu1 %v1130_v27 }
 0x16f   :  { %1464 = vperm.xlu2 %2186, %v1446_v16   ;;  %v3207_v16 = vpop.permute.xlu2 %1417 }
 0x173   :  { %1474 = vperm.xlu0 %2187, %v1448_v28  }
 0x180   :  { %1469 = vperm.xlu1 %2185, %v1447_v17  }
 0x1a2   :  { %v1104_v52 = vpop.xlane.xlu0 %1103 }
 0x1a3   :  { %v1133_v58 = vmul.f32 0.0038461538, %v1104_v52 }
 0x1a5   :  { %v3151_v59 = vsub.f32 %v2970_v0, %v1133_v58  ;;  %v3154_v14 = vsub.f32 %v3056_v39, %v1133_v58  ;;  %v1143_v15 = vsub.f32 %v3060_v19, %v1133_v58  ;;  %v3169_v39 = vpop.permute.xlu1 %1454 }
 0x1a7   :  { %v3161_v62 = vsel %vm1171_vm0, %v1143_v15, 0.0  ;;  %v1196_v3 = vmul.f32 %v3151_v59, %v3151_v59  ;;  %v1197_v63 = vmul.f32 %v3154_v14, %v3154_v14 }
 0x1a8   :  { %v1198_v0 = vmul.f32 %v3161_v62, %v3161_v62 }
 0x1a9   :  { %v1220_v20 = vadd.f32 %v1197_v63, %v1196_v3 }
 0x1aa   :  { %v1108_v1 = vpop.xlane.xlu0 %1107 }
 0x1ab   :  { %v1134_v19 = vmul.f32 0.0038461538, %v1108_v1  ;;  %v1221_v57 = vadd.f32 %v1220_v20, %v1198_v0 }
 0x1ad   :  { %v3172_v50 = vsub.f32 %v2972_v48, %v1134_v19  ;;  %v3175_v51 = vsub.f32 %v3063_v42, %v1134_v19  ;;  %v1146_v56 = vsub.f32 %v3067_v61, %v1134_v19  ;;  %1222 = vadd.xlane.f32.xlu2 %v1221_v57 }
 0x1af   :  { %v3180_v29 = vsel %vm1171_vm0, %v1146_v56, 0.0  ;;  %v1199_v30 = vmul.f32 %v3172_v50, %v3172_v50  ;;  %v1200_v37 = vmul.f32 %v3175_v51, %v3175_v51 }
 0x1b0   :  { %v1201_v48 = vmul.f32 %v3180_v29, %v3180_v29 }
 0x1b1   :  { %v1224_v42 = vadd.f32 %v1200_v37, %v1199_v30 }
 0x1b2   :  { %v1112_v32 = vpop.xlane.xlu1 %1111 }
 0x1b3   :  { %v1135_v6 = vmul.f32 0.0038461538, %v1112_v32  ;;  %v1225_v61 = vadd.f32 %v1224_v42, %v1201_v48 }
 0x1b5   :  { %v3191_v33 = vsub.f32 %v2978_v10, %v1135_v6  ;;  %v3194_v35 = vsub.f32 %v3070_v4, %v1135_v6  ;;  %v1149_v53 = vsub.f32 %v3074_v38, %v1135_v6  ;;  %1226 = vadd.xlane.f32.xlu0 %v1225_v61 }
 0x1b7   :  { %v3199_v23 = vsel %vm1171_vm0, %v1149_v53, 0.0  ;;  %v1202_v25 = vmul.f32 %v3191_v33, %v3191_v33  ;;  %v1203_v54 = vmul.f32 %v3194_v35, %v3194_v35 }
 0x1b8   :  { %v1204_v10 = vmul.f32 %v3199_v23, %v3199_v23 }
 0x1b9   :  { %v1228_v27 = vadd.f32 %v1203_v54, %v1202_v25 }
 0x1ba   :  { %v1116_v4 = vpop.xlane.xlu1 %1115 }
 0x1bb   :  { %v1136_v28 = vmul.f32 0.0038461538, %v1116_v4  ;;  %v1229_v38 = vadd.f32 %v1228_v27, %v1204_v10 }
 0x1bd   :  { %v3210_v17 = vsub.f32 %v2980_v44, %v1136_v28  ;;  %v3213_v11 = vsub.f32 %v3077_v31, %v1136_v28  ;;  %v1152_v47 = vsub.f32 %v3082_v7, %v1136_v28  ;;  %1230 = vadd.xlane.f32.xlu1 %v1229_v38 }
 0x1bf   :  { %v3218_v52 = vsel %vm1171_vm0, %v1152_v47, 0.0  ;;  %v1205_v58 = vmul.f32 %v3210_v17, %v3210_v17  ;;  %v1206_v15 = vmul.f32 %v3213_v11, %v3213_v11 }
 0x1c0   :  { %v1207_v44 = vmul.f32 %v3218_v52, %v3218_v52 }
 0x1c1   :  { %v1232_v3 = vadd.f32 %v1206_v15, %v1205_v58 }
 0x1c2   :  { %v1120_v63 = vpop.xlane.xlu2 %1119 }
 0x1c3   :  { %v1137_v31 = vmul.f32 0.0038461538, %v1120_v63  ;;  %v1233_v0 = vadd.f32 %v1232_v3, %v1207_v44 }
 0x1c5   :  { %v3227_v7 = vsub.f32 %v2986_v24, %v1137_v31  ;;  %v3230_v20 = vsub.f32 %v3086_v8, %v1137_v31  ;;  %v1155_v1 = vsub.f32 %v3093_v55, %v1137_v31  ;;  %1234 = vadd.xlane.f32.xlu2 %v1233_v0 }
 0x1c7   :  { %v3235_v19 = vsel %vm1171_vm0, %v1155_v1, 0.0  ;;  %v1208_v57 = vmul.f32 %v3227_v7, %v3227_v7  ;;  %v1209_v56 = vmul.f32 %v3230_v20, %v3230_v20 }
 0x1c8   :  { %v1210_v24 = vmul.f32 %v3235_v19, %v3235_v19 }
 0x1c9   :  { %v1236_v30 = vadd.f32 %v1209_v56, %v1208_v57 }
 0x1ca   :  { %v1124_v37 = vpop.xlane.xlu2 %1123 }
 0x1cb   :  { %v1138_v8 = vmul.f32 0.0038461538, %v1124_v37  ;;  %v1237_v48 = vadd.f32 %v1236_v30, %v1210_v24 }
 0x1cd   :  { %v3244_v55 = vsub.f32 %v2988_v36, %v1138_v8  ;;  %v3247_v42 = vsub.f32 %v3097_v13, %v1138_v8  ;;  %v1158_v32 = vsub.f32 %v3104_v2, %v1138_v8  ;;  %1238 = vadd.xlane.f32.xlu0 %v1237_v48 }
 0x1cf   :  { %v3252_v6 = vsel %vm1171_vm0, %v1158_v32, 0.0  ;;  %v1211_v61 = vmul.f32 %v3244_v55, %v3244_v55  ;;  %v1212_v53 = vmul.f32 %v3247_v42, %v3247_v42 }
 0x1d0   :  { %v1213_v36 = vmul.f32 %v3252_v6, %v3252_v6 }
 0x1d1   :  { %v1240_v25 = vadd.f32 %v1212_v53, %v1211_v61 }
 0x1d2   :  { %v1128_v54 = vpop.xlane.xlu0 %1127  ;;  %v3303_v24 = vpop.permute.xlu2 %1464 }
 0x1d3   :  { %v1139_v13 = vmul.f32 0.0038461538, %v1128_v54  ;;  %v1241_v10 = vadd.f32 %v1240_v25, %v1213_v36 }
 0x1d5   :  { %v3261_v2 = vsub.f32 %v2994_v34, %v1139_v13  ;;  %v3264_v27 = vsub.f32 %v3108_v26, %v1139_v13  ;;  %v1161_v4 = vsub.f32 %v3115_v5, %v1139_v13  ;;  %1242 = vadd.xlane.f32.xlu1 %v1241_v10 }
 0x1d7   :  { %v3269_v28 = vsel %vm1171_vm0, %v1161_v4, 0.0  ;;  %v1214_v38 = vmul.f32 %v3261_v2, %v3261_v2  ;;  %v1215_v47 = vmul.f32 %v3264_v27, %v3264_v27 }
 0x1d8   :  { %v1216_v34 = vmul.f32 %v3269_v28, %v3269_v28 }
 0x1d9   :  { %v1244_v58 = vadd.f32 %v1215_v47, %v1214_v38 }
 0x1da   :  { %v1132_v15 = vpop.xlane.xlu1 %1131 }
 0x1db   :  { %v1140_v26 = vmul.f32 0.0038461538, %v1132_v15  ;;  %v1245_v44 = vadd.f32 %v1244_v58, %v1216_v34 }
 0x1dd   :  { %v3278_v5 = vsub.f32 %v3002_v45, %v1140_v26  ;;  %v3281_v3 = vsub.f32 %v3119_v22, %v1140_v26  ;;  %v1164_v63 = vsub.f32 %v3123_v40, %v1140_v26  ;;  %1246 = vadd.xlane.f32.xlu2 %v1245_v44  ;;  %v1450_v22 = vld [vmem:[%s3456_s3 + $0x30] sm:$0xff]  ;;  %v1449_v40 = vld [vmem:[%s3456_s3 + $0x28] sm:$0xff] }
 0x1df   :  { %v3286_v31 = vsel %vm1171_vm0, %v1164_v63, 0.0  ;;  %v1217_v0 = vmul.f32 %v3278_v5, %v3278_v5  ;;  %v1218_v1 = vmul.f32 %v3281_v3, %v3281_v3 }
 0x1e0   :  { %v1219_v45 = vmul.f32 %v3286_v31, %v3286_v31 }
 0x1e1   :  { %v1248_v57 = vadd.f32 %v1218_v1, %v1217_v0 }
 0x1e3   :  { %v1249_v56 = vadd.f32 %v1248_v57, %v1219_v45 }
 0x1e5   :  { %1250 = vadd.xlane.f32.xlu0 %v1249_v56  ;;  %v3305_v30 = vpop.permute.xlu0 %1474 }
 0x1ee   :  { %1484 = vperm.xlu1 %2185, %v1450_v22  }
 0x1f2   :  { %v3307_v32 = vpop.permute.xlu1 %1469 }
 0x1f5   :  { %1479 = vperm.xlu2 %2186, %v1449_v40  }
 0x1f9   :  { %1489 = vperm.xlu0 %2187, %v1451_v12  }
 0x220   :  { %v1223_v37 = vpop.xlane.xlu2 %1222 }
 0x221   :  { %v1252_v8 = vmul.f32 0.0038461538, %v1223_v37 }
 0x223   :  { %v1260_v48 = vadd.f32 1e-05, %v1252_v8 }
 0x225   :  { %2188 = vrsqrt.f32 %v1260_v48  ;;  %vm1274_vm2 = vweird.f32 %v1260_v48 }
 0x228   :  { %v1227_v61 = vpop.xlane.xlu0 %1226 }
 0x229   :  { %v1253_v53 = vmul.f32 0.0038461538, %v1227_v61 }
 0x22b   :  { %v2189_v36 = vpop.eup %2188  ;;  %v1261_v25 = vadd.f32 1e-05, %v1253_v53 }
 0x22c   :  { %v1269_v54 = vmul.f32 %v2189_v36, %v1260_v48  ;;  %vm1275_vm1 = vweird.f32 %v2189_v36 }
 0x22d   :  { %2190 = vrsqrt.f32 %v1261_v25  ;;  %vm1276_vm3 = vmor %vm1274_vm2, %vm1275_vm1  ;;  %vm1284_vm5 = vweird.f32 %v1261_v25 }
 0x22e   :  { %v1270_v13 = vmul.f32 %v2189_v36, %v1269_v54 }
 0x230   :  { %v1271_v10 = vmul.f32 0.5, %v1270_v13  ;;  %v1231_v4 = vpop.xlane.xlu1 %1230 }
 0x231   :  { %v1254_v38 = vmul.f32 0.0038461538, %v1231_v4 }
 0x232   :  { %v1272_v47 = vsub.f32 1.5, %v1271_v10 }
 0x233   :  { %v2191_v34 = vpop.eup %2190  ;;  %v3309_v58 = vadd.f32 1e-05, %v1254_v38 }
 0x234   :  { %v1273_v15 = vmul.f32 %v2189_v36, %v1272_v47  ;;  %v1279_v26 = vmul.f32 %v2191_v34, %v1261_v25  ;;  %vm1285_vm4 = vweird.f32 %v2191_v34 }
 0x235   :  { %2192 = vrsqrt.f32 %v3309_v58  ;;  %vm1286_vm9 = vmor %vm1284_vm5, %vm1285_vm4  ;;  %vm1294_vm11 = vweird.f32 %v3309_v58 }
 0x236   :  { %v1277_v44 = vsel %vm1276_vm3, %v2189_v36, %v1273_v15  ;;  %v1280_v63 = vmul.f32 %v2191_v34, %v1279_v26 }
 0x237   :  { %v1348_v0 = vmul.f32 %v1277_v44, %v3151_v59  ;;  %v1349_v1 = vmul.f32 %v1277_v44, %v3154_v14  ;;  %v1350_v45 = vmul.f32 %v1277_v44, %v3161_v62 }
 0x238   :  { %v1281_v57 = vmul.f32 0.5, %v1280_v63  ;;  %v1235_v56 = vpop.xlane.xlu2 %1234 }
 0x239   :  { %v1420_v22 = vmul.f32 %v3135_v18, %v1348_v0  ;;  %v1421_v40 = vmul.f32 %v3135_v18, %v1349_v1  ;;  %v1422_v12 = vmul.f32 %v3135_v18, %v1350_v45  ;;  %v1255_v37 = vmul.f32 0.0038461538, %v1235_v56 }
 0x23a   :  { %v1282_v8 = vsub.f32 1.5, %v1281_v57 }
 0x23b   :  { %v2193_v48 = vpop.eup %2192  ;;  %v1492_v61 = vadd.f32 %v3169_v39, %v1420_v22  ;;  %v1493_v59 = vadd.f32 %v3169_v39, %v1421_v40  ;;  %v1494_v14 = vadd.f32 %v3169_v39, %v1422_v12  ;;  %v3322_v36 = vadd.f32 1e-05, %v1255_v37 }
 0x23c   :  { %v1283_v53 = vmul.f32 %v2191_v34, %v1282_v8  ;;  %v1289_v62 = vmul.f32 %v2193_v48, %v3309_v58  ;;  %vm1295_vm10 = vweird.f32 %v2193_v48 }
 0x23d   :  { %vm1516_vm6 = vcmp.gt.f32.partialorder %v1492_v61, 0.0  ;;  %vm1517_vm7 = vcmp.gt.f32.partialorder %v1493_v59, 0.0  ;;  %vm1518_vm8 = vcmp.gt.f32.partialorder %v1494_v14, 0.0  ;;  %v1540_v18 = vmul.f32 0.2, %v1492_v61  ;;  %vm1296_vm14 = vmor %vm1294_vm11, %vm1295_vm10 }
 0x23e   :  { %v1541_v54 = vmul.f32 0.2, %v1493_v59  ;;  %v1542_v13 = vmul.f32 0.2, %v1494_v14  ;;  %v1287_v10 = vsel %vm1286_vm9, %v2191_v34, %v1283_v53  ;;  %v1290_v4 = vmul.f32 %v2193_v48, %v1289_v62 }
 0x23f   :  { %v1564_v38 = vsel %vm1516_vm6, %v1492_v61, %v1540_v18  ;;  %v1351_v47 = vmul.f32 %v1287_v10, %v3172_v50  ;;  %v1352_v39 = vmul.f32 %v1287_v10, %v3175_v51  ;;  %v1353_v25 = vmul.f32 %v1287_v10, %v3180_v29 }
 0x240   :  { %v1565_v15 = vsel %vm1517_vm7, %v1493_v59, %v1541_v54  ;;  %v1566_v26 = vsel %vm1518_vm8, %v1494_v14, %v1542_v13  ;;  %v1291_v44 = vmul.f32 0.5, %v1290_v4  ;;  %2194 = vrsqrt.f32 %v3322_v36  ;;  %v1239_v63 = vpop.xlane.xlu0 %1238 }
 0x241   :  { %v1588_v0 = vpack.c.bf16 %v1565_v15, %v1564_v38  ;;  %v1589_v1 = vpack.c.bf16 %v1566_v26, %v1566_v26  ;;  %v1423_v45 = vmul.f32 %v3143_v46, %v1351_v47  ;;  %v1424_v34 = vmul.f32 %v3143_v46, %v1352_v39 }
 0x242   :  { %v1425_v57 = vmul.f32 %v3143_v46, %v1353_v25  ;;  %v1292_v56 = vsub.f32 1.5, %v1291_v44  ;;  %v1256_v50 = vmul.f32 0.0038461538, %v1239_v63  ;;  %vm1304_vm4 = vweird.f32 %v3322_v36 }
 0x243   :  { %1604 = vst [vmem:[%s3457_s4] sm:$0xff] %v1588_v0  ;;  %v1495_v51 = vadd.f32 %v3141_v43, %v1423_v45  ;;  %v1496_v29 = vadd.f32 %v3141_v43, %v1424_v34 }
 0x244   :  { %1605 = vst [vmem:[%s3457_s4 + $0x8] sm:$0xf] %v1589_v1  ;;  %v1497_v22 = vadd.f32 %v3141_v43, %v1425_v57  ;;  %v1293_v40 = vmul.f32 %v2193_v48, %v1292_v56  ;;  %v3341_v46 = vadd.f32 1e-05, %v1256_v50 }
 0x245   :  { %vm1519_vm12 = vcmp.gt.f32.partialorder %v1495_v51, 0.0  ;;  %vm1520_vm13 = vcmp.gt.f32.partialorder %v1496_v29, 0.0  ;;  %v1543_v12 = vmul.f32 0.2, %v1495_v51  ;;  %v1544_v37 = vmul.f32 0.2, %v1496_v29 }
 0x246   :  { %v2195_v8 = vpop.eup %2194  ;;  %vm1521_vm15 = vcmp.gt.f32.partialorder %v1497_v22, 0.0  ;;  %v1545_v61 = vmul.f32 0.2, %v1497_v22  ;;  %v1297_v59 = vsel %vm1296_vm14, %v2193_v48, %v1293_v40  ;;  %2196 = vrsqrt.f32 %v3341_v46 }
 0x247   :  { %v1567_v14 = vsel %vm1519_vm12, %v1495_v51, %v1543_v12  ;;  %v1568_v53 = vsel %vm1520_vm13, %v1496_v29, %v1544_v37  ;;  %v1354_v43 = vmul.f32 %v1297_v59, %v3191_v33  ;;  %v1355_v62 = vmul.f32 %v1297_v59, %v3194_v35 }
 0x248   :  { %v1569_v58 = vsel %vm1521_vm15, %v1497_v22, %v1545_v61  ;;  %v1590_v18 = vpack.c.bf16 %v1568_v53, %v1567_v14  ;;  %v1356_v54 = vmul.f32 %v1297_v59, %v3199_v23  ;;  %v1299_v13 = vmul.f32 %v2195_v8, %v3322_v36  ;;  %v1243_v10 = vpop.xlane.xlu1 %1242 }
 0x249   :  { %v1591_v4 = vpack.c.bf16 %v1569_v58, %v1569_v58  ;;  %v1426_v38 = vmul.f32 %v3137_v41, %v1354_v43  ;;  %v1427_v48 = vmul.f32 %v3137_v41, %v1355_v62  ;;  %v1257_v35 = vmul.f32 0.0038461538, %v1243_v10 }
 0x24a   :  { %1606 = vst [vmem:[%s3457_s4 + $0xc] sm:$0xff] %v1590_v18  ;;  %v1428_v33 = vmul.f32 %v3137_v41, %v1356_v54  ;;  %v1300_v47 = vmul.f32 %v2195_v8, %v1299_v13  ;;  %vm1305_vm0 = vweird.f32 %v2195_v8  ;;  %vm1314_vm7 = vweird.f32 %v3341_v46 }
 0x24b   :  { %1607 = vst [vmem:[%s3457_s4 + $0x14] sm:$0xf] %v1591_v4  ;;  %v1498_v23 = vadd.f32 %v3303_v24, %v1426_v38  ;;  %v1499_v39 = vadd.f32 %v3303_v24, %v1427_v48  ;;  %v3360_v44 = vadd.f32 1e-05, %v1257_v35  ;;  %vm1306_vm5 = vmor %vm1304_vm4, %vm1305_vm0 }
 0x24c   :  { %v2197_v25 = vpop.eup %2196  ;;  %v1500_v15 = vadd.f32 %v3303_v24, %v1428_v33  ;;  %v1301_v26 = vmul.f32 0.5, %v1300_v47 }
 0x24d   :  { %vm1522_vm1 = vcmp.gt.f32.partialorder %v1498_v23, 0.0  ;;  %vm1523_vm2 = vcmp.gt.f32.partialorder %v1499_v39, 0.0  ;;  %v1546_v41 = vmul.f32 0.2, %v1498_v23  ;;  %v1547_v63 = vmul.f32 0.2, %v1499_v39 }
 0x24e   :  { %vm1524_vm3 = vcmp.gt.f32.partialorder %v1500_v15, 0.0  ;;  %v1548_v0 = vmul.f32 0.2, %v1500_v15  ;;  %v1302_v1 = vsub.f32 1.5, %v1301_v26  ;;  %v1309_v45 = vmul.f32 %v2197_v25, %v3341_v46 }
 0x24f   :  { %v1570_v34 = vsel %vm1522_vm1, %v1498_v23, %v1546_v41  ;;  %v1571_v57 = vsel %vm1523_vm2, %v1499_v39, %v1547_v63  ;;  %2198 = vrsqrt.f32 %v3360_v44  ;;  %vm1315_vm6 = vweird.f32 %v2197_v25 }
 0x250   :  { %v1572_v24 = vsel %vm1524_vm3, %v1500_v15, %v1548_v0  ;;  %v1592_v56 = vpack.c.bf16 %v1571_v57, %v1570_v34  ;;  %v1303_v50 = vmul.f32 %v2195_v8, %v1302_v1  ;;  %v1310_v51 = vmul.f32 %v2197_v25, %v1309_v45  ;;  %v1247_v29 = vpop.xlane.xlu2 %1246  ;;  %vm1316_vm8 = vmor %vm1314_vm7, %vm1315_vm6 }
 0x251   :  { %v1593_v22 = vpack.c.bf16 %v1572_v24, %v1572_v24  ;;  %v1258_v40 = vmul.f32 0.0038461538, %v1247_v29  ;;  %vm1324_vm13 = vweird.f32 %v3360_v44 }
 0x252   :  { %1608 = vst [vmem:[%s3457_s4 + $0x18] sm:$0xff] %v1592_v56  ;;  %v1307_v12 = vsel %vm1306_vm5, %v2195_v8, %v1303_v50  ;;  %v1311_v37 = vmul.f32 0.5, %v1310_v51 }
 0x253   :  { %1609 = vst [vmem:[%s3457_s4 + $0x20] sm:$0xf] %v1593_v22  ;;  %v1357_v36 = vmul.f32 %v1307_v12, %v3210_v17  ;;  %v1358_v61 = vmul.f32 %v1307_v12, %v3213_v11  ;;  %v1359_v59 = vmul.f32 %v1307_v12, %v3218_v52  ;;  %v3375_v14 = vadd.f32 1e-05, %v1258_v40 }
 0x254   :  { %v1312_v53 = vsub.f32 1.5, %v1311_v37 }
 0x255   :  { %v2199_v43 = vpop.eup %2198  ;;  %v1429_v62 = vmul.f32 %v3157_v60, %v1357_v36  ;;  %v1430_v8 = vmul.f32 %v3157_v60, %v1358_v61  ;;  %v1431_v58 = vmul.f32 %v3157_v60, %v1359_v59  ;;  %2200 = vrsqrt.f32 %v3375_v14 }
 0x256   :  { %v1313_v18 = vmul.f32 %v2197_v25, %v1312_v53  ;;  %v1319_v17 = vmul.f32 %v2199_v43, %v3360_v44  ;;  %vm1325_vm9 = vweird.f32 %v2199_v43  ;;  %vm1334_vm3 = vweird.f32 %v3375_v14 }
 0x257   :  { %v1501_v11 = vadd.f32 %v3307_v32, %v1429_v62  ;;  %v1502_v52 = vadd.f32 %v3307_v32, %v1430_v8  ;;  %v1503_v54 = vadd.f32 %v3307_v32, %v1431_v58  ;;  %vm1326_vm1 = vmor %vm1324_vm13, %vm1325_vm9 }
 0x258   :  { %v1317_v13 = vsel %vm1316_vm8, %v2197_v25, %v1313_v18  ;;  %v1320_v10 = vmul.f32 %v2199_v43, %v1319_v17  ;;  %v1251_v4 = vpop.xlane.xlu0 %1250  ;;  %v1480_v58 = vpop.permute.xlu2 %1479 }
 0x259   :  { %vm1525_vm10 = vcmp.gt.f32.partialorder %v1501_v11, 0.0  ;;  %vm1526_vm11 = vcmp.gt.f32.partialorder %v1502_v52, 0.0  ;;  %vm1527_vm12 = vcmp.gt.f32.partialorder %v1503_v54, 0.0  ;;  %v1549_v60 = vmul.f32 0.2, %v1501_v11 }
 0x25a   :  { %v1550_v38 = vmul.f32 0.2, %v1502_v52  ;;  %v1551_v48 = vmul.f32 0.2, %v1503_v54  ;;  %v1360_v46 = vmul.f32 %v1317_v13, %v3227_v7  ;;  %v1361_v33 = vmul.f32 %v1317_v13, %v3230_v20 }
 0x25b   :  { %v2201_v47 = vpop.eup %2200  ;;  %v1573_v35 = vsel %vm1525_vm10, %v1501_v11, %v1549_v60  ;;  %v1362_v23 = vmul.f32 %v1317_v13, %v3235_v19  ;;  %v1321_v32 = vmul.f32 0.5, %v1320_v10  ;;  %v1259_v39 = vmul.f32 0.0038461538, %v1251_v4 }
 0x25c   :  { %v1574_v25 = vsel %vm1526_vm11, %v1502_v52, %v1550_v38  ;;  %v1575_v15 = vsel %vm1527_vm12, %v1503_v54, %v1551_v48  ;;  %v1432_v26 = vmul.f32 %v3139_v9, %v1360_v46  ;;  %v1433_v41 = vmul.f32 %v3139_v9, %v1361_v33 }
 0x25d   :  { %v1594_v63 = vpack.c.bf16 %v1574_v25, %v1573_v35  ;;  %v1595_v0 = vpack.c.bf16 %v1575_v15, %v1575_v15  ;;  %v1434_v1 = vmul.f32 %v3139_v9, %v1362_v23  ;;  %v1322_v45 = vsub.f32 1.5, %v1321_v32 }
 0x25e   :  { %v1504_v7 = vadd.f32 %v3305_v30, %v1432_v26  ;;  %v1505_v20 = vadd.f32 %v3305_v30, %v1433_v41  ;;  %v1329_v19 = vmul.f32 %v2201_v47, %v3375_v14  ;;  %vm1335_vm14 = vweird.f32 %v2201_v47 }
 0x25f   :  { %1610 = vst [vmem:[%s3457_s4 + $0x24] sm:$0xff] %v1594_v63  ;;  %v1506_v34 = vadd.f32 %v3305_v30, %v1434_v1  ;;  %v1323_v57 = vmul.f32 %v2199_v43, %v1322_v45  ;;  %v3400_v24 = vadd.f32 1e-05, %v1259_v39  ;;  %vm1336_vm4 = vmor %vm1334_vm3, %vm1335_vm14 }
 0x260   :  { %1611 = vst [vmem:[%s3457_s4 + $0x2c] sm:$0xf] %v1595_v0  ;;  %vm1528_vm15 = vcmp.gt.f32.partialorder %v1504_v7, 0.0  ;;  %vm1529_vm0 = vcmp.gt.f32.partialorder %v1505_v20, 0.0  ;;  %v1552_v9 = vmul.f32 0.2, %v1504_v7  ;;  %v1330_v44 = vmul.f32 %v2201_v47, %v1329_v19  ;;  %v1485_v23 = vpop.permute.xlu1 %1484 }
 0x261   :  { %vm1530_vm2 = vcmp.gt.f32.partialorder %v1506_v34, 0.0  ;;  %v1553_v56 = vmul.f32 0.2, %v1505_v20  ;;  %v1554_v50 = vmul.f32 0.2, %v1506_v34  ;;  %v1327_v51 = vsel %vm1326_vm1, %v2199_v43, %v1323_v57 }
 0x262   :  { %v1576_v29 = vsel %vm1528_vm15, %v1504_v7, %v1552_v9  ;;  %v1331_v30 = vmul.f32 0.5, %v1330_v44  ;;  %v1363_v22 = vmul.f32 %v1327_v51, %v3244_v55  ;;  %v1364_v40 = vmul.f32 %v1327_v51, %v3247_v42 }
 0x263   :  { %v1577_v12 = vsel %vm1529_vm0, %v1505_v20, %v1553_v56  ;;  %v1578_v37 = vsel %vm1530_vm2, %v1506_v34, %v1554_v50  ;;  %v1365_v36 = vmul.f32 %v1327_v51, %v3252_v6  ;;  %2202 = vrsqrt.f32 %v3400_v24 }
 0x264   :  { %v1596_v61 = vpack.c.bf16 %v1577_v12, %v1576_v29  ;;  %v1597_v59 = vpack.c.bf16 %v1578_v37, %v1578_v37  ;;  %v1332_v53 = vsub.f32 1.5, %v1331_v30  ;;  %v1435_v62 = vmul.f32 %v3186_v21, %v1363_v22 }
 0x265   :  { %v1436_v8 = vmul.f32 %v3186_v21, %v1364_v40  ;;  %v1437_v43 = vmul.f32 %v3186_v21, %v1365_v36  ;;  %vm1344_vm12 = vweird.f32 %v3400_v24 }
 0x266   :  { %1612 = vst [vmem:[%s3457_s4 + $0x30] sm:$0xff] %v1596_v61  ;;  %v1333_v55 = vmul.f32 %v2201_v47, %v1332_v53  ;;  %v1507_v42 = vadd.f32 %v1480_v58, %v1435_v62 }
 0x267   :  { %1613 = vst [vmem:[%s3457_s4 + $0x38] sm:$0xf] %v1597_v59  ;;  %v1508_v6 = vadd.f32 %v1480_v58, %v1436_v8  ;;  %v1509_v18 = vadd.f32 %v1480_v58, %v1437_v43 }
 0x268   :  { %vm1531_vm5 = vcmp.gt.f32.partialorder %v1507_v42, 0.0  ;;  %v1555_v17 = vmul.f32 0.2, %v1507_v42  ;;  %v1337_v21 = vsel %vm1336_vm4, %v2201_v47, %v1333_v55 }
 0x269   :  { %v2203_v11 = vpop.eup %2202  ;;  %vm1532_vm6 = vcmp.gt.f32.partialorder %v1508_v6, 0.0  ;;  %vm1533_vm7 = vcmp.gt.f32.partialorder %v1509_v18, 0.0  ;;  %v1556_v52 = vmul.f32 0.2, %v1508_v6  ;;  %v1557_v54 = vmul.f32 0.2, %v1509_v18 }
 0x26a   :  { %v1579_v13 = vsel %vm1531_vm5, %v1507_v42, %v1555_v17  ;;  %v1339_v14 = vmul.f32 %v2203_v11, %v3400_v24  ;;  %v1366_v10 = vmul.f32 %v1337_v21, %v3261_v2  ;;  %v1367_v38 = vmul.f32 %v1337_v21, %v3264_v27 }
 0x26b   :  { %v1580_v4 = vsel %vm1532_vm6, %v1508_v6, %v1556_v52  ;;  %v1581_v60 = vsel %vm1533_vm7, %v1509_v18, %v1557_v54  ;;  %v1368_v48 = vmul.f32 %v1337_v21, %v3269_v28  ;;  %vm1345_vm8 = vweird.f32 %v2203_v11  ;;  %v1490_v50 = vpop.permute.xlu0 %1489 }
 0x26c   :  { %v1598_v46 = vpack.c.bf16 %v1580_v4, %v1579_v13  ;;  %v1599_v33 = vpack.c.bf16 %v1581_v60, %v1581_v60  ;;  %v1340_v35 = vmul.f32 %v2203_v11, %v1339_v14  ;;  %v1438_v47 = vmul.f32 %v3145_v49, %v1366_v10  ;;  %vm1346_vm13 = vmor %vm1344_vm12, %vm1345_vm8 }
 0x26d   :  { %v1439_v32 = vmul.f32 %v3145_v49, %v1367_v38  ;;  %v1440_v39 = vmul.f32 %v3145_v49, %v1368_v48 }
 0x26e   :  { %1614 = vst [vmem:[%s3457_s4 + $0x3c] sm:$0xff] %v1598_v46  ;;  %v1341_v2 = vmul.f32 0.5, %v1340_v35  ;;  %v1510_v25 = vadd.f32 %v1485_v23, %v1438_v47 }
 0x26f   :  { %1615 = vst [vmem:[%s3457_s4 + $0x44] sm:$0xf] %v1599_v33  ;;  %v1511_v27 = vadd.f32 %v1485_v23, %v1439_v32  ;;  %v1512_v28 = vadd.f32 %v1485_v23, %v1440_v39 }
 0x270   :  { %v1342_v15 = vsub.f32 1.5, %v1341_v2  ;;  %vm1534_vm9 = vcmp.gt.f32.partialorder %v1510_v25, 0.0  ;;  %v1558_v26 = vmul.f32 0.2, %v1510_v25 }
 0x271   :  { %vm1535_vm10 = vcmp.gt.f32.partialorder %v1511_v27, 0.0  ;;  %vm1536_vm11 = vcmp.gt.f32.partialorder %v1512_v28, 0.0  ;;  %v1559_v41 = vmul.f32 0.2, %v1511_v27  ;;  %v1560_v49 = vmul.f32 0.2, %v1512_v28 }
 0x272   :  { %v1343_v63 = vmul.f32 %v2203_v11, %v1342_v15  ;;  %v1582_v0 = vsel %vm1534_vm9, %v1510_v25, %v1558_v26 }
 0x273   :  { %v1583_v1 = vsel %vm1535_vm10, %v1511_v27, %v1559_v41  ;;  %v1584_v45 = vsel %vm1536_vm11, %v1512_v28, %v1560_v49 }
 0x274   :  { %v1600_v7 = vpack.c.bf16 %v1583_v1, %v1582_v0  ;;  %v1601_v20 = vpack.c.bf16 %v1584_v45, %v1584_v45  ;;  %v1347_v19 = vsel %vm1346_vm13, %v2203_v11, %v1343_v63 }
 0x275   :  { %v1369_v34 = vmul.f32 %v1347_v19, %v3278_v5  ;;  %v1370_v57 = vmul.f32 %v1347_v19, %v3281_v3  ;;  %v1371_v9 = vmul.f32 %v1347_v19, %v3286_v31 }
 0x276   :  { %1616 = vst [vmem:[%s3457_s4 + $0x48] sm:$0xff] %v1600_v7 }
 0x277   :  { %1617 = vst [vmem:[%s3457_s4 + $0x50] sm:$0xf] %v1601_v20  ;;  %v1441_v24 = vmul.f32 %v3207_v16, %v1369_v34  ;;  %v1442_v44 = vmul.f32 %v3207_v16, %v1370_v57  ;;  %v1443_v56 = vmul.f32 %v3207_v16, %v1371_v9 }
 0x279   :  { %v1513_v5 = vadd.f32 %v1490_v50, %v1441_v24  ;;  %v1514_v51 = vadd.f32 %v1490_v50, %v1442_v44  ;;  %v1515_v3 = vadd.f32 %v1490_v50, %v1443_v56 }
 0x27b   :  { %vm1537_vm14 = vcmp.gt.f32.partialorder %v1513_v5, 0.0  ;;  %vm1538_vm15 = vcmp.gt.f32.partialorder %v1514_v51, 0.0  ;;  %vm1539_vm0 = vcmp.gt.f32.partialorder %v1515_v3, 0.0  ;;  %v1561_v31 = vmul.f32 0.2, %v1513_v5 }
 0x27c   :  { %v1562_v29 = vmul.f32 0.2, %v1514_v51  ;;  %v1563_v30 = vmul.f32 0.2, %v1515_v3 }
 0x27d   :  { %v1585_v22 = vsel %vm1537_vm14, %v1513_v5, %v1561_v31 }
 0x27e   :  { %v1586_v40 = vsel %vm1538_vm15, %v1514_v51, %v1562_v29  ;;  %v1587_v12 = vsel %vm1539_vm0, %v1515_v3, %v1563_v30 }
 0x27f   :  { %v1602_v37 = vpack.c.bf16 %v1586_v40, %v1585_v22  ;;  %v1603_v36 = vpack.c.bf16 %v1587_v12, %v1587_v12 }
 0x281   :  { %1618 = vst [vmem:[%s3457_s4 + $0x54] sm:$0xff] %v1602_v37 }
 0x282   :  { %1619 = vst [vmem:[%s3457_s4 + $0x5c] sm:$0xf] %v1603_v36 }

// kernel: discriminator_forward.9
= control target key start
LH: loop header
LB: loop body
LE: loop exit
PB: predicated region body
PF: predicated region fallthrough
CT: control target
= control target key end

     0   :  { %vm1028_vm0 = vcmask 565248   ;;  %vm1058_vm1 = vcmask 1045504   ;;  %vm1036_vm2 = vcmask 474112   ;;  %vm1054_vm3 = vcmask 572416   ;;  %s2764_s0 = inlined_call_operand.vmem [shape: bf16[1024,140], index: 0, kind: input, shape index: {}]   ;;  %s2765_s1 = inlined_call_operand.vmem [shape: bf16[1,1024], index: 1, kind: input, shape index: {}]   ;;  %s2766_s3 = inlined_call_operand.vmem [shape: f32[1,40], index: 3, kind: input, shape index: {}]   ;;  %s2767_s2 = inlined_call_operand.vmem [shape: f32[70,40], index: 2, kind: input, shape index: {}]   ;;  %s2768_s4 = inlined_call_operand.vmem [shape: f32[40,10], index: 4, kind: input, shape index: {}]   ;;  %s2769_s5 = inlined_call_operand.vmem [shape: f32[1,10], index: 5, kind: input, shape index: {}]   ;;  %s2770_s6 = inlined_call_operand.vmem [shape: f32[10,1], index: 6, kind: input, shape index: {}]   ;;  %s2771_s7 = inlined_call_operand.<no memory space> [shape: f32[1,1], index: 7, kind: input, shape index: {}]   ;;  %s2772_s8 = inlined_call_operand.vmem [shape: f32[2,1], index: 8, kind: output, shape index: {}]  }
   0x1   :  { %v1254_v0 = vld [vmem:[%s2764_s0 + $0x70] sm:$0xf]  ;;  %v1728_v1 = vld [vmem:[%s2764_s0 + $0x74] sm:$0xf0]  ;;  %v1246_v11 = vld [vmem:[%s2764_s0 + $0x60] sm:$0xf] }
   0x2   :  { %v1318_v2 = vld [vmem:[%s2764_s0 + $0xf0] sm:$0xf]  ;;  %v1255_v3 = vor.u32 %v1728_v1, %v1254_v0  ;;  %v1744_v4 = vld [vmem:[%s2764_s0 + $0xf4] sm:$0xf0]  ;;  %v1726_v13 = vld [vmem:[%s2764_s0 + $0x64] sm:$0xf0] }
   0x3   :  { %v1382_v5 = vld [vmem:[%s2764_s0 + $0x170] sm:$0xf]  ;;  %v1760_v6 = vld [vmem:[%s2764_s0 + $0x174] sm:$0xf0]  ;;  %v1319_v7 = vor.u32 %v1744_v4, %v1318_v2  ;;  %v1310_v14 = vld [vmem:[%s2764_s0 + $0xe0] sm:$0xf]  ;;  %v1247_v16 = vor.u32 %v1726_v13, %v1246_v11 }
   0x4   :  { %v1383_v8 = vor.u32 %v1760_v6, %v1382_v5  ;;  %v1446_v9 = vld [vmem:[%s2764_s0 + $0x1f0] sm:$0xf]  ;;  %v1776_v10 = vld [vmem:[%s2764_s0 + $0x1f4] sm:$0xf0]  ;;  %818 = vmatpush.bf16.msra.mxu0 %v1255_v3  ;;  %v1742_v15 = vld [vmem:[%s2764_s0 + $0xe4] sm:$0xf0] }
   0x5   :  { %v1447_v12 = vor.u32 %v1776_v10, %v1446_v9  ;;  %831 = vmatpush.bf16.msra.mxu1 %v1319_v7  ;;  %v1311_v17 = vor.u32 %v1742_v15, %v1310_v14  ;;  %v1374_v18 = vld [vmem:[%s2764_s0 + $0x160] sm:$0xf]  ;;  %v1758_v19 = vld [vmem:[%s2764_s0 + $0x164] sm:$0xf0]  ;;  %v1238_v23 = vld [vmem:[%s2764_s0 + $0x50] sm:$0xf] }
   0x6   :  { %844 = vmatpush.bf16.msra.mxu2 %v1383_v8  ;;  %v1438_v20 = vld [vmem:[%s2764_s0 + $0x1e0] sm:$0xf]  ;;  %v1375_v21 = vor.u32 %v1758_v19, %v1374_v18  ;;  %v1774_v22 = vld [vmem:[%s2764_s0 + $0x1e4] sm:$0xf0]  ;;  %v1724_v24 = vld [vmem:[%s2764_s0 + $0x54] sm:$0xf0] }
   0x7   :  { %857 = vmatpush.bf16.msra.mxu3 %v1447_v12  ;;  %v1439_v25 = vor.u32 %v1774_v22, %v1438_v20  ;;  %v1302_v26 = vld [vmem:[%s2764_s0 + $0xd0] sm:$0xf]  ;;  %v1740_v27 = vld [vmem:[%s2764_s0 + $0xd4] sm:$0xf0]  ;;  %v1239_v29 = vor.u32 %v1724_v24, %v1238_v23  ;;  %v1230_v35 = vld [vmem:[%s2764_s0 + $0x40] sm:$0xf] }
   0x8   :  { %v1366_v28 = vld [vmem:[%s2764_s0 + $0x150] sm:$0xf]  ;;  %819 = vmatpush.bf16.msra.mxu0 %v1247_v16  ;;  %v1756_v30 = vld [vmem:[%s2764_s0 + $0x154] sm:$0xf0]  ;;  %v1303_v33 = vor.u32 %v1740_v27, %v1302_v26  ;;  %v1722_v36 = vld [vmem:[%s2764_s0 + $0x44] sm:$0xf0] }
   0x9   :  { %v1430_v31 = vld [vmem:[%s2764_s0 + $0x1d0] sm:$0xf]  ;;  %v1772_v32 = vld [vmem:[%s2764_s0 + $0x1d4] sm:$0xf0]  ;;  %832 = vmatpush.bf16.msra.mxu1 %v1311_v17  ;;  %v1367_v34 = vor.u32 %v1756_v30, %v1366_v28  ;;  %v1294_v37 = vld [vmem:[%s2764_s0 + $0xc0] sm:$0xf]  ;;  %v1231_v44 = vor.u32 %v1722_v36, %v1230_v35 }
   0xa   :  { %845 = vmatpush.bf16.msra.mxu2 %v1375_v21  ;;  %v1431_v38 = vor.u32 %v1772_v32, %v1430_v31  ;;  %v1738_v39 = vld [vmem:[%s2764_s0 + $0xc4] sm:$0xf0]  ;;  %v1358_v40 = vld [vmem:[%s2764_s0 + $0x140] sm:$0xf]  ;;  %v1222_v47 = vld [vmem:[%s2764_s0 + $0x30] sm:$0xf] }
   0xb   :  { %858 = vmatpush.bf16.msra.mxu3 %v1439_v25  ;;  %v1754_v41 = vld [vmem:[%s2764_s0 + $0x144] sm:$0xf0]  ;;  %v1422_v42 = vld [vmem:[%s2764_s0 + $0x1c0] sm:$0xf]  ;;  %v1295_v45 = vor.u32 %v1738_v39, %v1294_v37  ;;  %v1720_v48 = vld [vmem:[%s2764_s0 + $0x34] sm:$0xf0] }
   0xc   :  { %v1770_v43 = vld [vmem:[%s2764_s0 + $0x1c4] sm:$0xf0]  ;;  %820 = vmatpush.bf16.msra.mxu0 %v1239_v29  ;;  %v1359_v46 = vor.u32 %v1754_v41, %v1358_v40  ;;  %v1286_v49 = vld [vmem:[%s2764_s0 + $0xb0] sm:$0xf]  ;;  %v1736_v51 = vld [vmem:[%s2764_s0 + $0xb4] sm:$0xf0]  ;;  %v1223_v56 = vor.u32 %v1720_v48, %v1222_v47 }
   0xd   :  { %833 = vmatpush.bf16.msra.mxu1 %v1303_v33  ;;  %v1423_v50 = vor.u32 %v1770_v43, %v1422_v42  ;;  %v1350_v52 = vld [vmem:[%s2764_s0 + $0x130] sm:$0xf]  ;;  %v1752_v53 = vld [vmem:[%s2764_s0 + $0x134] sm:$0xf0]  ;;  %v1287_v57 = vor.u32 %v1736_v51, %v1286_v49  ;;  %v1214_v59 = vld [vmem:[%s2764_s0 + $0x20] sm:$0xf] }
   0xe   :  { %846 = vmatpush.bf16.msra.mxu2 %v1367_v34  ;;  %v1414_v54 = vld [vmem:[%s2764_s0 + $0x1b0] sm:$0xf]  ;;  %v1768_v55 = vld [vmem:[%s2764_s0 + $0x1b4] sm:$0xf0]  ;;  %v1351_v58 = vor.u32 %v1752_v53, %v1350_v52  ;;  %v1718_v60 = vld [vmem:[%s2764_s0 + $0x24] sm:$0xf0] }
   0xf   :  { %859 = vmatpush.bf16.msra.mxu3 %v1431_v38  ;;  %v1278_v61 = vld [vmem:[%s2764_s0 + $0xa0] sm:$0xf]  ;;  %v1415_v62 = vor.u32 %v1768_v55, %v1414_v54  ;;  %v1734_v63 = vld [vmem:[%s2764_s0 + $0xa4] sm:$0xf0]  ;;  %v1215_v4 = vor.u32 %v1718_v60, %v1214_v59  ;;  %v1206_v7 = vld [vmem:[%s2764_s0 + $0x10] sm:$0xf] }
  0x10   :  { %821 = vmatpush.bf16.msra.mxu0 %v1231_v44  ;;  %v1342_v0 = vld [vmem:[%s2764_s0 + $0x120] sm:$0xf]  ;;  %v1750_v1 = vld [vmem:[%s2764_s0 + $0x124] sm:$0xf0]  ;;  %v1279_v5 = vor.u32 %v1734_v63, %v1278_v61  ;;  %v1716_v8 = vld [vmem:[%s2764_s0 + $0x14] sm:$0xf0] }
  0x11   :  { %834 = vmatpush.bf16.msra.mxu1 %v1295_v45  ;;  %v1406_v2 = vld [vmem:[%s2764_s0 + $0x1a0] sm:$0xf]  ;;  %v1766_v3 = vld [vmem:[%s2764_s0 + $0x1a4] sm:$0xf0]  ;;  %v1343_v6 = vor.u32 %v1750_v1, %v1342_v0  ;;  %v1270_v9 = vld [vmem:[%s2764_s0 + $0x90] sm:$0xf]  ;;  %v1207_v16 = vor.u32 %v1716_v8, %v1206_v7 }
  0x12   :  { %847 = vmatpush.bf16.msra.mxu2 %v1359_v46  ;;  %v1407_v10 = vor.u32 %v1766_v3, %v1406_v2  ;;  %v1732_v11 = vld [vmem:[%s2764_s0 + $0x94] sm:$0xf0]  ;;  %v1334_v12 = vld [vmem:[%s2764_s0 + $0x110] sm:$0xf]  ;;  %v1198_v17 = vld [vmem:[%s2764_s0] sm:$0xf] }
  0x13   :  { %860 = vmatpush.bf16.msra.mxu3 %v1423_v50  ;;  %v1748_v13 = vld [vmem:[%s2764_s0 + $0x114] sm:$0xf0]  ;;  %v1398_v14 = vld [vmem:[%s2764_s0 + $0x190] sm:$0xf]  ;;  %v1714_v18 = vld [vmem:[%s2764_s0 + $0x4] sm:$0xf0]  ;;  %v1271_v19 = vor.u32 %v1732_v11, %v1270_v9 }
  0x14   :  { %822 = vmatpush.bf16.msra.mxu0 %v1223_v56  ;;  %v1764_v15 = vld [vmem:[%s2764_s0 + $0x194] sm:$0xf0]  ;;  %v1335_v20 = vor.u32 %v1748_v13, %v1334_v12  ;;  %v1262_v21 = vld [vmem:[%s2764_s0 + $0x80] sm:$0xf]  ;;  %v1730_v22 = vld [vmem:[%s2764_s0 + $0x84] sm:$0xf0]  ;;  %v1199_v31 = vor.u32 %v1714_v18, %v1198_v17 }
  0x15   :  { %835 = vmatpush.bf16.msra.mxu1 %v1287_v57  ;;  %v1326_v23 = vld [vmem:[%s2764_s0 + $0x100] sm:$0xf]  ;;  %v1399_v24 = vor.u32 %v1764_v15, %v1398_v14  ;;  %v1746_v25 = vld [vmem:[%s2764_s0 + $0x104] sm:$0xf0]  ;;  %v1510_v28 = vld [vmem:[%s2764_s0 + $0x270] sm:$0xf]  ;;  %v1263_v35 = vor.u32 %v1730_v22, %v1262_v21 }
  0x16   :  { %848 = vmatpush.bf16.msra.mxu2 %v1351_v58  ;;  %v1390_v26 = vld [vmem:[%s2764_s0 + $0x180] sm:$0xf]  ;;  %v1762_v27 = vld [vmem:[%s2764_s0 + $0x184] sm:$0xf0]  ;;  %v1792_v29 = vld [vmem:[%s2764_s0 + $0x274] sm:$0xf0]  ;;  %v1327_v36 = vor.u32 %v1746_v25, %v1326_v23 }
  0x17   :  { %861 = vmatpush.bf16.msra.mxu3 %v1415_v62  ;;  %v1574_v30 = vld [vmem:[%s2764_s0 + $0x2f0] sm:$0xf]  ;;  %v1808_v32 = vld [vmem:[%s2764_s0 + $0x2f4] sm:$0xf0]  ;;  %v1391_v39 = vor.u32 %v1762_v27, %v1390_v26  ;;  %v1511_v40 = vor.u32 %v1792_v29, %v1510_v28  ;;  %v1502_v43 = vld [vmem:[%s2764_s0 + $0x260] sm:$0xf] }
  0x18   :  { %823 = vmatpush.bf16.msra.mxu0 %v1215_v4  ;;  %v1638_v33 = vld [vmem:[%s2764_s0 + $0x370] sm:$0xf]  ;;  %v1824_v34 = vld [vmem:[%s2764_s0 + $0x374] sm:$0xf0]  ;;  %v1575_v41 = vor.u32 %v1808_v32, %v1574_v30  ;;  %v1790_v44 = vld [vmem:[%s2764_s0 + $0x264] sm:$0xf0] }
  0x19   :  { %836 = vmatpush.bf16.msra.mxu1 %v1279_v5  ;;  %v1702_v37 = vld [vmem:[%s2764_s0 + $0x3f0] sm:$0xf]  ;;  %v1840_v38 = vld [vmem:[%s2764_s0 + $0x3f4] sm:$0xf0]  ;;  %v1639_v42 = vor.u32 %v1824_v34, %v1638_v33  ;;  %v1566_v45 = vld [vmem:[%s2764_s0 + $0x2e0] sm:$0xf]  ;;  %v1503_v52 = vor.u32 %v1790_v44, %v1502_v43 }
  0x1a   :  { %849 = vmatpush.bf16.msra.mxu2 %v1343_v6  ;;  %v1703_v46 = vor.u32 %v1840_v38, %v1702_v37  ;;  %v1806_v47 = vld [vmem:[%s2764_s0 + $0x2e4] sm:$0xf0]  ;;  %v1630_v48 = vld [vmem:[%s2764_s0 + $0x360] sm:$0xf]  ;;  %v1494_v53 = vld [vmem:[%s2764_s0 + $0x250] sm:$0xf] }
  0x1b   :  { %862 = vmatpush.bf16.msra.mxu3 %v1407_v10  ;;  %v1822_v49 = vld [vmem:[%s2764_s0 + $0x364] sm:$0xf0]  ;;  %v1694_v50 = vld [vmem:[%s2764_s0 + $0x3e0] sm:$0xf]  ;;  %v1788_v54 = vld [vmem:[%s2764_s0 + $0x254] sm:$0xf0]  ;;  %v1567_v55 = vor.u32 %v1806_v47, %v1566_v45 }
  0x1c   :  { %824 = vmatpush.bf16.msra.mxu0 %v1207_v16  ;;  %v1838_v51 = vld [vmem:[%s2764_s0 + $0x3e4] sm:$0xf0]  ;;  %v1631_v56 = vor.u32 %v1822_v49, %v1630_v48  ;;  %v1558_v57 = vld [vmem:[%s2764_s0 + $0x2d0] sm:$0xf]  ;;  %v1804_v58 = vld [vmem:[%s2764_s0 + $0x2d4] sm:$0xf0]  ;;  %v1495_v1 = vor.u32 %v1788_v54, %v1494_v53 }
  0x1d   :  { %837 = vmatpush.bf16.msra.mxu1 %v1271_v19  ;;  %v31_v59 = vld [vmem:[%s2765_s1] sm:$0xff]  ;;  %v1695_v60 = vor.u32 %v1838_v51, %v1694_v50  ;;  %v1622_v61 = vld [vmem:[%s2764_s0 + $0x350] sm:$0xf]  ;;  %v1820_v62 = vld [vmem:[%s2764_s0 + $0x354] sm:$0xf0]  ;;  %v1559_v2 = vor.u32 %v1804_v58, %v1558_v57  ;;  %vm1127_vm4 = vcmask 1041408  }
  0x1e   :  { %850 = vmatpush.bf16.msra.mxu2 %v1335_v20  ;;  %161 = vst [vmem:[#allocation1] ss:$9 sm:$0xff] %v31_v59  ;;  %v1686_v63 = vld [vmem:[%s2764_s0 + $0x3d0] sm:$0xf]  ;;  %v1836_v0 = vld [vmem:[%s2764_s0 + $0x3d4] sm:$0xf0]  ;;  %v1623_v3 = vor.u32 %v1820_v62, %v1622_v61 }
  0x1f   :  { %863 = vmatpush.bf16.msra.mxu3 %v1399_v24  ;;  %v1486_v4 = vld [vmem:[%s2764_s0 + $0x240] sm:$0xf]  ;;  %v1786_v5 = vld [vmem:[%s2764_s0 + $0x244] sm:$0xf0]  ;;  %v1687_v7 = vor.u32 %v1836_v0, %v1686_v63  ;;  %v1478_v13 = vld [vmem:[%s2764_s0 + $0x230] sm:$0xf] }
  0x20   :  { %825 = vmatpush.bf16.msra.mxu0 %v1199_v31  ;;  %v1550_v6 = vld [vmem:[%s2764_s0 + $0x2c0] sm:$0xf]  ;;  %v1802_v8 = vld [vmem:[%s2764_s0 + $0x2c4] sm:$0xf0]  ;;  %v1487_v14 = vor.u32 %v1786_v5, %v1486_v4  ;;  %v1784_v15 = vld [vmem:[%s2764_s0 + $0x234] sm:$0xf0] }
  0x21   :  { %838 = vmatpush.bf16.msra.mxu1 %v1263_v35  ;;  %v1614_v9 = vld [vmem:[%s2764_s0 + $0x340] sm:$0xf]  ;;  %v1818_v10 = vld [vmem:[%s2764_s0 + $0x344] sm:$0xf0]  ;;  %v1542_v16 = vld [vmem:[%s2764_s0 + $0x2b0] sm:$0xf]  ;;  %v1551_v18 = vor.u32 %v1802_v8, %v1550_v6  ;;  %v1479_v29 = vor.u32 %v1784_v15, %v1478_v13 }
  0x22   :  { %851 = vmatpush.bf16.msra.mxu2 %v1327_v36  ;;  %v1678_v11 = vld [vmem:[%s2764_s0 + $0x3c0] sm:$0xf]  ;;  %v1834_v12 = vld [vmem:[%s2764_s0 + $0x3c4] sm:$0xf0]  ;;  %v1800_v17 = vld [vmem:[%s2764_s0 + $0x2b4] sm:$0xf0]  ;;  %v1615_v19 = vor.u32 %v1818_v10, %v1614_v9 }
  0x23   :  { %864 = vmatpush.bf16.msra.mxu3 %v1391_v39  ;;  %v1679_v23 = vor.u32 %v1834_v12, %v1678_v11  ;;  %v1606_v24 = vld [vmem:[%s2764_s0 + $0x330] sm:$0xf]  ;;  %v1816_v25 = vld [vmem:[%s2764_s0 + $0x334] sm:$0xf0]  ;;  %v1543_v30 = vor.u32 %v1800_v17, %v1542_v16  ;;  %v1470_v32 = vld [vmem:[%s2764_s0 + $0x220] sm:$0xf] }
  0x24   :  { %870 = vmatpush.bf16.msrb.mxu0 %v1511_v40  ;;  %v1670_v27 = vld [vmem:[%s2764_s0 + $0x3b0] sm:$0xf]  ;;  %v1832_v28 = vld [vmem:[%s2764_s0 + $0x3b4] sm:$0xf0]  ;;  %v1607_v31 = vor.u32 %v1816_v25, %v1606_v24  ;;  %v1782_v33 = vld [vmem:[%s2764_s0 + $0x224] sm:$0xf0] }
  0x25   :  { %883 = vmatpush.bf16.msrb.mxu1 %v1575_v41  ;;  %v2202_v20 = vld [vmem:[#allocation1 + $0x12] sm:$0xff]  ;;  %v2204_v21 = vld [vmem:[#allocation1] sm:$0xff]  ;;  %v2215_v26 = vld [vmem:[#allocation1 + $0x9] sm:$0xff]  ;;  %v1671_v35 = vor.u32 %v1832_v28, %v1670_v27  ;;  %v1471_v41 = vor.u32 %v1782_v33, %v1470_v32  ;;  %vm1092_vm5 = vcmask 326656   ;;  %vm1123_vm6 = vcmask 80896  }
  0x26   :  { %896 = vmatpush.bf16.msrb.mxu2 %v1639_v42  ;;  %v2206_v22 = vld [vmem:[#allocation1 + $0x1b] sm:$0xff]  ;;  %826 = vmatmul.bf16.vlgmr.msra.gmra.mxu0 %v2204_v21  ;;  %v1798_v36 = vld [vmem:[%s2764_s0 + $0x2a4] sm:$0xf0]  ;;  %v1462_v44 = vld [vmem:[%s2764_s0 + $0x210] sm:$0xf]  ;;  %vm1190_vm15 = vcmask 1024  }
  0x27   :  { %909 = vmatpush.bf16.msrb.mxu3 %v1703_v46  ;;  %852 = vmatmul.bf16.vlgmr.msra.gmra.mxu2 %v2202_v20  ;;  %v1534_v34 = vld [vmem:[%s2764_s0 + $0x2a0] sm:$0xf]  ;;  %v1814_v38 = vld [vmem:[%s2764_s0 + $0x324] sm:$0xf0]  ;;  %v1780_v45 = vld [vmem:[%s2764_s0 + $0x214] sm:$0xf0] }
  0x28   :  { %871 = vmatpush.bf16.msrb.mxu0 %v1503_v52  ;;  %865 = vmatmul.bf16.vlgmr.msra.gmra.mxu3 %v2206_v22  ;;  %v1598_v37 = vld [vmem:[%s2764_s0 + $0x320] sm:$0xf]  ;;  %v1830_v40 = vld [vmem:[%s2764_s0 + $0x3a4] sm:$0xf0]  ;;  %v1535_v42 = vor.u32 %v1798_v36, %v1534_v34  ;;  %v1526_v46 = vld [vmem:[%s2764_s0 + $0x290] sm:$0xf]  ;;  %v1463_v53 = vor.u32 %v1780_v45, %v1462_v44 }
  0x29   :  { %884 = vmatpush.bf16.msrb.mxu1 %v1567_v55  ;;  %v1662_v39 = vld [vmem:[%s2764_s0 + $0x3a0] sm:$0xf]  ;;  %v1599_v43 = vor.u32 %v1814_v38, %v1598_v37  ;;  %v1796_v48 = vld [vmem:[%s2764_s0 + $0x294] sm:$0xf0]  ;;  %v1590_v49 = vld [vmem:[%s2764_s0 + $0x310] sm:$0xf] }
  0x2a   :  { %897 = vmatpush.bf16.msrb.mxu2 %v1631_v56  ;;  %839 = vmatmul.bf16.vlgmr.msra.gmra.mxu1 %v2215_v26  ;;  %v1663_v47 = vor.u32 %v1830_v40, %v1662_v39  ;;  %v1812_v50 = vld [vmem:[%s2764_s0 + $0x314] sm:$0xf0]  ;;  %v1654_v51 = vld [vmem:[%s2764_s0 + $0x390] sm:$0xf]  ;;  %v1454_v54 = vld [vmem:[%s2764_s0 + $0x200] sm:$0xf]  ;;  %v1527_v56 = vor.u32 %v1796_v48, %v1526_v46 }
  0x2b   :  { %910 = vmatpush.bf16.msrb.mxu3 %v1695_v60  ;;  %v1828_v52 = vld [vmem:[%s2764_s0 + $0x394] sm:$0xf0]  ;;  %v1778_v55 = vld [vmem:[%s2764_s0 + $0x204] sm:$0xf0]  ;;  %v1591_v57 = vor.u32 %v1812_v50, %v1590_v49  ;;  %v1518_v58 = vld [vmem:[%s2764_s0 + $0x280] sm:$0xf] }
  0x2c   :  { %872 = vmatpush.bf16.msrb.mxu0 %v1495_v1  ;;  %v1794_v59 = vld [vmem:[%s2764_s0 + $0x284] sm:$0xf0]  ;;  %v1582_v60 = vld [vmem:[%s2764_s0 + $0x300] sm:$0xf]  ;;  %v1655_v61 = vor.u32 %v1828_v52, %v1654_v51  ;;  %v1727_v1 = vld [vmem:[%s2764_s0 + $0x74] sm:$0xf]  ;;  %v1455_v4 = vor.u32 %v1778_v55, %v1454_v54 }
  0x2d   :  { %885 = vmatpush.bf16.msrb.mxu1 %v1559_v2  ;;  %v1810_v62 = vld [vmem:[%s2764_s0 + $0x304] sm:$0xf0]  ;;  %v1646_v63 = vld [vmem:[%s2764_s0 + $0x380] sm:$0xf]  ;;  %v1256_v2 = vld [vmem:[%s2764_s0 + $0x78] sm:$0xf0]  ;;  %v1519_v8 = vor.u32 %v1794_v59, %v1518_v58 }
  0x2e   :  { %898 = vmatpush.bf16.msrb.mxu2 %v1623_v3  ;;  %v1826_v0 = vld [vmem:[%s2764_s0 + $0x384] sm:$0xf0]  ;;  %v1743_v3 = vld [vmem:[%s2764_s0 + $0xf4] sm:$0xf]  ;;  %v1320_v5 = vld [vmem:[%s2764_s0 + $0xf8] sm:$0xf0]  ;;  %v1583_v9 = vor.u32 %v1810_v62, %v1582_v60  ;;  %v1259_v13 = vor.u32 %v1727_v1, %v1256_v2 }
  0x2f   :  { %911 = vmatpush.bf16.msrb.mxu3 %v1687_v7  ;;  %v1759_v6 = vld [vmem:[%s2764_s0 + $0x174] sm:$0xf]  ;;  %v1384_v7 = vld [vmem:[%s2764_s0 + $0x178] sm:$0xf0]  ;;  %v1647_v12 = vor.u32 %v1826_v0, %v1646_v63  ;;  %v1725_v16 = vld [vmem:[%s2764_s0 + $0x64] sm:$0xf] }
  0x30   :  { %873 = vmatpush.bf16.msrb.mxu0 %v1487_v14  ;;  %v1775_v10 = vld [vmem:[%s2764_s0 + $0x1f4] sm:$0xf]  ;;  %v1448_v11 = vld [vmem:[%s2764_s0 + $0x1f8] sm:$0xf0]  ;;  %v1323_v14 = vor.u32 %v1743_v3, %v1320_v5  ;;  %v1387_v15 = vor.u32 %v1759_v6, %v1384_v7  ;;  %v1248_v17 = vld [vmem:[%s2764_s0 + $0x68] sm:$0xf0] }
  0x31   :  { %886 = vmatpush.bf16.msrb.mxu1 %v1551_v18  ;;  %v1741_v18 = vld [vmem:[%s2764_s0 + $0xe4] sm:$0xf]  ;;  %v1376_v25 = vld [vmem:[%s2764_s0 + $0x168] sm:$0xf0]  ;;  %v1723_v33 = vld [vmem:[%s2764_s0 + $0x54] sm:$0xf] }
  0x32   :  { %899 = vmatpush.bf16.msrb.mxu2 %v1615_v19  ;;  %v1451_v19 = vor.u32 %v1775_v10, %v1448_v11  ;;  %v1757_v24 = vld [vmem:[%s2764_s0 + $0x164] sm:$0xf]  ;;  %v1440_v28 = vld [vmem:[%s2764_s0 + $0x1e8] sm:$0xf0]  ;;  %v1240_v36 = vld [vmem:[%s2764_s0 + $0x58] sm:$0xf0] }
  0x33   :  { %912 = vmatpush.bf16.msrb.mxu3 %v1679_v23  ;;  %v1312_v23 = vld [vmem:[%s2764_s0 + $0xe8] sm:$0xf0]  ;;  %v1773_v27 = vld [vmem:[%s2764_s0 + $0x1e4] sm:$0xf]  ;;  %v1739_v37 = vld [vmem:[%s2764_s0 + $0xd4] sm:$0xf]  ;;  %v1243_v45 = vor.u32 %v1723_v33, %v1240_v36 }
  0x34   :  { %874 = vmatpush.bf16.msrb.mxu0 %v1479_v29  ;;  %v2346_v29 = vld [vmem:[#allocation1 + $0x36] sm:$0xff]  ;;  %v2350_v32 = vld [vmem:[#allocation1 + $0x3f] sm:$0xff]  ;;  %v1315_v34 = vor.u32 %v1741_v18, %v1312_v23  ;;  %v2361_v38 = vld [vmem:[#allocation1 + $0x2d] sm:$0xff]  ;;  %v1443_v39 = vor.u32 %v1773_v27, %v1440_v28 }
  0x35   :  { %887 = vmatpush.bf16.msrb.mxu1 %v1543_v30  ;;  %v1251_v30 = vor.u32 %v1725_v16, %v1248_v17  ;;  %v1304_v40 = vld [vmem:[%s2764_s0 + $0xd8] sm:$0xf0]  ;;  %v1721_v48 = vld [vmem:[%s2764_s0 + $0x44] sm:$0xf]  ;;  %v1232_v49 = vld [vmem:[%s2764_s0 + $0x48] sm:$0xf0] }
  0x36   :  { %900 = vmatpush.bf16.msrb.mxu2 %v1607_v31  ;;  %v2348_v31 = vld [vmem:[#allocation1 + $0x24] sm:$0xff]  ;;  %v1432_v44 = vld [vmem:[%s2764_s0 + $0x1d8] sm:$0xf0]  ;;  %v1307_v46 = vor.u32 %v1739_v37, %v1304_v40  ;;  %v1296_v52 = vld [vmem:[%s2764_s0 + $0xc8] sm:$0xf0] }
  0x37   :  { %913 = vmatpush.bf16.msrb.mxu3 %v1671_v35  ;;  %v1379_v35 = vor.u32 %v1757_v24, %v1376_v25  ;;  %v1737_v50 = vld [vmem:[%s2764_s0 + $0xc4] sm:$0xf]  ;;  %v1360_v54 = vld [vmem:[%s2764_s0 + $0x148] sm:$0xf0]  ;;  %v1719_v60 = vld [vmem:[%s2764_s0 + $0x34] sm:$0xf] }
  0x38   :  { %875 = vmatpush.bf16.msrb.mxu0 %v1471_v41  ;;  %v1755_v41 = vld [vmem:[%s2764_s0 + $0x154] sm:$0xf]  ;;  %v1769_v55 = vld [vmem:[%s2764_s0 + $0x1c4] sm:$0xf]  ;;  %v1299_v58 = vor.u32 %v1737_v50, %v1296_v52  ;;  %v1288_v0 = vld [vmem:[%s2764_s0 + $0xb8] sm:$0xf0] }
  0x39   :  { %888 = vmatpush.bf16.msrb.mxu1 %v1535_v42  ;;  %v1368_v42 = vld [vmem:[%s2764_s0 + $0x158] sm:$0xf0]  ;;  %v1735_v62 = vld [vmem:[%s2764_s0 + $0xb4] sm:$0xf]  ;;  %v1733_v10 = vld [vmem:[%s2764_s0 + $0xa4] sm:$0xf] }
  0x3a   :  { %901 = vmatpush.bf16.msrb.mxu2 %v1599_v43  ;;  %v1771_v43 = vld [vmem:[%s2764_s0 + $0x1d4] sm:$0xf]  ;;  %v1352_v2 = vld [vmem:[%s2764_s0 + $0x138] sm:$0xf0]  ;;  %v1291_v6 = vor.u32 %v1735_v62, %v1288_v0  ;;  %v1408_v16 = vld [vmem:[%s2764_s0 + $0x1a8] sm:$0xf0] }
  0x3b   :  { %914 = vmatpush.bf16.msrb.mxu3 %v1663_v47  ;;  %v1371_v47 = vor.u32 %v1755_v41, %v1368_v42  ;;  %v1435_v51 = vor.u32 %v1771_v43, %v1432_v44  ;;  %v1751_v1 = vld [vmem:[%s2764_s0 + $0x134] sm:$0xf]  ;;  %v1208_v24 = vld [vmem:[%s2764_s0 + $0x18] sm:$0xf0]  ;;  %v1713_v37 = vld [vmem:[%s2764_s0 + $0x4] sm:$0xf] }
  0x3c   :  { %876 = vmatpush.bf16.msrb.mxu0 %v1463_v53  ;;  %v1753_v53 = vld [vmem:[%s2764_s0 + $0x144] sm:$0xf]  ;;  %v1767_v3 = vld [vmem:[%s2764_s0 + $0x1b4] sm:$0xf]  ;;  %v1355_v7 = vor.u32 %v1751_v1, %v1352_v2  ;;  %v1272_v28 = vld [vmem:[%s2764_s0 + $0x98] sm:$0xf0] }
  0x3d   :  { %889 = vmatpush.bf16.msrb.mxu1 %v1527_v56  ;;  %v1424_v56 = vld [vmem:[%s2764_s0 + $0x1c8] sm:$0xf0]  ;;  %v1363_v59 = vor.u32 %v1753_v53, %v1360_v54  ;;  %v1715_v23 = vld [vmem:[%s2764_s0 + $0x14] sm:$0xf]  ;;  %v1336_v33 = vld [vmem:[%s2764_s0 + $0x118] sm:$0xf0] }
  0x3e   :  { %902 = vmatpush.bf16.msrb.mxu2 %v1591_v57  ;;  %v1235_v57 = vor.u32 %v1721_v48, %v1232_v49  ;;  %v1427_v63 = vor.u32 %v1769_v55, %v1424_v56  ;;  %v1731_v25 = vld [vmem:[%s2764_s0 + $0x94] sm:$0xf]  ;;  %v1211_v36 = vor.u32 %v1715_v23, %v1208_v24  ;;  %v1729_v42 = vld [vmem:[%s2764_s0 + $0x84] sm:$0xf]  ;;  %v1264_v43 = vld [vmem:[%s2764_s0 + $0x88] sm:$0xf0] }
  0x3f   :  { %915 = vmatpush.bf16.msrb.mxu3 %v1655_v61  ;;  %v1224_v61 = vld [vmem:[%s2764_s0 + $0x38] sm:$0xf0]  ;;  %v1275_v40 = vor.u32 %v1731_v25, %v1272_v28  ;;  %v1745_v44 = vld [vmem:[%s2764_s0 + $0x104] sm:$0xf]  ;;  %v1392_v48 = vld [vmem:[%s2764_s0 + $0x188] sm:$0xf0]  ;;  %v1267_v56 = vor.u32 %v1729_v42, %v1264_v43 }
  0x40   :  { %877 = vmatpush.bf16.msrb.mxu0 %v1455_v4  ;;  %v1416_v4 = vld [vmem:[%s2764_s0 + $0x1b8] sm:$0xf0]  ;;  %v1227_v5 = vor.u32 %v1719_v60, %v1224_v61  ;;  %v1791_v49 = vld [vmem:[%s2764_s0 + $0x274] sm:$0xf]  ;;  %v1789_v0 = vld [vmem:[%s2764_s0 + $0x264] sm:$0xf] }
  0x41   :  { %890 = vmatpush.bf16.msrb.mxu1 %v1519_v8  ;;  %v1717_v8 = vld [vmem:[%s2764_s0 + $0x24] sm:$0xf]  ;;  %v1419_v11 = vor.u32 %v1767_v3, %v1416_v4  ;;  %v1512_v50 = vld [vmem:[%s2764_s0 + $0x278] sm:$0xf0]  ;;  %v1823_v54 = vld [vmem:[%s2764_s0 + $0x374] sm:$0xf] }
  0x42   :  { %903 = vmatpush.bf16.msrb.mxu2 %v1583_v9  ;;  %v1216_v9 = vld [vmem:[%s2764_s0 + $0x28] sm:$0xf0]  ;;  %v1576_v53 = vld [vmem:[%s2764_s0 + $0x2f8] sm:$0xf0]  ;;  %v1515_v61 = vor.u32 %v1791_v49, %v1512_v50  ;;  %v1805_v2 = vld [vmem:[%s2764_s0 + $0x2e4] sm:$0xf] }
  0x43   :  { %916 = vmatpush.bf16.msrb.mxu3 %v1647_v12  ;;  %878 = vmatmul.bf16.vlgmr.msrb.gmra.mxu0 %v2348_v31  ;;  %v1280_v12 = vld [vmem:[%s2764_s0 + $0xa8] sm:$0xf0]  ;;  %v1219_v17 = vor.u32 %v1717_v8, %v1216_v9  ;;  %v1640_v55 = vld [vmem:[%s2764_s0 + $0x378] sm:$0xf0]  ;;  %v1799_v42 = vld [vmem:[%s2764_s0 + $0x2b4] sm:$0xf] }
  0x44   :  { %922 = vmatpush.bf16.msra.mxu0 %v1259_v13  ;;  %891 = vmatmul.bf16.vlgmr.msrb.gmra.mxu1 %v2361_v38  ;;  %v1749_v13 = vld [vmem:[%s2764_s0 + $0x124] sm:$0xf]  ;;  %v1283_v18 = vor.u32 %v1733_v10, %v1280_v12  ;;  %v1504_v1 = vld [vmem:[%s2764_s0 + $0x268] sm:$0xf0]  ;;  %v1787_v12 = vld [vmem:[%s2764_s0 + $0x254] sm:$0xf] }
  0x45   :  { %935 = vmatpush.bf16.msra.mxu1 %v1323_v14  ;;  %904 = vmatmul.bf16.vlgmr.msrb.gmra.mxu2 %v2346_v29  ;;  %v1344_v14 = vld [vmem:[%s2764_s0 + $0x128] sm:$0xf0]  ;;  %v1507_v9 = vor.u32 %v1789_v0, %v1504_v1  ;;  %v1779_v0 = vld [vmem:[%s2764_s0 + $0x214] sm:$0xf]  ;;  %v1464_v1 = vld [vmem:[%s2764_s0 + $0x218] sm:$0xf0] }
  0x46   :  { %948 = vmatpush.bf16.msra.mxu2 %v1387_v15  ;;  %917 = vmatmul.bf16.vlgmr.msrb.gmra.mxu3 %v2350_v32  ;;  %v1765_v15 = vld [vmem:[%s2764_s0 + $0x1a4] sm:$0xf]  ;;  %v1568_v4 = vld [vmem:[%s2764_s0 + $0x2e8] sm:$0xf0] }
  0x47   :  { %961 = vmatpush.bf16.msra.mxu3 %v1451_v19  ;;  %v1347_v19 = vor.u32 %v1749_v13, %v1344_v14  ;;  %v1411_v27 = vor.u32 %v1765_v15, %v1408_v16  ;;  %v1696_v8 = vld [vmem:[%s2764_s0 + $0x3e8] sm:$0xf0]  ;;  %v1571_v10 = vor.u32 %v1805_v2, %v1568_v4  ;;  %v1496_v13 = vld [vmem:[%s2764_s0 + $0x258] sm:$0xf0]  ;;  %v1803_v14 = vld [vmem:[%s2764_s0 + $0x2d4] sm:$0xf] }
  0x48   :  { %923 = vmatpush.bf16.msra.mxu0 %v1251_v30  ;;  %v1747_v30 = vld [vmem:[%s2764_s0 + $0x114] sm:$0xf]  ;;  %v1560_v16 = vld [vmem:[%s2764_s0 + $0x2d8] sm:$0xf0]  ;;  %v1499_v23 = vor.u32 %v1787_v12, %v1496_v13  ;;  %v1488_v28 = vld [vmem:[%s2764_s0 + $0x248] sm:$0xf0] }
  0x49   :  { %936 = vmatpush.bf16.msra.mxu1 %v1315_v34  ;;  %v1763_v34 = vld [vmem:[%s2764_s0 + $0x194] sm:$0xf]  ;;  %v1339_v41 = vor.u32 %v1747_v30, %v1336_v33  ;;  %v1563_v24 = vor.u32 %v1803_v14, %v1560_v16  ;;  %v1817_v30 = vld [vmem:[%s2764_s0 + $0x344] sm:$0xf]  ;;  %v1616_v33 = vld [vmem:[%s2764_s0 + $0x348] sm:$0xf0] }
  0x4a   :  { %949 = vmatpush.bf16.msra.mxu2 %v1379_v35  ;;  %v1400_v35 = vld [vmem:[%s2764_s0 + $0x198] sm:$0xf0]  ;;  %v1795_v2 = vld [vmem:[%s2764_s0 + $0x294] sm:$0xf]  ;;  %v1777_v12 = vld [vmem:[%s2764_s0 + $0x204] sm:$0xf] }
  0x4b   :  { %962 = vmatpush.bf16.msra.mxu3 %v1443_v39  ;;  %v1200_v39 = vld [vmem:[%s2764_s0 + $0x8] sm:$0xf0]  ;;  %v1528_v4 = vld [vmem:[%s2764_s0 + $0x298] sm:$0xf0]  ;;  %v1793_v14 = vld [vmem:[%s2764_s0 + $0x284] sm:$0xf] }
  0x4c   :  { %924 = vmatpush.bf16.msra.mxu0 %v1243_v45  ;;  %v1403_v45 = vor.u32 %v1763_v34, %v1400_v35  ;;  %v1203_v52 = vor.u32 %v1713_v37, %v1200_v39  ;;  %v1833_v34 = vld [vmem:[%s2764_s0 + $0x3c4] sm:$0xf]  ;;  %v1680_v35 = vld [vmem:[%s2764_s0 + $0x3c8] sm:$0xf0]  ;;  %v1619_v39 = vor.u32 %v1817_v30, %v1616_v33 }
  0x4d   :  { %937 = vmatpush.bf16.msra.mxu1 %v1307_v46  ;;  %v1328_v46 = vld [vmem:[%s2764_s0 + $0x108] sm:$0xf0]  ;;  %v1683_v43 = vor.u32 %v1833_v34, %v1680_v35 }
  0x4e   :  { %950 = vmatpush.bf16.msra.mxu2 %v1371_v47  ;;  %v1761_v47 = vld [vmem:[%s2764_s0 + $0x184] sm:$0xf]  ;;  %v1456_v13 = vld [vmem:[%s2764_s0 + $0x208] sm:$0xf0] }
  0x4f   :  { %963 = vmatpush.bf16.msra.mxu3 %v1435_v51  ;;  %v1807_v51 = vld [vmem:[%s2764_s0 + $0x2f4] sm:$0xf]  ;;  %v1395_v60 = vor.u32 %v1761_v47, %v1392_v48  ;;  %v1672_v48 = vld [vmem:[%s2764_s0 + $0x3b8] sm:$0xf0]  ;;  %v1520_v16 = vld [vmem:[%s2764_s0 + $0x288] sm:$0xf0] }
  0x50   :  { %925 = vmatpush.bf16.msra.mxu0 %v1235_v57  ;;  %v1331_v57 = vor.u32 %v1745_v44, %v1328_v46  ;;  %v1579_v62 = vor.u32 %v1807_v51, %v1576_v53  ;;  %v1544_v44 = vld [vmem:[%s2764_s0 + $0x2b8] sm:$0xf0]  ;;  %v1831_v47 = vld [vmem:[%s2764_s0 + $0x3b4] sm:$0xf]  ;;  %v1472_v53 = vld [vmem:[%s2764_s0 + $0x228] sm:$0xf0] }
  0x51   :  { %938 = vmatpush.bf16.msra.mxu1 %v1299_v58  ;;  %v1839_v58 = vld [vmem:[%s2764_s0 + $0x3f4] sm:$0xf]  ;;  %v1608_v46 = vld [vmem:[%s2764_s0 + $0x338] sm:$0xf0]  ;;  %v1547_v50 = vor.u32 %v1799_v42, %v1544_v44 }
  0x52   :  { %951 = vmatpush.bf16.msra.mxu2 %v1363_v59  ;;  %v1704_v59 = vld [vmem:[%s2764_s0 + $0x3f8] sm:$0xf0] }
  0x53   :  { %964 = vmatpush.bf16.msra.mxu3 %v1427_v63  ;;  %v1643_v63 = vor.u32 %v1823_v54, %v1640_v55  ;;  %v1707_v3 = vor.u32 %v1839_v58, %v1704_v59  ;;  %v1797_v54 = vld [vmem:[%s2764_s0 + $0x2a4] sm:$0xf]  ;;  %v1675_v55 = vor.u32 %v1831_v47, %v1672_v48  ;;  %v1600_v58 = vld [vmem:[%s2764_s0 + $0x328] sm:$0xf0] }
  0x54   :  { %926 = vmatpush.bf16.msra.mxu0 %v1227_v5  ;;  %v1821_v5 = vld [vmem:[%s2764_s0 + $0x364] sm:$0xf] }
  0x55   :  { %939 = vmatpush.bf16.msra.mxu1 %v1291_v6  ;;  %v1632_v6 = vld [vmem:[%s2764_s0 + $0x368] sm:$0xf0]  ;;  %v1829_v59 = vld [vmem:[%s2764_s0 + $0x3a4] sm:$0xf] }
  0x56   :  { %952 = vmatpush.bf16.msra.mxu2 %v1355_v7  ;;  %v1837_v7 = vld [vmem:[%s2764_s0 + $0x3e4] sm:$0xf] }
  0x57   :  { %965 = vmatpush.bf16.msra.mxu3 %v1419_v11  ;;  %v1635_v11 = vor.u32 %v1821_v5, %v1632_v6  ;;  %v1699_v15 = vor.u32 %v1837_v7, %v1696_v8  ;;  %v1811_v5 = vld [vmem:[%s2764_s0 + $0x314] sm:$0xf]  ;;  %v1592_v6 = vld [vmem:[%s2764_s0 + $0x318] sm:$0xf0] }
  0x58   :  { %927 = vmatpush.bf16.msra.mxu0 %v1219_v17  ;;  %v1819_v17 = vld [vmem:[%s2764_s0 + $0x354] sm:$0xf]  ;;  %v1656_v8 = vld [vmem:[%s2764_s0 + $0x398] sm:$0xf0] }
  0x59   :  { %940 = vmatpush.bf16.msra.mxu1 %v1283_v18  ;;  %v1624_v18 = vld [vmem:[%s2764_s0 + $0x358] sm:$0xf0]  ;;  %v1827_v7 = vld [vmem:[%s2764_s0 + $0x394] sm:$0xf] }
  0x5a   :  { %953 = vmatpush.bf16.msra.mxu2 %v1347_v19  ;;  %v1835_v19 = vld [vmem:[%s2764_s0 + $0x3d4] sm:$0xf]  ;;  %v1627_v25 = vor.u32 %v1819_v17, %v1624_v18  ;;  %v1809_v17 = vld [vmem:[%s2764_s0 + $0x304] sm:$0xf]  ;;  %v1584_v18 = vld [vmem:[%s2764_s0 + $0x308] sm:$0xf0] }
  0x5b   :  { %966 = vmatpush.bf16.msra.mxu3 %v1411_v27  ;;  %v1785_v27 = vld [vmem:[%s2764_s0 + $0x244] sm:$0xf] }
  0x5c   :  { %928 = vmatpush.bf16.msra.mxu0 %v1211_v36  ;;  %v1491_v36 = vor.u32 %v1785_v27, %v1488_v28 }
  0x5d   :  { %941 = vmatpush.bf16.msra.mxu1 %v1275_v40  ;;  %v1783_v40 = vld [vmem:[%s2764_s0 + $0x234] sm:$0xf] }
  0x5e   :  { %954 = vmatpush.bf16.msra.mxu2 %v1339_v41  ;;  %v1480_v41 = vld [vmem:[%s2764_s0 + $0x238] sm:$0xf0] }
  0x5f   :  { %967 = vmatpush.bf16.msra.mxu3 %v1403_v45  ;;  %v1815_v45 = vld [vmem:[%s2764_s0 + $0x334] sm:$0xf]  ;;  %v1483_v49 = vor.u32 %v1783_v40, %v1480_v41 }
  0x60   :  { %929 = vmatpush.bf16.msra.mxu0 %v1203_v52  ;;  %v1611_v51 = vor.u32 %v1815_v45, %v1608_v46  ;;  %v1781_v52 = vld [vmem:[%s2764_s0 + $0x224] sm:$0xf] }
  0x61   :  { %942 = vmatpush.bf16.msra.mxu1 %v1267_v56  ;;  %v1536_v56 = vld [vmem:[%s2764_s0 + $0x2a8] sm:$0xf0] }
  0x62   :  { %955 = vmatpush.bf16.msra.mxu2 %v1331_v57  ;;  %v1813_v57 = vld [vmem:[%s2764_s0 + $0x324] sm:$0xf] }
  0x63   :  { %968 = vmatpush.bf16.msra.mxu3 %v1395_v60  ;;  %930 = vmatmul.bf16.vlgmr.msra.gmra.mxu0 %v2204_v21  ;;  %v1801_v21 = vld [vmem:[%s2764_s0 + $0x2c4] sm:$0xf]  ;;  %v1664_v60 = vld [vmem:[%s2764_s0 + $0x3a8] sm:$0xf0] }
  0x64   :  { %974 = vmatpush.bf16.msrb.mxu0 %v1515_v61  ;;  %943 = vmatmul.bf16.vlgmr.msra.gmra.mxu1 %v2215_v26  ;;  %v1552_v26 = vld [vmem:[%s2764_s0 + $0x2c8] sm:$0xf0]  ;;  %v1475_v61 = vor.u32 %v1781_v52, %v1472_v53 }
  0x65   :  { %987 = vmatpush.bf16.msrb.mxu1 %v1579_v62  ;;  %956 = vmatmul.bf16.vlgmr.msra.gmra.mxu2 %v2202_v20  ;;  %v1688_v20 = vld [vmem:[%s2764_s0 + $0x3d8] sm:$0xf0]  ;;  %v1555_v37 = vor.u32 %v1801_v21, %v1552_v26  ;;  %v1539_v62 = vor.u32 %v1797_v54, %v1536_v56 }
  0x66   :  { %1000 = vmatpush.bf16.msrb.mxu2 %v1643_v63  ;;  %969 = vmatmul.bf16.vlgmr.msra.gmra.mxu3 %v2206_v22  ;;  %v1691_v22 = vor.u32 %v1835_v19, %v1688_v20  ;;  %v1603_v63 = vor.u32 %v1813_v57, %v1600_v58  ;;  %v1825_v19 = vld [vmem:[%s2764_s0 + $0x384] sm:$0xf]  ;;  %v1648_v20 = vld [vmem:[%s2764_s0 + $0x388] sm:$0xf0]  ;;  %s1853_s0 = smov 58  }
  0x67   :  { %1013 = vmatpush.bf16.msrb.mxu3 %v1707_v3  ;;  %v1667_v3 = vor.u32 %v1829_v59, %v1664_v60  ;;  %v1651_v27 = vor.u32 %v1825_v19, %v1648_v20  ;;  %v1086_v19 = vld [vmem:[%s2768_s4 + $0x18] sm:$0xff]  ;;  %v1085_v20 = vld [vmem:[%s2768_s4 + $0x10] sm:$0xff] }
  0x68   :  { %975 = vmatpush.bf16.msrb.mxu0 %v1507_v9  ;;  %v1467_v9 = vor.u32 %v1779_v0, %v1464_v1 }
  0x69   :  { %988 = vmatpush.bf16.msrb.mxu1 %v1571_v10  ;;  %v1531_v10 = vor.u32 %v1795_v2, %v1528_v4 }
  0x6a   :  { %1001 = vmatpush.bf16.msrb.mxu2 %v1635_v11  ;;  %v1595_v11 = vor.u32 %v1811_v5, %v1592_v6 }
  0x6b   :  { %1014 = vmatpush.bf16.msrb.mxu3 %v1699_v15  ;;  %v1659_v15 = vor.u32 %v1827_v7, %v1656_v8 }
  0x6c   :  { %976 = vmatpush.bf16.msrb.mxu0 %v1499_v23  ;;  %v1459_v23 = vor.u32 %v1777_v12, %v1456_v13  ;;  %v1046_v12 = vld [vmem:[%s2767_s2 + $0x28] sm:$0xff]  ;;  %v1045_v13 = vld [vmem:[%s2767_s2 + $0x20] sm:$0xff] }
  0x6d   :  { %989 = vmatpush.bf16.msrb.mxu1 %v1563_v24  ;;  %v1523_v24 = vor.u32 %v1793_v14, %v1520_v16  ;;  %v1044_v14 = vld [vmem:[%s2767_s2 + $0x18] sm:$0xff]  ;;  %v1042_v16 = vld [vmem:[%s2767_s2 + $0x8] sm:$0xff] }
  0x6e   :  { %1002 = vmatpush.bf16.msrb.mxu2 %v1627_v25  ;;  %v1587_v25 = vor.u32 %v1809_v17, %v1584_v18  ;;  %v1041_v17 = vld [vmem:[%s2767_s2] sm:$0xff] }
  0x6f   :  { %1015 = vmatpush.bf16.msrb.mxu3 %v1691_v22  ;;  %v1087_v18 = vld [vmem:[%s2768_s4 + $0x20] sm:$0xff] }
  0x70   :  { %977 = vmatpush.bf16.msrb.mxu0 %v1491_v36 }
  0x71   :  { %990 = vmatpush.bf16.msrb.mxu1 %v1555_v37 }
  0x72   :  { %1003 = vmatpush.bf16.msrb.mxu2 %v1619_v39 }
  0x73   :  { %1016 = vmatpush.bf16.msrb.mxu3 %v1683_v43 }
  0x74   :  { %978 = vmatpush.bf16.msrb.mxu0 %v1483_v49 }
  0x75   :  { %991 = vmatpush.bf16.msrb.mxu1 %v1547_v50 }
  0x76   :  { %1004 = vmatpush.bf16.msrb.mxu2 %v1611_v51 }
  0x77   :  { %1017 = vmatpush.bf16.msrb.mxu3 %v1675_v55 }
  0x78   :  { %979 = vmatpush.bf16.msrb.mxu0 %v1475_v61 }
  0x79   :  { %992 = vmatpush.bf16.msrb.mxu1 %v1539_v62 }
  0x7a   :  { %1005 = vmatpush.bf16.msrb.mxu2 %v1603_v63 }
  0x7b   :  { %1018 = vmatpush.bf16.msrb.mxu3 %v1667_v3 }
  0x7c   :  { %980 = vmatpush.bf16.msrb.mxu0 %v1467_v9  ;;  %v1049_v9 = vld [vmem:[%s2767_s2 + $0x40] sm:$0x3f] }
  0x7d   :  { %993 = vmatpush.bf16.msrb.mxu1 %v1531_v10  ;;  %v1048_v10 = vld [vmem:[%s2767_s2 + $0x38] sm:$0xff] }
  0x7e   :  { %1006 = vmatpush.bf16.msrb.mxu2 %v1595_v11  ;;  %v1047_v11 = vld [vmem:[%s2767_s2 + $0x30] sm:$0xff] }
  0x7f   :  { %1019 = vmatpush.bf16.msrb.mxu3 %v1659_v15  ;;  %v1043_v15 = vld [vmem:[%s2767_s2 + $0x10] sm:$0xff] }
  0x80   :  { %981 = vmatpush.bf16.msrb.mxu0 %v1459_v23  ;;  %v1084_v23 = vld [vmem:[%s2768_s4 + $0x8] sm:$0xff] }
  0x81   :  { %994 = vmatpush.bf16.msrb.mxu1 %v1523_v24 }
  0x82   :  { %1007 = vmatpush.bf16.msrb.mxu2 %v1587_v25 }
  0x83   :  { %1020 = vmatpush.bf16.msrb.mxu3 %v1651_v27  ;;  %982 = vmatmul.bf16.vlgmr.msrb.gmra.mxu0 %v2348_v31 }
  0x84   :  { %995 = vmatmul.bf16.vlgmr.msrb.gmra.mxu1 %v2361_v38  ;;  %1708 = vmatpush.msk.msra.mxu0 %vm1058_vm1, %v1049_v9 }
  0x85   :  { %1008 = vmatmul.bf16.vlgmr.msrb.gmra.mxu2 %v2346_v29  ;;  %1107 = vmatpush.msra.mxu1 %v1087_v18 }
  0x86   :  { %1021 = vmatmul.bf16.vlgmr.msrb.gmra.mxu3 %v2350_v32  ;;  %1070 = vmatpush.msra.mxu0 %v1048_v10 }
  0x87   :  { %1108 = vmatpush.msra.mxu1 %v1086_v19 }
  0x88   :  { %1071 = vmatpush.msra.mxu0 %v1047_v11 }
  0x89   :  { %1109 = vmatpush.msra.mxu1 %v1085_v20 }
  0x8a   :  { %1072 = vmatpush.msra.mxu0 %v1046_v12 }
  0x8b   :  { %1110 = vmatpush.msra.mxu1 %v1084_v23 }
  0x8c   :  { %1073 = vmatpush.msra.mxu0 %v1045_v13 }
  0x8e   :  { %1074 = vmatpush.msra.mxu0 %v1044_v14 }
  0x90   :  { %1075 = vmatpush.msra.mxu0 %v1043_v15 }
  0x92   :  { %1076 = vmatpush.msra.mxu0 %v1042_v16 }
  0x94   :  { %1077 = vmatpush.msra.mxu0 %v1041_v17 }
  0xa3   :  { %v827_v28 = vpop.f32.mrf.mxu0 }
  0xa7   :  { %v840_v21 = vpop.f32.mrf.mxu1 }
  0xa8   :  { %v841_v34 = vadd.f32 %v840_v21, %v827_v28  ;;  %v1083_v21 = vld [vmem:[%s2768_s4] sm:$0xff] }
  0xa9   :  { %1111 = vmatpush.msra.mxu1 %v1083_v21 }
  0xaa   :  { %v853_v22 = vpop.f32.mrf.mxu2 }
  0xab   :  { %v866_v26 = vpop.f32.mrf.mxu3  ;;  %v829_v30 = vpop.f32.mrf.mxu0  ;;  %v854_v37 = vadd.f32 %v853_v22, %v841_v34  ;;  %v1118_v22 = vld [vmem:[%s2770_s6 + $0x8] sm:$0x3] }
  0xac   :  { %1711 = vmatpush.msk.msra.mxu2 %vm1127_vm4, %v1118_v22  ;;  %v1842_v30 = vld [vmem:[%s2766_s3] ss:$0 sm:$0xff] }
  0xad   :  { %v867_v39 = vadd.f32 %v866_v26, %v854_v37  ;;  %v1117_v26 = vld [vmem:[%s2770_s6] sm:$0xff] }
  0xae   :  { %1146 = vmatpush.msra.mxu2 %v1117_v26  ;;  %v1843_v37 = vld [vmem:[%s2769_s5] ss:$0 sm:$0xff] }
  0xaf   :  { %v842_v33 = vpop.f32.mrf.mxu1 }
  0xb2   :  { %v855_v35 = vpop.f32.mrf.mxu2 }
  0xb3   :  { %v868_v36 = vpop.f32.mrf.mxu3 }
  0xb4   :  { %v13_v36 = vstv %s2771_s7 }
  0xb5   :  { %14 = vst [vmem:[#allocation3] sm:$0x1] %v13_v36 }
  0xc0   :  { %v879_v40 = vpop.f32.mrf.mxu0 }
  0xc1   :  { %v880_v41 = vadd.f32 %v879_v40, %v867_v39  ;;  %v892_v31 = vpop.f32.mrf.mxu1 }
  0xc3   :  { %v893_v42 = vadd.f32 %v892_v31, %v880_v41  ;;  %v1844_v31 = vld [vmem:[#allocation3] ss:$0 sm:$0xff] }
  0xc8   :  { %v905_v38 = vpop.f32.mrf.mxu2  ;;  %v881_v32 = vpop.f32.mrf.mxu0 }
  0xc9   :  { %v906_v43 = vadd.f32 %v905_v38, %v893_v42  ;;  %v918_v29 = vpop.f32.mrf.mxu3  ;;  %v894_v45 = vpop.f32.mrf.mxu1 }
  0xcb   :  { %v919_v44 = vadd.f32 %v918_v29, %v906_v43 }
  0xcd   :  { %v1026_v46 = vmax.f32 %v919_v44, 0.0 }
  0xcf   :  { %1029 = vst.msk [vmem:[#allocation2] sm:$0x1] %vm1028_vm0, %v1026_v46  ;;  %1032 = vrot.lane.b32.xlu0 %v1026_v46, %s1853_s0 }
  0xd0   :  { %v907_v47 = vpop.f32.mrf.mxu2 }
  0xd1   :  { %v920_v48 = vpop.f32.mrf.mxu3 }
  0xe0   :  { %v931_v49 = vpop.f32.mrf.mxu0 }
  0xe1   :  { %v944_v50 = vpop.f32.mrf.mxu1 }
  0xe2   :  { %v945_v57 = vadd.f32 %v944_v50, %v931_v49 }
  0xe8   :  { %v957_v51 = vpop.f32.mrf.mxu2  ;;  %v933_v53 = vpop.f32.mrf.mxu0 }
  0xe9   :  { %v970_v52 = vpop.f32.mrf.mxu3  ;;  %v946_v54 = vpop.f32.mrf.mxu1  ;;  %v958_v58 = vadd.f32 %v957_v51, %v945_v57 }
  0xeb   :  { %v971_v59 = vadd.f32 %v970_v52, %v958_v58 }
  0xf0   :  { %v959_v55 = vpop.f32.mrf.mxu2 }
  0xf1   :  { %v972_v56 = vpop.f32.mrf.mxu3 }
 0x100   :  { %v983_v60 = vpop.f32.mrf.mxu0 }
 0x101   :  { %v996_v61 = vpop.f32.mrf.mxu1  ;;  %v984_v62 = vadd.f32 %v983_v60, %v971_v59 }
 0x103   :  { %v997_v63 = vadd.f32 %v996_v61, %v984_v62 }
 0x108   :  { %v1009_v0 = vpop.f32.mrf.mxu2  ;;  %v985_v3 = vpop.f32.mrf.mxu0 }
 0x109   :  { %v1010_v1 = vadd.f32 %v1009_v0, %v997_v63  ;;  %v1022_v2 = vpop.f32.mrf.mxu3  ;;  %v998_v4 = vpop.f32.mrf.mxu1 }
 0x10b   :  { %v1023_v5 = vadd.f32 %v1022_v2, %v1010_v1 }
 0x10d   :  { %v1027_v6 = vmax.f32 %v1023_v5, 0.0 }
 0x10f   :  { %1034 = vrot.lane.b32.xlu0 %v1027_v6, %s1853_s0 }
 0x110   :  { %v1011_v7 = vpop.f32.mrf.mxu2 }
 0x111   :  { %v1024_v8 = vpop.f32.mrf.mxu3 }
 0x141   :  { %v1033_v24 = vpop.permute.xlu0 %1032 }
 0x181   :  { %v1035_v25 = vpop.permute.xlu0 %1034 }
 0x182   :  { %v1037_v27 = vsel %vm1036_vm2, %v1033_v24, %v1035_v25 }
 0x183   :  { %1039 = vst.msk [vmem:[#allocation2 + $0x1] sm:$0x1] %vm1028_vm0, %v1037_v27 }
 0x18a   :  { %v1040_v28 = vld [vmem:[#allocation2] sm:$0x3] }
 0x18b   :  { %1709 = vmatmul.msk.f32.vlgmr.msra.gmra.mxu0 %vm1054_vm3, %v1040_v28 }
 0x208   :  { %v1079_v33 = vpop.f32.mrf.mxu0 }
 0x209   :  { %v1080_v34 = vadd.f32 %v1842_v30, %v1079_v33 }
 0x20b   :  { %v1082_v35 = vmax.f32 %v1080_v34, 0.0 }
 0x20d   :  { %1710 = vmatmul.msk.f32.vlgmr.msra.gmra.mxu1 %vm1092_vm5, %v1082_v35 }
 0x28a   :  { %v1113_v39 = vpop.f32.mrf.mxu1 }
 0x28b   :  { %v1114_v40 = vadd.f32 %v1843_v37, %v1113_v39 }
 0x28d   :  { %v1116_v41 = vmax.f32 %v1114_v40, 0.0 }
 0x28f   :  { %1712 = vmatmul.msk.f32.vlgmr.msra.gmra.mxu2 %vm1123_vm6, %v1116_v41 }
 0x312   :  { %v1148_v42 = vpop.f32.mrf.mxu2 }
 0x313   :  { %v1149_v38 = vadd.f32 %v1844_v31, %v1148_v42 }
 0x315   :  { %v1152_v43 = vsub.f32 0.0, %v1149_v38  ;;  %v1171_v29 = vmul.f32 1.442695, %v1149_v38  ;;  %vm1151_vm0 = vcmp.ge.f32.partialorder %v1149_v38, 0.0 }
 0x317   :  { %v1153_v44 = vmul.f32 1.442695, %v1152_v43  ;;  %1845 = vpow2.f32 %v1171_v29 }
 0x319   :  { %1847 = vpow2.f32 %v1153_v44 }
 0x31d   :  { %v1846_v32 = vpop.eup %1845 }
 0x31e   :  { %v1173_v45 = vadd.f32 1.0, %v1846_v32 }
 0x31f   :  { %v1848_v46 = vpop.eup %1847 }
 0x320   :  { %v1155_v47 = vadd.f32 1.0, %v1848_v46  ;;  %1849 = vrcp.f32 %v1173_v45  ;;  %v1185_v53 = vand.u32 2147483648, %v1173_v45  ;;  %v1183_v56 = vand.u32 2147483647, %v1173_v45 }
 0x321   :  { %vm1179_vm8 = vweird.f32 %v1173_v45 }
 0x322   :  { %1851 = vrcp.f32 %v1155_v47  ;;  %v1167_v57 = vand.u32 2147483648, %v1155_v47  ;;  %v1165_v59 = vand.u32 2147483647, %v1155_v47  ;;  %v1186_v61 = vor.u32 1.1754944e-38, %v1185_v53 }
 0x323   :  { %vm1161_vm11 = vweird.f32 %v1155_v47  ;;  %vm1184_vm12 = vcmp.eq.f32.partialorder %v1183_v56, 8.507059e+37 }
 0x324   :  { %v1168_v0 = vor.u32 1.1754944e-38, %v1167_v57  ;;  %vm1166_vm14 = vcmp.eq.f32.partialorder %v1165_v59, 8.507059e+37 }
 0x326   :  { %v1850_v48 = vpop.eup %1849 }
 0x327   :  { %v1175_v49 = vmul.f32 %v1850_v48, %v1173_v45  ;;  %vm1180_vm7 = vweird.f32 %v1850_v48 }
 0x328   :  { %v1852_v50 = vpop.eup %1851  ;;  %vm1181_vm10 = vmor %vm1179_vm8, %vm1180_vm7 }
 0x329   :  { %v1157_v51 = vmul.f32 %v1852_v50, %v1155_v47  ;;  %v1176_v52 = vsub.f32 1.0, %v1175_v49  ;;  %vm1162_vm9 = vweird.f32 %v1852_v50 }
 0x32a   :  { %vm1163_vm13 = vmor %vm1161_vm11, %vm1162_vm9 }
 0x32b   :  { %v1158_v54 = vsub.f32 1.0, %v1157_v51  ;;  %v1177_v55 = vmul.f32 %v1850_v48, %v1176_v52 }
 0x32d   :  { %v1159_v58 = vmul.f32 %v1852_v50, %v1158_v54  ;;  %v1178_v60 = vadd.f32 %v1850_v48, %v1177_v55 }
 0x32f   :  { %v1160_v62 = vadd.f32 %v1852_v50, %v1159_v58  ;;  %v1182_v63 = vsel %vm1181_vm10, %v1850_v48, %v1178_v60 }
 0x330   :  { %v1187_v1 = vsel %vm1184_vm12, %v1186_v61, %v1182_v63 }
 0x331   :  { %v1164_v2 = vsel %vm1163_vm13, %v1852_v50, %v1160_v62  ;;  %v1188_v3 = vmul.f32 %v1846_v32, %v1187_v1 }
 0x332   :  { %v1169_v4 = vsel %vm1166_vm14, %v1168_v0, %v1164_v2 }
 0x333   :  { %v1189_v5 = vsel %vm1151_vm0, %v1169_v4, %v1188_v3 }
 0x334   :  { %1191 = vst.msk [vmem:[%s2772_s8] sm:$0x3] %vm1190_vm15, %v1189_v5 }

</bundles_post_ra>
